<compile_context>
chip_gen: v7x
topology: tpu7x:2x2x1
jax: 0.10.0
libtpu: 0.0.40
codegen_flags: <defaults>
</compile_context>

<pallas_src>
import functools
import math

import jax
import jax.numpy as jnp
from jax.experimental import pallas as pl
from jax.experimental.pallas import tpu as pltpu


# ----------------------------------------------------------------------------
# GELU: the module's hand-rolled tanh approximation (EUP tanh).
def _gelu(x):
    c = math.sqrt(2.0 / math.pi)
    return 0.5 * x * (1.0 + jnp.tanh(c * (x + 0.044715 * x * x * x)))


# Torch-style hand-rolled LayerNorm: a_2 * (x - mean) / (std + eps) + b_2
# (unbiased std, eps added to std).  Divide replaced by EUP reciprocal.
def _layer_norm(x, g, b, eps):
    n = x.shape[-1]
    mean = jnp.mean(x, axis=-1, keepdims=True)
    d = x - mean
    var = jnp.sum(d * d, axis=-1, keepdims=True) * (1.0 / (n - 1))
    std = jnp.sqrt(var)
    return g * d * pl.reciprocal(std + eps, approx=True) + b


# ----------------------------------------------------------------------------
# Fully fused transformer block, one (L, E) batch tile per grid step.
def _block_kernel(x_ref, mb_ref, ln1g_ref, ln1b_ref, wqkv_ref, bqkv_ref,
                  wo_ref, bo_ref, ln2g_ref, ln2b_ref, w1_ref, b1_ref,
                  w2_ref, b2_ref, o_ref, *, heads, eps, mxu_dtype):
    f32 = jnp.float32
    x = x_ref[...].astype(f32)                       # (L, E)
    E = x.shape[-1]
    dk = E // heads

    # ---------------- sublayer 1: x + Wo(Attn(LN1(x))) ----------------
    h = _layer_norm(x, ln1g_ref[...], ln1b_ref[...], eps)
    # Fused QKV projection; 1/sqrt(dk) already folded into the Q columns.
    qkv = jnp.dot(h.astype(mxu_dtype), wqkv_ref[...].astype(mxu_dtype),
                  preferred_element_type=f32) + bqkv_ref[...]
    mb = mb_ref[...]                                 # additive mask bias (L, L)

    heads_out = []
    for hd in range(heads):                          # static head loop, Dk slices
        q = qkv[:, hd * dk:(hd + 1) * dk]
        k = qkv[:, E + hd * dk:E + (hd + 1) * dk]
        v = qkv[:, 2 * E + hd * dk:2 * E + (hd + 1) * dk]
        s = jax.lax.dot_general(q.astype(mxu_dtype), k.astype(mxu_dtype),
                                (((1,), (1,)), ((), ())),
                                preferred_element_type=f32) + mb
        s_max = jnp.max(s, axis=-1, keepdims=True)
        p = jnp.exp(s - s_max)
        p = p * pl.reciprocal(jnp.sum(p, axis=-1, keepdims=True), approx=True)
        heads_out.append(jnp.dot(p.astype(mxu_dtype), v.astype(mxu_dtype),
                                 preferred_element_type=f32))
    a = jnp.concatenate(heads_out, axis=-1)          # (L, E), lane-dense

    x1 = jnp.dot(a.astype(mxu_dtype), wo_ref[...].astype(mxu_dtype),
                 preferred_element_type=f32) + bo_ref[...] + x

    # ---------------- sublayer 2: x1 + W2(GELU(W1(LN2(x1)))) ----------------
    h2 = _layer_norm(x1, ln2g_ref[...], ln2b_ref[...], eps)
    f = jnp.dot(h2.astype(mxu_dtype), w1_ref[...].astype(mxu_dtype),
                preferred_element_type=f32) + b1_ref[...]
    f = _gelu(f)
    out = jnp.dot(f.astype(mxu_dtype), w2_ref[...].astype(mxu_dtype),
                  preferred_element_type=f32) + b2_ref[...] + x1

    o_ref[...] = out.astype(o_ref.dtype)


def transformer_block(x, mask, p, *, heads, eps=1e-6, mxu_dtype=jnp.float32):
    """Eval-mode TransformerBlock forward.  mxu_dtype=jnp.bfloat16 on v6e/v7x."""
    B, L, E = x.shape
    dk = E // heads
    F = p["w1"].shape[1]
    scale = 1.0 / math.sqrt(dk)

    # Fused QKV weight/bias; fold the attention scale into the Q columns.
    wqkv = jnp.concatenate([p["wq"] * scale, p["wk"], p["wv"]], axis=1)
    bqkv = jnp.concatenate([p["bq"] * scale, p["bk"], p["bv"]], axis=0)
    bqkv = bqkv.reshape(1, 3 * E)

    # Additive mask bias: masked positions get -1e9, unmasked 0.
    mask_bias = jnp.where(mask == 0, -1e9, 0.0).astype(jnp.float32)

    rep = lambda b: (0, 0)   # weights / biases: resident, never re-fetched
    kernel = functools.partial(_block_kernel, heads=heads, eps=eps,
                               mxu_dtype=mxu_dtype)
    return pl.pallas_call(
        kernel,
        out_shape=jax.ShapeDtypeStruct((B, L, E), x.dtype),
        grid_spec=pltpu.PrefetchScalarGridSpec(
            num_scalar_prefetch=0,
            grid=(B,),
            in_specs=[
                pl.BlockSpec((None, L, E), lambda b: (b, 0, 0)),   # x
                pl.BlockSpec((None, L, L), lambda b: (b, 0, 0)),   # mask bias
                pl.BlockSpec((1, E), rep),                         # ln1 gamma
                pl.BlockSpec((1, E), rep),                         # ln1 beta
                pl.BlockSpec((E, 3 * E), rep),                     # wqkv
                pl.BlockSpec((1, 3 * E), rep),                     # bqkv
                pl.BlockSpec((E, E), rep),                         # wo
                pl.BlockSpec((1, E), rep),                         # bo
                pl.BlockSpec((1, E), rep),                         # ln2 gamma
                pl.BlockSpec((1, E), rep),                         # ln2 beta
                pl.BlockSpec((E, F), rep),                         # w1
                pl.BlockSpec((1, F), rep),                         # b1
                pl.BlockSpec((F, E), rep),                         # w2
                pl.BlockSpec((1, E), rep),                         # b2
            ],
            out_specs=pl.BlockSpec((None, L, E), lambda b: (b, 0, 0)),
        ),
        compiler_params=pltpu.CompilerParams(
            dimension_semantics=("parallel",),           # one batch per TC on v7x
            vmem_limit_bytes=32 * 1024 * 1024,
        ),
    )(x, mask_bias,
      p["ln1_g"].reshape(1, E), p["ln1_b"].reshape(1, E),
      wqkv, bqkv,
      p["wo"], p["bo"].reshape(1, E),
      p["ln2_g"].reshape(1, E), p["ln2_b"].reshape(1, E),
      p["w1"], p["b1"].reshape(1, F),
      p["w2"], p["b2"].reshape(1, E))

# TODO(synk): dropout layers are eval-mode identity; train-mode dropout would
# need pltpu.prng_seed + pltpu.stateful_bernoulli and is not bitwise
# reproducible vs torch's RNG.


# ----------------------------------------------------------------------------
# Params (torch nn.Linear-style uniform(-1/sqrt(fan_in), 1/sqrt(fan_in)) init).
def init_params(key, hidden, ff_hidden):
    def make_linear(k, fan_in, fan_out):
        kw, kb = jax.random.split(k)
        bound = 1.0 / math.sqrt(fan_in)
        w = jax.random.uniform(kw, (fan_in, fan_out), jnp.float32, -bound, bound)
        b = jax.random.uniform(kb, (fan_out,), jnp.float32, -bound, bound)
        return w, b

    ks = jax.random.split(key, 6)
    wq, bq = make_linear(ks[0], hidden, hidden)
    wk, bk = make_linear(ks[1], hidden, hidden)
    wv, bv = make_linear(ks[2], hidden, hidden)
    wo, bo = make_linear(ks[3], hidden, hidden)
    w1, b1 = make_linear(ks[4], hidden, ff_hidden)
    w2, b2 = make_linear(ks[5], ff_hidden, hidden)
    return dict(
        wq=wq, bq=bq, wk=wk, bk=bk, wv=wv, bv=bv, wo=wo, bo=bo,
        w1=w1, b1=b1, w2=w2, b2=b2,
        ln1_g=jnp.ones((hidden,), jnp.float32),
        ln1_b=jnp.zeros((hidden,), jnp.float32),
        ln2_g=jnp.ones((hidden,), jnp.float32),
        ln2_b=jnp.zeros((hidden,), jnp.float32),
    )


# ----------------------------------------------------------------------------
# Pure-JAX reference (same math as the PyTorch module, eval mode).
def reference(x, mask, p, *, heads):
    B, L, E = x.shape
    Dk = E // heads
    hp = jax.lax.Precision.HIGHEST

    def ln(t, g, b, eps=1e-6):
        mean = t.mean(-1, keepdims=True)
        var = jnp.sum((t - mean) ** 2, -1, keepdims=True) / (t.shape[-1] - 1)
        return g * (t - mean) / (jnp.sqrt(var) + eps) + b

    def lin(t, w, b):
        return jnp.dot(t, w, precision=hp) + b

    h = ln(x, p["ln1_g"], p["ln1_b"])

    def split(t):
        return t.reshape(B, L, heads, Dk).transpose(0, 2, 1, 3)

    q = split(lin(h, p["wq"], p["bq"]))
    k = split(lin(h, p["wk"], p["bk"]))
    v = split(lin(h, p["wv"], p["bv"]))
    s = jnp.einsum("bhqd,bhkd->bhqk", q, k, precision=hp) / math.sqrt(Dk)
    s = jnp.where(mask[:, None, :, :] == 0, -1e9, s)
    pr = jax.nn.softmax(s, axis=-1)
    a = jnp.einsum("bhqk,bhkd->bhqd", pr, v, precision=hp)
    a = a.transpose(0, 2, 1, 3).reshape(B, L, E)
    x1 = x + lin(a, p["wo"], p["bo"])
    h2 = ln(x1, p["ln2_g"], p["ln2_b"])
    f = _gelu(lin(h2, p["w1"], p["b1"]))
    return x1 + lin(f, p["w2"], p["b2"])


if __name__ == "__main__":
    key = jax.random.PRNGKey(0)
    batch, seq, hidden, heads, ff_hidden = 2, 128, 128, 4, 512

    k_p, k_x, k_m = jax.random.split(key, 3)
    params = init_params(k_p, hidden, ff_hidden)
    x = jax.random.normal(k_x, (batch, seq, hidden), jnp.float32)
    mask = (jax.random.uniform(k_m, (batch, seq, seq)) > 0.1).astype(jnp.int32)
    mask = jnp.maximum(mask, jnp.eye(seq, dtype=jnp.int32)[None])  # diag unmasked

    out = transformer_block(x, mask, params, heads=heads)
    jax.block_until_ready(out)

    ref = reference(x, mask, params, heads=heads)
    assert out.shape == (batch, seq, hidden)
    max_err = float(jnp.max(jnp.abs(out - ref)))
    assert jnp.allclose(out, ref, atol=2e-2, rtol=2e-2), f"max abs err {max_err}"

    print("KERNEL_OK")
</pallas_src>

<mosaic_0001>
module attributes {stable_mosaic.version = 11 : i64} {
  func.func @_block_kernel(%arg0: i32, %arg1: memref<1x128x128xf32, #tpu.memory_space<vmem>>, %arg2: memref<1x128x128xf32, #tpu.memory_space<vmem>>, %arg3: memref<1x128xf32, #tpu.memory_space<vmem>>, %arg4: memref<1x128xf32, #tpu.memory_space<vmem>>, %arg5: memref<128x384xf32, #tpu.memory_space<vmem>>, %arg6: memref<1x384xf32, #tpu.memory_space<vmem>>, %arg7: memref<128x128xf32, #tpu.memory_space<vmem>>, %arg8: memref<1x128xf32, #tpu.memory_space<vmem>>, %arg9: memref<1x128xf32, #tpu.memory_space<vmem>>, %arg10: memref<1x128xf32, #tpu.memory_space<vmem>>, %arg11: memref<128x512xf32, #tpu.memory_space<vmem>>, %arg12: memref<1x512xf32, #tpu.memory_space<vmem>>, %arg13: memref<512x128xf32, #tpu.memory_space<vmem>>, %arg14: memref<1x128xf32, #tpu.memory_space<vmem>>, %arg15: memref<1x128x128xf32, #tpu.memory_space<vmem>>) attributes {dimension_semantics = [#tpu.dimension_semantics<parallel>], iteration_bounds = array<i64: 2>, scalar_prefetch = 0 : i64, scratch_operands = 0 : i64, tpu.core_type = #tpu.core_type<tc>, window_params = [{transform_indices = @transform_0, window_bounds = array<i64: 1, 128, 128>}, {transform_indices = @transform_1, window_bounds = array<i64: 1, 128, 128>}, {pipeline_mode = #tpu.pipeline_mode<synchronous>, transform_indices = @transform_2, window_bounds = array<i64: 1, 128>}, {pipeline_mode = #tpu.pipeline_mode<synchronous>, transform_indices = @transform_3, window_bounds = array<i64: 1, 128>}, {pipeline_mode = #tpu.pipeline_mode<synchronous>, transform_indices = @transform_4, window_bounds = array<i64: 128, 384>}, {pipeline_mode = #tpu.pipeline_mode<synchronous>, transform_indices = @transform_5, window_bounds = array<i64: 1, 384>}, {pipeline_mode = #tpu.pipeline_mode<synchronous>, transform_indices = @transform_6, window_bounds = array<i64: 128, 128>}, {pipeline_mode = #tpu.pipeline_mode<synchronous>, transform_indices = @transform_7, window_bounds = array<i64: 1, 128>}, {pipeline_mode = #tpu.pipeline_mode<synchronous>, transform_indices = @transform_8, window_bounds = array<i64: 1, 128>}, {pipeline_mode = #tpu.pipeline_mode<synchronous>, transform_indices = @transform_9, window_bounds = array<i64: 1, 128>}, {pipeline_mode = #tpu.pipeline_mode<synchronous>, transform_indices = @transform_10, window_bounds = array<i64: 128, 512>}, {pipeline_mode = #tpu.pipeline_mode<synchronous>, transform_indices = @transform_11, window_bounds = array<i64: 1, 512>}, {pipeline_mode = #tpu.pipeline_mode<synchronous>, transform_indices = @transform_12, window_bounds = array<i64: 512, 128>}, {pipeline_mode = #tpu.pipeline_mode<synchronous>, transform_indices = @transform_13, window_bounds = array<i64: 1, 128>}, {transform_indices = @transform_14, window_bounds = array<i64: 1, 128, 128>}]} {
    %c0 = arith.constant 0 : index
    %c0_0 = arith.constant 0 : index
    %c0_1 = arith.constant 0 : index
    %0 = vector.load %arg1[%c0, %c0_0, %c0_1] : memref<1x128x128xf32, #tpu.memory_space<vmem>>, vector<1x128x128xf32>
    %1 = vector.shape_cast %0 : vector<1x128x128xf32> to vector<128x128xf32>
    %c0_2 = arith.constant 0 : index
    %c0_3 = arith.constant 0 : index
    %2 = vector.load %arg3[%c0_2, %c0_3] : memref<1x128xf32, #tpu.memory_space<vmem>>, vector<1x128xf32>
    %c0_4 = arith.constant 0 : index
    %c0_5 = arith.constant 0 : index
    %3 = vector.load %arg4[%c0_4, %c0_5] : memref<1x128xf32, #tpu.memory_space<vmem>>, vector<1x128xf32>
    %cst = arith.constant dense<0.000000e+00> : vector<128xf32>
    %4 = vector.multi_reduction <add>, %1, %cst [1] : vector<128x128xf32> to vector<128xf32>
    %5 = vector.shape_cast %4 : vector<128xf32> to vector<128x1xf32>
    %cst_6 = arith.constant 1.280000e+02 : f32
    %6 = vector.broadcast %cst_6 : f32 to vector<128x1xf32>
    %7 = arith.divf %5, %6 : vector<128x1xf32>
    %8 = vector.broadcast %7 : vector<128x1xf32> to vector<128x128xf32>
    %9 = arith.subf %1, %8 : vector<128x128xf32>
    %10 = arith.mulf %9, %9 : vector<128x128xf32>
    %cst_7 = arith.constant dense<0.000000e+00> : vector<128xf32>
    %11 = vector.multi_reduction <add>, %10, %cst_7 [1] : vector<128x128xf32> to vector<128xf32>
    %12 = vector.shape_cast %11 : vector<128xf32> to vector<128x1xf32>
    %cst_8 = arith.constant 0.00787401571 : f32
    %13 = vector.broadcast %cst_8 : f32 to vector<128x1xf32>
    %14 = arith.mulf %12, %13 : vector<128x1xf32>
    %15 = math.sqrt %14 : vector<128x1xf32>
    %16 = vector.broadcast %2 : vector<1x128xf32> to vector<128x128xf32>
    %17 = arith.mulf %16, %9 : vector<128x128xf32>
    %cst_9 = arith.constant 9.99999997E-7 : f32
    %18 = vector.broadcast %cst_9 : f32 to vector<128x1xf32>
    %19 = arith.addf %15, %18 : vector<128x1xf32>
    %20 = tpu.reciprocal %19 {approx = true} : vector<128x1xf32> -> vector<128x1xf32>
    %21 = vector.broadcast %20 : vector<128x1xf32> to vector<128x128xf32>
    %22 = arith.mulf %17, %21 : vector<128x128xf32>
    %23 = vector.broadcast %3 : vector<1x128xf32> to vector<128x128xf32>
    %24 = arith.addf %22, %23 : vector<128x128xf32>
    %c0_10 = arith.constant 0 : index
    %c0_11 = arith.constant 0 : index
    %25 = vector.load %arg5[%c0_10, %c0_11] : memref<128x384xf32, #tpu.memory_space<vmem>>, vector<128x384xf32>
    %cst_12 = arith.constant dense<0.000000e+00> : vector<128x384xf32>
    %26 = tpu.matmul %24, %25, %cst_12 {dimension_numbers = #tpu.dot_dimension_numbers<[1], [0], [0], [1], [0, 0, 1, 1], [], []>} : vector<128x128xf32>, vector<128x384xf32>, vector<128x384xf32> -> vector<128x384xf32>
    %c0_13 = arith.constant 0 : index
    %c0_14 = arith.constant 0 : index
    %27 = vector.load %arg6[%c0_13, %c0_14] : memref<1x384xf32, #tpu.memory_space<vmem>>, vector<1x384xf32>
    %28 = vector.broadcast %27 : vector<1x384xf32> to vector<128x384xf32>
    %29 = arith.addf %26, %28 : vector<128x384xf32>
    %c0_15 = arith.constant 0 : index
    %c0_16 = arith.constant 0 : index
    %c0_17 = arith.constant 0 : index
    %30 = vector.load %arg2[%c0_15, %c0_16, %c0_17] : memref<1x128x128xf32, #tpu.memory_space<vmem>>, vector<1x128x128xf32>
    %31 = vector.shape_cast %30 : vector<1x128x128xf32> to vector<128x128xf32>
    %32 = vector.extract_strided_slice %29 {offsets = [0, 0], sizes = [128, 32], strides = [1, 1]} : vector<128x384xf32> to vector<128x32xf32>
    %33 = vector.extract_strided_slice %29 {offsets = [0, 128], sizes = [128, 32], strides = [1, 1]} : vector<128x384xf32> to vector<128x32xf32>
    %34 = vector.extract_strided_slice %29 {offsets = [0, 256], sizes = [128, 32], strides = [1, 1]} : vector<128x384xf32> to vector<128x32xf32>
    %cst_18 = arith.constant dense<0.000000e+00> : vector<128x128xf32>
    %35 = tpu.matmul %32, %33, %cst_18 {dimension_numbers = #tpu.dot_dimension_numbers<[1], [1], [0], [0], [0, 0, 1, 0], [], []>} : vector<128x32xf32>, vector<128x32xf32>, vector<128x128xf32> -> vector<128x128xf32>
    %36 = arith.addf %35, %31 : vector<128x128xf32>
    %cst_19 = arith.constant dense<0xFF800000> : vector<128xf32>
    %37 = vector.multi_reduction <maximumf>, %36, %cst_19 [1] : vector<128x128xf32> to vector<128xf32>
    %38 = vector.shape_cast %37 : vector<128xf32> to vector<128x1xf32>
    %39 = vector.broadcast %38 : vector<128x1xf32> to vector<128x128xf32>
    %40 = arith.subf %36, %39 : vector<128x128xf32>
    %41 = math.exp %40 : vector<128x128xf32>
    %cst_20 = arith.constant dense<0.000000e+00> : vector<128xf32>
    %42 = vector.multi_reduction <add>, %41, %cst_20 [1] : vector<128x128xf32> to vector<128xf32>
    %43 = vector.shape_cast %42 : vector<128xf32> to vector<128x1xf32>
    %44 = tpu.reciprocal %43 {approx = true} : vector<128x1xf32> -> vector<128x1xf32>
    %45 = vector.broadcast %44 : vector<128x1xf32> to vector<128x128xf32>
    %46 = arith.mulf %41, %45 : vector<128x128xf32>
    %cst_21 = arith.constant dense<0.000000e+00> : vector<128x32xf32>
    %47 = tpu.matmul %46, %34, %cst_21 {dimension_numbers = #tpu.dot_dimension_numbers<[1], [0], [0], [1], [0, 0, 1, 1], [], []>} : vector<128x128xf32>, vector<128x32xf32>, vector<128x32xf32> -> vector<128x32xf32>
    %48 = vector.extract_strided_slice %29 {offsets = [0, 32], sizes = [128, 32], strides = [1, 1]} : vector<128x384xf32> to vector<128x32xf32>
    %49 = vector.extract_strided_slice %29 {offsets = [0, 160], sizes = [128, 32], strides = [1, 1]} : vector<128x384xf32> to vector<128x32xf32>
    %50 = vector.extract_strided_slice %29 {offsets = [0, 288], sizes = [128, 32], strides = [1, 1]} : vector<128x384xf32> to vector<128x32xf32>
    %cst_22 = arith.constant dense<0.000000e+00> : vector<128x128xf32>
    %51 = tpu.matmul %48, %49, %cst_22 {dimension_numbers = #tpu.dot_dimension_numbers<[1], [1], [0], [0], [0, 0, 1, 0], [], []>} : vector<128x32xf32>, vector<128x32xf32>, vector<128x128xf32> -> vector<128x128xf32>
    %52 = arith.addf %51, %31 : vector<128x128xf32>
    %cst_23 = arith.constant dense<0xFF800000> : vector<128xf32>
    %53 = vector.multi_reduction <maximumf>, %52, %cst_23 [1] : vector<128x128xf32> to vector<128xf32>
    %54 = vector.shape_cast %53 : vector<128xf32> to vector<128x1xf32>
    %55 = vector.broadcast %54 : vector<128x1xf32> to vector<128x128xf32>
    %56 = arith.subf %52, %55 : vector<128x128xf32>
    %57 = math.exp %56 : vector<128x128xf32>
    %cst_24 = arith.constant dense<0.000000e+00> : vector<128xf32>
    %58 = vector.multi_reduction <add>, %57, %cst_24 [1] : vector<128x128xf32> to vector<128xf32>
    %59 = vector.shape_cast %58 : vector<128xf32> to vector<128x1xf32>
    %60 = tpu.reciprocal %59 {approx = true} : vector<128x1xf32> -> vector<128x1xf32>
    %61 = vector.broadcast %60 : vector<128x1xf32> to vector<128x128xf32>
    %62 = arith.mulf %57, %61 : vector<128x128xf32>
    %cst_25 = arith.constant dense<0.000000e+00> : vector<128x32xf32>
    %63 = tpu.matmul %62, %50, %cst_25 {dimension_numbers = #tpu.dot_dimension_numbers<[1], [0], [0], [1], [0, 0, 1, 1], [], []>} : vector<128x128xf32>, vector<128x32xf32>, vector<128x32xf32> -> vector<128x32xf32>
    %64 = vector.extract_strided_slice %29 {offsets = [0, 64], sizes = [128, 32], strides = [1, 1]} : vector<128x384xf32> to vector<128x32xf32>
    %65 = vector.extract_strided_slice %29 {offsets = [0, 192], sizes = [128, 32], strides = [1, 1]} : vector<128x384xf32> to vector<128x32xf32>
    %66 = vector.extract_strided_slice %29 {offsets = [0, 320], sizes = [128, 32], strides = [1, 1]} : vector<128x384xf32> to vector<128x32xf32>
    %cst_26 = arith.constant dense<0.000000e+00> : vector<128x128xf32>
    %67 = tpu.matmul %64, %65, %cst_26 {dimension_numbers = #tpu.dot_dimension_numbers<[1], [1], [0], [0], [0, 0, 1, 0], [], []>} : vector<128x32xf32>, vector<128x32xf32>, vector<128x128xf32> -> vector<128x128xf32>
    %68 = arith.addf %67, %31 : vector<128x128xf32>
    %cst_27 = arith.constant dense<0xFF800000> : vector<128xf32>
    %69 = vector.multi_reduction <maximumf>, %68, %cst_27 [1] : vector<128x128xf32> to vector<128xf32>
    %70 = vector.shape_cast %69 : vector<128xf32> to vector<128x1xf32>
    %71 = vector.broadcast %70 : vector<128x1xf32> to vector<128x128xf32>
    %72 = arith.subf %68, %71 : vector<128x128xf32>
    %73 = math.exp %72 : vector<128x128xf32>
    %cst_28 = arith.constant dense<0.000000e+00> : vector<128xf32>
    %74 = vector.multi_reduction <add>, %73, %cst_28 [1] : vector<128x128xf32> to vector<128xf32>
    %75 = vector.shape_cast %74 : vector<128xf32> to vector<128x1xf32>
    %76 = tpu.reciprocal %75 {approx = true} : vector<128x1xf32> -> vector<128x1xf32>
    %77 = vector.broadcast %76 : vector<128x1xf32> to vector<128x128xf32>
    %78 = arith.mulf %73, %77 : vector<128x128xf32>
    %cst_29 = arith.constant dense<0.000000e+00> : vector<128x32xf32>
    %79 = tpu.matmul %78, %66, %cst_29 {dimension_numbers = #tpu.dot_dimension_numbers<[1], [0], [0], [1], [0, 0, 1, 1], [], []>} : vector<128x128xf32>, vector<128x32xf32>, vector<128x32xf32> -> vector<128x32xf32>
    %80 = vector.extract_strided_slice %29 {offsets = [0, 96], sizes = [128, 32], strides = [1, 1]} : vector<128x384xf32> to vector<128x32xf32>
    %81 = vector.extract_strided_slice %29 {offsets = [0, 224], sizes = [128, 32], strides = [1, 1]} : vector<128x384xf32> to vector<128x32xf32>
    %82 = vector.extract_strided_slice %29 {offsets = [0, 352], sizes = [128, 32], strides = [1, 1]} : vector<128x384xf32> to vector<128x32xf32>
    %cst_30 = arith.constant dense<0.000000e+00> : vector<128x128xf32>
    %83 = tpu.matmul %80, %81, %cst_30 {dimension_numbers = #tpu.dot_dimension_numbers<[1], [1], [0], [0], [0, 0, 1, 0], [], []>} : vector<128x32xf32>, vector<128x32xf32>, vector<128x128xf32> -> vector<128x128xf32>
    %84 = arith.addf %83, %31 : vector<128x128xf32>
    %cst_31 = arith.constant dense<0xFF800000> : vector<128xf32>
    %85 = vector.multi_reduction <maximumf>, %84, %cst_31 [1] : vector<128x128xf32> to vector<128xf32>
    %86 = vector.shape_cast %85 : vector<128xf32> to vector<128x1xf32>
    %87 = vector.broadcast %86 : vector<128x1xf32> to vector<128x128xf32>
    %88 = arith.subf %84, %87 : vector<128x128xf32>
    %89 = math.exp %88 : vector<128x128xf32>
    %cst_32 = arith.constant dense<0.000000e+00> : vector<128xf32>
    %90 = vector.multi_reduction <add>, %89, %cst_32 [1] : vector<128x128xf32> to vector<128xf32>
    %91 = vector.shape_cast %90 : vector<128xf32> to vector<128x1xf32>
    %92 = tpu.reciprocal %91 {approx = true} : vector<128x1xf32> -> vector<128x1xf32>
    %93 = vector.broadcast %92 : vector<128x1xf32> to vector<128x128xf32>
    %94 = arith.mulf %89, %93 : vector<128x128xf32>
    %cst_33 = arith.constant dense<0.000000e+00> : vector<128x32xf32>
    %95 = tpu.matmul %94, %82, %cst_33 {dimension_numbers = #tpu.dot_dimension_numbers<[1], [0], [0], [1], [0, 0, 1, 1], [], []>} : vector<128x128xf32>, vector<128x32xf32>, vector<128x32xf32> -> vector<128x32xf32>
    %96 = tpu.concatenate %47, %63, %79, %95 in 1 : vector<128x32xf32>, vector<128x32xf32>, vector<128x32xf32>, vector<128x32xf32> -> vector<128x128xf32>
    %c0_34 = arith.constant 0 : index
    %c0_35 = arith.constant 0 : index
    %97 = vector.load %arg7[%c0_34, %c0_35] : memref<128x128xf32, #tpu.memory_space<vmem>>, vector<128x128xf32>
    %cst_36 = arith.constant dense<0.000000e+00> : vector<128x128xf32>
    %98 = tpu.matmul %96, %97, %cst_36 {dimension_numbers = #tpu.dot_dimension_numbers<[1], [0], [0], [1], [0, 0, 1, 1], [], []>} : vector<128x128xf32>, vector<128x128xf32>, vector<128x128xf32> -> vector<128x128xf32>
    %c0_37 = arith.constant 0 : index
    %c0_38 = arith.constant 0 : index
    %99 = vector.load %arg8[%c0_37, %c0_38] : memref<1x128xf32, #tpu.memory_space<vmem>>, vector<1x128xf32>
    %100 = vector.broadcast %99 : vector<1x128xf32> to vector<128x128xf32>
    %101 = arith.addf %98, %100 : vector<128x128xf32>
    %102 = arith.addf %101, %1 : vector<128x128xf32>
    %c0_39 = arith.constant 0 : index
    %c0_40 = arith.constant 0 : index
    %103 = vector.load %arg9[%c0_39, %c0_40] : memref<1x128xf32, #tpu.memory_space<vmem>>, vector<1x128xf32>
    %c0_41 = arith.constant 0 : index
    %c0_42 = arith.constant 0 : index
    %104 = vector.load %arg10[%c0_41, %c0_42] : memref<1x128xf32, #tpu.memory_space<vmem>>, vector<1x128xf32>
    %cst_43 = arith.constant dense<0.000000e+00> : vector<128xf32>
    %105 = vector.multi_reduction <add>, %102, %cst_43 [1] : vector<128x128xf32> to vector<128xf32>
    %106 = vector.shape_cast %105 : vector<128xf32> to vector<128x1xf32>
    %cst_44 = arith.constant 1.280000e+02 : f32
    %107 = vector.broadcast %cst_44 : f32 to vector<128x1xf32>
    %108 = arith.divf %106, %107 : vector<128x1xf32>
    %109 = vector.broadcast %108 : vector<128x1xf32> to vector<128x128xf32>
    %110 = arith.subf %102, %109 : vector<128x128xf32>
    %111 = arith.mulf %110, %110 : vector<128x128xf32>
    %cst_45 = arith.constant dense<0.000000e+00> : vector<128xf32>
    %112 = vector.multi_reduction <add>, %111, %cst_45 [1] : vector<128x128xf32> to vector<128xf32>
    %113 = vector.shape_cast %112 : vector<128xf32> to vector<128x1xf32>
    %cst_46 = arith.constant 0.00787401571 : f32
    %114 = vector.broadcast %cst_46 : f32 to vector<128x1xf32>
    %115 = arith.mulf %113, %114 : vector<128x1xf32>
    %116 = math.sqrt %115 : vector<128x1xf32>
    %117 = vector.broadcast %103 : vector<1x128xf32> to vector<128x128xf32>
    %118 = arith.mulf %117, %110 : vector<128x128xf32>
    %cst_47 = arith.constant 9.99999997E-7 : f32
    %119 = vector.broadcast %cst_47 : f32 to vector<128x1xf32>
    %120 = arith.addf %116, %119 : vector<128x1xf32>
    %121 = tpu.reciprocal %120 {approx = true} : vector<128x1xf32> -> vector<128x1xf32>
    %122 = vector.broadcast %121 : vector<128x1xf32> to vector<128x128xf32>
    %123 = arith.mulf %118, %122 : vector<128x128xf32>
    %124 = vector.broadcast %104 : vector<1x128xf32> to vector<128x128xf32>
    %125 = arith.addf %123, %124 : vector<128x128xf32>
    %c0_48 = arith.constant 0 : index
    %c0_49 = arith.constant 0 : index
    %126 = vector.load %arg11[%c0_48, %c0_49] : memref<128x512xf32, #tpu.memory_space<vmem>>, vector<128x512xf32>
    %cst_50 = arith.constant dense<0.000000e+00> : vector<128x512xf32>
    %127 = tpu.matmul %125, %126, %cst_50 {dimension_numbers = #tpu.dot_dimension_numbers<[1], [0], [0], [1], [0, 0, 1, 1], [], []>} : vector<128x128xf32>, vector<128x512xf32>, vector<128x512xf32> -> vector<128x512xf32>
    %c0_51 = arith.constant 0 : index
    %c0_52 = arith.constant 0 : index
    %128 = vector.load %arg12[%c0_51, %c0_52] : memref<1x512xf32, #tpu.memory_space<vmem>>, vector<1x512xf32>
    %129 = vector.broadcast %128 : vector<1x512xf32> to vector<128x512xf32>
    %130 = arith.addf %127, %129 : vector<128x512xf32>
    %cst_53 = arith.constant 5.000000e-01 : f32
    %131 = vector.broadcast %cst_53 : f32 to vector<128x512xf32>
    %132 = arith.mulf %131, %130 : vector<128x512xf32>
    %cst_54 = arith.constant 4.471500e-02 : f32
    %133 = vector.broadcast %cst_54 : f32 to vector<128x512xf32>
    %134 = arith.mulf %133, %130 : vector<128x512xf32>
    %135 = arith.mulf %134, %130 : vector<128x512xf32>
    %136 = arith.mulf %135, %130 : vector<128x512xf32>
    %137 = arith.addf %130, %136 : vector<128x512xf32>
    %cst_55 = arith.constant 0.797884583 : f32
    %138 = vector.broadcast %cst_55 : f32 to vector<128x512xf32>
    %139 = arith.mulf %138, %137 : vector<128x512xf32>
    %140 = math.tanh %139 : vector<128x512xf32>
    %cst_56 = arith.constant 1.000000e+00 : f32
    %141 = vector.broadcast %cst_56 : f32 to vector<128x512xf32>
    %142 = arith.addf %141, %140 : vector<128x512xf32>
    %143 = arith.mulf %132, %142 : vector<128x512xf32>
    %c0_57 = arith.constant 0 : index
    %c0_58 = arith.constant 0 : index
    %144 = vector.load %arg13[%c0_57, %c0_58] : memref<512x128xf32, #tpu.memory_space<vmem>>, vector<512x128xf32>
    %cst_59 = arith.constant dense<0.000000e+00> : vector<128x128xf32>
    %145 = tpu.matmul %143, %144, %cst_59 {dimension_numbers = #tpu.dot_dimension_numbers<[1], [0], [0], [1], [0, 0, 1, 1], [], []>} : vector<128x512xf32>, vector<512x128xf32>, vector<128x128xf32> -> vector<128x128xf32>
    %c0_60 = arith.constant 0 : index
    %c0_61 = arith.constant 0 : index
    %146 = vector.load %arg14[%c0_60, %c0_61] : memref<1x128xf32, #tpu.memory_space<vmem>>, vector<1x128xf32>
    %147 = vector.broadcast %146 : vector<1x128xf32> to vector<128x128xf32>
    %148 = arith.addf %145, %147 : vector<128x128xf32>
    %149 = arith.addf %148, %102 : vector<128x128xf32>
    %c0_62 = arith.constant 0 : index
    %c0_63 = arith.constant 0 : index
    %c0_64 = arith.constant 0 : index
    %150 = vector.load %arg15[%c0_62, %c0_63, %c0_64] : memref<1x128x128xf32, #tpu.memory_space<vmem>>, vector<1x128x128xf32>
    %151 = vector.shape_cast %150 : vector<1x128x128xf32> to vector<128x128xf32>
    %152 = vector.shape_cast %149 : vector<128x128xf32> to vector<1x128x128xf32>
    tpu.vector_store %arg15[%c0_62, %c0_63, %c0_64], %152 {strides = array<i32>} : memref<1x128x128xf32, #tpu.memory_space<vmem>>, vector<1x128x128xf32>,
    return
  }
  func.func @transform_0(%arg0: i32) -> (i32, i32, i32) {
    %c0_i32 = arith.constant 0 : i32
    %c0_i32_0 = arith.constant 0 : i32
    %c0_i32_1 = arith.constant 0 : i32
    return %arg0, %c0_i32, %c0_i32_0 : i32, i32, i32
  }
  func.func @transform_1(%arg0: i32) -> (i32, i32, i32) {
    %c0_i32 = arith.constant 0 : i32
    %c0_i32_0 = arith.constant 0 : i32
    %c0_i32_1 = arith.constant 0 : i32
    return %arg0, %c0_i32, %c0_i32_0 : i32, i32, i32
  }
  func.func @transform_2(%arg0: i32) -> (i32, i32) {
    %c0_i32 = arith.constant 0 : i32
    %c0_i32_0 = arith.constant 0 : i32
    %c0_i32_1 = arith.constant 0 : i32
    return %c0_i32, %c0_i32_0 : i32, i32
  }
  func.func @transform_3(%arg0: i32) -> (i32, i32) {
    %c0_i32 = arith.constant 0 : i32
    %c0_i32_0 = arith.constant 0 : i32
    %c0_i32_1 = arith.constant 0 : i32
    return %c0_i32, %c0_i32_0 : i32, i32
  }
  func.func @transform_4(%arg0: i32) -> (i32, i32) {
    %c0_i32 = arith.constant 0 : i32
    %c0_i32_0 = arith.constant 0 : i32
    %c0_i32_1 = arith.constant 0 : i32
    return %c0_i32, %c0_i32_0 : i32, i32
  }
  func.func @transform_5(%arg0: i32) -> (i32, i32) {
    %c0_i32 = arith.constant 0 : i32
    %c0_i32_0 = arith.constant 0 : i32
    %c0_i32_1 = arith.constant 0 : i32
    return %c0_i32, %c0_i32_0 : i32, i32
  }
  func.func @transform_6(%arg0: i32) -> (i32, i32) {
    %c0_i32 = arith.constant 0 : i32
    %c0_i32_0 = arith.constant 0 : i32
    %c0_i32_1 = arith.constant 0 : i32
    return %c0_i32, %c0_i32_0 : i32, i32
  }
  func.func @transform_7(%arg0: i32) -> (i32, i32) {
    %c0_i32 = arith.constant 0 : i32
    %c0_i32_0 = arith.constant 0 : i32
    %c0_i32_1 = arith.constant 0 : i32
    return %c0_i32, %c0_i32_0 : i32, i32
  }
  func.func @transform_8(%arg0: i32) -> (i32, i32) {
    %c0_i32 = arith.constant 0 : i32
    %c0_i32_0 = arith.constant 0 : i32
    %c0_i32_1 = arith.constant 0 : i32
    return %c0_i32, %c0_i32_0 : i32, i32
  }
  func.func @transform_9(%arg0: i32) -> (i32, i32) {
    %c0_i32 = arith.constant 0 : i32
    %c0_i32_0 = arith.constant 0 : i32
    %c0_i32_1 = arith.constant 0 : i32
    return %c0_i32, %c0_i32_0 : i32, i32
  }
  func.func @transform_10(%arg0: i32) -> (i32, i32) {
    %c0_i32 = arith.constant 0 : i32
    %c0_i32_0 = arith.constant 0 : i32
    %c0_i32_1 = arith.constant 0 : i32
    return %c0_i32, %c0_i32_0 : i32, i32
  }
  func.func @transform_11(%arg0: i32) -> (i32, i32) {
    %c0_i32 = arith.constant 0 : i32
    %c0_i32_0 = arith.constant 0 : i32
    %c0_i32_1 = arith.constant 0 : i32
    return %c0_i32, %c0_i32_0 : i32, i32
  }
  func.func @transform_12(%arg0: i32) -> (i32, i32) {
    %c0_i32 = arith.constant 0 : i32
    %c0_i32_0 = arith.constant 0 : i32
    %c0_i32_1 = arith.constant 0 : i32
    return %c0_i32, %c0_i32_0 : i32, i32
  }
  func.func @transform_13(%arg0: i32) -> (i32, i32) {
    %c0_i32 = arith.constant 0 : i32
    %c0_i32_0 = arith.constant 0 : i32
    %c0_i32_1 = arith.constant 0 : i32
    return %c0_i32, %c0_i32_0 : i32, i32
  }
  func.func @transform_14(%arg0: i32) -> (i32, i32, i32) {
    %c0_i32 = arith.constant 0 : i32
    %c0_i32_0 = arith.constant 0 : i32
    %c0_i32_1 = arith.constant 0 : i32
    return %arg0, %c0_i32, %c0_i32_0 : i32, i32, i32
  }
}

</mosaic_0001>

<bundles_post_ra>
// kernel: tpu_custom_call.1
= control target key start
LH: loop header
LB: loop body
LE: loop exit
PB: predicated region body
PF: predicated region fallthrough
CT: control target
= control target key end

     0   :  { %s12486_s0 = inlined_call_operand.hbm [shape: f32[2,128,128], index: 0, kind: input, shape index: {}]   ;;  %s12487_s1 = inlined_call_operand.hbm [shape: f32[2,128,128], index: 1, kind: input, shape index: {}]   ;;  %s12488_s2 = inlined_call_operand.hbm [shape: f32[1,128], index: 2, kind: input, shape index: {}]   ;;  %s12489_s3 = inlined_call_operand.vmem [shape: f32[1,128], index: 3, kind: input, shape index: {}]   ;;  %s12490_s4 = inlined_call_operand.hbm [shape: f32[128,384], index: 4, kind: input, shape index: {}]   ;;  %s12491_s5 = inlined_call_operand.vmem [shape: f32[1,384], index: 5, kind: input, shape index: {}]   ;;  %s12492_s6 = inlined_call_operand.hbm [shape: f32[128,128], index: 6, kind: input, shape index: {}]   ;;  %s12493_s7 = inlined_call_operand.vmem [shape: f32[1,128], index: 7, kind: input, shape index: {}]   ;;  %s12494_s8 = inlined_call_operand.vmem [shape: f32[1,128], index: 8, kind: input, shape index: {}]   ;;  %s12495_s9 = inlined_call_operand.vmem [shape: f32[1,128], index: 9, kind: input, shape index: {}]   ;;  %s12496_s10 = inlined_call_operand.hbm [shape: f32[128,512], index: 10, kind: input, shape index: {}]   ;;  %s12497_s11 = inlined_call_operand.vmem [shape: f32[1,512], index: 11, kind: input, shape index: {}]   ;;  %s12498_s12 = inlined_call_operand.hbm [shape: f32[512,128], index: 12, kind: input, shape index: {}]   ;;  %s12499_s13 = inlined_call_operand.vmem [shape: f32[1,128], index: 13, kind: input, shape index: {}]   ;;  %s12500_s14 = inlined_call_operand.hbm [shape: f32[2,128,128], index: 14, kind: output, shape index: {}]  }
   0x1   :  { %12633 = sst [smem:[#allocation75_spill]] %s12486_s0 }
   0x2   :  { %12634 = sst [smem:[#allocation76_spill]] %s12488_s2 }
   0x3   :  { %12635 = sst [smem:[#allocation77_spill]] %s12490_s4 }
   0x4   :  { %12636 = sst [smem:[#allocation78_spill]] %s12492_s6 }
   0x5   :  { %12637 = sst [smem:[#allocation79_spill]] %s12495_s9 }
   0x6   :  { %12638 = sst [smem:[#allocation80_spill]] %s12496_s10 }
   0x7   :  { %12639 = sst [smem:[#allocation81_spill]] %s12497_s11 }
   0x8   :  { %12640 = sst [smem:[#allocation82_spill]] %s12498_s12 }
   0x9   :  { %12641 = sst [smem:[#allocation83_spill]] %s12499_s13 }
   0xa   :  { %12642 = sst [smem:[#allocation84_spill]] %s12500_s14 }
   0xb   :  { %19 = vsyncpa [#allocation3], 0 }
   0xc   :  { %21 = vsyncpa [#allocation3 + $0x1], 0 }
   0xd   :  { %22 = vsyncpa [#allocation6], 0 }
   0xe   :  { %24 = vsyncpa [#allocation6 + $0x1], 0 }
   0xf   :  { %25 = vsyncpa [#allocation9], 0 }
  0x10   :  { %26 = vsyncpa [#allocation12], 0 }
  0x11   :  { %27 = vsyncpa [#allocation4], 0 }
  0x12   :  { %29 = vsyncpa [#allocation4 + $0x1], 0  ;;  %s9167_s29 = smov 0   ;;  %s9169_s30 = smov 0  }
  0x13   :  { %s9171_s15 = smov 0   ;;  %s9173_s16 = smov 0  }
  0x14 LB: > { %12643 = sst [smem:[#allocation21_spill]] %s9066_s15  ;;  %s9072_s17 = smov [#allocation7]   ;;  %s9070_s16 = sphi %s9173_s16, %s12946_s16   ;;  %s9066_s15 = sphi %s9171_s15, %s12948_s15   ;;  %s9062_s30 = sphi %s9169_s30, %s12950_s30   ;;  %s9058_s29 = sphi %s9167_s29, %s12949_s29  }
  0x15   : > { %s383_s18 = sshll.u32 %s9072_s17, 4  ;;  %s9188_s19 = sadd.s32 4294967295, %s9070_s16   ;;  %s9193_s18 = int_to_ptr.vmem [resolvable:$true] %s383_s18 }
  0x16   : > { %p6006_p0 = scmp.ge.s32.totalorder %s9070_s16, 1  ;;  %p12502_p1 = scmp.eq.s32.totalorder %s9188_s19, 0 }
  0x17   : > { %p370_p2 = scmp.lt.s32.totalorder %s9070_s16, 3  ;;  %s9073_s21 = smov [#allocation8]  }
  0x18   : > { %s396_s22 = sshll.u32 %s9073_s21, 4  ;;  %s9074_s24 = smov [#allocation11]   ;;  %s9202_s22 = int_to_ptr.vmem [resolvable:$true] %s396_s22 }
  0x19   : > { %p9195_p3 = pnand %p6006_p0, %p370_p2  ;;  %s434_s25 = sshll.u32 %s9074_s24, 4  ;;  %s9210_s25 = int_to_ptr.vmem [resolvable:$true] %s434_s25 }
  0x1a   : > { %s12646_s2 = sld [smem:[#allocation76_spill]] }
  0x1b   : > { %s12644_s20 = scalar_select %p9195_p3, 1, 0 }
  0x1c   : > { %p7796_p5 = pneg %p9195_p3 }
  0x1e   : > { %p9206_p6 = pnand %p7796_p5, %p12502_p1 }
  0x20   : > { %s8788_s28 = scalar_lea.hbm %s12646_s2, 16  ;;  %p9220_p8 = pneg %p9206_p6 }
  0x21   : > { %p8789_p7 = scmp.ne.s32.totalorder %s12646_s2, %s8788_s28  ;;  %p8795_p11 = scmp.lt.u32.totalorder %s8788_s28, %s12646_s2 }
  0x23   : > { %p8791_p9 = pnand %p9220_p8, %p8789_p7 }
  0x25   : > { %p8792_p10 = pneg %p8791_p9 }
  0x27   : > { %p8797_p12 = pnand %p8795_p11, %p8792_p10 }
  0x29   : > { %8800 = shalt.err (!%p8797_p12)
}
  0x2a   : > { %s8801_s14 = scalar_lea.vmem %s9193_s18, 16  ;;  %s8808_s26 = scalar_lea.vmem %s9193_s18, 32 }
  0x2b   : > { %p8802_p13 = scmp.ne.s32.totalorder %s9193_s18, %s8801_s14  ;;  %p8809_p5 = scmp.lt.s32.totalorder %s9193_s18, %s9193_s18 }
  0x2c   : > { %p8810_p7 = scmp.lt.s32.totalorder %s8808_s26, %s8801_s14 }
  0x2d   : > { %p8804_p0 = pnand %p8802_p13, %p9220_p8 }
  0x2e   : > { %p8811_p9 = por %p8810_p7, %p8809_p5 }
  0x2f   : > { %p8805_p2 = pneg %p8804_p0 }
  0x31   : > { %p8812_p4 = pnand %p8811_p9, %p8805_p2 }
  0x33   : > { %8815 = shalt.err (!%p8812_p4)
}
  0x34   : > { %7799 = dma.hbm_to_vmem [thread:$0]  (!%p9206_p6), %s12646_s2, 16, %s9193_s18, [#allocation6]  }
  0x35   : > { %s12648_s4 = sld [smem:[#allocation77_spill]] }
  0x3b   : > { %s8816_s24 = scalar_lea.hbm %s12648_s4, 6144 }
  0x3c   : > { %p8817_p10 = scmp.ne.s32.totalorder %s12648_s4, %s8816_s24  ;;  %p8823_p4 = scmp.lt.u32.totalorder %s8816_s24, %s12648_s4 }
  0x3e   : > { %p8819_p11 = pnand %p8817_p10, %p9220_p8 }
  0x40   : > { %p8820_p12 = pneg %p8819_p11 }
  0x42   : > { %p8825_p13 = pnand %p8823_p4, %p8820_p12 }
  0x44   : > { %8828 = shalt.err (!%p8825_p13)
}
  0x45   : > { %s8829_s18 = scalar_lea.vmem %s9202_s22, 6144  ;;  %p8837_p7 = scmp.lt.s32.totalorder %s9202_s22, %s9202_s22 }
  0x46   : > { %p8830_p0 = scmp.ne.s32.totalorder %s9202_s22, %s8829_s18  ;;  %p8838_p9 = scmp.lt.s32.totalorder %s8829_s18, %s8829_s18 }
  0x48   : > { %p8832_p2 = pnand %p8830_p0, %p9220_p8  ;;  %p8839_p10 = por %p8838_p9, %p8837_p7 }
  0x4a   : > { %p8833_p5 = pneg %p8832_p2 }
  0x4c   : > { %p8840_p11 = pnand %p8839_p10, %p8833_p5 }
  0x4e   : > { %8843 = shalt.err (!%p8840_p11)
}
  0x4f   : > { %s9075_s9 = smov 384   ;;  %s9076_s11 = smov 24  }
  0x50   : > { %7802 = dma.hbm_to_vmem [thread:$0]  (!%p9206_p6), %s12648_s4, 6144, %s9202_s22, [#allocation9], %s9075_s9, %s9075_s9, %s9076_s11  }
  0x51   : > { %s12649_s10 = sld [smem:[#allocation80_spill]] }
  0x57   : > { %s8844_s24 = scalar_lea.hbm %s12649_s10, 8192 }
  0x58   : > { %p8845_p12 = scmp.ne.s32.totalorder %s12649_s10, %s8844_s24  ;;  %p8851_p0 = scmp.lt.u32.totalorder %s8844_s24, %s12649_s10 }
  0x5a   : > { %p8847_p4 = pnand %p8845_p12, %p9220_p8 }
  0x5c   : > { %p8848_p13 = pneg %p8847_p4 }
  0x5e   : > { %p8853_p2 = pnand %p8851_p0, %p8848_p13 }
  0x60   : > { %8856 = shalt.err (!%p8853_p2)
}
  0x61   : > { %s8857_s22 = scalar_lea.vmem %s9210_s25, 8192  ;;  %p8865_p10 = scmp.lt.s32.totalorder %s9210_s25, %s9210_s25 }
  0x62   : > { %p8858_p5 = scmp.ne.s32.totalorder %s9210_s25, %s8857_s22  ;;  %p8866_p11 = scmp.lt.s32.totalorder %s8857_s22, %s8857_s22 }
  0x64   : > { %p8860_p7 = pnand %p8858_p5, %p9220_p8  ;;  %p8867_p12 = por %p8866_p11, %p8865_p10 }
  0x66   : > { %p8861_p9 = pneg %p8860_p7 }
  0x68   : > { %p8868_p4 = pnand %p8867_p12, %p8861_p9 }
  0x6a   : > { %8871 = shalt.err (!%p8868_p4)
}
  0x6b   : > { %s9077_s9 = smov 512   ;;  %s9078_s2 = smov 32  }
  0x6c   : > { %7808 = dma.hbm_to_vmem [thread:$0]  (!%p9206_p6), %s12649_s10, 8192, %s9210_s25, [#allocation12], %s9077_s9, %s9077_s9, %s9078_s2  }
  0x6d   : > { %s9079_s27 = smov [#allocation10]   ;;  %s12650_s6 = sld [smem:[#allocation78_spill]] }
  0x6e   : > { %s412_s28 = sshll.u32 %s9079_s27, 4  ;;  %s413_s28 = int_to_ptr.vmem [resolvable:$true] %s412_s28 }
  0x73   : > { %s8872_s14 = scalar_lea.hbm %s12650_s6, 2048 }
  0x74   : > { %p8873_p13 = scmp.ne.s32.totalorder %s12650_s6, %s8872_s14  ;;  %p8879_p5 = scmp.lt.u32.totalorder %s8872_s14, %s12650_s6 }
  0x76   : > { %p8875_p0 = pnand %p8873_p13, %p9220_p8 }
  0x78   : > { %p8876_p2 = pneg %p8875_p0 }
  0x7a   : > { %p8881_p7 = pnand %p8879_p5, %p8876_p2 }
  0x7c   : > { %8884 = shalt.err (!%p8881_p7)
}
  0x7d   : > { %s8885_s25 = scalar_lea.vmem %s413_s28, 2048  ;;  %p8893_p12 = scmp.lt.s32.totalorder %s413_s28, %s413_s28 }
  0x7e   : > { %p8886_p9 = scmp.ne.s32.totalorder %s413_s28, %s8885_s25  ;;  %p8894_p4 = scmp.lt.s32.totalorder %s8885_s25, %s8885_s25 }
  0x80   : > { %p8888_p10 = pnand %p8886_p9, %p9220_p8  ;;  %p8895_p1 = por %p8894_p4, %p8893_p12 }
  0x82   : > { %p8889_p11 = pneg %p8888_p10 }
  0x84   : > { %p8896_p3 = pnand %p8895_p1, %p8889_p11 }
  0x86   : > { %8899 = shalt.err (!%p8896_p3)
}
  0x87   : > { %s12504_s9 = smov 128   ;;  %s12506_s2 = smov 8  }
  0x88   : > { %7805 = dma.hbm_to_vmem [thread:$0]  (!%p9206_p6), %s12650_s6, 2048, %s413_s28, [#allocation9], %s12504_s9, %s12504_s9, %s12506_s2  }
  0x89   : > { %s9082_s13 = smov [#allocation13]   ;;  %s12651_s12 = sld [smem:[#allocation82_spill]] }
  0x8a   : > { %s450_s27 = sshll.u32 %s9082_s13, 4  ;;  %s451_s27 = int_to_ptr.vmem [resolvable:$true] %s450_s27 }
  0x8f   : > { %s8900_s14 = scalar_lea.hbm %s12651_s12, 8192 }
  0x90   : > { %p8901_p1 = scmp.ne.s32.totalorder %s12651_s12, %s8900_s14  ;;  %p8907_p0 = scmp.lt.u32.totalorder %s8900_s14, %s12651_s12 }
  0x92   : > { %p8903_p3 = pnand %p8901_p1, %p9220_p8 }
  0x94   : > { %p8904_p13 = pneg %p8903_p3 }
  0x96   : > { %p8909_p2 = pnand %p8907_p0, %p8904_p13 }
  0x98   : > { %8912 = shalt.err (!%p8909_p2)
}
  0x99   : > { %s8913_s28 = scalar_lea.vmem %s451_s27, 8192  ;;  %p8921_p10 = scmp.lt.s32.totalorder %s451_s27, %s451_s27 }
  0x9a   : > { %p8914_p5 = scmp.ne.s32.totalorder %s451_s27, %s8913_s28  ;;  %p8922_p11 = scmp.lt.s32.totalorder %s8913_s28, %s8913_s28 }
  0x9c   : > { %p8916_p7 = pnand %p8914_p5, %p9220_p8  ;;  %p8923_p12 = por %p8922_p11, %p8921_p10 }
  0x9e   : > { %p8917_p9 = pneg %p8916_p7 }
  0xa0   : > { %p8924_p4 = pnand %p8923_p12, %p8917_p9 }
  0xa2   : > { %8927 = shalt.err (!%p8924_p4)
}
  0xa3   : > { %7811 = dma.hbm_to_vmem [thread:$0]  (!%p9206_p6), %s12651_s12, 8192, %s451_s27, [#allocation12], %s12504_s9, %s12504_s9, %s12506_s2  }
  0xa4   : > { %s6005_s23 = sadd.s32 4294967294, %s9070_s16   ;;  %s9332_s21 = sadd.s32 1, %s9070_s16  }
  0xa5   : > { %12652 = sst [smem:[#allocation22_spill]] %s9332_s21  ;;  %s42_s13 = sadd.s32 1, %s9066_s15 }
  0xa6   : > { %s39_s17 = ssub.s32 %s9070_s16, %s9332_s21  ;;  %p49_p8 = scmp.ne.s32.totalorder %s9066_s15, %s9062_s30 }
  0xa7   : > { %p40_p1 = scmp.eq.s32.totalorder %s39_s17, 0  ;;  %p50_p3 = scmp.eq.s32.totalorder %s9070_s16, 0 }
  0xa8   : > { %p55_p13 = scmp.ne.s32.totalorder %s9062_s30, %s9058_s29  ;;  %p357_p0 = scmp.eq.s32.totalorder %s9188_s19, 1 }
  0xa9   : > { %s9344_s24 = scalar_select %p40_p1, %s9066_s15, %s42_s13  }
  0xaa   : > { %p51_p2 = por %p50_p3, %p49_p8  ;;  %p12654_p5 = scmp.eq.s32.totalorder %s9188_s19, 0 }
  0xab   : > { %12653 = sst [smem:[#allocation23_spill]] %s9344_s24  ;;  %p9352_p6 = por %p357_p0, %p49_p8 }
  0xac   : > { %p9348_p7 = por %p12654_p5, %p55_p13  ;;  %p363_p9 = scmp.eq.s32.totalorder %s6005_s23, 1 }
  0xad   : > { %s12656_s27 = scalar_select %p9352_p6, 1, 0 }
  0xae   : > { %p7828_p10 = scmp.lt.s32.totalorder %s9070_s16, 2  ;;  %s467_s26 = sand.u32 1, %s9066_s15  }
  0xaf   : > { %p9358_p11 = por %p363_p9, %p55_p13  ;;  %s9362_s22 = sshll.u32 %s467_s26, 7 }
  0xb0   : > { %s6167_s25 = sshll.u32 %s9070_s16, 11  ;;  %s12658_s0 = sld [smem:[#allocation75_spill]] }
  0xb1   : > { %s12657_s18 = scalar_select %p9358_p11, 1, 0 }
  0xb2   : > { %s471_s23 = scalar_lea.vmem [#allocation2], %s9362_s22  ;;  %p9371_p12 = pnand %p7828_p10, %p51_p2 }
  0xb3   : > { %s478_s13 = sshll.u32 %s471_s23, 4  ;;  %s9380_s28 = scalar_lea.hbm %s12487_s1, %s6167_s25  ;;  %s9375_s13 = int_to_ptr.vmem [resolvable:$true] %s478_s13 }
  0xb4   : > { %s9382_s4 = scalar_lea.sflag [#allocation3], %s467_s26  ;;  %p8930_p8 = pneg %p9371_p12 }
  0xb6   : > { %s9368_s11 = scalar_lea.hbm %s12658_s0, %s6167_s25  ;;  %s8933_s12 = scalar_lea.hbm %s12658_s0, 4096 }
  0xb7   : > { %s8928_s6 = scalar_lea.hbm %s9368_s11, 2048  ;;  %p8934_p13 = scmp.lt.u32.totalorder %s9368_s11, %s12658_s0 }
  0xb8   : > { %p8929_p4 = scmp.ne.s32.totalorder %s9368_s11, %s8928_s6  ;;  %p8935_p0 = scmp.lt.u32.totalorder %s8933_s12, %s8928_s6 }
  0xb9   : > { %p8937_p5 = scmp.lt.u32.totalorder %s8928_s6, %s9368_s11 }
  0xba   : > { %p8931_p1 = pnand %p8930_p8, %p8929_p4  ;;  %p8936_p2 = por %p8935_p0, %p8934_p13 }
  0xbc   : > { %p8932_p3 = pneg %p8931_p1  ;;  %p8938_p9 = por %p8937_p5, %p8936_p2 }
  0xbe   : > { %p8939_p10 = pnand %p8938_p9, %p8932_p3 }
  0xc0   : > { %8942 = shalt.err (!%p8939_p10)
}
  0xc1   : > { %s8943_s9 = scalar_lea.vmem %s9375_s13, 2048  ;;  %s9083_s10 = smov [#allocation2]  }
  0xc2   : > { %p8944_p4 = scmp.ne.s32.totalorder %s9375_s13, %s8943_s9  ;;  %s8948_s2 = sshll.u32 %s9083_s10, 4  ;;  %s8949_s2 = int_to_ptr.vmem [resolvable:$false] %s8948_s2 }
  0xc3   : > { %s8950_s15 = scalar_lea.vmem %s8949_s2, 4096  ;;  %p8951_p6 = scmp.lt.s32.totalorder %s9375_s13, %s8949_s2 }
  0xc4   : > { %p8946_p1 = pnand %p8944_p4, %p8930_p8  ;;  %p8952_p13 = scmp.lt.s32.totalorder %s8950_s15, %s8943_s9 }
  0xc6   : > { %p8947_p11 = pneg %p8946_p1  ;;  %p8953_p0 = por %p8952_p13, %p8951_p6 }
  0xc8   : > { %p8954_p2 = pnand %p8953_p0, %p8947_p11 }
  0xca   : > { %8957 = shalt.err (!%p8954_p2)
}
  0xcb   : > { %s12660_s6 = smov 8   ;;  %s12661_s12 = smov 128  }
  0xcc   : > { %7815 = dma.hbm_to_vmem [thread:$0]  (!%p9371_p12), %s9368_s11, 2048, %s9375_s13, %s9382_s4, %s12661_s12, %s12661_s12, %s12660_s6  }
  0xcd   : > { %s492_s24 = scalar_lea.vmem [#allocation5], %s9362_s22  ;;  %s488_s25 = sand.u32 1, %s9070_s16  }
  0xce   : > { %s499_s26 = sshll.u32 %s492_s24, 4  ;;  %s9417_s23 = scalar_lea.sflag [#allocation6], %s488_s25  ;;  %s9415_s26 = int_to_ptr.vmem [resolvable:$true] %s499_s26 }
  0xcf   : > { %s8958_s9 = scalar_lea.hbm %s9380_s28, 2048  ;;  %s8963_s15 = scalar_lea.hbm %s12487_s1, 4096 }
  0xd0   : > { %p8959_p6 = scmp.ne.s32.totalorder %s9380_s28, %s8958_s9  ;;  %p8964_p5 = scmp.lt.u32.totalorder %s9380_s28, %s12487_s1 }
  0xd1   : > { %p8965_p9 = scmp.lt.u32.totalorder %s8963_s15, %s8958_s9  ;;  %p8967_p4 = scmp.lt.u32.totalorder %s8958_s9, %s9380_s28 }
  0xd2   : > { %p8961_p11 = pnand %p8959_p6, %p8930_p8 }
  0xd3   : > { %p8966_p10 = por %p8965_p9, %p8964_p5 }
  0xd4   : > { %p8962_p3 = pneg %p8961_p11 }
  0xd5   : > { %p8968_p1 = por %p8967_p4, %p8966_p10 }
  0xd7   : > { %p8969_p13 = pnand %p8968_p1, %p8962_p3 }
  0xd9   : > { %8972 = shalt.err (!%p8969_p13)
}
  0xda   : > { %s8973_s22 = scalar_lea.vmem %s9415_s26, 2048  ;;  %s9084_s11 = smov [#allocation5]  }
  0xdb   : > { %p8974_p0 = scmp.ne.s32.totalorder %s9415_s26, %s8973_s22  ;;  %s8978_s13 = sshll.u32 %s9084_s11, 4  ;;  %s8979_s13 = int_to_ptr.vmem [resolvable:$false] %s8978_s13 }
  0xdc   : > { %s8980_s0 = scalar_lea.vmem %s8979_s13, 4096  ;;  %p8981_p11 = scmp.lt.s32.totalorder %s9415_s26, %s8979_s13 }
  0xdd   : > { %p8976_p2 = pnand %p8974_p0, %p8930_p8  ;;  %p8982_p5 = scmp.lt.s32.totalorder %s8980_s0, %s8973_s22 }
  0xdf   : > { %p8977_p6 = pneg %p8976_p2  ;;  %p8983_p9 = por %p8982_p5, %p8981_p11 }
  0xe1   : > { %p8984_p10 = pnand %p8983_p9, %p8977_p6 }
  0xe3   : > { %8987 = shalt.err (!%p8984_p10)
}
  0xe4   : > { %7818 = dma.hbm_to_vmem [thread:$0]  (!%p9371_p12), %s9380_s28, 2048, %s9415_s26, %s9417_s23, %s12661_s12, %s12661_s12, %s12660_s6  }
  0xe5   : > { %p12662_p8 = scmp.ne.s32.totalorder %s12644_s20, 0 }
  0xe7   : > { %511 = sbr.rel (%p12662_p8) target bundleno = 4751 (0x128f), region = 76 }
  0xee   : > { %s9449_s21 = sand.u32 1, %s9062_s30  }
  0xef   : > { %s9452_s4 = sshll.u32 %s9449_s21, 7  ;;  %s514_s17 = scalar_lea.sflag [#allocation3], %s9449_s21 }
  0xf0   : > { %s9456_s24 = scalar_lea.vmem [#allocation2], %s9452_s4 }
  0xf1   : > { %9033 = dma.done.wait (%p9348_p7), %s514_s17, 2048  }
  0xf2   : > { %9035 = vsyncadd (%p9348_p7), %s514_s17, 4294965248  ;;  %s522_s20 = sand.u32 1, %s9188_s19   ;;  %s9464_s6 = scalar_lea.vmem [#allocation5], %s9452_s4 }
  0xf3   : > { %s523_s28 = scalar_lea.sflag [#allocation6], %s522_s20 }
  0xf4   : > { %9037 = dma.done.wait (%p9348_p7), %s523_s28, 2048  }
  0xf5   : > { %9039 = vsyncadd (%p9348_p7), %s523_s28, 4294965248  ;;  %p12663_p12 = scmp.eq.s32.totalorder %s9188_s19, 0 }
  0xf7   : > { %9041 = dma.done.wait (%p12663_p12), [#allocation6], 16   ;;  %p12664_p3 = pmov %p12663_p12 }
  0xf9   : > { %9043 = vsyncadd (%p12664_p3), [#allocation6], 4294967280  ;;  %p12665_p4 = pmov %p12664_p3 }
  0xfa   : > { %p12666_p1 = pmov %p12664_p3 }
  0xfb   : > { %9045 = dma.done.wait (%p12665_p4), [#allocation9], 8192  }
  0xfc   : > { %9047 = vsyncadd (%p12666_p1), [#allocation9], 4294959104  ;;  %p12667_p13 = pmov %p12666_p1 }
  0xfd   : > { %p12668_p0 = pmov %p12666_p1 }
  0xfe   : > { %9049 = dma.done.wait (%p12667_p13), [#allocation12], 16384  }
  0xff   : > { %9051 = vsyncadd (%p12668_p0), [#allocation12], 4294950912  ;;  %v596_v0 = vld [vmem:[%s9456_s24] sm:$0xff]  ;;  %v598_v1 = vld [vmem:[%s9456_s24 + $0x10] sm:$0xff]  ;;  %s9086_s23 = smov 96   ;;  %s9087_s9 = smov 64  }
 0x100   : > { %614 = vadd.xlane.f32.xlu0 %v596_v0  ;;  %618 = vadd.xlane.f32.xlu1 %v598_v1  ;;  %v597_v2 = vld [vmem:[%s9456_s24 + $0x8] sm:$0xff]  ;;  %v599_v3 = vld [vmem:[%s9456_s24 + $0x18] sm:$0xff]  ;;  %v600_v4 = vld [vmem:[%s9456_s24 + $0x20] sm:$0xff]  ;;  %s9088_s10 = smov 32   ;;  %s12851_s17 = sld [smem:[#allocation79_spill]] }
 0x101   : > { %v601_v5 = vld [vmem:[%s9456_s24 + $0x28] sm:$0xff]  ;;  %v602_v6 = vld [vmem:[%s9456_s24 + $0x30] sm:$0xff]  ;;  %v603_v7 = vld [vmem:[%s9456_s24 + $0x38] sm:$0xff]  ;;  %s12860_s28 = sld [smem:[#allocation81_spill]]  ;;  %s12925_s12 = sld [smem:[#allocation83_spill]] }
 0x102   : > { %v604_v8 = vld [vmem:[%s9456_s24 + $0x40] sm:$0xff]  ;;  %v605_v9 = vld [vmem:[%s9456_s24 + $0x48] sm:$0xff]  ;;  %v9493_v10 = vld [vmem:[%s9456_s24 + $0x50] sm:$0xff]  ;;  %s12387_s26 = scalar_lea.vmem [#allocation14], %s9452_s4  ;;  %s6169_s4 = sshll.u32 %s9188_s19, 11 }
 0x103   : > { %v9496_v11 = vld [vmem:[%s9456_s24 + $0x58] sm:$0xff]  ;;  %v9501_v12 = vld [vmem:[%s9456_s24 + $0x60] sm:$0xff]  ;;  %v9504_v13 = vld [vmem:[%s9456_s24 + $0x68] sm:$0xff]  ;;  %s5862_s25 = sshll.u32 %s12387_s26, 4  ;;  %s5849_s15 = scalar_lea.sflag [#allocation4], %s9449_s21  ;;  %s12440_s25 = int_to_ptr.vmem [resolvable:$true] %s5862_s25 }
 0x104   : > { %616 = vadd.xlane.f32.xlu0 %v597_v2  ;;  %620 = vadd.xlane.f32.xlu1 %v599_v3  ;;  %v9509_v14 = vld [vmem:[%s9456_s24 + $0x70] sm:$0xff]  ;;  %v9512_v15 = vld [vmem:[%s9456_s24 + $0x78] sm:$0xff]  ;;  %v951_v57 = vld [vmem:[#allocation8 + $0x20] sm:$0xff]  ;;  %s8988_s22 = scalar_lea.vmem %s12440_s25, 2048  ;;  %p12943_p2 = scmp.ne.s32.totalorder %s12656_s27, 0 }
 0x105   : > { %v948_v56 = vld [vmem:[#allocation8 + $0x8] sm:$0xff]  ;;  %v947_v61 = vld [vmem:[#allocation8] sm:$0xff]  ;;  %v950_v62 = vld [vmem:[#allocation8 + $0x18] sm:$0xff]  ;;  %p8989_p7 = scmp.ne.s32.totalorder %s12440_s25, %s8988_s22  ;;  %s9089_s19 = smov [#allocation14]  }
 0x106   : > { %v7210_v63 = vpack.c.bf16 %v951_v57, %v948_v56  ;;  %v965_v56 = vld [vmem:[#allocation8 + $0x90] sm:$0xff]  ;;  %s8992_s11 = sshll.u32 %s9089_s19, 4  ;;  %s8993_s11 = int_to_ptr.vmem [resolvable:$false] %s8992_s11 }
 0x107   : > { %p8990_p6 = pnand %p8989_p7, %p12943_p2  ;;  %s8994_s13 = scalar_lea.vmem %s8993_s11, 4096 }
 0x108   : > { %622 = vadd.xlane.f32.xlu0 %v600_v4  ;;  %624 = vadd.xlane.f32.xlu1 %v601_v5  ;;  %p8995_p5 = scmp.lt.s32.totalorder %s12440_s25, %s8993_s11  ;;  %p8996_p9 = scmp.lt.s32.totalorder %s8994_s13, %s8988_s22 }
 0x109   : > { %7211 = vmatprep.subr.bf16.mxu0 %v7210_v63  ;;  %v970_v63 = vld [vmem:[#allocation8 + $0xb8] sm:$0xff]  ;;  %p8991_p11 = pneg %p8990_p6 }
 0x10a   : > { %p8997_p10 = por %p8996_p9, %p8995_p5 }
 0x10c   : > { %626 = vadd.xlane.f32.xlu0 %v602_v6  ;;  %628 = vadd.xlane.f32.xlu1 %v603_v7  ;;  %p8998_p8 = pnand %p8997_p10, %p8991_p11 }
 0x110   : > { %630 = vadd.xlane.f32.xlu0 %v604_v8  ;;  %632 = vadd.xlane.f32.xlu1 %v605_v9 }
 0x114   : > { %634 = vadd.xlane.f32.xlu0 %v9493_v10  ;;  %636 = vadd.xlane.f32.xlu1 %v9496_v11 }
 0x118   : > { %638 = vadd.xlane.f32.xlu0 %v9501_v12  ;;  %640 = vadd.xlane.f32.xlu1 %v9504_v13 }
 0x11c   : > { %642 = vadd.xlane.f32.xlu0 %v9509_v14  ;;  %644 = vadd.xlane.f32.xlu1 %v9512_v15 }
 0x18d   : > { %v615_v16 = vpop.xlane.xlu0 %614  ;;  %v619_v17 = vpop.xlane.xlu1 %618 }
 0x18e   : > { %v647_v18 = vmul.f32 0.0078125, %v615_v16  ;;  %v649_v19 = vmul.f32 0.0078125, %v619_v17  ;;  %v957_v16 = vld [vmem:[#allocation8 + $0x50] sm:$0xff] }
 0x18f   : > { %v949_v17 = vld [vmem:[#allocation8 + $0x10] sm:$0xff] }
 0x190   : > { %v9516_v20 = vsub.f32 %v596_v0, %v647_v18  ;;  %v9518_v21 = vsub.f32 %v598_v1, %v649_v19  ;;  %v7212_v0 = vpack.c.bf16 %v950_v62, %v947_v61  ;;  %v952_v19 = vld [vmem:[#allocation8 + $0x28] sm:$0xff]  ;;  %v967_v61 = vld [vmem:[#allocation8 + $0xa0] sm:$0xff] }
 0x191   : > { %v617_v22 = vpop.xlane.xlu0 %616  ;;  %v621_v23 = vpop.xlane.xlu1 %620 }
 0x192   : > { %v648_v24 = vmul.f32 0.0078125, %v617_v22  ;;  %v679_v25 = vmul.f32 %v9516_v20, %v9516_v20  ;;  %v650_v26 = vmul.f32 0.0078125, %v621_v23  ;;  %v681_v27 = vmul.f32 %v9518_v21, %v9518_v21  ;;  %7213 = vmatpush1.bf16.msra.mxu0 %v7212_v0  ;;  %v953_v22 = vld [vmem:[#allocation8 + $0x30] sm:$0xff]  ;;  %v971_v0 = vld [vmem:[#allocation8 + $0xc0] sm:$0xff] }
 0x194   : > { %695 = vadd.xlane.f32.xlu0 %v679_v25  ;;  %v9524_v28 = vsub.f32 %v597_v2, %v648_v24  ;;  %v9526_v29 = vsub.f32 %v599_v3, %v650_v26  ;;  %v7242_v25 = vpack.c.bf16 %v952_v19, %v949_v17  ;;  %v977_v17 = vld [vmem:[#allocation8 + $0xf0] sm:$0xff] }
 0x195   : > { %v623_v30 = vpop.xlane.xlu0 %622  ;;  %v625_v31 = vpop.xlane.xlu1 %624 }
 0x196   : > { %v651_v32 = vmul.f32 0.0078125, %v623_v30  ;;  %v680_v33 = vmul.f32 %v9524_v28, %v9524_v28  ;;  %v652_v34 = vmul.f32 0.0078125, %v625_v31  ;;  %v682_v35 = vmul.f32 %v9526_v29, %v9526_v29  ;;  %7243 = vmatprep.subr.bf16.mxu1 %v7242_v25 }
 0x197   : > { %7245 = vmatpush3.bf16.msra.mxu1 %v7242_v25  ;;  %v979_v25 = vld [vmem:[#allocation8 + $0x100] sm:$0xff] }
 0x198   : > { %699 = vadd.xlane.f32.xlu0 %v681_v27  ;;  %697 = vadd.xlane.f32.xlu1 %v680_v33  ;;  %v9532_v36 = vsub.f32 %v600_v4, %v651_v32  ;;  %v9534_v37 = vsub.f32 %v601_v5, %v652_v34  ;;  %v960_v34 = vld [vmem:[#allocation8 + $0x68] sm:$0xff] }
 0x199   : > { %v627_v38 = vpop.xlane.xlu0 %626  ;;  %v629_v39 = vpop.xlane.xlu1 %628 }
 0x19a   : > { %v653_v40 = vmul.f32 0.0078125, %v627_v38  ;;  %v683_v41 = vmul.f32 %v9532_v36, %v9532_v36  ;;  %v654_v42 = vmul.f32 0.0078125, %v629_v39  ;;  %v684_v43 = vmul.f32 %v9534_v37, %v9534_v37  ;;  %v955_v38 = vld [vmem:[#allocation8 + $0x40] sm:$0xff]  ;;  %v958_v39 = vld [vmem:[#allocation8 + $0x58] sm:$0xff] }
 0x19c   : > { %701 = vadd.xlane.f32.xlu1 %v682_v35  ;;  %703 = vadd.xlane.f32.xlu0 %v683_v41  ;;  %v9540_v44 = vsub.f32 %v602_v6, %v653_v40  ;;  %v9542_v45 = vsub.f32 %v603_v7, %v654_v42  ;;  %v963_v35 = vld [vmem:[#allocation8 + $0x80] sm:$0xff]  ;;  %v962_v41 = vld [vmem:[#allocation8 + $0x78] sm:$0xff] }
 0x19d   : > { %v631_v46 = vpop.xlane.xlu0 %630  ;;  %v633_v47 = vpop.xlane.xlu1 %632  ;;  %v959_v40 = vld [vmem:[#allocation8 + $0x60] sm:$0xff] }
 0x19e   : > { %v655_v48 = vmul.f32 0.0078125, %v631_v46  ;;  %v685_v49 = vmul.f32 %v9540_v44, %v9540_v44  ;;  %v656_v50 = vmul.f32 0.0078125, %v633_v47  ;;  %v686_v51 = vmul.f32 %v9542_v45, %v9542_v45 }
 0x19f   : > { %v7246_v46 = vpack.c.bf16 %v958_v39, %v955_v38  ;;  %v7220_v47 = vpack.c.bf16 %v962_v41, %v959_v40  ;;  %v985_v38 = vld [vmem:[#allocation8 + $0x130] sm:$0xff]  ;;  %v992_v40 = vld [vmem:[#allocation8 + $0x168] sm:$0xff] }
 0x1a0   : > { %705 = vadd.xlane.f32.xlu1 %v684_v43  ;;  %707 = vadd.xlane.f32.xlu0 %v685_v49  ;;  %v9548_v52 = vsub.f32 %v604_v8, %v655_v48  ;;  %v9550_v53 = vsub.f32 %v605_v9, %v656_v50  ;;  %v954_v9 = vld [vmem:[#allocation8 + $0x38] sm:$0xff]  ;;  %v969_v50 = vld [vmem:[#allocation8 + $0xb0] sm:$0xff] }
 0x1a1   : > { %v635_v54 = vpop.xlane.xlu0 %634  ;;  %v637_v55 = vpop.xlane.xlu1 %636  ;;  %7247 = vmatprep.subr.bf16.mxu1 %v7246_v46  ;;  %v966_v49 = vld [vmem:[#allocation8 + $0x98] sm:$0xff]  ;;  %v989_v39 = vld [vmem:[#allocation8 + $0x150] sm:$0xff] }
 0x1a2   : > { %v657_v58 = vmul.f32 0.0078125, %v635_v54  ;;  %v687_v59 = vmul.f32 %v9548_v52, %v9548_v52  ;;  %v658_v60 = vmul.f32 0.0078125, %v637_v55  ;;  %v688_v1 = vmul.f32 %v9550_v53, %v9550_v53  ;;  %7249 = vmatpush3.bf16.msra.mxu1 %v7246_v46  ;;  %v964_v55 = vld [vmem:[#allocation8 + $0x88] sm:$0xff] }
 0x1a3   : > { %v7222_v54 = vpack.c.bf16 %v969_v50, %v966_v49  ;;  %v7240_v46 = vpack.c.bf16 %v992_v40, %v989_v39  ;;  %v994_v49 = vld [vmem:[#allocation8 + $0x178] sm:$0xff] }
 0x1a4   : > { %709 = vadd.xlane.f32.xlu1 %v686_v51  ;;  %711 = vadd.xlane.f32.xlu0 %v687_v59  ;;  %v9557_v2 = vsub.f32 %v9493_v10, %v657_v58  ;;  %v9560_v3 = vsub.f32 %v9496_v11, %v658_v60  ;;  %v7214_v10 = vpack.c.bf16 %v957_v16, %v954_v9  ;;  %v956_v11 = vld [vmem:[#allocation8 + $0x48] sm:$0xff]  ;;  %v961_v51 = vld [vmem:[#allocation8 + $0x70] sm:$0xff]  ;;  %v975_v60 = vld [vmem:[#allocation8 + $0xe0] sm:$0xff] }
 0x1a5   : > { %v639_v4 = vpop.xlane.xlu0 %638  ;;  %v641_v5 = vpop.xlane.xlu1 %640  ;;  %v7216_v30 = vpack.c.bf16 %v956_v11, %v953_v22  ;;  %v7250_v57 = vpack.c.bf16 %v964_v55, %v961_v51  ;;  %v972_v59 = vld [vmem:[#allocation8 + $0xc8] sm:$0xff]  ;;  %v987_v11 = vld [vmem:[#allocation8 + $0x140] sm:$0xff] }
 0x1a6   : > { %v659_v6 = vmul.f32 0.0078125, %v639_v4  ;;  %v689_v7 = vmul.f32 %v9557_v2, %v9557_v2  ;;  %v660_v8 = vmul.f32 0.0078125, %v641_v5  ;;  %v690_v18 = vmul.f32 %v9560_v3, %v9560_v3  ;;  %7215 = vmatprep.subr.bf16.mxu0 %v7214_v10  ;;  %v976_v16 = vld [vmem:[#allocation8 + $0xe8] sm:$0xff] }
 0x1a7   : > { %7217 = vmatpush1.bf16.msra.mxu0 %v7216_v30  ;;  %7251 = vmatprep.subr.bf16.mxu1 %v7250_v57  ;;  %v7226_v62 = vpack.c.bf16 %v975_v60, %v972_v59  ;;  %v7254_v4 = vpack.c.bf16 %v970_v63, %v967_v61  ;;  %v984_v22 = vld [vmem:[#allocation8 + $0x128] sm:$0xff]  ;;  %v983_v30 = vld [vmem:[#allocation8 + $0x120] sm:$0xff]  ;;  %v9597_v61 = vld [vmem:[#allocation7] ss:$0 sm:$0xff] }
 0x1a8   : > { %713 = vadd.xlane.f32.xlu1 %v688_v1  ;;  %715 = vadd.xlane.f32.xlu0 %v689_v7  ;;  %v9567_v23 = vsub.f32 %v9501_v12, %v659_v6  ;;  %v9570_v24 = vsub.f32 %v9504_v13, %v660_v8  ;;  %v7218_v13 = vpack.c.bf16 %v963_v35, %v960_v34  ;;  %v974_v1 = vld [vmem:[#allocation8 + $0xd8] sm:$0xff]  ;;  %v981_v7 = vld [vmem:[#allocation8 + $0x110] sm:$0xff] }
 0x1a9   : > { %v643_v26 = vpop.xlane.xlu0 %642  ;;  %v645_v27 = vpop.xlane.xlu1 %644  ;;  %7253 = vmatpush3.bf16.msra.mxu1 %v7250_v57  ;;  %v7228_v5 = vpack.c.bf16 %v974_v1, %v971_v0  ;;  %v978_v6 = vld [vmem:[#allocation8 + $0xf8] sm:$0xff]  ;;  %v973_v8 = vld [vmem:[#allocation8 + $0xd0] sm:$0xff] }
 0x1aa   : > { %v661_v31 = vmul.f32 0.0078125, %v643_v26  ;;  %v691_v32 = vmul.f32 %v9567_v23, %v9567_v23  ;;  %v662_v33 = vmul.f32 0.0078125, %v645_v27  ;;  %v692_v12 = vmul.f32 %v9570_v24, %v9570_v24  ;;  %7219 = vmatprep.subr.bf16.mxu0 %v7218_v13  ;;  %7255 = vmatprep.subr.bf16.mxu1 %v7254_v4  ;;  %v982_v27 = vld [vmem:[#allocation8 + $0x118] sm:$0xff]  ;;  %v993_v35 = vld [vmem:[#allocation8 + $0x170] sm:$0xff]  ;;  %v988_v13 = vld [vmem:[#allocation8 + $0x148] sm:$0xff] }
 0x1ab   : > { %7221 = vmatpush1.bf16.msra.mxu0 %v7220_v47  ;;  %v7230_v9 = vpack.c.bf16 %v981_v7, %v978_v6  ;;  %v7258_v10 = vpack.c.bf16 %v976_v16, %v973_v8  ;;  %v7234_v26 = vpack.c.bf16 %v987_v11, %v984_v22  ;;  %v990_v34 = vld [vmem:[#allocation8 + $0x158] sm:$0xff]  ;;  %v7266_v41 = vpack.c.bf16 %v988_v13, %v985_v38 }
 0x1ac   : > { %717 = vadd.xlane.f32.xlu1 %v690_v18  ;;  %719 = vadd.xlane.f32.xlu0 %v691_v32  ;;  %v9577_v42 = vsub.f32 %v9509_v14, %v661_v31  ;;  %v9580_v43 = vsub.f32 %v9512_v15, %v662_v33  ;;  %v968_v14 = vld [vmem:[#allocation8 + $0xa8] sm:$0xff]  ;;  %v986_v31 = vld [vmem:[#allocation8 + $0x138] sm:$0xff]  ;;  %v7262_v32 = vpack.c.bf16 %v982_v27, %v979_v25  ;;  %v12515_v47 = vmov 0.0  }
 0x1ad   : > { %v7224_v58 = vpack.c.bf16 %v968_v14, %v965_v56  ;;  %7223 = vmatprep.subr.bf16.mxu0 %v7222_v54  ;;  %7257 = vmatpush3.bf16.msra.mxu1 %v7254_v4  ;;  %v980_v18 = vld [vmem:[#allocation8 + $0x108] sm:$0xff]  ;;  %v7236_v33 = vpack.c.bf16 %v986_v31, %v983_v30  ;;  %v9611_v7 = vmul.f32 %v9597_v61, %v9518_v21 }
 0x1ae   : > { %v693_v48 = vmul.f32 %v9577_v42, %v9577_v42  ;;  %v694_v15 = vmul.f32 %v9580_v43, %v9580_v43  ;;  %v7232_v19 = vpack.c.bf16 %v980_v18, %v977_v17  ;;  %7259 = vmatprep.subr.bf16.mxu1 %v7258_v10  ;;  %1076 = vmatprep.mubr.f32.mxu0 %v12515_v47 }
 0x1af   : > { %7225 = vmatpush1.bf16.msra.mxu0 %v7224_v58 }
 0x1b0   : > { %721 = vadd.xlane.f32.xlu1 %v692_v12  ;;  %723 = vadd.xlane.f32.xlu0 %v693_v48  ;;  %v7238_v12 = vpack.c.bf16 %v993_v35, %v990_v34  ;;  %v991_v48 = vld [vmem:[#allocation8 + $0x160] sm:$0xff] }
 0x1b1   : > { %7227 = vmatprep.subr.bf16.mxu0 %v7226_v62  ;;  %7261 = vmatpush3.bf16.msra.mxu1 %v7258_v10  ;;  %v7270_v50 = vpack.c.bf16 %v994_v49, %v991_v48 }
 0x1b2   : > { %7263 = vmatprep.subr.bf16.mxu1 %v7262_v32 }
 0x1b3   : > { %7229 = vmatpush1.bf16.msra.mxu0 %v7228_v5  ;;  %v9607_v5 = vmul.f32 %v9597_v61, %v9516_v20 }
 0x1b4   : > { %725 = vadd.xlane.f32.xlu1 %v694_v15  ;;  %7231 = vmatprep.subr.bf16.mxu0 %v7230_v9  ;;  %v9616_v9 = vmul.f32 %v9597_v61, %v9524_v28 }
 0x1b5   : > { %7265 = vmatpush3.bf16.msra.mxu1 %v7262_v32 }
 0x1b6   : > { %7267 = vmatprep.subr.bf16.mxu1 %v7266_v41 }
 0x1b7   : > { %7233 = vmatpush1.bf16.msra.mxu0 %v7232_v19 }
 0x1b8   : > { %7235 = vmatprep.subr.bf16.mxu0 %v7234_v26 }
 0x1b9   : > { %7269 = vmatpush3.bf16.msra.mxu1 %v7266_v41 }
 0x1ba   : > { %7271 = vmatprep.subr.bf16.mxu1 %v7270_v50 }
 0x1bb   : > { %7237 = vmatpush1.bf16.msra.mxu0 %v7236_v33 }
 0x1bc   : > { %7239 = vmatprep.subr.bf16.mxu0 %v7238_v12 }
 0x1bd   : > { %7273 = vmatpush3.bf16.msra.mxu1 %v7270_v50 }
 0x1bf   : > { %7241 = vmatpush1.bf16.msra.mxu0 %v7240_v46 }
 0x221   : > { %v696_v51 = vpop.xlane.xlu0 %695 }
 0x222   : > { %v727_v54 = vmul.f32 0.007874016, %v696_v51 }
 0x224   : > { %8244 = vrsqrt.f32 %v727_v54  ;;  %vm745_vm0 = vcmp.eq.f32.partialorder %v727_v54, inf  ;;  %v748_v8 = vand.u32 2147483648, %v727_v54  ;;  %vm747_vm1 = vcmp.eq.f32.partialorder %v727_v54, 0.0 }
 0x225   : > { %v698_v55 = vpop.xlane.xlu1 %697  ;;  %v700_v56 = vpop.xlane.xlu0 %699 }
 0x226   : > { %v9587_v14 = vmul.f32 0.007874016, %v698_v55  ;;  %v9589_v15 = vmul.f32 0.007874016, %v700_v56 }
 0x228   : > { %8246 = vrsqrt.f32 %v9587_v14  ;;  %vm752_vm2 = vcmp.eq.f32.partialorder %v9587_v14, inf  ;;  %vm754_vm3 = vcmp.eq.f32.partialorder %v9587_v14, 0.0  ;;  %v755_v28 = vand.u32 2147483648, %v9587_v14 }
 0x229   : > { %8248 = vrsqrt.f32 %v9589_v15  ;;  %v702_v57 = vpop.xlane.xlu1 %701  ;;  %v704_v58 = vpop.xlane.xlu0 %703  ;;  %vm759_vm4 = vcmp.eq.f32.partialorder %v9589_v15, inf  ;;  %vm761_vm5 = vcmp.eq.f32.partialorder %v9589_v15, 0.0  ;;  %v762_v26 = vand.u32 2147483648, %v9589_v15 }
 0x22a   : > { %v9593_v59 = vmul.f32 0.007874016, %v702_v57  ;;  %v9595_v60 = vmul.f32 0.007874016, %v704_v58 }
 0x22c   : > { %8250 = vrsqrt.f32 %v9593_v59  ;;  %vm766_vm6 = vcmp.eq.f32.partialorder %v9593_v59, inf  ;;  %v769_v34 = vand.u32 2147483648, %v9593_v59  ;;  %vm773_vm7 = vcmp.eq.f32.partialorder %v9595_v60, inf }
 0x22d   : > { %8252 = vrsqrt.f32 %v9595_v60  ;;  %v706_v62 = vpop.xlane.xlu1 %705  ;;  %v708_v63 = vpop.xlane.xlu0 %707  ;;  %v776_v35 = vand.u32 2147483648, %v9595_v60  ;;  %vm768_vm11 = vcmp.eq.f32.partialorder %v9593_v59, 0.0  ;;  %vm775_vm15 = vcmp.eq.f32.partialorder %v9595_v60, 0.0 }
 0x22e   : > { %v8245_v0 = vpop.eup %8244  ;;  %v9601_v1 = vmul.f32 0.007874016, %v706_v62  ;;  %v9603_v4 = vmul.f32 0.007874016, %v708_v63 }
 0x22f   : > { %v744_v6 = vmul.f32 %v8245_v0, %v727_v54 }
 0x230   : > { %8254 = vrsqrt.f32 %v9601_v1  ;;  %vm780_vm8 = vcmp.eq.f32.partialorder %v9601_v1, inf  ;;  %v783_v13 = vand.u32 2147483648, %v9601_v1  ;;  %vm787_vm9 = vcmp.eq.f32.partialorder %v9603_v4, inf }
 0x231   : > { %v746_v16 = vsel %vm745_vm0, %v727_v54, %v744_v6  ;;  %8256 = vrsqrt.f32 %v9603_v4  ;;  %v710_v17 = vpop.xlane.xlu1 %709  ;;  %v712_v20 = vpop.xlane.xlu0 %711  ;;  %v790_v48 = vand.u32 2147483648, %v9603_v4  ;;  %vm789_vm13 = vcmp.eq.f32.partialorder %v9603_v4, 0.0 }
 0x232   : > { %v8247_v18 = vpop.eup %8246  ;;  %v9620_v10 = vmul.f32 0.007874016, %v710_v17  ;;  %v9622_v21 = vmul.f32 0.007874016, %v712_v20  ;;  %v749_v19 = vsel %vm747_vm1, %v748_v8, %v746_v16  ;;  %vm782_vm0 = vcmp.eq.f32.partialorder %v9601_v1, 0.0 }
 0x233   : > { %v8249_v22 = vpop.eup %8248  ;;  %v751_v11 = vmul.f32 %v8247_v18, %v9587_v14  ;;  %v877_v25 = vadd.f32 1e-06, %v749_v19 }
 0x234   : > { %8258 = vrsqrt.f32 %v9620_v10  ;;  %v758_v30 = vmul.f32 %v8249_v22, %v9589_v15  ;;  %vm794_vm10 = vcmp.eq.f32.partialorder %v9620_v10, inf  ;;  %v797_v55 = vand.u32 2147483648, %v9620_v10 }
 0x235   : > { %v753_v27 = vsel %vm752_vm2, %v9587_v14, %v751_v11  ;;  %8260 = vrsqrt.f32 %v9622_v21  ;;  %v714_v31 = vpop.xlane.xlu1 %713  ;;  %v716_v32 = vpop.xlane.xlu0 %715  ;;  %vm801_vm12 = vcmp.eq.f32.partialorder %v9622_v21, inf  ;;  %v804_v57 = vand.u32 2147483648, %v9622_v21 }
 0x236   : > { %v8251_v33 = vpop.eup %8250  ;;  %v9638_v38 = vmul.f32 0.007874016, %v714_v31  ;;  %v9642_v39 = vmul.f32 0.007874016, %v716_v32  ;;  %8262 = vrcp.f32 %v877_v25  ;;  %v756_v41 = vsel %vm754_vm3, %v755_v28, %v753_v27 }
 0x237   : > { %v8253_v12 = vpop.eup %8252  ;;  %v765_v40 = vmul.f32 %v8251_v33, %v9593_v59  ;;  %v760_v46 = vsel %vm759_vm4, %v9589_v15, %v758_v30  ;;  %v878_v62 = vadd.f32 1e-06, %v756_v41  ;;  %vm796_vm1 = vcmp.eq.f32.partialorder %v9620_v10, 0.0 }
 0x238   : > { %8264 = vrsqrt.f32 %v9638_v38  ;;  %v772_v54 = vmul.f32 %v8253_v12, %v9595_v60  ;;  %vm808_vm14 = vcmp.eq.f32.partialorder %v9638_v38, inf  ;;  %v763_v6 = vsel %vm761_vm5, %v762_v26, %v760_v46 }
 0x239   : > { %8266 = vrsqrt.f32 %v9642_v39  ;;  %v718_v49 = vpop.xlane.xlu1 %717  ;;  %v720_v50 = vpop.xlane.xlu0 %719  ;;  %v767_v63 = vsel %vm766_vm6, %v9593_v59, %v765_v40  ;;  %vm803_vm2 = vcmp.eq.f32.partialorder %v9622_v21, 0.0  ;;  %v811_v16 = vand.u32 2147483648, %v9638_v38 }
 0x23a   : > { %v8255_v51 = vpop.eup %8254  ;;  %v9659_v56 = vmul.f32 0.007874016, %v718_v49  ;;  %v9664_v58 = vmul.f32 0.007874016, %v720_v50  ;;  %vm815_vm3 = vcmp.eq.f32.partialorder %v9642_v39, inf  ;;  %v774_v18 = vsel %vm773_vm7, %v9595_v60, %v772_v54 }
 0x23b   : > { %v8257_v14 = vpop.eup %8256  ;;  %v779_v0 = vmul.f32 %v8255_v51, %v9601_v1  ;;  %v818_v19 = vand.u32 2147483648, %v9642_v39  ;;  %v879_v26 = vadd.f32 1e-06, %v763_v6  ;;  %v9717_v51 = vld [vmem:[%s12489_s3] ss:$0 sm:$0xff] }
 0x23c   : > { %8268 = vrsqrt.f32 %v9659_v56  ;;  %v786_v8 = vmul.f32 %v8257_v14, %v9603_v4  ;;  %vm822_vm4 = vcmp.eq.f32.partialorder %v9659_v56, inf  ;;  %v825_v31 = vand.u32 2147483648, %v9659_v56 }
 0x23d   : > { %8270 = vrsqrt.f32 %v9664_v58  ;;  %v722_v17 = vpop.xlane.xlu1 %721  ;;  %v724_v20 = vpop.xlane.xlu0 %723  ;;  %v781_v27 = vsel %vm780_vm8, %v9601_v1, %v779_v0  ;;  %vm829_vm7 = vcmp.eq.f32.partialorder %v9664_v58, inf  ;;  %v832_v12 = vand.u32 2147483648, %v9664_v58 }
 0x23e   : > { %v8259_v15 = vpop.eup %8258  ;;  %v9686_v22 = vmul.f32 0.007874016, %v722_v17  ;;  %v9690_v25 = vmul.f32 0.007874016, %v724_v20  ;;  %8272 = vrcp.f32 %v878_v62  ;;  %v788_v33 = vsel %vm787_vm9, %v9603_v4, %v786_v8 }
 0x23f   : > { %v8261_v11 = vpop.eup %8260  ;;  %v793_v28 = vmul.f32 %v8259_v15, %v9620_v10  ;;  %vm824_vm8 = vcmp.eq.f32.partialorder %v9659_v56, 0.0  ;;  %vm831_vm6 = vcmp.eq.f32.partialorder %v9664_v58, 0.0  ;;  %v770_v0 = vsel %vm768_vm11, %v769_v34, %v767_v63 }
 0x240   : > { %v800_v30 = vmul.f32 %v8261_v11, %v9622_v21  ;;  %8274 = vrsqrt.f32 %v9686_v22  ;;  %v8263_v32 = vpop.eup %8262  ;;  %vm836_vm5 = vcmp.eq.f32.partialorder %v9686_v22, inf  ;;  %v839_v49 = vand.u32 2147483648, %v9686_v22 }
 0x241   : > { %8276 = vrsqrt.f32 %v9690_v25  ;;  %v726_v40 = vpop.xlane.xlu1 %725  ;;  %v795_v46 = vsel %vm794_vm10, %v9620_v10, %v793_v28  ;;  %v909_v62 = vmul.f32 %v8263_v32, %v9607_v5  ;;  %vm838_vm10 = vcmp.eq.f32.partialorder %v9686_v22, 0.0 }
 0x242   : > { %v8265_v41 = vpop.eup %8264  ;;  %v9712_v50 = vmul.f32 0.007874016, %v726_v40  ;;  %8278 = vrcp.f32 %v879_v26  ;;  %v802_v6 = vsel %vm801_vm12, %v9622_v21, %v800_v30  ;;  %v846_v17 = vand.u32 2147483648, %v9690_v25 }
 0x243   : > { %v8267_v54 = vpop.eup %8266  ;;  %v807_v14 = vmul.f32 %v8265_v41, %v9638_v38  ;;  %vm845_vm9 = vcmp.eq.f32.partialorder %v9690_v25, 0.0  ;;  %v931_v34 = vadd.f32 %v9717_v51, %v909_v62  ;;  %v880_v63 = vadd.f32 1e-06, %v770_v0 }
 0x244   : > { %v814_v8 = vmul.f32 %v8267_v54, %v9642_v39  ;;  %8280 = vrsqrt.f32 %v9712_v50  ;;  %v853_v59 = vand.u32 2147483648, %v9712_v50  ;;  %vm850_vm11 = vcmp.eq.f32.partialorder %v9712_v50, inf }
 0x245   : > { %v809_v5 = vsel %vm808_vm14, %v9638_v38, %v807_v14  ;;  %v777_v11 = vsel %vm775_vm15, %v776_v35, %v774_v18  ;;  %v784_v28 = vsel %vm782_vm0, %v783_v13, %v781_v27  ;;  %v791_v26 = vsel %vm789_vm13, %v790_v48, %v788_v33  ;;  %1077 = vmatmul.mubr.f32.vlgmr.msra.gmra.mrb[0].mxu0 %v931_v34 }
 0x246   : > { %v8269_v20 = vpop.eup %8268  ;;  %v816_v15 = vsel %vm815_vm3, %v9642_v39, %v814_v8  ;;  %vm852_vm12 = vcmp.eq.f32.partialorder %v9712_v50, 0.0  ;;  %6682 = vmatprep.mubr.f32.mxu1 %v931_v34  ;;  %8282 = vrcp.f32 %v880_v63  ;;  %v881_v60 = vadd.f32 1e-06, %v777_v11  ;;  %1082 = vmatprep.mubr.f32.mxu0 %v12515_v47 }
 0x247   : > { %v8271_v30 = vpop.eup %8270  ;;  %v821_v32 = vmul.f32 %v8269_v20, %v9659_v56  ;;  %v882_v35 = vadd.f32 1e-06, %v784_v28  ;;  %v883_v1 = vadd.f32 1e-06, %v791_v26  ;;  %v798_v4 = vsel %vm796_vm1, %v797_v55, %v795_v46 }
 0x248   : > { %v828_v18 = vmul.f32 %v8271_v30, %v9664_v58  ;;  %v805_v13 = vsel %vm803_vm2, %v804_v57, %v802_v6  ;;  %v8273_v48 = vpop.eup %8272  ;;  %8284 = vrcp.f32 %v881_v60  ;;  %v884_v33 = vadd.f32 1e-06, %v798_v4 }
 0x249   : > { %v823_v27 = vsel %vm822_vm4, %v9659_v56, %v821_v32  ;;  %v885_v40 = vadd.f32 1e-06, %v805_v13  ;;  %v910_v10 = vmul.f32 %v8273_v48, %v9616_v9  ;;  %8286 = vrcp.f32 %v882_v35 }
 0x24a   : > { %v8275_v41 = vpop.eup %8274  ;;  %v830_v54 = vsel %vm829_vm7, %v9664_v58, %v828_v18  ;;  %vm12669_vm13 = vcmp.eq.f32.partialorder %v9638_v38, 0.0  ;;  %8288 = vrcp.f32 %v883_v1  ;;  %vm12670_vm14 = vcmp.eq.f32.partialorder %v9642_v39, 0.0 }
 0x24b   : > { %v812_v21 = vsel %vm12669_vm13, %v811_v16, %v809_v5  ;;  %v8277_v55 = vpop.eup %8276  ;;  %v835_v57 = vmul.f32 %v8275_v41, %v9686_v22  ;;  %v819_v14 = vsel %vm12670_vm14, %v818_v19, %v816_v15  ;;  %v932_v9 = vadd.f32 %v9717_v51, %v910_v10 }
 0x24c   : > { %v886_v46 = vadd.f32 1e-06, %v812_v21  ;;  %v842_v62 = vmul.f32 %v8277_v55, %v9690_v25  ;;  %8290 = vrcp.f32 %v884_v33  ;;  %v887_v0 = vadd.f32 1e-06, %v819_v14  ;;  %v8279_v6 = vpop.eup %8278 }
 0x24d   : > { %v837_v38 = vsel %vm836_vm5, %v9686_v22, %v835_v57  ;;  %8292 = vrcp.f32 %v885_v40  ;;  %v826_v16 = vsel %vm824_vm8, %v825_v31, %v823_v27  ;;  %v833_v39 = vsel %vm831_vm6, %v832_v12, %v830_v54  ;;  %1083 = vmatmul.mubr.f32.gmra.mrb[2].mxu0 %v932_v9  ;;  %6683 = vmatmul.mubr.f32.vlgmr.msra.gmra.mrb[0].mxu1 %v932_v9 }
 0x24e   : > { %v8281_v19 = vpop.eup %8280  ;;  %vm12671_vm15 = vcmp.eq.f32.partialorder %v9690_v25, inf  ;;  %v911_v5 = vmul.f32 %v8279_v6, %v9611_v7  ;;  %8294 = vrcp.f32 %v886_v46  ;;  %v888_v34 = vadd.f32 1e-06, %v826_v16  ;;  %1088 = vmatprep.mubr.f32.mxu0 %v12515_v47 }
 0x24f   : > { %v844_v8 = vsel %vm12671_vm15, %v9690_v25, %v842_v62  ;;  %v849_v63 = vmul.f32 %v8281_v19, %v9712_v50  ;;  %8296 = vrcp.f32 %v887_v0  ;;  %v889_v56 = vadd.f32 1e-06, %v833_v39 }
 0x250   : > { %v840_v58 = vsel %vm838_vm10, %v839_v49, %v837_v38  ;;  %v864_v31 = vmul.f32 %v9597_v61, %v9526_v29  ;;  %v933_v12 = vadd.f32 %v9717_v51, %v911_v5  ;;  %v847_v7 = vsel %vm845_vm9, %v846_v17, %v844_v8  ;;  %v8283_v20 = vpop.eup %8282 }
 0x251   : > { %v865_v15 = vmul.f32 %v9597_v61, %v9532_v36  ;;  %v851_v11 = vsel %vm850_vm11, %v9712_v50, %v849_v63  ;;  %8298 = vrcp.f32 %v888_v34  ;;  %v890_v22 = vadd.f32 1e-06, %v840_v58  ;;  %v995_v58 = vld [vmem:[%s12491_s5] sm:$0x7] }
 0x252   : > { %6685 = vmatprep.mubr.f32.mxu1 %v933_v12  ;;  %1089 = vmatmul.mubr.f32.gmra.mrb[4].mxu0 %v933_v12  ;;  %v912_v29 = vmul.f32 %v8283_v20, %v864_v31  ;;  %8300 = vrcp.f32 %v889_v56  ;;  %v891_v49 = vadd.f32 1e-06, %v847_v7  ;;  %v854_v25 = vsel %vm852_vm12, %v853_v59, %v851_v11  ;;  %v8285_v17 = vpop.eup %8284 }
 0x253   : > { %v866_v36 = vmul.f32 %v9597_v61, %v9534_v37  ;;  %1094 = vmatprep.mubr.f32.mxu0 %v12515_v47  ;;  %v8287_v28 = vpop.eup %8286  ;;  %v867_v26 = vmul.f32 %v9597_v61, %v9540_v44  ;;  %v913_v32 = vmul.f32 %v8285_v17, %v865_v15  ;;  %v868_v35 = vmul.f32 %v9597_v61, %v9542_v45 }
 0x254   : > { %v934_v30 = vadd.f32 %v9717_v51, %v912_v29  ;;  %v8289_v60 = vpop.eup %8288  ;;  %8302 = vrcp.f32 %v890_v22  ;;  %v892_v50 = vadd.f32 1e-06, %v854_v25  ;;  %v869_v37 = vmul.f32 %v9597_v61, %v9548_v52 }
 0x255   : > { %v914_v18 = vmul.f32 %v8287_v28, %v866_v36  ;;  %v935_v1 = vadd.f32 %v9717_v51, %v913_v32  ;;  %v915_v4 = vmul.f32 %v8289_v60, %v867_v26  ;;  %8304 = vrcp.f32 %v891_v49 }
 0x256   : > { %v8291_v59 = vpop.eup %8290  ;;  %6686 = vmatmul.mubr.f32.gmra.mrb[2].mxu1 %v934_v30  ;;  %1095 = vmatmul.mubr.f32.gmra.mrb[6].mxu0 %v934_v30  ;;  %v870_v27 = vmul.f32 %v9597_v61, %v9550_v53  ;;  %v871_v41 = vmul.f32 %v9597_v61, %v9557_v2  ;;  %8306 = vrcp.f32 %v892_v50  ;;  %v872_v46 = vmul.f32 %v9597_v61, %v9560_v3 }
 0x257   : > { %v8293_v44 = vpop.eup %8292  ;;  %v936_v13 = vadd.f32 %v9717_v51, %v914_v18  ;;  %1100 = vmatprep.mubr.f32.mxu0 %v12515_v47  ;;  %v916_v48 = vmul.f32 %v8291_v59, %v868_v35  ;;  %6688 = vmatprep.mubr.f32.mxu1 %v935_v1  ;;  %v937_v33 = vadd.f32 %v9717_v51, %v915_v4  ;;  %vm1334_vm0 = vcmask 261120  }
 0x258   : > { %v8295_v45 = vpop.eup %8294  ;;  %v917_v52 = vmul.f32 %v8293_v44, %v869_v37  ;;  %v873_v2 = vmul.f32 %v9597_v61, %v9567_v23  ;;  %v874_v16 = vmul.f32 %v9597_v61, %v9570_v24  ;;  %v875_v3 = vmul.f32 %v9597_v61, %v9577_v42  ;;  %vm9906_vm1 = vmpackc.low %vm1334_vm0, %vm1334_vm0 }
 0x259   : > { %v8297_v40 = vpop.eup %8296  ;;  %v938_v54 = vadd.f32 %v9717_v51, %v916_v48  ;;  %v918_v10 = vmul.f32 %v8295_v45, %v870_v27  ;;  %v876_v34 = vmul.f32 %v9597_v61, %v9580_v43  ;;  %v997_v43 = vlaneseq }
 0x25a   : > { %6689 = vmatmul.mubr.f32.gmra.mrb[4].mxu1 %v936_v13  ;;  %1101 = vmatmul.mubr.f32.gmra.mrb[8].mxu0 %v935_v1  ;;  %v939_v55 = vadd.f32 %v9717_v51, %v917_v52  ;;  %v919_v53 = vmul.f32 %v8297_v40, %v871_v41  ;;  %v12673_v37 = vmov 0  ;;  %vm3919_vm2 = vcmask 523264  }
 0x25b   : > { %v8299_v21 = vpop.eup %8298  ;;  %6691 = vmatprep.mubr.f32.mxu1 %v937_v33  ;;  %1106 = vmatprep.mubr.f32.mxu0 %v12515_v47  ;;  %v940_v14 = vadd.f32 %v9717_v51, %v918_v10  ;;  %v9870_v61 = vshrl.u32 %v997_v43, 7  ;;  %v12674_v37 = vsel %vm9906_vm1, 4294967295, %v12673_v37  ;;  %vm3936_vm3 = vcmask 785408  }
 0x25c   : > { %v8301_v57 = vpop.eup %8300  ;;  %v920_v62 = vmul.f32 %v8299_v21, %v872_v46  ;;  %v941_v0 = vadd.f32 %v9717_v51, %v919_v53  ;;  %12675 = vst [vmem:[#allocation25_spill] sm:$0xff] %v12674_v37 }
 0x25d   : > { %v921_v6 = vmul.f32 %v8301_v57, %v873_v2  ;;  %12672 = vst [vmem:[#allocation24_spill] sm:$0xff] %v9870_v61  ;;  %v12513_v7 = vsub.s32 2, %v9870_v61  ;;  %v12512_v15 = vsub.s32 1, %v9870_v61 }
 0x25e   : > { %6692 = vmatmul.mubr.f32.gmra.mrb[6].mxu1 %v938_v54  ;;  %1107 = vmatmul.mubr.f32.gmra.mrb[10].mxu0 %v936_v13  ;;  %v8303_v9 = vpop.eup %8302  ;;  %v942_v23 = vadd.f32 %v9717_v51, %v920_v62 }
 0x25f   : > { %6694 = vmatprep.mubr.f32.mxu1 %v939_v55  ;;  %1112 = vmatprep.mubr.f32.mxu0 %v12515_v47  ;;  %v8305_v38 = vpop.eup %8304  ;;  %v922_v39 = vmul.f32 %v8303_v9, %v874_v16  ;;  %v943_v8 = vadd.f32 %v9717_v51, %v921_v6  ;;  %v9889_v22 = vrot.slane %v995_v58, %v12513_v7 }
 0x260   : > { %v8307_v19 = vpop.eup %8306  ;;  %v923_v5 = vmul.f32 %v8305_v38, %v875_v3  ;;  %v9893_v29 = vrot.slane %v995_v58, %v12512_v15 }
 0x261   : > { %v944_v24 = vadd.f32 %v9717_v51, %v922_v39  ;;  %v924_v42 = vmul.f32 %v8307_v19, %v876_v34 }
 0x262   : > { %6695 = vmatmul.mubr.f32.gmra.mrb[8].mxu1 %v940_v14  ;;  %1113 = vmatmul.mubr.f32.gmra.mrb[12].mxu0 %v937_v33  ;;  %v945_v63 = vadd.f32 %v9717_v51, %v923_v5 }
 0x263   : > { %6697 = vmatprep.mubr.f32.mxu1 %v941_v0  ;;  %1118 = vmatprep.mubr.f32.mxu0 %v12515_v47  ;;  %v946_v56 = vadd.f32 %v9717_v51, %v924_v42  ;;  %v12514_v51 = vsub.s32 0, %v9870_v61 }
 0x265   : > { %v9878_v31 = vrot.slane %v995_v58, %v12514_v51  ;;  %v10149_v51 = vld [vmem:[%s9464_s6 + $0x18] sm:$0xff] }
 0x266   : > { %6698 = vmatmul.mubr.f32.gmra.mrb[10].mxu1 %v942_v23  ;;  %1119 = vmatmul.mubr.f32.gmra.mrb[14].mxu0 %v938_v54  ;;  %12693 = vst [vmem:[#allocation43_spill] sm:$0xff] %v10149_v51 }
 0x267   : > { %6700 = vmatprep.mubr.f32.mxu1 %v943_v8  ;;  %1124 = vmatprep.mubr.f32.mxu0 %v12515_v47 }
 0x26a   : > { %6701 = vmatmul.mubr.f32.gmra.mrb[12].mxu1 %v944_v24  ;;  %1125 = vmatmul.mubr.f32.gmra.mrb[16].mxu0 %v939_v55 }
 0x26b   : > { %6703 = vmatprep.mubr.f32.mxu1 %v945_v63  ;;  %1130 = vmatprep.mubr.f32.mxu0 %v12515_v47 }
 0x26e   : > { %6704 = vmatmul.mubr.f32.gmra.mrb[14].mxu1 %v946_v56  ;;  %1131 = vmatmul.mubr.f32.gmra.mrb[18].mxu0 %v940_v14 }
 0x26f   : > { %1136 = vmatprep.mubr.f32.mxu0 %v12515_v47 }
 0x272   : > { %1137 = vmatmul.mubr.f32.gmra.mrb[20].mxu0 %v941_v0 }
 0x273   : > { %1142 = vmatprep.mubr.f32.mxu0 %v12515_v47 }
 0x276   : > { %1143 = vmatmul.mubr.f32.gmra.mrb[22].mxu0 %v942_v23 }
 0x277   : > { %1148 = vmatprep.mubr.f32.mxu0 %v12515_v47 }
 0x27a   : > { %1149 = vmatmul.mubr.f32.gmra.mrb[24].mxu0 %v943_v8 }
 0x27b   : > { %1154 = vmatprep.mubr.f32.mxu0 %v12515_v47 }
 0x27e   : > { %1155 = vmatmul.mubr.f32.gmra.mrb[26].mxu0 %v944_v24 }
 0x27f   : > { %1160 = vmatprep.mubr.f32.mxu0 %v12515_v47 }
 0x282   : > { %1161 = vmatmul.mubr.f32.gmra.mrb[28].mxu0 %v945_v63 }
 0x283   : > { %1166 = vmatprep.mubr.f32.mxu0 %v12515_v47 }
 0x286   : > { %1167 = vmatmul.mubr.f32.gmra.mrb[30].mxu0 %v946_v56 }
 0x318   : > { %v1078_v12 = vpop.f32.mrb[0].mxu0 }
 0x319   : > { %v9882_v20 = vadd.f32 %v1078_v12, %v9878_v31  ;;  %v1080_v11 = vpop.f32.mrb[1].mxu0 }
 0x31a   : > { %v1081_v30 = vadd.f32 %v1080_v11, %v9893_v29 }
 0x31b   : > { %6738 = vmatprep.mubr.msk.f32.mxu0 %vm1334_vm0, %v9882_v20 }
 0x320   : > { %v1084_v49 = vpop.f32.mrb[2].mxu0  ;;  %v6684_v25 = vpop.f32.mrb[0].mxu1 }
 0x321   : > { %v9896_v17 = vadd.f32 %v1084_v49, %v9878_v31  ;;  %v1245_v36 = vadd.f32 %v6684_v25, %v9889_v22  ;;  %v1086_v28 = vpop.f32.mrb[3].mxu0  ;;  %v1239_v26 = vpop.f32.mrb[1].mxu1 }
 0x322   : > { %v1087_v32 = vadd.f32 %v1086_v28, %v9893_v29  ;;  %v1240_v60 = vadd.f32 %v1239_v26, %v9889_v22 }
 0x324   : > { %v7322_v18 = vpack.c.bf16 %v1245_v36, %v1240_v60  ;;  %v9902_v50 = vpack.i.bf16 %v1087_v32, %v1081_v30  ;;  %v7274_v59 = vpack.c.bf16 %v1087_v32, %v1081_v30  ;;  %v9910_v1 = vpack.i.bf16 %v1245_v36, %v1240_v60 }
 0x325   : > { %v1090_v35 = vpop.f32.mrb[4].mxu0 }
 0x326   : > { %v9913_v4 = vadd.f32 %v1090_v35, %v9878_v31  ;;  %v1092_v44 = vpop.f32.mrb[5].mxu0  ;;  %7323 = vmatprep.subr.bf16.mxu1 %v7322_v18  ;;  %7885 = vrot.lane.b32.xlu0 %v9902_v50, %s9086_s23 }
 0x327   : > { %7276 = vmatprep.subr.msk.bf16.mxu0 %vm9906_vm1, %v7274_v59  ;;  %7325 = vmatpush3.bf16.msra.mxu1 %v7322_v18  ;;  %v1093_v40 = vadd.f32 %v1092_v44, %v9893_v29 }
 0x328   : > { %7279 = vmatpush3.bf16.xpose.msk.msra.mxu0 %vm9906_vm1, %v7274_v59 }
 0x329   : > { %v6687_v13 = vpop.f32.mrb[2].mxu1  ;;  %v1096_v48 = vpop.f32.mrb[6].mxu0 }
 0x32a   : > { %v1255_v45 = vadd.f32 %v6687_v13, %v9889_v22  ;;  %v1249_v27 = vpop.f32.mrb[3].mxu1  ;;  %v9923_v33 = vadd.f32 %v1096_v48, %v9878_v31  ;;  %v1098_v52 = vpop.f32.mrb[7].mxu0 }
 0x32b   : > { %v1250_v41 = vadd.f32 %v1249_v27, %v9889_v22  ;;  %v1099_v54 = vadd.f32 %v1098_v52, %v9893_v29 }
 0x32d   : > { %v6690_v10 = vpop.f32.mrb[4].mxu1  ;;  %v7326_v21 = vpack.c.bf16 %v1255_v45, %v1250_v41  ;;  %v1102_v55 = vpop.f32.mrb[8].mxu0  ;;  %v9928_v53 = vpack.i.bf16 %v1099_v54, %v1093_v40  ;;  %v7280_v57 = vpack.c.bf16 %v1099_v54, %v1093_v40  ;;  %v9930_v46 = vpack.i.bf16 %v1255_v45, %v1250_v41 }
 0x32e   : > { %v1265_v2 = vadd.f32 %v6690_v10, %v9889_v22  ;;  %v1259_v14 = vpop.f32.mrb[5].mxu1  ;;  %v9934_v62 = vadd.f32 %v1102_v55, %v9878_v31  ;;  %v1104_v9 = vpop.f32.mrb[9].mxu0 }
 0x32f   : > { %v1260_v0 = vadd.f32 %v1259_v14, %v9889_v22  ;;  %7327 = vmatprep.subr.bf16.mxu1 %v7326_v21  ;;  %7890 = vrot.lane.b32.xlu1 %v9928_v53, %s9086_s23  ;;  %v1105_v5 = vadd.f32 %v1104_v9, %v9893_v29 }
 0x330   : > { %7329 = vmatpush3.bf16.msra.mxu1 %v7326_v21  ;;  %7282 = vmatprep.subr.msk.bf16.mxu0 %vm9906_vm1, %v7280_v57 }
 0x331   : > { %v6693_v6 = vpop.f32.mrb[6].mxu1  ;;  %v7330_v38 = vpack.c.bf16 %v1265_v2, %v1260_v0  ;;  %7285 = vmatpush3.bf16.xpose.msk.msra.mxu0 %vm9906_vm1, %v7280_v57  ;;  %v1108_v16 = vpop.f32.mrb[10].mxu0  ;;  %v9943_v3 = vpack.i.bf16 %v1265_v2, %v1260_v0 }
 0x332   : > { %v1275_v23 = vadd.f32 %v6693_v6, %v9889_v22  ;;  %v1269_v39 = vpop.f32.mrb[7].mxu1  ;;  %v9947_v19 = vadd.f32 %v1108_v16, %v9878_v31  ;;  %v1110_v8 = vpop.f32.mrb[11].mxu0 }
 0x333   : > { %v1270_v34 = vadd.f32 %v1269_v39, %v9889_v22  ;;  %7331 = vmatprep.subr.bf16.mxu1 %v7330_v38  ;;  %v1111_v24 = vadd.f32 %v1110_v8, %v9893_v29 }
 0x334   : > { %7333 = vmatpush3.bf16.msra.mxu1 %v7330_v38 }
 0x335   : > { %v6696_v42 = vpop.f32.mrb[8].mxu1  ;;  %v7334_v63 = vpack.c.bf16 %v1275_v23, %v1270_v34  ;;  %v1114_v56 = vpop.f32.mrb[12].mxu0  ;;  %v9952_v43 = vpack.i.bf16 %v1111_v24, %v1105_v5  ;;  %v7286_v58 = vpack.c.bf16 %v1111_v24, %v1105_v5  ;;  %v9954_v12 = vpack.i.bf16 %v1275_v23, %v1270_v34 }
 0x336   : > { %v1285_v11 = vadd.f32 %v6696_v42, %v9889_v22  ;;  %v1279_v49 = vpop.f32.mrb[9].mxu1  ;;  %v9958_v25 = vadd.f32 %v1114_v56, %v9878_v31  ;;  %v1116_v36 = vpop.f32.mrb[13].mxu0 }
 0x337   : > { %v1280_v28 = vadd.f32 %v1279_v49, %v9889_v22  ;;  %7335 = vmatprep.subr.bf16.mxu1 %v7334_v63  ;;  %7895 = vrot.lane.b32.xlu0 %v9952_v43, %s9086_s23  ;;  %v1117_v13 = vadd.f32 %v1116_v36, %v9893_v29 }
 0x338   : > { %7337 = vmatpush3.bf16.msra.mxu1 %v7334_v63  ;;  %7288 = vmatprep.subr.msk.bf16.mxu0 %vm9906_vm1, %v7286_v58 }
 0x339   : > { %v6699_v26 = vpop.f32.mrb[10].mxu1  ;;  %v7338_v30 = vpack.c.bf16 %v1285_v11, %v1280_v28  ;;  %7291 = vmatpush3.bf16.xpose.msk.msra.mxu0 %vm9906_vm1, %v7286_v58  ;;  %v1120_v32 = vpop.f32.mrb[14].mxu0  ;;  %v9967_v60 = vpack.i.bf16 %v1285_v11, %v1280_v28 }
 0x33a   : > { %v1295_v35 = vadd.f32 %v6699_v26, %v9889_v22  ;;  %v1289_v18 = vpop.f32.mrb[11].mxu1  ;;  %v9971_v59 = vadd.f32 %v1120_v32, %v9878_v31  ;;  %v1122_v44 = vpop.f32.mrb[15].mxu0 }
 0x33b   : > { %12676 = vst [vmem:[#allocation26_spill] sm:$0xff] %v9967_v60  ;;  %v1290_v48 = vadd.f32 %v1289_v18, %v9889_v22  ;;  %7339 = vmatprep.subr.bf16.mxu1 %v7338_v30  ;;  %v1123_v45 = vadd.f32 %v1122_v44, %v9893_v29 }
 0x33c   : > { %7341 = vmatpush3.bf16.msra.mxu1 %v7338_v30 }
 0x33d   : > { %v6702_v27 = vpop.f32.mrb[12].mxu1  ;;  %v7342_v52 = vpack.c.bf16 %v1295_v35, %v1290_v48  ;;  %v1126_v40 = vpop.f32.mrb[16].mxu0  ;;  %v7292_v41 = vpack.c.bf16 %v1123_v45, %v1117_v13  ;;  %v9976_v54 = vpack.i.bf16 %v1123_v45, %v1117_v13  ;;  %v9978_v10 = vpack.i.bf16 %v1295_v35, %v1290_v48 }
 0x33e   : > { %v1305_v21 = vadd.f32 %v6702_v27, %v9889_v22  ;;  %v1299_v55 = vpop.f32.mrb[13].mxu1  ;;  %v9982_v57 = vadd.f32 %v1126_v40, %v9878_v31  ;;  %v1128_v2 = vpop.f32.mrb[17].mxu0 }
 0x33f   : > { %12677 = vst [vmem:[#allocation27_spill] sm:$0xff] %v9976_v54  ;;  %12678 = vst [vmem:[#allocation28_spill] sm:$0xff] %v9978_v10  ;;  %v1300_v14 = vadd.f32 %v1299_v55, %v9889_v22  ;;  %7343 = vmatprep.subr.bf16.mxu1 %v7342_v52  ;;  %7294 = vmatprep.subr.msk.bf16.mxu0 %vm9906_vm1, %v7292_v41  ;;  %v1129_v5 = vadd.f32 %v1128_v2, %v9893_v29 }
 0x340   : > { %7345 = vmatpush3.bf16.msra.mxu1 %v7342_v52 }
 0x341   : > { %v6705_v9 = vpop.f32.mrb[14].mxu1  ;;  %v7346_v0 = vpack.c.bf16 %v1305_v21, %v1300_v14  ;;  %7297 = vmatpush3.bf16.xpose.msk.msra.mxu0 %vm9906_vm1, %v7292_v41  ;;  %v1132_v6 = vpop.f32.mrb[18].mxu0  ;;  %v9989_v38 = vpack.i.bf16 %v1305_v21, %v1300_v14 }
 0x342   : > { %v1315_v16 = vadd.f32 %v6705_v9, %v9889_v22  ;;  %v1309_v23 = vpop.f32.mrb[15].mxu1  ;;  %v9993_v39 = vadd.f32 %v1132_v6, %v9878_v31  ;;  %v1134_v8 = vpop.f32.mrb[19].mxu0 }
 0x343   : > { %12679 = vst [vmem:[#allocation29_spill] sm:$0xff] %v9989_v38  ;;  %v1310_v34 = vadd.f32 %v1309_v23, %v9889_v22  ;;  %7347 = vmatprep.subr.bf16.mxu1 %v7346_v0  ;;  %v1135_v24 = vadd.f32 %v1134_v8, %v9893_v29 }
 0x344   : > { %7349 = vmatpush3.bf16.msra.mxu1 %v7346_v0 }
 0x345   : > { %v7350_v42 = vpack.c.bf16 %v1315_v16, %v1310_v34  ;;  %v1138_v63 = vpop.f32.mrb[20].mxu0  ;;  %v7298_v56 = vpack.c.bf16 %v1135_v24, %v1129_v5  ;;  %v9998_v58 = vpack.i.bf16 %v1135_v24, %v1129_v5  ;;  %v10000_v11 = vpack.i.bf16 %v1315_v16, %v1310_v34 }
 0x346   : > { %v10003_v49 = vadd.f32 %v1138_v63, %v9878_v31  ;;  %v1140_v36 = vpop.f32.mrb[21].mxu0  ;;  %v10084_v63 = vld [vmem:[%s9464_s6 + $0x8] sm:$0xff] }
 0x347   : > { %12680 = vst [vmem:[#allocation30_spill] sm:$0xff] %v9998_v58  ;;  %12681 = vst [vmem:[#allocation31_spill] sm:$0xff] %v10000_v11  ;;  %7351 = vmatprep.subr.bf16.mxu1 %v7350_v42  ;;  %7300 = vmatprep.subr.msk.bf16.mxu0 %vm9906_vm1, %v7298_v56  ;;  %v1141_v30 = vadd.f32 %v1140_v36, %v9893_v29 }
 0x348   : > { %7353 = vmatpush3.bf16.msra.mxu1 %v7350_v42  ;;  %12684 = vst [vmem:[#allocation34_spill] sm:$0xff] %v10084_v63 }
 0x349   : > { %7303 = vmatpush3.bf16.xpose.msk.msra.mxu0 %vm9906_vm1, %v7298_v56  ;;  %v1144_v22 = vpop.f32.mrb[22].mxu0  ;;  %v10087_v56 = vld [vmem:[%s9464_s6] sm:$0xff] }
 0x34a   : > { %v10010_v28 = vadd.f32 %v1144_v22, %v9878_v31  ;;  %v1146_v26 = vpop.f32.mrb[23].mxu0  ;;  %12685 = vst [vmem:[#allocation35_spill] sm:$0xff] %v10087_v56 }
 0x34b   : > { %v1147_v32 = vadd.f32 %v1146_v26, %v9893_v29 }
 0x34d   : > { %v1150_v35 = vpop.f32.mrb[24].mxu0  ;;  %v7304_v18 = vpack.c.bf16 %v1147_v32, %v1141_v30  ;;  %v10014_v44 = vpack.i.bf16 %v1147_v32, %v1141_v30  ;;  %v10097_v32 = vld [vmem:[%s9464_s6 + $0x10] sm:$0xff] }
 0x34e   : > { %v10017_v13 = vadd.f32 %v1150_v35, %v9878_v31  ;;  %v1152_v48 = vpop.f32.mrb[25].mxu0  ;;  %12686 = vst [vmem:[#allocation36_spill] sm:$0xff] %v10097_v32 }
 0x34f   : > { %12682 = vst [vmem:[#allocation32_spill] sm:$0xff] %v10014_v44  ;;  %7306 = vmatprep.subr.msk.bf16.mxu0 %vm9906_vm1, %v7304_v18  ;;  %v1153_v40 = vadd.f32 %v1152_v48, %v9893_v29 }
 0x351   : > { %7309 = vmatpush3.bf16.xpose.msk.msra.mxu0 %vm9906_vm1, %v7304_v18  ;;  %v1156_v45 = vpop.f32.mrb[26].mxu0 }
 0x352   : > { %v10024_v27 = vadd.f32 %v1156_v45, %v9878_v31  ;;  %v1158_v52 = vpop.f32.mrb[27].mxu0  ;;  %v10104_v45 = vld [vmem:[%s9464_s6 + $0x20] sm:$0xff] }
 0x353   : > { %v1159_v41 = vadd.f32 %v1158_v52, %v9893_v29  ;;  %12687 = vst [vmem:[#allocation37_spill] sm:$0xff] %v10104_v45 }
 0x355   : > { %v1162_v21 = vpop.f32.mrb[28].mxu0  ;;  %v7310_v55 = vpack.c.bf16 %v1159_v41, %v1153_v40  ;;  %v10028_v2 = vpack.i.bf16 %v1159_v41, %v1153_v40 }
 0x356   : > { %v10031_v14 = vadd.f32 %v1162_v21, %v9878_v31  ;;  %v1164_v9 = vpop.f32.mrb[29].mxu0  ;;  %v10111_v21 = vld [vmem:[%s9464_s6 + $0x30] sm:$0xff] }
 0x357   : > { %12683 = vst [vmem:[#allocation33_spill] sm:$0xff] %v10028_v2  ;;  %7312 = vmatprep.subr.msk.bf16.mxu0 %vm9906_vm1, %v7310_v55  ;;  %v1165_v23 = vadd.f32 %v1164_v9, %v9893_v29  ;;  %12688 = vst [vmem:[#allocation38_spill] sm:$0xff] %v10111_v21 }
 0x359   : > { %7315 = vmatpush3.bf16.xpose.msk.msra.mxu0 %vm9906_vm1, %v7310_v55  ;;  %v1168_v0 = vpop.f32.mrb[30].mxu0 }
 0x35a   : > { %v10038_v6 = vadd.f32 %v1168_v0, %v9878_v31  ;;  %v1170_v16 = vpop.f32.mrb[31].mxu0 }
 0x35b   : > { %v1171_v8 = vadd.f32 %v1170_v16, %v9893_v29  ;;  %v10118_v16 = vld [vmem:[%s9464_s6 + $0x40] sm:$0xff] }
 0x35c   : > { %12689 = vst [vmem:[#allocation39_spill] sm:$0xff] %v10118_v16 }
 0x35d   : > { %v7316_v5 = vpack.c.bf16 %v1171_v8, %v1165_v23  ;;  %v10042_v34 = vpack.i.bf16 %v1171_v8, %v1165_v23 }
 0x35f   : > { %7318 = vmatprep.subr.msk.bf16.mxu0 %vm9906_vm1, %v7316_v5 }
 0x361   : > { %7321 = vmatpush3.bf16.xpose.msk.msra.mxu0 %vm9906_vm1, %v7316_v5 }
 0x368   : > { %6739 = vmatmul.mubr.msk.f32.vlgmr.msra.gmra.mrb[32].mxu0 %vm1334_vm0, %v9896_v17 }
 0x369   : > { %6741 = vmatprep.mubr.msk.f32.mxu0 %vm1334_vm0, %v9913_v4 }
 0x36c   : > { %6742 = vmatmul.mubr.msk.f32.gmra.mrb[34].mxu0 %vm1334_vm0, %v9923_v33 }
 0x36d   : > { %6744 = vmatprep.mubr.msk.f32.mxu0 %vm1334_vm0, %v9934_v62 }
 0x370   : > { %6745 = vmatmul.mubr.msk.f32.gmra.mrb[36].mxu0 %vm1334_vm0, %v9947_v19 }
 0x371   : > { %6747 = vmatprep.mubr.msk.f32.mxu0 %vm1334_vm0, %v9958_v25 }
 0x374   : > { %6748 = vmatmul.mubr.msk.f32.gmra.mrb[38].mxu0 %vm1334_vm0, %v9971_v59 }
 0x375   : > { %6750 = vmatprep.mubr.msk.f32.mxu0 %vm1334_vm0, %v9982_v57 }
 0x378   : > { %6751 = vmatmul.mubr.msk.f32.gmra.mrb[40].mxu0 %vm1334_vm0, %v9993_v39 }
 0x379   : > { %6753 = vmatprep.mubr.msk.f32.mxu0 %vm1334_vm0, %v10003_v49 }
 0x37c   : > { %6754 = vmatmul.mubr.msk.f32.gmra.mrb[42].mxu0 %vm1334_vm0, %v10010_v28 }
 0x37d   : > { %6756 = vmatprep.mubr.msk.f32.mxu0 %vm1334_vm0, %v10017_v13 }
 0x380   : > { %6757 = vmatmul.mubr.msk.f32.gmra.mrb[44].mxu0 %vm1334_vm0, %v10024_v27 }
 0x381   : > { %6759 = vmatprep.mubr.msk.f32.mxu0 %vm1334_vm0, %v10031_v14 }
 0x384   : > { %6760 = vmatmul.mubr.msk.f32.gmra.mrb[46].mxu0 %vm1334_vm0, %v10038_v6 }
 0x398   : > { %v7886_v31 = vpop.permute.xlu0 %7885 }
 0x399   : > { %v7888_v29 = vunpack.i.h.bf16 %v7886_v31  ;;  %v7887_v24 = vunpack.i.l.bf16 %v7886_v31  ;;  %v10125_v31 = vld [vmem:[%s9464_s6 + $0x50] sm:$0xff] }
 0x39a   : > { %12690 = vst [vmem:[#allocation40_spill] sm:$0xff] %v10125_v31 }
 0x39b   : > { %v10078_v42 = vpack.c.bf16 %v7888_v29, %v7887_v24 }
 0x39d   : > { %7356 = vmatprep.subr.msk.bf16.mxu1 %vm9906_vm1, %v10078_v42 }
 0x43b   : > { %v6740_v36 = vpop.f32.mrb[32].mxu0 }
 0x43c   : > { %v10090_v22 = vadd.f32 %v6740_v36, %v10084_v63  ;;  %v1497_v26 = vpop.f32.mrb[33].mxu0 }
 0x43d   : > { %v10093_v30 = vadd.f32 %v1497_v26, %v10087_v56  ;;  %v10134_v26 = vld [vmem:[%s9464_s6 + $0x60] sm:$0xff] }
 0x43e   : > { %1578 = vmax.xlane.f32.xlu1 %v10090_v22  ;;  %12691 = vst [vmem:[#allocation41_spill] sm:$0xff] %v10134_v26 }
 0x43f   : > { %v6743_v35 = vpop.f32.mrb[34].mxu0  ;;  %1576 = vmax.xlane.f32.xlu0 %v10093_v30 }
 0x440   : > { %v1507_v18 = vpop.f32.mrb[35].mxu0  ;;  %v1513_v47 = vadd.f32 %v6743_v35, %v10149_v51  ;;  %v10169_v35 = vld [vmem:[%s9464_s6 + $0x58] sm:$0xff] }
 0x441   : > { %v10101_v48 = vadd.f32 %v1507_v18, %v10097_v32  ;;  %12697 = vst [vmem:[#allocation47_spill] sm:$0xff] %v10169_v35 }
 0x443   : > { %v6746_v52 = vpop.f32.mrb[36].mxu0  ;;  %1580 = vmax.xlane.f32.xlu0 %v10101_v48 }
 0x444   : > { %v1517_v40 = vpop.f32.mrb[37].mxu0 }
 0x445   : > { %v10108_v41 = vadd.f32 %v1517_v40, %v10104_v45 }
 0x447   : > { %v6749_v55 = vpop.f32.mrb[38].mxu0  ;;  %1584 = vmax.xlane.f32.xlu0 %v10108_v41 }
 0x448   : > { %v1527_v9 = vpop.f32.mrb[39].mxu0 }
 0x449   : > { %v10115_v0 = vadd.f32 %v1527_v9, %v10111_v21 }
 0x44b   : > { %v6752_v23 = vpop.f32.mrb[40].mxu0  ;;  %1588 = vmax.xlane.f32.xlu0 %v10115_v0 }
 0x44c   : > { %v1537_v8 = vpop.f32.mrb[41].mxu0 }
 0x44d   : > { %v10122_v5 = vadd.f32 %v1537_v8, %v10118_v16  ;;  %v10141_v8 = vld [vmem:[%s9464_s6 + $0x70] sm:$0xff]  ;;  %v10176_v16 = vld [vmem:[%s9464_s6 + $0x68] sm:$0xff] }
 0x44e   : > { %12692 = vst [vmem:[#allocation42_spill] sm:$0xff] %v10141_v8  ;;  %12698 = vst [vmem:[#allocation48_spill] sm:$0xff] %v10176_v16 }
 0x44f   : > { %7900 = vrot.lane.b32.xlu1 %v9976_v54, %s9086_s23  ;;  %v6755_v29 = vpop.f32.mrb[42].mxu0  ;;  %1592 = vmax.xlane.f32.xlu0 %v10122_v5 }
 0x450   : > { %v1547_v24 = vpop.f32.mrb[43].mxu0 }
 0x451   : > { %v10131_v36 = vadd.f32 %v1547_v24, %v10125_v31 }
 0x453   : > { %v6758_v18 = vpop.f32.mrb[44].mxu0  ;;  %1596 = vmax.xlane.f32.xlu0 %v10131_v36 }
 0x454   : > { %v1557_v40 = vpop.f32.mrb[45].mxu0 }
 0x455   : > { %v10138_v9 = vadd.f32 %v1557_v40, %v10134_v26  ;;  %v10155_v40 = vld [vmem:[%s9464_s6 + $0x28] sm:$0xff]  ;;  %v10159_v26 = vld [vmem:[%s9464_s6 + $0x38] sm:$0xff] }
 0x456   : > { %12694 = vst [vmem:[#allocation44_spill] sm:$0xff] %v10155_v40  ;;  %v1523_v61 = vadd.f32 %v6746_v52, %v10155_v40  ;;  %12695 = vst [vmem:[#allocation45_spill] sm:$0xff] %v10159_v26  ;;  %v10180_v52 = vadd.f32 %v6758_v18, %v10176_v16 }
 0x457   : > { %1600 = vmax.xlane.f32.xlu0 %v10138_v9  ;;  %v6761_v15 = vpop.f32.mrb[46].mxu0 }
 0x458   : > { %v1567_v7 = vpop.f32.mrb[47].mxu0 }
 0x459   : > { %v10145_v24 = vadd.f32 %v1567_v7, %v10141_v8  ;;  %v1533_v7 = vadd.f32 %v6749_v55, %v10159_v26  ;;  %v10163_v8 = vld [vmem:[%s9464_s6 + $0x48] sm:$0xff]  ;;  %v10183_v55 = vld [vmem:[%s9464_s6 + $0x78] sm:$0xff] }
 0x45a   : > { %12696 = vst [vmem:[#allocation46_spill] sm:$0xff] %v10163_v8  ;;  %v10166_v31 = vadd.f32 %v6752_v23, %v10163_v8  ;;  %12699 = vst [vmem:[#allocation49_spill] sm:$0xff] %v10183_v55  ;;  %v10187_v23 = vadd.f32 %v6761_v15, %v10183_v55  ;;  %v10190_v8 = vpop.permute.xlu1 %7890 }
 0x45b   : > { %1604 = vmax.xlane.f32.xlu0 %v10145_v24 }
 0x471   : > { %7905 = vrot.lane.b32.xlu0 %v9998_v58, %s9086_s23  ;;  %v10173_v58 = vadd.f32 %v6755_v29, %v10169_v35  ;;  %v10192_v29 = vpop.permute.xlu0 %7895 }
 0x472   : > { %12700 = vst [vmem:[#allocation50_spill] sm:$0xff] %v10192_v29 }
 0x473   : > { %1582 = vmax.xlane.f32.xlu1 %v1513_v47 }
 0x477   : > { %1586 = vmax.xlane.f32.xlu1 %v1523_v61 }
 0x47b   : > { %1590 = vmax.xlane.f32.xlu1 %v1533_v7 }
 0x47f   : > { %1594 = vmax.xlane.f32.xlu1 %v10166_v31 }
 0x483   : > { %1598 = vmax.xlane.f32.xlu1 %v10173_v58 }
 0x487   : > { %1602 = vmax.xlane.f32.xlu1 %v10180_v52 }
 0x48b   : > { %1606 = vmax.xlane.f32.xlu1 %v10187_v23 }
 0x4cb   : > { %v1579_v35 = vpop.xlane.xlu1 %1578 }
 0x4cc   : > { %v1609_v26 = vsub.f32 %v10090_v22, %v1579_v35  ;;  %v1577_v40 = vpop.xlane.xlu0 %1576 }
 0x4cd   : > { %v1608_v18 = vsub.f32 %v10093_v30, %v1577_v40 }
 0x4ce   : > { %v1626_v16 = vmul.f32 1.442695, %v1609_v26 }
 0x4cf   : > { %v1624_v54 = vmul.f32 1.442695, %v1608_v18  ;;  %v10206_v26 = vpop.permute.xlu1 %7900 }
 0x4d0   : > { %8308 = vpow2.f32 %v1626_v16  ;;  %v1581_v55 = vpop.xlane.xlu0 %1580  ;;  %12701 = vst [vmem:[#allocation51_spill] sm:$0xff] %v10206_v26 }
 0x4d1   : > { %8310 = vpow2.f32 %v1624_v54  ;;  %v1610_v54 = vsub.f32 %v10101_v48, %v1581_v55 }
 0x4d3   : > { %v1628_v40 = vmul.f32 1.442695, %v1610_v54 }
 0x4d4   : > { %v1585_v22 = vpop.xlane.xlu0 %1584 }
 0x4d5   : > { %v1612_v45 = vsub.f32 %v10108_v41, %v1585_v22  ;;  %8312 = vpow2.f32 %v1628_v40 }
 0x4d7   : > { %v1632_v63 = vmul.f32 1.442695, %v1612_v45 }
 0x4d8   : > { %v1589_v30 = vpop.xlane.xlu0 %1588 }
 0x4d9   : > { %v1614_v26 = vsub.f32 %v10115_v0, %v1589_v30 }
 0x4da   : > { %v10196_v21 = vpop.eup %8308 }
 0x4db   : > { %v10198_v15 = vpop.eup %8310  ;;  %1658 = vadd.xlane.f32.xlu1 %v10196_v21  ;;  %v1636_v41 = vmul.f32 1.442695, %v1614_v26 }
 0x4dc   : > { %1656 = vadd.xlane.f32.xlu0 %v10198_v15  ;;  %v1593_v16 = vpop.xlane.xlu0 %1592 }
 0x4df   : > { %v10213_v40 = vpop.eup %8312 }
 0x4e0   : > { %v1597_v32 = vpop.xlane.xlu0 %1596 }
 0x4ec   : > { %7910 = vrot.lane.b32.xlu1 %v10014_v44, %s9086_s23 }
 0x4f2   : > { %7915 = vrot.lane.b32.xlu0 %v10028_v2, %s9086_s23  ;;  %v1618_v2 = vsub.f32 %v10131_v36, %v1597_v32 }
 0x4f4   : > { %v1644_v55 = vmul.f32 1.442695, %v1618_v2 }
 0x500   : > { %v1583_v35 = vpop.xlane.xlu1 %1582 }
 0x501   : > { %v1611_v18 = vsub.f32 %v1513_v47, %v1583_v35 }
 0x503   : > { %v1630_v51 = vmul.f32 1.442695, %v1611_v18 }
 0x504   : > { %v1587_v56 = vpop.xlane.xlu1 %1586 }
 0x505   : > { %8314 = vpow2.f32 %v1630_v51  ;;  %v1613_v44 = vsub.f32 %v1523_v61, %v1587_v56  ;;  %v1616_v51 = vsub.f32 %v10122_v5, %v1593_v16 }
 0x507   : > { %v1634_v29 = vmul.f32 1.442695, %v1613_v44  ;;  %v1640_v32 = vmul.f32 1.442695, %v1616_v51 }
 0x508   : > { %v1591_v37 = vpop.xlane.xlu1 %1590 }
 0x509   : > { %8316 = vpow2.f32 %v1634_v29  ;;  %v1615_v48 = vsub.f32 %v1533_v7, %v1591_v37  ;;  %v1601_v37 = vpop.xlane.xlu0 %1600 }
 0x50a   : > { %8318 = vpow2.f32 %v1632_v63  ;;  %v1620_v45 = vsub.f32 %v10138_v9, %v1601_v37 }
 0x50b   : > { %v1638_v47 = vmul.f32 1.442695, %v1615_v48 }
 0x50c   : > { %v1595_v54 = vpop.xlane.xlu1 %1594  ;;  %v1648_v30 = vmul.f32 1.442695, %v1620_v45  ;;  %v7893_v45 = vunpack.i.h.bf16 %v10190_v8 }
 0x50d   : > { %8320 = vpow2.f32 %v1638_v47  ;;  %v1617_v22 = vsub.f32 %v10166_v31, %v1595_v54 }
 0x50e   : > { %8322 = vpow2.f32 %v1644_v55 }
 0x50f   : > { %v10215_v61 = vpop.eup %8314  ;;  %8324 = vpow2.f32 %v1636_v41  ;;  %v1642_v63 = vmul.f32 1.442695, %v1617_v22 }
 0x510   : > { %v1599_v44 = vpop.xlane.xlu1 %1598  ;;  %1660 = vadd.xlane.f32.xlu1 %v10213_v40 }
 0x511   : > { %1662 = vadd.xlane.f32.xlu0 %v10215_v61  ;;  %8326 = vpow2.f32 %v1642_v63  ;;  %v1619_v5 = vsub.f32 %v10173_v58, %v1599_v44  ;;  %v1605_v58 = vpop.xlane.xlu0 %1604 }
 0x512   : > { %8328 = vpow2.f32 %v1640_v32  ;;  %v1622_v35 = vsub.f32 %v10145_v24, %v1605_v58 }
 0x513   : > { %v10220_v2 = vpop.eup %8316  ;;  %v1646_v9 = vmul.f32 1.442695, %v1619_v5 }
 0x514   : > { %v10222_v56 = vpop.eup %8318  ;;  %v1603_v0 = vpop.xlane.xlu1 %1602  ;;  %1666 = vadd.xlane.f32.xlu1 %v10220_v2  ;;  %v1652_v55 = vmul.f32 1.442695, %v1622_v35 }
 0x515   : > { %v1621_v31 = vsub.f32 %v10180_v52, %v1603_v0  ;;  %1664 = vadd.xlane.f32.xlu0 %v10222_v56  ;;  %v7906_v51 = vpop.permute.xlu0 %7905  ;;  %v7892_v0 = vunpack.i.l.bf16 %v10190_v8 }
 0x517   : > { %v10229_v36 = vpop.eup %8320  ;;  %v1650_v7 = vmul.f32 1.442695, %v1621_v31 }
 0x518   : > { %v10231_v29 = vpop.eup %8322  ;;  %v1607_v26 = vpop.xlane.xlu1 %1606  ;;  %1670 = vadd.xlane.f32.xlu1 %v10229_v36 }
 0x519   : > { %8330 = vpow2.f32 %v1650_v7  ;;  %v1623_v16 = vsub.f32 %v10187_v23, %v1607_v26  ;;  %1676 = vadd.xlane.f32.xlu0 %v10231_v29  ;;  %v10236_v52 = vpop.eup %8324  ;;  %v7360_v7 = vpack.c.bf16 %v7893_v45, %v7892_v0  ;;  %v12703_v26 = vld [vmem:[#allocation50_spill] sm:$0xff] }
 0x51a   : > { %8332 = vpow2.f32 %v1648_v30  ;;  %v7897_v8 = vunpack.i.l.bf16 %v12703_v26 }
 0x51b   : > { %8334 = vpow2.f32 %v1646_v9  ;;  %v1654_v18 = vmul.f32 1.442695, %v1623_v16  ;;  %v10240_v48 = vpop.eup %8326  ;;  %v7898_v9 = vunpack.i.h.bf16 %v12703_v26 }
 0x51c   : > { %1668 = vadd.xlane.f32.xlu1 %v10236_v52  ;;  %v10243_v47 = vpop.eup %8328 }
 0x51d   : > { %8336 = vpow2.f32 %v1654_v18  ;;  %v7366_v16 = vpack.c.bf16 %v7898_v9, %v7897_v8  ;;  %v7907_v18 = vunpack.i.l.bf16 %v7906_v51 }
 0x51e   : > { %8338 = vpow2.f32 %v1652_v55 }
 0x520   : > { %1674 = vadd.xlane.f32.xlu1 %v10240_v48 }
 0x523   : > { %v10245_v23 = vpop.eup %8330 }
 0x524   : > { %1672 = vadd.xlane.f32.xlu1 %v10243_v47  ;;  %1682 = vadd.xlane.f32.xlu0 %v10245_v23  ;;  %v10249_v54 = vpop.eup %8332 }
 0x525   : > { %v10251_v24 = vpop.eup %8334 }
 0x527   : > { %v10255_v41 = vpop.eup %8336 }
 0x528   : > { %1678 = vadd.xlane.f32.xlu1 %v10251_v24  ;;  %1680 = vadd.xlane.f32.xlu0 %v10249_v54  ;;  %v10258_v22 = vpop.eup %8338 }
 0x52c   : > { %1686 = vadd.xlane.f32.xlu1 %v10255_v41 }
 0x530   : > { %1684 = vadd.xlane.f32.xlu1 %v10258_v22 }
 0x53e   : > { %7920 = vrot.lane.b32.xlu0 %v10042_v34, %s9086_s23 }
 0x541   : > { %1867 = vrot.lane.b32.xlu1 %v9896_v17, %s9086_s23 }
 0x542   : > { %1865 = vrot.lane.b32.xlu0 %v9882_v20, %s9086_s23 }
 0x545   : > { %1871 = vrot.lane.b32.xlu1 %v9923_v33, %s9086_s23 }
 0x546   : > { %1869 = vrot.lane.b32.xlu0 %v9913_v4, %s9086_s23 }
 0x549   : > { %1875 = vrot.lane.b32.xlu1 %v9947_v19, %s9086_s23 }
 0x54a   : > { %1873 = vrot.lane.b32.xlu0 %v9934_v62, %s9086_s23 }
 0x54d   : > { %1879 = vrot.lane.b32.xlu1 %v9971_v59, %s9086_s23 }
 0x54e   : > { %1877 = vrot.lane.b32.xlu0 %v9958_v25, %s9086_s23 }
 0x551   : > { %1883 = vrot.lane.b32.xlu1 %v9993_v39, %s9086_s23 }
 0x552   : > { %1881 = vrot.lane.b32.xlu0 %v9982_v57, %s9086_s23 }
 0x555   : > { %1887 = vrot.lane.b32.xlu1 %v10010_v28, %s9086_s23 }
 0x556   : > { %1885 = vrot.lane.b32.xlu0 %v10003_v49, %s9086_s23 }
 0x559   : > { %1891 = vrot.lane.b32.xlu1 %v10024_v27, %s9086_s23 }
 0x55a   : > { %1889 = vrot.lane.b32.xlu0 %v10017_v13, %s9086_s23 }
 0x55d   : > { %1895 = vrot.lane.b32.xlu1 %v10038_v6, %s9086_s23 }
 0x55e   : > { %1893 = vrot.lane.b32.xlu0 %v10031_v14, %s9086_s23 }
 0x561   : > { %7930 = vrot.lane.b32.xlu1 %v9930_v46, %s9086_s23 }
 0x562   : > { %7925 = vrot.lane.b32.xlu0 %v9910_v1, %s9086_s23 }
 0x565   : > { %7935 = vrot.lane.b32.xlu1 %v9943_v3, %s9086_s23 }
 0x566   : > { %7940 = vrot.lane.b32.xlu0 %v9954_v12, %s9086_s23 }
 0x568   : > { %v1659_v44 = vpop.xlane.xlu1 %1658 }
 0x569   : > { %8340 = vrcp.f32 %v1659_v44  ;;  %7950 = vrot.lane.b32.xlu1 %v9978_v10, %s9086_s23  ;;  %v1657_v37 = vpop.xlane.xlu0 %1656 }
 0x56a   : > { %8342 = vrcp.f32 %v1657_v37  ;;  %7945 = vrot.lane.b32.xlu0 %v9967_v60, %s9086_s23 }
 0x56c   : > { %v7911_v44 = vpop.permute.xlu1 %7910 }
 0x56d   : > { %7955 = vrot.lane.b32.xlu1 %v9989_v38, %s9086_s23  ;;  %v7913_v37 = vunpack.i.h.bf16 %v7911_v44  ;;  %v7916_v45 = vpop.permute.xlu0 %7915 }
 0x56e   : > { %7965 = vrot.lane.b32.xlu0 %v9902_v50, %s9087_s9  ;;  %v7918_v0 = vunpack.i.h.bf16 %v7916_v45 }
 0x571   : > { %7960 = vrot.lane.b32.xlu1 %v10000_v11, %s9086_s23 }
 0x572   : > { %7975 = vrot.lane.b32.xlu0 %v9952_v43, %s9087_s9 }
 0x573   : > { %v8341_v63 = vpop.eup %8340 }
 0x574   : > { %v8343_v32 = vpop.eup %8342  ;;  %v1705_v31 = vmul.f32 %v8341_v63, %v10196_v21  ;;  %v12704_v21 = vld [vmem:[#allocation51_spill] sm:$0xff]  ;;  %v7912_v63 = vunpack.i.l.bf16 %v7911_v44 }
 0x575   : > { %7970 = vrot.lane.b32.xlu1 %v9928_v53, %s9087_s9  ;;  %v1704_v5 = vmul.f32 %v8343_v32, %v10198_v15  ;;  %v7903_v15 = vunpack.i.h.bf16 %v12704_v21  ;;  %v7902_v58 = vunpack.i.l.bf16 %v12704_v21 }
 0x576   : > { %v7384_v32 = vpack.c.bf16 %v7913_v37, %v7912_v63 }
 0x577   : > { %6794 = vmatprep.mubr.f32.mxu1 %v1704_v5  ;;  %v7372_v35 = vpack.c.bf16 %v7903_v15, %v7902_v58 }
 0x578   : > { %6795 = vmatmul.mubr.f32.vlgmr.msra.gmra.mrb[16].mxu1 %v1705_v31 }
 0x579   : > { %7359 = vmatpush3.bf16.xpose.msk.msra.mxu1 %vm9906_vm1, %v10078_v42  ;;  %v7908_v42 = vunpack.i.h.bf16 %v7906_v51  ;;  %v7917_v51 = vunpack.i.l.bf16 %v7916_v45 }
 0x57a   : > { %7362 = vmatprep.subr.msk.bf16.mxu1 %vm9906_vm1, %v7360_v7 }
 0x57b   : > { %v7378_v55 = vpack.c.bf16 %v7908_v42, %v7907_v18 }
 0x581   : > { %7365 = vmatpush3.bf16.xpose.msk.msra.mxu1 %vm9906_vm1, %v7360_v7  ;;  %v7390_v7 = vpack.c.bf16 %v7918_v0, %v7917_v51 }
 0x582   : > { %7368 = vmatprep.subr.msk.bf16.mxu1 %vm9906_vm1, %v7366_v16 }
 0x589   : > { %7371 = vmatpush3.bf16.xpose.msk.msra.mxu1 %vm9906_vm1, %v7366_v16 }
 0x58a   : > { %7374 = vmatprep.subr.msk.bf16.mxu1 %vm9906_vm1, %v7372_v35 }
 0x591   : > { %7377 = vmatpush3.bf16.xpose.msk.msra.mxu1 %vm9906_vm1, %v7372_v35 }
 0x592   : > { %7380 = vmatprep.subr.msk.bf16.mxu1 %vm9906_vm1, %v7378_v55 }
 0x599   : > { %7383 = vmatpush3.bf16.xpose.msk.msra.mxu1 %vm9906_vm1, %v7378_v55 }
 0x59a   : > { %7386 = vmatprep.subr.msk.bf16.mxu1 %vm9906_vm1, %v7384_v32 }
 0x59d   : > { %v1661_v5 = vpop.xlane.xlu1 %1660 }
 0x59e   : > { %8344 = vrcp.f32 %v1661_v5  ;;  %v1663_v31 = vpop.xlane.xlu0 %1662 }
 0x59f   : > { %8346 = vrcp.f32 %v1663_v31 }
 0x5a1   : > { %7389 = vmatpush3.bf16.xpose.msk.msra.mxu1 %vm9906_vm1, %v7384_v32  ;;  %v1667_v26 = vpop.xlane.xlu1 %1666 }
 0x5a2   : > { %8348 = vrcp.f32 %v1667_v26  ;;  %7392 = vmatprep.subr.msk.bf16.mxu1 %vm9906_vm1, %v7390_v7  ;;  %v1665_v9 = vpop.xlane.xlu0 %1664 }
 0x5a3   : > { %8350 = vrcp.f32 %v1665_v9 }
 0x5a5   : > { %v1671_v8 = vpop.xlane.xlu1 %1670 }
 0x5a6   : > { %8352 = vrcp.f32 %v1671_v8  ;;  %v1677_v55 = vpop.xlane.xlu0 %1676 }
 0x5a8   : > { %v8345_v16 = vpop.eup %8344 }
 0x5a9   : > { %v8347_v21 = vpop.eup %8346  ;;  %7395 = vmatpush3.bf16.xpose.msk.msra.mxu1 %vm9906_vm1, %v7390_v7  ;;  %v1669_v15 = vpop.xlane.xlu1 %1668  ;;  %v1706_v58 = vmul.f32 %v8345_v16, %v10213_v40 }
 0x5aa   : > { %8354 = vrcp.f32 %v1669_v15  ;;  %v1707_v35 = vmul.f32 %v8347_v21, %v10215_v61 }
 0x5ab   : > { %6797 = vmatprep.mubr.f32.mxu1 %v1706_v58  ;;  %8356 = vrcp.f32 %v1677_v55 }
 0x5ac   : > { %v8349_v42 = vpop.eup %8348  ;;  %6798 = vmatmul.mubr.f32.gmra.mrb[18].mxu1 %v1707_v35 }
 0x5ad   : > { %v8351_v18 = vpop.eup %8350  ;;  %v1675_v44 = vpop.xlane.xlu1 %1674  ;;  %v1709_v63 = vmul.f32 %v8349_v42, %v10220_v2 }
 0x5ae   : > { %v1708_v37 = vmul.f32 %v8351_v18, %v10222_v56  ;;  %8358 = vrcp.f32 %v1675_v44 }
 0x5b0   : > { %6800 = vmatprep.mubr.f32.mxu1 %v1708_v37  ;;  %v8353_v40 = vpop.eup %8352 }
 0x5b1   : > { %v1673_v32 = vpop.xlane.xlu1 %1672  ;;  %6801 = vmatmul.mubr.f32.gmra.mrb[20].mxu1 %v1709_v63  ;;  %v1683_v45 = vpop.xlane.xlu0 %1682  ;;  %v1711_v31 = vmul.f32 %v8353_v40, %v10229_v36 }
 0x5b2   : > { %8360 = vrcp.f32 %v1673_v32 }
 0x5b4   : > { %v8355_v0 = vpop.eup %8354 }
 0x5b5   : > { %v1679_v61 = vpop.xlane.xlu1 %1678  ;;  %v1681_v51 = vpop.xlane.xlu0 %1680  ;;  %v1710_v5 = vmul.f32 %v8355_v0, %v10236_v52 }
 0x5b6   : > { %8362 = vrcp.f32 %v1679_v61  ;;  %v8357_v7 = vpop.eup %8356 }
 0x5b7   : > { %8364 = vrcp.f32 %v1681_v51  ;;  %6803 = vmatprep.mubr.f32.mxu1 %v1710_v5  ;;  %v1714_v35 = vmul.f32 %v8357_v7, %v10231_v29 }
 0x5b8   : > { %6804 = vmatmul.mubr.f32.gmra.mrb[22].mxu1 %v1711_v31  ;;  %8366 = vrcp.f32 %v1683_v45  ;;  %v8359_v8 = vpop.eup %8358 }
 0x5b9   : > { %v1687_v2 = vpop.xlane.xlu1 %1686  ;;  %v7921_v56 = vpop.permute.xlu0 %7920  ;;  %v1713_v36 = vmul.f32 %v8359_v8, %v10240_v48 }
 0x5ba   : > { %v7923_v26 = vunpack.i.h.bf16 %v7921_v56  ;;  %v7922_v9 = vunpack.i.l.bf16 %v7921_v56  ;;  %8368 = vrcp.f32 %v1687_v2 }
 0x5bc   : > { %v8361_v16 = vpop.eup %8360  ;;  %v7396_v21 = vpack.c.bf16 %v7923_v26, %v7922_v9 }
 0x5bd   : > { %v1685_v15 = vpop.xlane.xlu1 %1684  ;;  %v1866_v58 = vpop.permute.xlu0 %1865  ;;  %v1712_v52 = vmul.f32 %v8361_v16, %v10243_v47 }
 0x5be   : > { %8370 = vrcp.f32 %v1685_v15  ;;  %7398 = vmatprep.subr.msk.bf16.mxu1 %vm9906_vm1, %v7396_v21 }
 0x5bf   : > { %6806 = vmatprep.mubr.f32.mxu1 %v1712_v52  ;;  %7401 = vmatpush3.bf16.xpose.msk.msra.mxu1 %vm9906_vm1, %v7396_v21 }
 0x5c0   : > { %v8363_v42 = vpop.eup %8362  ;;  %6807 = vmatmul.mubr.f32.gmra.mrb[24].mxu1 %v1713_v36 }
 0x5c1   : > { %v8365_v18 = vpop.eup %8364  ;;  %v1868_v55 = vpop.permute.xlu1 %1867  ;;  %6809 = vmatprep.mubr.f32.mxu1 %v1714_v35  ;;  %v1715_v47 = vmul.f32 %v8363_v42, %v10251_v24 }
 0x5c2   : > { %v1870_v44 = vpop.permute.xlu0 %1869  ;;  %v8367_v37 = vpop.eup %8366  ;;  %v1716_v63 = vmul.f32 %v8365_v18, %v10249_v54 }
 0x5c3   : > { %v1717_v45 = vmul.f32 %v8367_v37, %v10245_v23 }
 0x5c4   : > { %6810 = vmatmul.mubr.f32.gmra.mrb[26].mxu1 %v1715_v47  ;;  %v8369_v40 = vpop.eup %8368 }
 0x5c5   : > { %v1872_v32 = vpop.permute.xlu1 %1871  ;;  %6812 = vmatprep.mubr.f32.mxu1 %v1716_v63  ;;  %v1719_v5 = vmul.f32 %v8369_v40, %v10255_v41 }
 0x5c6   : > { %v1874_v48 = vpop.permute.xlu0 %1873 }
 0x5c8   : > { %v8371_v0 = vpop.eup %8370  ;;  %6813 = vmatmul.mubr.f32.gmra.mrb[28].mxu1 %v1717_v45 }
 0x5c9   : > { %v1876_v29 = vpop.permute.xlu1 %1875  ;;  %v1718_v51 = vmul.f32 %v8371_v0, %v10258_v22 }
 0x5ca   : > { %v1878_v61 = vpop.permute.xlu0 %1877 }
 0x5cb   : > { %6815 = vmatprep.mubr.f32.mxu1 %v1718_v51 }
 0x5cc   : > { %6816 = vmatmul.mubr.f32.gmra.mrb[30].mxu1 %v1719_v5 }
 0x5cd   : > { %v1880_v24 = vpop.permute.xlu1 %1879  ;;  %6850 = vmatprep.mubr.msk.f32.mxu1 %vm1334_vm0, %v1866_v58 }
 0x5ce   : > { %v1882_v54 = vpop.permute.xlu0 %1881 }
 0x5d0   : > { %6851 = vmatmul.mubr.msk.f32.vlgmr.msra.gmra.mrb[32].mxu1 %vm1334_vm0, %v1868_v55 }
 0x5d1   : > { %v1884_v31 = vpop.permute.xlu1 %1883  ;;  %6853 = vmatprep.mubr.msk.f32.mxu1 %vm1334_vm0, %v1870_v44 }
 0x5d2   : > { %v1886_v2 = vpop.permute.xlu0 %1885 }
 0x5d4   : > { %6854 = vmatmul.mubr.msk.f32.gmra.mrb[34].mxu1 %vm1334_vm0, %v1872_v32 }
 0x5d5   : > { %v1888_v23 = vpop.permute.xlu1 %1887  ;;  %6856 = vmatprep.mubr.msk.f32.mxu1 %vm1334_vm0, %v1874_v48 }
 0x5d6   : > { %v1890_v56 = vpop.permute.xlu0 %1889 }
 0x5d8   : > { %6857 = vmatmul.mubr.msk.f32.gmra.mrb[36].mxu1 %vm1334_vm0, %v1876_v29 }
 0x5d9   : > { %v1892_v41 = vpop.permute.xlu1 %1891  ;;  %6859 = vmatprep.mubr.msk.f32.mxu1 %vm1334_vm0, %v1878_v61 }
 0x5da   : > { %v1894_v22 = vpop.permute.xlu0 %1893 }
 0x5dc   : > { %6860 = vmatmul.mubr.msk.f32.gmra.mrb[38].mxu1 %vm1334_vm0, %v1880_v24 }
 0x5dd   : > { %v1896_v7 = vpop.permute.xlu1 %1895  ;;  %6862 = vmatprep.mubr.msk.f32.mxu1 %vm1334_vm0, %v1882_v54 }
 0x5de   : > { %v7926_v26 = vpop.permute.xlu0 %7925 }
 0x5df   : > { %v7928_v9 = vunpack.i.h.bf16 %v7926_v26  ;;  %v7927_v8 = vunpack.i.l.bf16 %v7926_v26 }
 0x5e0   : > { %6863 = vmatmul.mubr.msk.f32.gmra.mrb[40].mxu1 %vm1334_vm0, %v1884_v31 }
 0x5e1   : > { %v7402_v16 = vpack.c.bf16 %v7928_v9, %v7927_v8  ;;  %v7931_v21 = vpop.permute.xlu1 %7930  ;;  %6865 = vmatprep.mubr.msk.f32.mxu1 %vm1334_vm0, %v1886_v2 }
 0x5e2   : > { %v7941_v15 = vpop.permute.xlu0 %7940  ;;  %v7933_v58 = vunpack.i.h.bf16 %v7931_v21  ;;  %v7932_v52 = vunpack.i.l.bf16 %v7931_v21 }
 0x5e3   : > { %7403 = vmatprep.subr.bf16.mxu0 %v7402_v16  ;;  %v7943_v42 = vunpack.i.h.bf16 %v7941_v15  ;;  %v7942_v18 = vunpack.i.l.bf16 %v7941_v15 }
 0x5e4   : > { %7405 = vmatpush3.bf16.msra.mxu0 %v7402_v16  ;;  %6866 = vmatmul.mubr.msk.f32.gmra.mrb[42].mxu1 %vm1334_vm0, %v1888_v23  ;;  %v7406_v36 = vpack.c.bf16 %v7933_v58, %v7932_v52 }
 0x5e5   : > { %v7936_v35 = vpop.permute.xlu1 %7935  ;;  %6868 = vmatprep.mubr.msk.f32.mxu1 %vm1334_vm0, %v1890_v56  ;;  %v7414_v45 = vpack.c.bf16 %v7943_v42, %v7942_v18 }
 0x5e6   : > { %v7938_v55 = vunpack.i.h.bf16 %v7936_v35  ;;  %v7937_v44 = vunpack.i.l.bf16 %v7936_v35  ;;  %7407 = vmatprep.subr.bf16.mxu0 %v7406_v36  ;;  %v7946_v47 = vpop.permute.xlu0 %7945 }
 0x5e7   : > { %v7948_v32 = vunpack.i.h.bf16 %v7946_v47  ;;  %v7947_v48 = vunpack.i.l.bf16 %v7946_v47 }
 0x5e8   : > { %7409 = vmatpush3.bf16.msra.mxu0 %v7406_v36  ;;  %6869 = vmatmul.mubr.msk.f32.gmra.mrb[44].mxu1 %vm1334_vm0, %v1892_v41  ;;  %v7410_v37 = vpack.c.bf16 %v7938_v55, %v7937_v44 }
 0x5e9   : > { %v7951_v63 = vpop.permute.xlu1 %7950  ;;  %6871 = vmatprep.mubr.msk.f32.mxu1 %vm1334_vm0, %v1894_v22  ;;  %v7418_v61 = vpack.c.bf16 %v7948_v32, %v7947_v48  ;;  %v12721_v48 = vld [vmem:[#allocation34_spill] sm:$0xff] }
 0x5ea   : > { %7411 = vmatprep.subr.bf16.mxu0 %v7410_v37  ;;  %v7953_v0 = vunpack.i.h.bf16 %v7951_v63  ;;  %v7952_v29 = vunpack.i.l.bf16 %v7951_v63  ;;  %v7966_v56 = vpop.permute.xlu0 %7965 }
 0x5eb   : > { %v7968_v41 = vunpack.i.h.bf16 %v7966_v56  ;;  %v7967_v22 = vunpack.i.l.bf16 %v7966_v56 }
 0x5ec   : > { %7413 = vmatpush3.bf16.msra.mxu0 %v7410_v37  ;;  %6872 = vmatmul.mubr.msk.f32.gmra.mrb[46].mxu1 %vm1334_vm0, %v1896_v7  ;;  %v7422_v24 = vpack.c.bf16 %v7953_v0, %v7952_v29  ;;  %v12722_v0 = vld [vmem:[#allocation35_spill] sm:$0xff] }
 0x5ed   : > { %7415 = vmatprep.subr.bf16.mxu0 %v7414_v45  ;;  %v7956_v40 = vpop.permute.xlu1 %7955  ;;  %v10386_v26 = vpack.c.bf16 %v7968_v41, %v7967_v22  ;;  %v12725_v22 = vld [vmem:[#allocation37_spill] sm:$0xff] }
 0x5ee   : > { %v7958_v51 = vunpack.i.h.bf16 %v7956_v40  ;;  %v7957_v5 = vunpack.i.l.bf16 %v7956_v40 }
 0x5f0   : > { %7417 = vmatpush3.bf16.msra.mxu0 %v7414_v45  ;;  %v7426_v23 = vpack.c.bf16 %v7958_v51, %v7957_v5  ;;  %v12723_v51 = vld [vmem:[#allocation43_spill] sm:$0xff] }
 0x5f1   : > { %7419 = vmatprep.subr.bf16.mxu0 %v7418_v61  ;;  %v7961_v54 = vpop.permute.xlu1 %7960 }
 0x5f2   : > { %v7963_v31 = vunpack.i.h.bf16 %v7961_v54  ;;  %v7962_v2 = vunpack.i.l.bf16 %v7961_v54 }
 0x5f4   : > { %7421 = vmatpush3.bf16.msra.mxu0 %v7418_v61  ;;  %v7430_v7 = vpack.c.bf16 %v7963_v31, %v7962_v2  ;;  %v12724_v2 = vld [vmem:[#allocation36_spill] sm:$0xff] }
 0x5f5   : > { %7423 = vmatprep.subr.bf16.mxu0 %v7422_v24 }
 0x5f8   : > { %7425 = vmatpush3.bf16.msra.mxu0 %v7422_v24 }
 0x5f9   : > { %7427 = vmatprep.subr.bf16.mxu0 %v7426_v23 }
 0x5fc   : > { %7429 = vmatpush3.bf16.msra.mxu0 %v7426_v23 }
 0x5fd   : > { %7431 = vmatprep.subr.bf16.mxu0 %v7430_v7 }
 0x600   : > { %7433 = vmatpush3.bf16.msra.mxu0 %v7430_v7 }
 0x601   : > { %7436 = vmatprep.subr.msk.bf16.mxu0 %vm9906_vm1, %v10386_v26 }
 0x64b   : > { %v10391_v9 = vpop.f32.mrb[16].mxu1 }
 0x64c   : > { %12705 = vst [vmem:[#allocation50_spill] sm:$0xff] %v10391_v9  ;;  %v10393_v8 = vpop.f32.mrb[17].mxu1 }
 0x64d   : > { %12706 = vst [vmem:[#allocation51_spill] sm:$0xff] %v10393_v8 }
 0x67f   : > { %v10395_v16 = vpop.f32.mrb[18].mxu1 }
 0x680   : > { %12707 = vst [vmem:[#allocation52_spill] sm:$0xff] %v10395_v16  ;;  %v10397_v21 = vpop.f32.mrb[19].mxu1 }
 0x681   : > { %12708 = vst [vmem:[#allocation53_spill] sm:$0xff] %v10397_v21 }
 0x684   : > { %v10399_v15 = vpop.f32.mrb[20].mxu1 }
 0x685   : > { %12709 = vst [vmem:[#allocation54_spill] sm:$0xff] %v10399_v15  ;;  %v10401_v58 = vpop.f32.mrb[21].mxu1 }
 0x686   : > { %12710 = vst [vmem:[#allocation55_spill] sm:$0xff] %v10401_v58 }
 0x68b   : > { %v10403_v52 = vpop.f32.mrb[22].mxu1 }
 0x68c   : > { %12711 = vst [vmem:[#allocation56_spill] sm:$0xff] %v10403_v52  ;;  %v10405_v36 = vpop.f32.mrb[23].mxu1  ;;  %v12735_v52 = vld [vmem:[#allocation46_spill] sm:$0xff] }
 0x68d   : > { %12712 = vst [vmem:[#allocation57_spill] sm:$0xff] %v10405_v36 }
 0x693   : > { %v10407_v35 = vpop.f32.mrb[24].mxu1 }
 0x694   : > { %12713 = vst [vmem:[#allocation58_spill] sm:$0xff] %v10407_v35  ;;  %v10409_v42 = vpop.f32.mrb[25].mxu1 }
 0x695   : > { %12714 = vst [vmem:[#allocation59_spill] sm:$0xff] %v10409_v42  ;;  %v12733_v42 = vld [vmem:[#allocation45_spill] sm:$0xff] }
 0x697   : > { %v10411_v18 = vpop.f32.mrb[26].mxu1 }
 0x698   : > { %12715 = vst [vmem:[#allocation60_spill] sm:$0xff] %v10411_v18  ;;  %v10413_v55 = vpop.f32.mrb[27].mxu1 }
 0x699   : > { %12716 = vst [vmem:[#allocation61_spill] sm:$0xff] %v10413_v55  ;;  %v12731_v55 = vld [vmem:[#allocation42_spill] sm:$0xff] }
 0x69b   : > { %v10415_v44 = vpop.f32.mrb[28].mxu1 }
 0x69c   : > { %12717 = vst [vmem:[#allocation62_spill] sm:$0xff] %v10415_v44  ;;  %v10417_v47 = vpop.f32.mrb[29].mxu1 }
 0x69d   : > { %12718 = vst [vmem:[#allocation63_spill] sm:$0xff] %v10417_v47 }
 0x69f   : > { %v10419_v37 = vpop.f32.mrb[30].mxu1 }
 0x6a0   : > { %12719 = vst [vmem:[#allocation64_spill] sm:$0xff] %v10419_v37  ;;  %v10421_v63 = vpop.f32.mrb[31].mxu1 }
 0x6a1   : > { %12720 = vst [vmem:[#allocation65_spill] sm:$0xff] %v10421_v63 }
 0x6a3   : > { %v6852_v32 = vpop.f32.mrb[32].mxu1 }
 0x6a4   : > { %v2065_v45 = vadd.f32 %v6852_v32, %v12721_v48  ;;  %v2059_v40 = vpop.f32.mrb[33].mxu1 }
 0x6a5   : > { %v2060_v29 = vadd.f32 %v2059_v40, %v12722_v0  ;;  %v12726_v40 = vld [vmem:[#allocation38_spill] sm:$0xff] }
 0x6a6   : > { %2140 = vmax.xlane.f32.xlu1 %v2065_v45 }
 0x6a7   : > { %v6855_v61 = vpop.f32.mrb[34].mxu1  ;;  %2138 = vmax.xlane.f32.xlu0 %v2060_v29 }
 0x6a8   : > { %v10426_v5 = vadd.f32 %v6855_v61, %v12723_v51  ;;  %v2069_v24 = vpop.f32.mrb[35].mxu1  ;;  %v12727_v61 = vld [vmem:[#allocation27_spill] sm:$0xff] }
 0x6a9   : > { %v10430_v23 = vadd.f32 %v2069_v24, %v12724_v2  ;;  %v12728_v2 = vld [vmem:[#allocation39_spill] sm:$0xff] }
 0x6ab   : > { %v6858_v54 = vpop.f32.mrb[36].mxu1  ;;  %2144 = vmax.xlane.f32.xlu0 %v10426_v5 }
 0x6ac   : > { %v2079_v31 = vpop.f32.mrb[37].mxu1 }
 0x6ad   : > { %v10434_v7 = vadd.f32 %v2079_v31, %v12725_v22  ;;  %v12729_v22 = vld [vmem:[#allocation40_spill] sm:$0xff] }
 0x6af   : > { %v6861_v56 = vpop.f32.mrb[38].mxu1  ;;  %2142 = vmax.xlane.f32.xlu0 %v10430_v23 }
 0x6b0   : > { %v2089_v41 = vpop.f32.mrb[39].mxu1 }
 0x6b1   : > { %v10438_v0 = vadd.f32 %v2089_v41, %v12726_v40  ;;  %v12730_v40 = vld [vmem:[#allocation41_spill] sm:$0xff] }
 0x6b3   : > { %v6864_v32 = vpop.f32.mrb[40].mxu1  ;;  %2146 = vmax.xlane.f32.xlu0 %v10434_v7 }
 0x6b4   : > { %v2099_v48 = vpop.f32.mrb[41].mxu1  ;;  %v2105_v36 = vadd.f32 %v6864_v32, %v12735_v52 }
 0x6b5   : > { %v10444_v37 = vadd.f32 %v2099_v48, %v12728_v2  ;;  %v12732_v48 = vld [vmem:[#allocation44_spill] sm:$0xff] }
 0x6b6   : > { %v2085_v2 = vadd.f32 %v6858_v54, %v12732_v48  ;;  %v12738_v54 = vld [vmem:[#allocation49_spill] sm:$0xff] }
 0x6b7   : > { %7980 = vrot.lane.b32.xlu1 %v12727_v61, %s9087_s9  ;;  %v6867_v51 = vpop.f32.mrb[42].mxu1  ;;  %2150 = vmax.xlane.f32.xlu0 %v10438_v0 }
 0x6b8   : > { %v2109_v24 = vpop.f32.mrb[43].mxu1 }
 0x6b9   : > { %v10448_v44 = vadd.f32 %v2109_v24, %v12729_v22  ;;  %v2095_v24 = vadd.f32 %v6861_v56, %v12733_v42  ;;  %v12734_v22 = vld [vmem:[#allocation30_spill] sm:$0xff]  ;;  %v10476_v42 = vpop.permute.xlu1 %7970  ;;  %v10478_v56 = vpop.permute.xlu0 %7975 }
 0x6ba   : > { %12739 = vst [vmem:[#allocation34_spill] sm:$0xff] %v10478_v56 }
 0x6bb   : > { %v6870_v63 = vpop.f32.mrb[44].mxu1  ;;  %2154 = vmax.xlane.f32.xlu0 %v10444_v37 }
 0x6bc   : > { %v2119_v31 = vpop.f32.mrb[45].mxu1 }
 0x6bd   : > { %v10452_v18 = vadd.f32 %v2119_v31, %v12730_v40  ;;  %v12736_v31 = vld [vmem:[#allocation47_spill] sm:$0xff] }
 0x6be   : > { %v10465_v40 = vadd.f32 %v6867_v51, %v12736_v31 }
 0x6bf   : > { %v6873_v47 = vpop.f32.mrb[46].mxu1  ;;  %2158 = vmax.xlane.f32.xlu0 %v10448_v44 }
 0x6c0   : > { %v2129_v41 = vpop.f32.mrb[47].mxu1  ;;  %v10473_v48 = vadd.f32 %v6873_v47, %v12738_v54  ;;  %v12740_v54 = vld [vmem:[#allocation32_spill] sm:$0xff] }
 0x6c1   : > { %v10456_v35 = vadd.f32 %v2129_v41, %v12731_v55  ;;  %v12737_v55 = vld [vmem:[#allocation48_spill] sm:$0xff] }
 0x6c2   : > { %v10469_v41 = vadd.f32 %v6870_v63, %v12737_v55 }
 0x6c3   : > { %2162 = vmax.xlane.f32.xlu0 %v10452_v18 }
 0x6c7   : > { %2166 = vmax.xlane.f32.xlu0 %v10456_v35 }
 0x6db   : > { %2148 = vmax.xlane.f32.xlu1 %v2085_v2 }
 0x6dd   : > { %7985 = vrot.lane.b32.xlu0 %v12734_v22, %s9087_s9 }
 0x6df   : > { %2152 = vmax.xlane.f32.xlu1 %v2095_v24 }
 0x6e3   : > { %2156 = vmax.xlane.f32.xlu1 %v2105_v36 }
 0x6e7   : > { %2160 = vmax.xlane.f32.xlu1 %v10465_v40 }
 0x6eb   : > { %2164 = vmax.xlane.f32.xlu1 %v10469_v41 }
 0x6ef   : > { %2168 = vmax.xlane.f32.xlu1 %v10473_v48 }
 0x733   : > { %v2141_v52 = vpop.xlane.xlu1 %2140 }
 0x734   : > { %v2171_v32 = vsub.f32 %v2065_v45, %v2141_v52  ;;  %v2139_v51 = vpop.xlane.xlu0 %2138  ;;  %v12741_v45 = vld [vmem:[#allocation33_spill] sm:$0xff] }
 0x735   : > { %v2170_v31 = vsub.f32 %v2060_v29, %v2139_v51 }
 0x736   : > { %v2188_v15 = vmul.f32 1.442695, %v2171_v32 }
 0x737   : > { %v2186_v58 = vmul.f32 1.442695, %v2170_v31 }
 0x738   : > { %8372 = vpow2.f32 %v2188_v15  ;;  %v2145_v47 = vpop.xlane.xlu0 %2144  ;;  %v10490_v15 = vpop.permute.xlu1 %7980 }
 0x739   : > { %8374 = vpow2.f32 %v2186_v58  ;;  %12742 = vst [vmem:[#allocation35_spill] sm:$0xff] %v10490_v15  ;;  %v2173_v32 = vsub.f32 %v10426_v5, %v2145_v47 }
 0x73b   : > { %v2192_v9 = vmul.f32 1.442695, %v2173_v32 }
 0x73c   : > { %v2143_v16 = vpop.xlane.xlu0 %2142 }
 0x73d   : > { %v2172_v58 = vsub.f32 %v10430_v23, %v2143_v16 }
 0x73f   : > { %v2190_v21 = vmul.f32 1.442695, %v2172_v58 }
 0x740   : > { %v2147_v29 = vpop.xlane.xlu0 %2146 }
 0x741   : > { %8376 = vpow2.f32 %v2190_v21 }
 0x742   : > { %v10480_v63 = vpop.eup %8372  ;;  %8378 = vpow2.f32 %v2192_v9 }
 0x743   : > { %v10482_v55 = vpop.eup %8374  ;;  %2220 = vadd.xlane.f32.xlu0 %v10480_v63 }
 0x744   : > { %2218 = vadd.xlane.f32.xlu1 %v10482_v55  ;;  %v2151_v52 = vpop.xlane.xlu0 %2150 }
 0x748   : > { %v2155_v51 = vpop.xlane.xlu0 %2154 }
 0x749   : > { %v2178_v21 = vsub.f32 %v10444_v37, %v2155_v51 }
 0x74c   : > { %v2159_v30 = vpop.xlane.xlu0 %2158 }
 0x74d   : > { %v2180_v5 = vsub.f32 %v10448_v44, %v2159_v30 }
 0x755   : > { %7990 = vrot.lane.b32.xlu1 %v12740_v54, %s9087_s9  ;;  %v2174_v54 = vsub.f32 %v10434_v7, %v2147_v29  ;;  %v2163_v7 = vpop.xlane.xlu0 %2162 }
 0x756   : > { %v2182_v30 = vsub.f32 %v10452_v18, %v2163_v7 }
 0x757   : > { %v2194_v23 = vmul.f32 1.442695, %v2174_v54 }
 0x758   : > { %v2210_v29 = vmul.f32 1.442695, %v2182_v30  ;;  %v7973_v30 = vunpack.i.h.bf16 %v10476_v42 }
 0x759   : > { %7995 = vrot.lane.b32.xlu0 %v12741_v45, %s9087_s9  ;;  %v2176_v45 = vsub.f32 %v10438_v0, %v2151_v52 }
 0x75b   : > { %v2198_v47 = vmul.f32 1.442695, %v2176_v45 }
 0x768   : > { %v2149_v31 = vpop.xlane.xlu1 %2148 }
 0x769   : > { %v2175_v8 = vsub.f32 %v2085_v2, %v2149_v31 }
 0x76b   : > { %v2196_v22 = vmul.f32 1.442695, %v2175_v8  ;;  %v2206_v8 = vmul.f32 1.442695, %v2180_v5 }
 0x76c   : > { %v2153_v61 = vpop.xlane.xlu1 %2152 }
 0x76d   : > { %v2177_v56 = vsub.f32 %v2095_v24, %v2153_v61  ;;  %8380 = vpow2.f32 %v2196_v22  ;;  %v10498_v61 = vpop.eup %8376  ;;  %v2202_v22 = vmul.f32 1.442695, %v2178_v21 }
 0x76e   : > { %v10500_v0 = vpop.eup %8378 }
 0x76f   : > { %v2200_v15 = vmul.f32 1.442695, %v2177_v56 }
 0x770   : > { %v2157_v16 = vpop.xlane.xlu1 %2156 }
 0x771   : > { %8382 = vpow2.f32 %v2200_v15  ;;  %v2179_v2 = vsub.f32 %v2105_v36, %v2157_v16  ;;  %v2167_v15 = vpop.xlane.xlu0 %2166 }
 0x772   : > { %8384 = vpow2.f32 %v2194_v23 }
 0x773   : > { %8386 = vpow2.f32 %v2198_v47  ;;  %v2204_v9 = vmul.f32 1.442695, %v2179_v2 }
 0x774   : > { %v2161_v58 = vpop.xlane.xlu1 %2160  ;;  %8388 = vpow2.f32 %v2206_v8 }
 0x775   : > { %8390 = vpow2.f32 %v2204_v9  ;;  %v2181_v37 = vsub.f32 %v10465_v40, %v2161_v58  ;;  %v2184_v40 = vsub.f32 %v10456_v35, %v2167_v15  ;;  %v7986_v8 = vpop.permute.xlu0 %7985 }
 0x777   : > { %v10506_v44 = vpop.eup %8380  ;;  %v2208_v18 = vmul.f32 1.442695, %v2181_v37 }
 0x778   : > { %v2165_v24 = vpop.xlane.xlu1 %2164  ;;  %2222 = vadd.xlane.f32.xlu0 %v10498_v61 }
 0x779   : > { %v2183_v36 = vsub.f32 %v10469_v41, %v2165_v24  ;;  %2224 = vadd.xlane.f32.xlu1 %v10500_v0 }
 0x77b   : > { %v10509_v56 = vpop.eup %8382  ;;  %v2212_v54 = vmul.f32 1.442695, %v2183_v36  ;;  %v7972_v36 = vunpack.i.l.bf16 %v10476_v42  ;;  %v12745_v42 = vld [vmem:[#allocation35_spill] sm:$0xff] }
 0x77c   : > { %v2169_v45 = vpop.xlane.xlu1 %2168  ;;  %2228 = vadd.xlane.f32.xlu0 %v10506_v44  ;;  %v10514_v52 = vpop.eup %8384 }
 0x77d   : > { %8392 = vpow2.f32 %v2212_v54  ;;  %2232 = vadd.xlane.f32.xlu1 %v10509_v56  ;;  %v2185_v41 = vsub.f32 %v10473_v48, %v2169_v45  ;;  %v10516_v32 = vpop.eup %8386  ;;  %v2214_v48 = vmul.f32 1.442695, %v2184_v40  ;;  %v7440_v37 = vpack.c.bf16 %v7973_v30, %v7972_v36 }
 0x77e   : > { %8394 = vpow2.f32 %v2202_v22  ;;  %v10521_v31 = vpop.eup %8388 }
 0x77f   : > { %8396 = vpow2.f32 %v2210_v29  ;;  %v2216_v51 = vmul.f32 1.442695, %v2185_v41  ;;  %v10523_v16 = vpop.eup %8390  ;;  %v7987_v41 = vunpack.i.l.bf16 %v7986_v8 }
 0x780   : > { %2226 = vadd.xlane.f32.xlu0 %v10514_v52  ;;  %8398 = vpow2.f32 %v2208_v18 }
 0x781   : > { %2230 = vadd.xlane.f32.xlu1 %v10516_v32  ;;  %8400 = vpow2.f32 %v2216_v51 }
 0x782   : > { %8402 = vpow2.f32 %v2214_v48 }
 0x784   : > { %2238 = vadd.xlane.f32.xlu0 %v10521_v31 }
 0x785   : > { %2236 = vadd.xlane.f32.xlu1 %v10523_v16 }
 0x787   : > { %v10527_v23 = vpop.eup %8392 }
 0x788   : > { %v10529_v5 = vpop.eup %8394  ;;  %2244 = vadd.xlane.f32.xlu0 %v10527_v23 }
 0x789   : > { %2234 = vadd.xlane.f32.xlu1 %v10529_v5  ;;  %v10533_v35 = vpop.eup %8396 }
 0x78a   : > { %v10535_v47 = vpop.eup %8398 }
 0x78b   : > { %v10539_v2 = vpop.eup %8400 }
 0x78c   : > { %2242 = vadd.xlane.f32.xlu0 %v10533_v35  ;;  %v10542_v58 = vpop.eup %8402 }
 0x78d   : > { %2240 = vadd.xlane.f32.xlu1 %v10535_v47 }
 0x791   : > { %2248 = vadd.xlane.f32.xlu1 %v10539_v2 }
 0x795   : > { %2246 = vadd.xlane.f32.xlu1 %v10542_v58 }
 0x7a2   : > { %8000 = vrot.lane.b32.xlu0 %v10042_v34, %s9087_s9 }
 0x7a6   : > { %2491 = vrot.lane.b32.xlu0 %v9882_v20, %s9087_s9  ;;  %2493 = vrot.lane.b32.xlu1 %v9896_v17, %s9087_s9 }
 0x7aa   : > { %2495 = vrot.lane.b32.xlu0 %v9913_v4, %s9087_s9  ;;  %2497 = vrot.lane.b32.xlu1 %v9923_v33, %s9087_s9 }
 0x7ae   : > { %2499 = vrot.lane.b32.xlu0 %v9934_v62, %s9087_s9  ;;  %2501 = vrot.lane.b32.xlu1 %v9947_v19, %s9087_s9 }
 0x7b2   : > { %2503 = vrot.lane.b32.xlu0 %v9958_v25, %s9087_s9  ;;  %2505 = vrot.lane.b32.xlu1 %v9971_v59, %s9087_s9 }
 0x7b6   : > { %2507 = vrot.lane.b32.xlu0 %v9982_v57, %s9087_s9  ;;  %2509 = vrot.lane.b32.xlu1 %v9993_v39, %s9087_s9 }
 0x7ba   : > { %2511 = vrot.lane.b32.xlu0 %v10003_v49, %s9087_s9  ;;  %2513 = vrot.lane.b32.xlu1 %v10010_v28, %s9087_s9 }
 0x7be   : > { %2515 = vrot.lane.b32.xlu0 %v10017_v13, %s9087_s9  ;;  %2517 = vrot.lane.b32.xlu1 %v10024_v27, %s9087_s9 }
 0x7c2   : > { %2519 = vrot.lane.b32.xlu0 %v10031_v14, %s9087_s9  ;;  %2521 = vrot.lane.b32.xlu1 %v10038_v6, %s9087_s9 }
 0x7c6   : > { %8005 = vrot.lane.b32.xlu0 %v9910_v1, %s9087_s9  ;;  %8010 = vrot.lane.b32.xlu1 %v9930_v46, %s9087_s9 }
 0x7ca   : > { %8020 = vrot.lane.b32.xlu0 %v9954_v12, %s9087_s9  ;;  %8015 = vrot.lane.b32.xlu1 %v9943_v3, %s9087_s9 }
 0x7ce   : > { %8025 = vrot.lane.b32.xlu0 %v9967_v60, %s9087_s9  ;;  %8030 = vrot.lane.b32.xlu1 %v9978_v10, %s9087_s9 }
 0x7d0   : > { %v2221_v21 = vpop.xlane.xlu0 %2220 }
 0x7d1   : > { %8404 = vrcp.f32 %v2221_v21  ;;  %v2219_v7 = vpop.xlane.xlu1 %2218 }
 0x7d2   : > { %8406 = vrcp.f32 %v2219_v7  ;;  %8045 = vrot.lane.b32.xlu0 %v9902_v50, %s9088_s10  ;;  %8035 = vrot.lane.b32.xlu1 %v9989_v38, %s9087_s9 }
 0x7d4   : > { %v7996_v7 = vpop.permute.xlu0 %7995 }
 0x7d5   : > { %v7991_v40 = vpop.permute.xlu1 %7990 }
 0x7d6   : > { %8055 = vrot.lane.b32.xlu0 %v9952_v43, %s9088_s10  ;;  %8040 = vrot.lane.b32.xlu1 %v10000_v11, %s9087_s9  ;;  %v7993_v51 = vunpack.i.h.bf16 %v7991_v40  ;;  %v7992_v48 = vunpack.i.l.bf16 %v7991_v40 }
 0x7d8   : > { %v7464_v21 = vpack.c.bf16 %v7993_v51, %v7992_v48 }
 0x7da   : > { %8050 = vrot.lane.b32.xlu1 %v9928_v53, %s9088_s10  ;;  %v12744_v53 = vld [vmem:[#allocation34_spill] sm:$0xff] }
 0x7db   : > { %v8405_v9 = vpop.eup %8404  ;;  %v7978_v54 = vunpack.i.h.bf16 %v12744_v53  ;;  %v7977_v45 = vunpack.i.l.bf16 %v12744_v53 }
 0x7dc   : > { %v8407_v24 = vpop.eup %8406  ;;  %v2267_v22 = vmul.f32 %v8405_v9, %v10480_v63  ;;  %v7983_v63 = vunpack.i.h.bf16 %v12745_v42  ;;  %v7998_v9 = vunpack.i.h.bf16 %v7996_v7 }
 0x7dd   : > { %v2266_v50 = vmul.f32 %v8407_v24, %v10482_v55  ;;  %v7446_v29 = vpack.c.bf16 %v7978_v54, %v7977_v45  ;;  %v7982_v55 = vunpack.i.l.bf16 %v12745_v42 }
 0x7df   : > { %6906 = vmatprep.mubr.f32.mxu0 %v2266_v50  ;;  %v7452_v18 = vpack.c.bf16 %v7983_v63, %v7982_v55 }
 0x7e0   : > { %6907 = vmatmul.mubr.f32.vlgmr.msra.gmra.mrb[48].mxu0 %v2267_v22 }
 0x7e1   : > { %7439 = vmatpush3.bf16.xpose.msk.msra.mxu0 %vm9906_vm1, %v10386_v26  ;;  %v7988_v26 = vunpack.i.h.bf16 %v7986_v8  ;;  %v7997_v8 = vunpack.i.l.bf16 %v7996_v7 }
 0x7e2   : > { %7442 = vmatprep.subr.msk.bf16.mxu0 %vm9906_vm1, %v7440_v37 }
 0x7e3   : > { %v7458_v15 = vpack.c.bf16 %v7988_v26, %v7987_v41  ;;  %v7470_v36 = vpack.c.bf16 %v7998_v9, %v7997_v8 }
 0x7e9   : > { %7445 = vmatpush3.bf16.xpose.msk.msra.mxu0 %vm9906_vm1, %v7440_v37 }
 0x7ea   : > { %7448 = vmatprep.subr.msk.bf16.mxu0 %vm9906_vm1, %v7446_v29 }
 0x7f1   : > { %7451 = vmatpush3.bf16.xpose.msk.msra.mxu0 %vm9906_vm1, %v7446_v29 }
 0x7f2   : > { %7454 = vmatprep.subr.msk.bf16.mxu0 %vm9906_vm1, %v7452_v18 }
 0x7f9   : > { %7457 = vmatpush3.bf16.xpose.msk.msra.mxu0 %vm9906_vm1, %v7452_v18 }
 0x7fa   : > { %7460 = vmatprep.subr.msk.bf16.mxu0 %vm9906_vm1, %v7458_v15 }
 0x801   : > { %7463 = vmatpush3.bf16.xpose.msk.msra.mxu0 %vm9906_vm1, %v7458_v15 }
 0x802   : > { %7466 = vmatprep.subr.msk.bf16.mxu0 %vm9906_vm1, %v7464_v21 }
 0x805   : > { %v2223_v24 = vpop.xlane.xlu0 %2222 }
 0x806   : > { %8408 = vrcp.f32 %v2223_v24  ;;  %v2225_v30 = vpop.xlane.xlu1 %2224 }
 0x807   : > { %8410 = vrcp.f32 %v2225_v30 }
 0x809   : > { %7469 = vmatpush3.bf16.xpose.msk.msra.mxu0 %vm9906_vm1, %v7464_v21  ;;  %v2229_v50 = vpop.xlane.xlu0 %2228 }
 0x80a   : > { %7472 = vmatprep.subr.msk.bf16.mxu0 %vm9906_vm1, %v7470_v36  ;;  %v2233_v22 = vpop.xlane.xlu1 %2232  ;;  %8412 = vrcp.f32 %v2229_v50 }
 0x80d   : > { %v2227_v37 = vpop.xlane.xlu0 %2226 }
 0x80e   : > { %8414 = vrcp.f32 %v2227_v37  ;;  %v2231_v53 = vpop.xlane.xlu1 %2230 }
 0x80f   : > { %8416 = vrcp.f32 %v2231_v53 }
 0x810   : > { %v8409_v54 = vpop.eup %8408  ;;  %8418 = vrcp.f32 %v2233_v22 }
 0x811   : > { %v8411_v45 = vpop.eup %8410  ;;  %7475 = vmatpush3.bf16.xpose.msk.msra.mxu0 %vm9906_vm1, %v7470_v36  ;;  %v2239_v29 = vpop.xlane.xlu0 %2238  ;;  %v2268_v42 = vmul.f32 %v8409_v54, %v10498_v61 }
 0x812   : > { %v2237_v63 = vpop.xlane.xlu1 %2236  ;;  %v2269_v55 = vmul.f32 %v8411_v45, %v10500_v0  ;;  %8420 = vrcp.f32 %v2239_v29 }
 0x813   : > { %6909 = vmatprep.mubr.f32.mxu0 %v2268_v42  ;;  %8422 = vrcp.f32 %v2237_v63 }
 0x814   : > { %6910 = vmatmul.mubr.f32.gmra.mrb[50].mxu0 %v2269_v55  ;;  %v8413_v41 = vpop.eup %8412 }
 0x815   : > { %v2245_v18 = vpop.xlane.xlu0 %2244  ;;  %v2271_v61 = vmul.f32 %v8413_v41, %v10506_v44 }
 0x816   : > { %v2235_v26 = vpop.xlane.xlu1 %2234 }
 0x817   : > { %8424 = vrcp.f32 %v2235_v26 }
 0x818   : > { %v8415_v15 = vpop.eup %8414 }
 0x819   : > { %v8417_v40 = vpop.eup %8416  ;;  %v2243_v51 = vpop.xlane.xlu0 %2242  ;;  %v2270_v48 = vmul.f32 %v8415_v15, %v10514_v52 }
 0x81a   : > { %8426 = vrcp.f32 %v2243_v51  ;;  %v2241_v21 = vpop.xlane.xlu1 %2240  ;;  %v2272_v7 = vmul.f32 %v8417_v40, %v10516_v32  ;;  %v8419_v0 = vpop.eup %8418 }
 0x81b   : > { %8428 = vrcp.f32 %v2241_v21  ;;  %6912 = vmatprep.mubr.f32.mxu0 %v2270_v48  ;;  %v2273_v36 = vmul.f32 %v8419_v0, %v10509_v56 }
 0x81c   : > { %6913 = vmatmul.mubr.f32.gmra.mrb[52].mxu0 %v2271_v61  ;;  %8430 = vrcp.f32 %v2245_v18  ;;  %v8421_v50 = vpop.eup %8420 }
 0x81d   : > { %6915 = vmatprep.mubr.f32.mxu0 %v2272_v7  ;;  %v8001_v9 = vpop.permute.xlu0 %8000  ;;  %v8423_v52 = vpop.eup %8422  ;;  %v2276_v45 = vmul.f32 %v8421_v50, %v10521_v31 }
 0x81e   : > { %v8003_v8 = vunpack.i.h.bf16 %v8001_v9  ;;  %v8002_v24 = vunpack.i.l.bf16 %v8001_v9  ;;  %v2249_v30 = vpop.xlane.xlu1 %2248  ;;  %v2275_v54 = vmul.f32 %v8423_v52, %v10523_v16 }
 0x81f   : > { %8432 = vrcp.f32 %v2249_v30 }
 0x820   : > { %v7476_v22 = vpack.c.bf16 %v8003_v8, %v8002_v24  ;;  %6916 = vmatmul.mubr.f32.gmra.mrb[54].mxu0 %v2273_v36 }
 0x821   : > { %v8425_v37 = vpop.eup %8424  ;;  %v2492_v44 = vpop.permute.xlu0 %2491 }
 0x822   : > { %v2247_v32 = vpop.xlane.xlu1 %2246  ;;  %7478 = vmatprep.subr.msk.bf16.mxu0 %vm9906_vm1, %v7476_v22  ;;  %v2274_v53 = vmul.f32 %v8425_v37, %v10529_v5 }
 0x823   : > { %8434 = vrcp.f32 %v2247_v32  ;;  %7481 = vmatpush3.bf16.xpose.msk.msra.mxu0 %vm9906_vm1, %v7476_v22 }
 0x824   : > { %v8427_v56 = vpop.eup %8426  ;;  %6918 = vmatprep.mubr.f32.mxu0 %v2274_v53 }
 0x825   : > { %v8429_v29 = vpop.eup %8428  ;;  %6919 = vmatmul.mubr.f32.gmra.mrb[56].mxu0 %v2275_v54  ;;  %v2496_v42 = vpop.permute.xlu0 %2495  ;;  %v2278_v5 = vmul.f32 %v8427_v56, %v10533_v35 }
 0x826   : > { %v2494_v63 = vpop.permute.xlu1 %2493  ;;  %6921 = vmatprep.mubr.f32.mxu0 %v2276_v45  ;;  %v2277_v55 = vmul.f32 %v8429_v29, %v10535_v47  ;;  %v8431_v18 = vpop.eup %8430 }
 0x827   : > { %v2279_v16 = vmul.f32 %v8431_v18, %v10527_v23 }
 0x829   : > { %6922 = vmatmul.mubr.f32.gmra.mrb[58].mxu0 %v2277_v55  ;;  %v2500_v26 = vpop.permute.xlu0 %2499  ;;  %v8433_v15 = vpop.eup %8432 }
 0x82a   : > { %v2498_v41 = vpop.permute.xlu1 %2497  ;;  %6924 = vmatprep.mubr.f32.mxu0 %v2278_v5  ;;  %v2281_v21 = vmul.f32 %v8433_v15, %v10539_v2 }
 0x82d   : > { %v8435_v40 = vpop.eup %8434  ;;  %6925 = vmatmul.mubr.f32.gmra.mrb[60].mxu0 %v2279_v16  ;;  %v2504_v31 = vpop.permute.xlu0 %2503 }
 0x82e   : > { %v2502_v51 = vpop.permute.xlu1 %2501  ;;  %v2280_v48 = vmul.f32 %v8435_v40, %v10542_v58 }
 0x830   : > { %6927 = vmatprep.mubr.f32.mxu0 %v2280_v48 }
 0x831   : > { %6928 = vmatmul.mubr.f32.gmra.mrb[62].mxu0 %v2281_v21  ;;  %v2508_v47 = vpop.permute.xlu0 %2507 }
 0x832   : > { %v2506_v61 = vpop.permute.xlu1 %2505  ;;  %6962 = vmatprep.mubr.msk.f32.mxu0 %vm1334_vm0, %v2492_v44 }
 0x835   : > { %v2512_v35 = vpop.permute.xlu0 %2511  ;;  %6963 = vmatmul.mubr.msk.f32.vlgmr.msra.gmra.mrb[64].mxu0 %vm1334_vm0, %v2494_v63 }
 0x836   : > { %v2510_v7 = vpop.permute.xlu1 %2509  ;;  %6965 = vmatprep.mubr.msk.f32.mxu0 %vm1334_vm0, %v2496_v42 }
 0x839   : > { %v2516_v23 = vpop.permute.xlu0 %2515  ;;  %6966 = vmatmul.mubr.msk.f32.gmra.mrb[66].mxu0 %vm1334_vm0, %v2498_v41 }
 0x83a   : > { %v2514_v0 = vpop.permute.xlu1 %2513  ;;  %6968 = vmatprep.mubr.msk.f32.mxu0 %vm1334_vm0, %v2500_v26 }
 0x83d   : > { %v2520_v58 = vpop.permute.xlu0 %2519  ;;  %6969 = vmatmul.mubr.msk.f32.gmra.mrb[68].mxu0 %vm1334_vm0, %v2502_v51 }
 0x83e   : > { %v2518_v2 = vpop.permute.xlu1 %2517  ;;  %6971 = vmatprep.mubr.msk.f32.mxu0 %vm1334_vm0, %v2504_v31 }
 0x841   : > { %v8006_v9 = vpop.permute.xlu0 %8005  ;;  %6972 = vmatmul.mubr.msk.f32.gmra.mrb[70].mxu0 %vm1334_vm0, %v2506_v61 }
 0x842   : > { %v8008_v8 = vunpack.i.h.bf16 %v8006_v9  ;;  %v8007_v24 = vunpack.i.l.bf16 %v8006_v9  ;;  %v2522_v30 = vpop.permute.xlu1 %2521  ;;  %6974 = vmatprep.mubr.msk.f32.mxu0 %vm1334_vm0, %v2508_v47 }
 0x844   : > { %v7482_v36 = vpack.c.bf16 %v8008_v8, %v8007_v24 }
 0x845   : > { %6975 = vmatmul.mubr.msk.f32.gmra.mrb[72].mxu0 %vm1334_vm0, %v2510_v7  ;;  %v8021_v50 = vpop.permute.xlu0 %8020 }
 0x846   : > { %v8011_v52 = vpop.permute.xlu1 %8010  ;;  %6977 = vmatprep.mubr.msk.f32.mxu0 %vm1334_vm0, %v2512_v35  ;;  %7483 = vmatprep.subr.bf16.mxu1 %v7482_v36  ;;  %v8023_v53 = vunpack.i.h.bf16 %v8021_v50  ;;  %v8022_v54 = vunpack.i.l.bf16 %v8021_v50 }
 0x847   : > { %v8013_v22 = vunpack.i.h.bf16 %v8011_v52  ;;  %v8012_v37 = vunpack.i.l.bf16 %v8011_v52  ;;  %7485 = vmatpush3.bf16.msra.mxu1 %v7482_v36  ;;  %v12765_v36 = vld [vmem:[#allocation27_spill] sm:$0xff] }
 0x848   : > { %v7494_v5 = vpack.c.bf16 %v8023_v53, %v8022_v54 }
 0x849   : > { %6978 = vmatmul.mubr.msk.f32.gmra.mrb[74].mxu0 %vm1334_vm0, %v2514_v0  ;;  %v7486_v44 = vpack.c.bf16 %v8013_v22, %v8012_v37  ;;  %v8026_v29 = vpop.permute.xlu0 %8025 }
 0x84a   : > { %v8016_v32 = vpop.permute.xlu1 %8015  ;;  %6980 = vmatprep.mubr.msk.f32.mxu0 %vm1334_vm0, %v2516_v23  ;;  %v8028_v55 = vunpack.i.h.bf16 %v8026_v29  ;;  %v8027_v18 = vunpack.i.l.bf16 %v8026_v29 }
 0x84b   : > { %v8018_v56 = vunpack.i.h.bf16 %v8016_v32  ;;  %v8017_v45 = vunpack.i.l.bf16 %v8016_v32  ;;  %7487 = vmatprep.subr.bf16.mxu1 %v7486_v44  ;;  %v10759_v32 = vld [vmem:[%s9464_s6 + $0x30] sm:$0xff] }
 0x84c   : > { %7489 = vmatpush3.bf16.msra.mxu1 %v7486_v44  ;;  %v7498_v15 = vpack.c.bf16 %v8028_v55, %v8027_v18  ;;  %v10752_v18 = vld [vmem:[%s9464_s6 + $0x20] sm:$0xff]  ;;  %12764 = vst [vmem:[#allocation67_spill] sm:$0xff] %v10759_v32 }
 0x84d   : > { %6981 = vmatmul.mubr.msk.f32.gmra.mrb[76].mxu0 %vm1334_vm0, %v2518_v2  ;;  %v7490_v42 = vpack.c.bf16 %v8018_v56, %v8017_v45  ;;  %v8046_v35 = vpop.permute.xlu0 %8045  ;;  %12763 = vst [vmem:[#allocation66_spill] sm:$0xff] %v10752_v18 }
 0x84e   : > { %v8031_v63 = vpop.permute.xlu1 %8030  ;;  %6983 = vmatprep.mubr.msk.f32.mxu0 %vm1334_vm0, %v2520_v58  ;;  %v8048_v7 = vunpack.i.h.bf16 %v8046_v35  ;;  %v8047_v23 = vunpack.i.l.bf16 %v8046_v35 }
 0x84f   : > { %7491 = vmatprep.subr.bf16.mxu1 %v7490_v42  ;;  %v8033_v41 = vunpack.i.h.bf16 %v8031_v63  ;;  %v8032_v16 = vunpack.i.l.bf16 %v8031_v63 }
 0x850   : > { %7493 = vmatpush3.bf16.msra.mxu1 %v7490_v42  ;;  %v10670_v58 = vpack.c.bf16 %v8048_v7, %v8047_v23 }
 0x851   : > { %6984 = vmatmul.mubr.msk.f32.gmra.mrb[78].mxu0 %vm1334_vm0, %v2522_v30  ;;  %7495 = vmatprep.subr.bf16.mxu1 %v7494_v5  ;;  %v7502_v51 = vpack.c.bf16 %v8033_v41, %v8032_v16 }
 0x852   : > { %v8036_v26 = vpop.permute.xlu1 %8035 }
 0x853   : > { %v8038_v40 = vunpack.i.h.bf16 %v8036_v26  ;;  %v8037_v31 = vunpack.i.l.bf16 %v8036_v26 }
 0x854   : > { %7497 = vmatpush3.bf16.msra.mxu1 %v7494_v5 }
 0x855   : > { %7499 = vmatprep.subr.bf16.mxu1 %v7498_v15  ;;  %v7506_v61 = vpack.c.bf16 %v8038_v40, %v8037_v31 }
 0x856   : > { %v8041_v48 = vpop.permute.xlu1 %8040 }
 0x857   : > { %v8043_v21 = vunpack.i.h.bf16 %v8041_v48  ;;  %v8042_v47 = vunpack.i.l.bf16 %v8041_v48 }
 0x858   : > { %7501 = vmatpush3.bf16.msra.mxu1 %v7498_v15  ;;  %v10724_v15 = vld [vmem:[%s9464_s6 + $0x8] sm:$0xff] }
 0x859   : > { %7503 = vmatprep.subr.bf16.mxu1 %v7502_v51  ;;  %v7510_v0 = vpack.c.bf16 %v8043_v21, %v8042_v47  ;;  %v10738_v47 = vld [vmem:[%s9464_s6 + $0x18] sm:$0xff] }
 0x85c   : > { %7505 = vmatpush3.bf16.msra.mxu1 %v7502_v51  ;;  %v10730_v51 = vld [vmem:[%s9464_s6] sm:$0xff] }
 0x85d   : > { %7507 = vmatprep.subr.bf16.mxu1 %v7506_v61 }
 0x860   : > { %7509 = vmatpush3.bf16.msra.mxu1 %v7506_v61 }
 0x861   : > { %7511 = vmatprep.subr.bf16.mxu1 %v7510_v0 }
 0x864   : > { %7513 = vmatpush3.bf16.msra.mxu1 %v7510_v0  ;;  %v10745_v0 = vld [vmem:[%s9464_s6 + $0x10] sm:$0xff] }
 0x865   : > { %7516 = vmatprep.subr.msk.bf16.mxu1 %vm9906_vm1, %v10670_v58  ;;  %12762 = vst [vmem:[#allocation35_spill] sm:$0xff] %v10745_v0 }
 0x8b3   : > { %v10675_v2 = vpop.f32.mrb[48].mxu0 }
 0x8b4   : > { %12746 = vst [vmem:[#allocation43_spill] sm:$0xff] %v10675_v2  ;;  %v10677_v9 = vpop.f32.mrb[49].mxu0 }
 0x8b5   : > { %12747 = vst [vmem:[#allocation36_spill] sm:$0xff] %v10677_v9 }
 0x8e7   : > { %v10681_v24 = vpop.f32.mrb[50].mxu0 }
 0x8e8   : > { %12748 = vst [vmem:[#allocation37_spill] sm:$0xff] %v10681_v24  ;;  %v10683_v30 = vpop.f32.mrb[51].mxu0  ;;  %v10806_v24 = vld [vmem:[%s9464_s6 + $0x48] sm:$0xff] }
 0x8e9   : > { %12749 = vst [vmem:[#allocation38_spill] sm:$0xff] %v10683_v30  ;;  %v12771_v30 = vld [vmem:[#allocation30_spill] sm:$0xff] }
 0x8ea   : > { %12772 = vst [vmem:[#allocation30_spill] sm:$0xff] %v10806_v24 }
 0x8ef   : > { %v10687_v50 = vpop.f32.mrb[52].mxu0 }
 0x8f0   : > { %12750 = vst [vmem:[#allocation39_spill] sm:$0xff] %v10687_v50  ;;  %v10689_v52 = vpop.f32.mrb[53].mxu0 }
 0x8f1   : > { %12751 = vst [vmem:[#allocation40_spill] sm:$0xff] %v10689_v52  ;;  %v10810_v52 = vld [vmem:[%s9464_s6 + $0x58] sm:$0xff] }
 0x8f2   : > { %12773 = vst [vmem:[#allocation72_spill] sm:$0xff] %v10810_v52 }
 0x8f3   : > { %v10693_v37 = vpop.f32.mrb[54].mxu0 }
 0x8f4   : > { %12752 = vst [vmem:[#allocation41_spill] sm:$0xff] %v10693_v37  ;;  %v10695_v44 = vpop.f32.mrb[55].mxu0  ;;  %v10800_v37 = vld [vmem:[%s9464_s6 + $0x38] sm:$0xff] }
 0x8f5   : > { %12753 = vst [vmem:[#allocation42_spill] sm:$0xff] %v10695_v44  ;;  %12770 = vst [vmem:[#allocation71_spill] sm:$0xff] %v10800_v37 }
 0x8f8   : > { %v10699_v53 = vpop.f32.mrb[56].mxu0 }
 0x8f9   : > { %12754 = vst [vmem:[#allocation44_spill] sm:$0xff] %v10699_v53  ;;  %v10701_v54 = vpop.f32.mrb[57].mxu0 }
 0x8fa   : > { %12755 = vst [vmem:[#allocation45_spill] sm:$0xff] %v10701_v54  ;;  %v10789_v54 = vld [vmem:[%s9464_s6 + $0x70] sm:$0xff] }
 0x8fb   : > { %12769 = vst [vmem:[#allocation70_spill] sm:$0xff] %v10789_v54 }
 0x8fc   : > { %v10705_v45 = vpop.f32.mrb[58].mxu0 }
 0x8fd   : > { %12756 = vst [vmem:[#allocation46_spill] sm:$0xff] %v10705_v45  ;;  %v10707_v29 = vpop.f32.mrb[59].mxu0  ;;  %v10782_v45 = vld [vmem:[%s9464_s6 + $0x60] sm:$0xff] }
 0x8fe   : > { %12757 = vst [vmem:[#allocation47_spill] sm:$0xff] %v10707_v29  ;;  %12768 = vst [vmem:[#allocation69_spill] sm:$0xff] %v10782_v45 }
 0x900   : > { %v10711_v63 = vpop.f32.mrb[60].mxu0 }
 0x901   : > { %12758 = vst [vmem:[#allocation48_spill] sm:$0xff] %v10711_v63  ;;  %v10713_v55 = vpop.f32.mrb[61].mxu0 }
 0x902   : > { %12759 = vst [vmem:[#allocation49_spill] sm:$0xff] %v10713_v55  ;;  %v10775_v55 = vld [vmem:[%s9464_s6 + $0x50] sm:$0xff] }
 0x903   : > { %12767 = vst [vmem:[#allocation68_spill] sm:$0xff] %v10775_v55 }
 0x904   : > { %v10717_v5 = vpop.f32.mrb[62].mxu0 }
 0x905   : > { %12760 = vst [vmem:[#allocation25_spill] sm:$0xff] %v10717_v5  ;;  %v10719_v26 = vpop.f32.mrb[63].mxu0 }
 0x906   : > { %12761 = vst [vmem:[#allocation34_spill] sm:$0xff] %v10719_v26 }
 0x908   : > { %v6964_v16 = vpop.f32.mrb[64].mxu0 }
 0x909   : > { %v10727_v40 = vadd.f32 %v10724_v15, %v6964_v16  ;;  %v2685_v31 = vpop.f32.mrb[65].mxu0 }
 0x90a   : > { %v10733_v48 = vadd.f32 %v10730_v51, %v2685_v31 }
 0x90b   : > { %2766 = vmax.xlane.f32.xlu1 %v10727_v40 }
 0x90c   : > { %v6967_v21 = vpop.f32.mrb[66].mxu0  ;;  %2764 = vmax.xlane.f32.xlu0 %v10733_v48 }
 0x90d   : > { %v10741_v61 = vadd.f32 %v10738_v47, %v6967_v21  ;;  %v2695_v35 = vpop.f32.mrb[67].mxu0 }
 0x90e   : > { %v10748_v16 = vadd.f32 %v10745_v0, %v2695_v35 }
 0x910   : > { %v6970_v7 = vpop.f32.mrb[68].mxu0  ;;  %2770 = vmax.xlane.f32.xlu0 %v10741_v61 }
 0x911   : > { %v2705_v23 = vpop.f32.mrb[69].mxu0 }
 0x912   : > { %v10755_v21 = vadd.f32 %v10752_v18, %v2705_v23  ;;  %v10768_v23 = vld [vmem:[%s9464_s6 + $0x40] sm:$0xff] }
 0x913   : > { %12766 = vst [vmem:[#allocation27_spill] sm:$0xff] %v10768_v23 }
 0x914   : > { %v6973_v31 = vpop.f32.mrb[70].mxu0  ;;  %2768 = vmax.xlane.f32.xlu0 %v10748_v16 }
 0x915   : > { %v2715_v41 = vpop.f32.mrb[71].mxu0 }
 0x916   : > { %v10762_v35 = vadd.f32 %v10759_v32, %v2715_v41 }
 0x918   : > { %v6976_v42 = vpop.f32.mrb[72].mxu0  ;;  %2772 = vmax.xlane.f32.xlu0 %v10755_v21 }
 0x919   : > { %v2725_v56 = vpop.f32.mrb[73].mxu0 }
 0x91a   : > { %v10771_v26 = vadd.f32 %v10768_v23, %v2725_v56 }
 0x91c   : > { %8060 = vrot.lane.b32.xlu1 %v12765_v36, %s9088_s10  ;;  %v6979_v22 = vpop.f32.mrb[74].mxu0  ;;  %2776 = vmax.xlane.f32.xlu0 %v10762_v35 }
 0x91d   : > { %v2735_v8 = vpop.f32.mrb[75].mxu0  ;;  %v10813_v50 = vadd.f32 %v10810_v52, %v6979_v22  ;;  %v10832_v22 = vpop.permute.xlu0 %8055 }
 0x91e   : > { %v10778_v36 = vadd.f32 %v10775_v55, %v2735_v8  ;;  %v10796_v8 = vld [vmem:[%s9464_s6 + $0x28] sm:$0xff] }
 0x91f   : > { %v2711_v44 = vadd.f32 %v10796_v8, %v6970_v7  ;;  %v10817_v7 = vld [vmem:[%s9464_s6 + $0x68] sm:$0xff] }
 0x920   : > { %v6982_v5 = vpop.f32.mrb[76].mxu0  ;;  %2780 = vmax.xlane.f32.xlu0 %v10771_v26  ;;  %12774 = vst [vmem:[#allocation73_spill] sm:$0xff] %v10817_v7 }
 0x921   : > { %v2745_v41 = vpop.f32.mrb[77].mxu0 }
 0x922   : > { %v10785_v56 = vadd.f32 %v10782_v45, %v2745_v41  ;;  %v2721_v41 = vadd.f32 %v10800_v37, %v6973_v31  ;;  %v10820_v31 = vadd.f32 %v10817_v7, %v6982_v5  ;;  %v12776_v7 = vld [vmem:[#allocation32_spill] sm:$0xff] }
 0x924   : > { %v6985_v63 = vpop.f32.mrb[78].mxu0  ;;  %2784 = vmax.xlane.f32.xlu0 %v10778_v36 }
 0x925   : > { %v2755_v29 = vpop.f32.mrb[79].mxu0 }
 0x926   : > { %v10792_v53 = vadd.f32 %v10789_v54, %v2755_v29  ;;  %v2731_v29 = vadd.f32 %v10806_v24, %v6976_v42  ;;  %v10830_v42 = vpop.permute.xlu1 %8050 }
 0x928   : > { %2788 = vmax.xlane.f32.xlu0 %v10785_v56 }
 0x92c   : > { %2792 = vmax.xlane.f32.xlu0 %v10792_v53 }
 0x940   : > { %2774 = vmax.xlane.f32.xlu1 %v2711_v44 }
 0x942   : > { %8065 = vrot.lane.b32.xlu0 %v12771_v30, %s9088_s10  ;;  %v10824_v30 = vld [vmem:[%s9464_s6 + $0x78] sm:$0xff] }
 0x943   : > { %12775 = vst [vmem:[#allocation74_spill] sm:$0xff] %v10824_v30  ;;  %v10827_v9 = vadd.f32 %v10824_v30, %v6985_v63 }
 0x944   : > { %2778 = vmax.xlane.f32.xlu1 %v2721_v41 }
 0x948   : > { %2782 = vmax.xlane.f32.xlu1 %v2731_v29 }
 0x94c   : > { %2786 = vmax.xlane.f32.xlu1 %v10813_v50 }
 0x950   : > { %2790 = vmax.xlane.f32.xlu1 %v10820_v31 }
 0x954   : > { %2794 = vmax.xlane.f32.xlu1 %v10827_v9 }
 0x998   : > { %v2767_v2 = vpop.xlane.xlu1 %2766 }
 0x999   : > { %v2797_v38 = vsub.f32 %v10727_v40, %v2767_v2  ;;  %v2765_v11 = vpop.xlane.xlu0 %2764  ;;  %v12777_v40 = vld [vmem:[#allocation33_spill] sm:$0xff] }
 0x99a   : > { %v2796_v5 = vsub.f32 %v10733_v48, %v2765_v11 }
 0x99b   : > { %v2814_v54 = vmul.f32 1.442695, %v2797_v38 }
 0x99c   : > { %v2812_v45 = vmul.f32 1.442695, %v2796_v5 }
 0x99d   : > { %8436 = vpow2.f32 %v2814_v54  ;;  %v2771_v30 = vpop.xlane.xlu0 %2770  ;;  %v10846_v54 = vpop.permute.xlu1 %8060 }
 0x99e   : > { %8438 = vpow2.f32 %v2812_v45  ;;  %v2799_v48 = vsub.f32 %v10741_v61, %v2771_v30 }
 0x9a0   : > { %v2818_v23 = vmul.f32 1.442695, %v2799_v48 }
 0x9a1   : > { %v2769_v2 = vpop.xlane.xlu0 %2768 }
 0x9a2   : > { %v2798_v45 = vsub.f32 %v10748_v16, %v2769_v2 }
 0x9a4   : > { %v2816_v60 = vmul.f32 1.442695, %v2798_v45 }
 0x9a5   : > { %v2773_v38 = vpop.xlane.xlu0 %2772 }
 0x9a6   : > { %8440 = vpow2.f32 %v2816_v60 }
 0x9a7   : > { %v10836_v55 = vpop.eup %8436  ;;  %8442 = vpow2.f32 %v2818_v23 }
 0x9a8   : > { %v10838_v63 = vpop.eup %8438  ;;  %2846 = vadd.xlane.f32.xlu0 %v10836_v55 }
 0x9a9   : > { %2844 = vadd.xlane.f32.xlu1 %v10838_v63  ;;  %v2777_v11 = vpop.xlane.xlu0 %2776 }
 0x9ad   : > { %v2781_v5 = vpop.xlane.xlu0 %2780 }
 0x9ae   : > { %v2804_v60 = vsub.f32 %v10771_v26, %v2781_v5 }
 0x9b0   : > { %v10854_v23 = vpop.eup %8440 }
 0x9b1   : > { %v2785_v37 = vpop.xlane.xlu0 %2784 }
 0x9b2   : > { %v2806_v61 = vsub.f32 %v10778_v36, %v2785_v37  ;;  %v2828_v36 = vmul.f32 1.442695, %v2804_v60 }
 0x9ba   : > { %8070 = vrot.lane.b32.xlu1 %v12776_v7, %s9088_s10  ;;  %v2800_v7 = vsub.f32 %v10755_v21, %v2773_v38 }
 0x9bc   : > { %v2820_v2 = vmul.f32 1.442695, %v2800_v7 }
 0x9be   : > { %8075 = vrot.lane.b32.xlu0 %v12777_v40, %s9088_s10  ;;  %v2802_v40 = vsub.f32 %v10762_v35, %v2777_v11  ;;  %v10856_v35 = vpop.eup %8442 }
 0x9c0   : > { %v2824_v30 = vmul.f32 1.442695, %v2802_v40 }
 0x9cd   : > { %v2775_v52 = vpop.xlane.xlu1 %2774 }
 0x9ce   : > { %v2801_v10 = vsub.f32 %v2711_v44, %v2775_v52 }
 0x9d0   : > { %v2822_v32 = vmul.f32 1.442695, %v2801_v10  ;;  %v2832_v10 = vmul.f32 1.442695, %v2806_v61 }
 0x9d1   : > { %v2779_v24 = vpop.xlane.xlu1 %2778 }
 0x9d2   : > { %v2803_v18 = vsub.f32 %v2721_v41, %v2779_v24  ;;  %8444 = vpow2.f32 %v2822_v32  ;;  %v2789_v24 = vpop.xlane.xlu0 %2788 }
 0x9d3   : > { %v2808_v37 = vsub.f32 %v10785_v56, %v2789_v24 }
 0x9d4   : > { %v2826_v0 = vmul.f32 1.442695, %v2803_v18 }
 0x9d5   : > { %v2783_v16 = vpop.xlane.xlu1 %2782  ;;  %v2836_v11 = vmul.f32 1.442695, %v2808_v37 }
 0x9d6   : > { %8446 = vpow2.f32 %v2826_v0  ;;  %v2805_v52 = vsub.f32 %v2731_v29, %v2783_v16  ;;  %v2793_v48 = vpop.xlane.xlu0 %2792 }
 0x9d7   : > { %8448 = vpow2.f32 %v2820_v2 }
 0x9d8   : > { %8450 = vpow2.f32 %v2824_v30  ;;  %v2830_v21 = vmul.f32 1.442695, %v2805_v52 }
 0x9d9   : > { %v2787_v44 = vpop.xlane.xlu1 %2786  ;;  %8452 = vpow2.f32 %v2832_v10 }
 0x9da   : > { %8454 = vpow2.f32 %v2830_v21  ;;  %v2807_v26 = vsub.f32 %v10813_v50, %v2787_v44  ;;  %v2810_v50 = vsub.f32 %v10792_v53, %v2793_v48 }
 0x9dc   : > { %v10862_v0 = vpop.eup %8444  ;;  %v2834_v56 = vmul.f32 1.442695, %v2807_v26 }
 0x9dd   : > { %v2791_v32 = vpop.xlane.xlu1 %2790  ;;  %2848 = vadd.xlane.f32.xlu0 %v10854_v23 }
 0x9de   : > { %v2809_v18 = vsub.f32 %v10820_v31, %v2791_v32  ;;  %2850 = vadd.xlane.f32.xlu1 %v10856_v35 }
 0x9e0   : > { %v10865_v41 = vpop.eup %8446  ;;  %v2838_v29 = vmul.f32 1.442695, %v2809_v18 }
 0x9e1   : > { %v2795_v38 = vpop.xlane.xlu1 %2794  ;;  %2854 = vadd.xlane.f32.xlu0 %v10862_v0  ;;  %v10870_v45 = vpop.eup %8448 }
 0x9e2   : > { %8456 = vpow2.f32 %v2838_v29  ;;  %2858 = vadd.xlane.f32.xlu1 %v10865_v41  ;;  %v2811_v31 = vsub.f32 %v10827_v9, %v2795_v38  ;;  %v10872_v5 = vpop.eup %8450  ;;  %v2840_v9 = vmul.f32 1.442695, %v2810_v50 }
 0x9e3   : > { %8458 = vpow2.f32 %v2828_v36  ;;  %v10877_v40 = vpop.eup %8452 }
 0x9e4   : > { %8460 = vpow2.f32 %v2836_v11  ;;  %v2842_v7 = vmul.f32 1.442695, %v2811_v31  ;;  %v10879_v16 = vpop.eup %8454 }
 0x9e5   : > { %2852 = vadd.xlane.f32.xlu0 %v10870_v45  ;;  %8462 = vpow2.f32 %v2834_v56 }
 0x9e6   : > { %2856 = vadd.xlane.f32.xlu1 %v10872_v5  ;;  %8464 = vpow2.f32 %v2842_v7 }
 0x9e7   : > { %8466 = vpow2.f32 %v2840_v9 }
 0x9e9   : > { %2864 = vadd.xlane.f32.xlu0 %v10877_v40 }
 0x9ea   : > { %2862 = vadd.xlane.f32.xlu1 %v10879_v16 }
 0x9ec   : > { %v10883_v2 = vpop.eup %8456 }
 0x9ed   : > { %v10885_v61 = vpop.eup %8458  ;;  %2870 = vadd.xlane.f32.xlu0 %v10883_v2 }
 0x9ee   : > { %2860 = vadd.xlane.f32.xlu1 %v10885_v61  ;;  %v10889_v53 = vpop.eup %8460 }
 0x9ef   : > { %v10891_v30 = vpop.eup %8462 }
 0x9f0   : > { %v10895_v52 = vpop.eup %8464 }
 0x9f1   : > { %2868 = vadd.xlane.f32.xlu0 %v10889_v53  ;;  %v10898_v44 = vpop.eup %8466 }
 0x9f2   : > { %2866 = vadd.xlane.f32.xlu1 %v10891_v30 }
 0x9f6   : > { %2874 = vadd.xlane.f32.xlu1 %v10895_v52 }
 0x9fa   : > { %2872 = vadd.xlane.f32.xlu1 %v10898_v44 }
 0xa07   : > { %8080 = vrot.lane.b32.xlu0 %v10042_v34, %s9088_s10 }
 0xa0b   : > { %3101 = vrot.lane.b32.xlu0 %v9882_v20, %s9088_s10  ;;  %3103 = vrot.lane.b32.xlu1 %v9896_v17, %s9088_s10  ;;  %v8066_v20 = vpop.permute.xlu0 %8065 }
 0xa0f   : > { %3105 = vrot.lane.b32.xlu0 %v9913_v4, %s9088_s10  ;;  %3107 = vrot.lane.b32.xlu1 %v9923_v33, %s9088_s10 }
 0xa13   : > { %3109 = vrot.lane.b32.xlu0 %v9934_v62, %s9088_s10  ;;  %3111 = vrot.lane.b32.xlu1 %v9947_v19, %s9088_s10  ;;  %v8053_v19 = vunpack.i.h.bf16 %v10830_v42 }
 0xa17   : > { %3113 = vrot.lane.b32.xlu0 %v9958_v25, %s9088_s10  ;;  %3115 = vrot.lane.b32.xlu1 %v9971_v59, %s9088_s10  ;;  %v8057_v59 = vunpack.i.l.bf16 %v10832_v22 }
 0xa1b   : > { %3117 = vrot.lane.b32.xlu0 %v9982_v57, %s9088_s10  ;;  %3119 = vrot.lane.b32.xlu1 %v9993_v39, %s9088_s10  ;;  %v8063_v39 = vunpack.i.h.bf16 %v10846_v54 }
 0xa1f   : > { %3121 = vrot.lane.b32.xlu0 %v10003_v49, %s9088_s10  ;;  %3123 = vrot.lane.b32.xlu1 %v10010_v28, %s9088_s10  ;;  %v8062_v49 = vunpack.i.l.bf16 %v10846_v54 }
 0xa21   : > { %v7532_v28 = vpack.c.bf16 %v8063_v39, %v8062_v49 }
 0xa23   : > { %3125 = vrot.lane.b32.xlu0 %v10017_v13, %s9088_s10  ;;  %3127 = vrot.lane.b32.xlu1 %v10024_v27, %s9088_s10  ;;  %v8068_v13 = vunpack.i.h.bf16 %v8066_v20  ;;  %v8067_v27 = vunpack.i.l.bf16 %v8066_v20 }
 0xa27   : > { %3129 = vrot.lane.b32.xlu0 %v10031_v14, %s9088_s10  ;;  %3131 = vrot.lane.b32.xlu1 %v10038_v6, %s9088_s10  ;;  %v7538_v14 = vpack.c.bf16 %v8068_v13, %v8067_v27 }
 0xa2b   : > { %8085 = vrot.lane.b32.xlu0 %v9910_v1, %s9088_s10  ;;  %8090 = vrot.lane.b32.xlu1 %v9930_v46, %s9088_s10  ;;  %v8052_v1 = vunpack.i.l.bf16 %v10830_v42 }
 0xa2f   : > { %8095 = vrot.lane.b32.xlu0 %v9943_v3, %s9088_s10  ;;  %8100 = vrot.lane.b32.xlu1 %v9954_v12, %s9088_s10  ;;  %v7520_v3 = vpack.c.bf16 %v8053_v19, %v8052_v1  ;;  %v8058_v12 = vunpack.i.h.bf16 %v10832_v22 }
 0xa31   : > { %v7526_v57 = vpack.c.bf16 %v8058_v12, %v8057_v59 }
 0xa35   : > { %v2847_v17 = vpop.xlane.xlu0 %2846 }
 0xa36   : > { %8468 = vrcp.f32 %v2847_v17  ;;  %v2845_v4 = vpop.xlane.xlu1 %2844 }
 0xa37   : > { %8470 = vrcp.f32 %v2845_v4 }
 0xa39   : > { %v8076_v42 = vpop.permute.xlu0 %8075 }
 0xa3a   : > { %v8071_v6 = vpop.permute.xlu1 %8070  ;;  %v8078_v22 = vunpack.i.h.bf16 %v8076_v42 }
 0xa3b   : > { %v8073_v34 = vunpack.i.h.bf16 %v8071_v6 }
 0xa40   : > { %v8469_v33 = vpop.eup %8468 }
 0xa41   : > { %v8471_v62 = vpop.eup %8470  ;;  %v2893_v46 = vmul.f32 %v8469_v33, %v10836_v55 }
 0xa42   : > { %v2892_v25 = vmul.f32 %v8471_v62, %v10838_v63  ;;  %v8077_v63 = vunpack.i.l.bf16 %v8076_v42 }
 0xa44   : > { %7018 = vmatprep.mubr.f32.mxu1 %v2892_v25  ;;  %v7550_v60 = vpack.c.bf16 %v8078_v22, %v8077_v63 }
 0xa45   : > { %7019 = vmatmul.mubr.f32.vlgmr.msra.gmra.mrb[48].mxu1 %v2893_v46 }
 0xa46   : > { %7519 = vmatpush3.bf16.xpose.msk.msra.mxu1 %vm9906_vm1, %v10670_v58  ;;  %v8072_v58 = vunpack.i.l.bf16 %v8071_v6 }
 0xa47   : > { %7522 = vmatprep.subr.msk.bf16.mxu1 %vm9906_vm1, %v7520_v3 }
 0xa48   : > { %v7544_v55 = vpack.c.bf16 %v8073_v34, %v8072_v58 }
 0xa4e   : > { %7525 = vmatpush3.bf16.xpose.msk.msra.mxu1 %vm9906_vm1, %v7520_v3 }
 0xa4f   : > { %7528 = vmatprep.subr.msk.bf16.mxu1 %vm9906_vm1, %v7526_v57 }
 0xa56   : > { %7531 = vmatpush3.bf16.xpose.msk.msra.mxu1 %vm9906_vm1, %v7526_v57 }
 0xa57   : > { %7534 = vmatprep.subr.msk.bf16.mxu1 %vm9906_vm1, %v7532_v28 }
 0xa5e   : > { %7537 = vmatpush3.bf16.xpose.msk.msra.mxu1 %vm9906_vm1, %v7532_v28 }
 0xa5f   : > { %7540 = vmatprep.subr.msk.bf16.mxu1 %vm9906_vm1, %v7538_v14 }
 0xa66   : > { %7543 = vmatpush3.bf16.xpose.msk.msra.mxu1 %vm9906_vm1, %v7538_v14 }
 0xa67   : > { %7546 = vmatprep.subr.msk.bf16.mxu1 %vm9906_vm1, %v7544_v55 }
 0xa6a   : > { %v2849_v54 = vpop.xlane.xlu0 %2848 }
 0xa6b   : > { %8472 = vrcp.f32 %v2849_v54  ;;  %v2851_v10 = vpop.xlane.xlu1 %2850 }
 0xa6c   : > { %8474 = vrcp.f32 %v2851_v10 }
 0xa6e   : > { %7549 = vmatpush3.bf16.xpose.msk.msra.mxu1 %vm9906_vm1, %v7544_v55  ;;  %v2855_v24 = vpop.xlane.xlu0 %2854 }
 0xa6f   : > { %7552 = vmatprep.subr.msk.bf16.mxu1 %vm9906_vm1, %v7550_v60  ;;  %v2859_v21 = vpop.xlane.xlu1 %2858  ;;  %8476 = vrcp.f32 %v2855_v24 }
 0xa72   : > { %v2853_v32 = vpop.xlane.xlu0 %2852 }
 0xa73   : > { %8478 = vrcp.f32 %v2853_v32  ;;  %v2857_v37 = vpop.xlane.xlu1 %2856 }
 0xa74   : > { %8480 = vrcp.f32 %v2857_v37 }
 0xa75   : > { %v8473_v18 = vpop.eup %8472  ;;  %8482 = vrcp.f32 %v2859_v21 }
 0xa76   : > { %v8475_v36 = vpop.eup %8474  ;;  %7555 = vmatpush3.bf16.xpose.msk.msra.mxu1 %vm9906_vm1, %v7550_v60  ;;  %v2865_v26 = vpop.xlane.xlu0 %2864  ;;  %v2894_v29 = vmul.f32 %v8473_v18, %v10854_v23 }
 0xa77   : > { %v2863_v38 = vpop.xlane.xlu1 %2862  ;;  %v2895_v11 = vmul.f32 %v8475_v36, %v10856_v35  ;;  %8484 = vrcp.f32 %v2865_v26 }
 0xa78   : > { %7021 = vmatprep.mubr.f32.mxu1 %v2894_v29  ;;  %8486 = vrcp.f32 %v2863_v38 }
 0xa79   : > { %7022 = vmatmul.mubr.f32.gmra.mrb[50].mxu1 %v2895_v11  ;;  %v8477_v48 = vpop.eup %8476 }
 0xa7a   : > { %v2871_v56 = vpop.xlane.xlu0 %2870  ;;  %v2897_v23 = vmul.f32 %v8477_v48, %v10862_v0 }
 0xa7b   : > { %v2861_v31 = vpop.xlane.xlu1 %2860 }
 0xa7c   : > { %8488 = vrcp.f32 %v2861_v31 }
 0xa7d   : > { %v8479_v50 = vpop.eup %8478 }
 0xa7e   : > { %v8481_v7 = vpop.eup %8480  ;;  %v2869_v9 = vpop.xlane.xlu0 %2868  ;;  %v2896_v20 = vmul.f32 %v8479_v50, %v10870_v45 }
 0xa7f   : > { %8490 = vrcp.f32 %v2869_v9  ;;  %v2867_v17 = vpop.xlane.xlu1 %2866  ;;  %v2898_v4 = vmul.f32 %v8481_v7, %v10872_v5  ;;  %v8483_v35 = vpop.eup %8482 }
 0xa80   : > { %8492 = vrcp.f32 %v2867_v17  ;;  %7024 = vmatprep.mubr.f32.mxu1 %v2896_v20  ;;  %v2899_v25 = vmul.f32 %v8483_v35, %v10865_v41  ;;  %v12778_v20 = vmov 0.0  }
 0xa81   : > { %7025 = vmatmul.mubr.f32.gmra.mrb[52].mxu1 %v2897_v23  ;;  %8494 = vrcp.f32 %v2871_v56  ;;  %v8485_v46 = vpop.eup %8484 }
 0xa82   : > { %7027 = vmatprep.mubr.f32.mxu1 %v2898_v4  ;;  %v8081_v33 = vpop.permute.xlu0 %8080  ;;  %v8487_v45 = vpop.eup %8486  ;;  %v2902_v39 = vmul.f32 %v8485_v46, %v10877_v40 }
 0xa83   : > { %v8083_v62 = vunpack.i.h.bf16 %v8081_v33  ;;  %v8082_v19 = vunpack.i.l.bf16 %v8081_v33  ;;  %v2875_v1 = vpop.xlane.xlu1 %2874  ;;  %v2901_v57 = vmul.f32 %v8487_v45, %v10879_v16 }
 0xa84   : > { %8496 = vrcp.f32 %v2875_v1 }
 0xa85   : > { %v7556_v3 = vpack.c.bf16 %v8083_v62, %v8082_v19  ;;  %7028 = vmatmul.mubr.f32.gmra.mrb[54].mxu1 %v2899_v25 }
 0xa86   : > { %v8489_v12 = vpop.eup %8488  ;;  %v3102_v0 = vpop.permute.xlu0 %3101 }
 0xa87   : > { %v2873_v5 = vpop.xlane.xlu1 %2872  ;;  %7558 = vmatprep.subr.msk.bf16.mxu1 %vm9906_vm1, %v7556_v3  ;;  %v2900_v59 = vmul.f32 %v8489_v12, %v10885_v61 }
 0xa88   : > { %8498 = vrcp.f32 %v2873_v5  ;;  %7561 = vmatpush3.bf16.xpose.msk.msra.mxu1 %vm9906_vm1, %v7556_v3 }
 0xa89   : > { %v8491_v41 = vpop.eup %8490  ;;  %7030 = vmatprep.mubr.f32.mxu1 %v2900_v59 }
 0xa8a   : > { %v8493_v49 = vpop.eup %8492  ;;  %7031 = vmatmul.mubr.f32.gmra.mrb[56].mxu1 %v2901_v57  ;;  %v3106_v28 = vpop.permute.xlu0 %3105  ;;  %v2904_v61 = vmul.f32 %v8491_v41, %v10889_v53 }
 0xa8b   : > { %v3104_v13 = vpop.permute.xlu1 %3103  ;;  %7033 = vmatprep.mubr.f32.mxu1 %v2902_v39  ;;  %v2903_v27 = vmul.f32 %v8493_v49, %v10891_v30  ;;  %v8495_v14 = vpop.eup %8494 }
 0xa8c   : > { %v2905_v16 = vmul.f32 %v8495_v14, %v10883_v2 }
 0xa8e   : > { %7034 = vmatmul.mubr.f32.gmra.mrb[58].mxu1 %v2903_v27  ;;  %v3110_v6 = vpop.permute.xlu0 %3109  ;;  %v8497_v34 = vpop.eup %8496 }
 0xa8f   : > { %v3108_v43 = vpop.permute.xlu1 %3107  ;;  %7036 = vmatprep.mubr.f32.mxu1 %v2904_v61  ;;  %v2907_v22 = vmul.f32 %v8497_v34, %v10895_v52 }
 0xa92   : > { %v8499_v58 = vpop.eup %8498  ;;  %7037 = vmatmul.mubr.f32.gmra.mrb[60].mxu1 %v2905_v16  ;;  %v3114_v40 = vpop.permute.xlu0 %3113 }
 0xa93   : > { %v3112_v55 = vpop.permute.xlu1 %3111  ;;  %v2906_v42 = vmul.f32 %v8499_v58, %v10898_v44 }
 0xa95   : > { %7039 = vmatprep.mubr.f32.mxu1 %v2906_v42 }
 0xa96   : > { %7040 = vmatmul.mubr.f32.gmra.mrb[62].mxu1 %v2907_v22  ;;  %v3118_v30 = vpop.permute.xlu0 %3117 }
 0xa97   : > { %v3116_v63 = vpop.permute.xlu1 %3115  ;;  %7074 = vmatprep.mubr.msk.f32.mxu1 %vm1334_vm0, %v3102_v0 }
 0xa9a   : > { %v3122_v53 = vpop.permute.xlu0 %3121  ;;  %7075 = vmatmul.mubr.msk.f32.vlgmr.msra.gmra.mrb[64].mxu1 %vm1334_vm0, %v3104_v13 }
 0xa9b   : > { %v3120_v54 = vpop.permute.xlu1 %3119  ;;  %7077 = vmatprep.mubr.msk.f32.mxu1 %vm1334_vm0, %v3106_v28 }
 0xa9e   : > { %v3126_v2 = vpop.permute.xlu0 %3125  ;;  %7078 = vmatmul.mubr.msk.f32.gmra.mrb[66].mxu1 %vm1334_vm0, %v3108_v43 }
 0xa9f   : > { %v3124_v10 = vpop.permute.xlu1 %3123  ;;  %7080 = vmatprep.mubr.msk.f32.mxu1 %vm1334_vm0, %v3110_v6 }
 0xaa2   : > { %v3130_v44 = vpop.permute.xlu0 %3129  ;;  %7081 = vmatmul.mubr.msk.f32.gmra.mrb[68].mxu1 %vm1334_vm0, %v3112_v55 }
 0xaa3   : > { %v3128_v52 = vpop.permute.xlu1 %3127  ;;  %7083 = vmatprep.mubr.msk.f32.mxu1 %vm1334_vm0, %v3114_v40 }
 0xaa6   : > { %v8086_v60 = vpop.permute.xlu0 %8085  ;;  %7084 = vmatmul.mubr.msk.f32.gmra.mrb[70].mxu1 %vm1334_vm0, %v3116_v63 }
 0xaa7   : > { %v8088_v24 = vunpack.i.h.bf16 %v8086_v60  ;;  %v8087_v21 = vunpack.i.l.bf16 %v8086_v60  ;;  %v3132_v32 = vpop.permute.xlu1 %3131  ;;  %7086 = vmatprep.mubr.msk.f32.mxu1 %vm1334_vm0, %v3118_v30  ;;  %v12779_v30 = vld [vmem:[#allocation35_spill] sm:$0xff] }
 0xaa8   : > { %v12783_v60 = vld [vmem:[#allocation67_spill] sm:$0xff] }
 0xaa9   : > { %v7562_v37 = vpack.c.bf16 %v8088_v24, %v8087_v21 }
 0xaaa   : > { %v8096_v18 = vpop.permute.xlu0 %8095  ;;  %7087 = vmatmul.mubr.msk.f32.gmra.mrb[72].mxu1 %vm1334_vm0, %v3120_v54 }
 0xaab   : > { %v8091_v36 = vpop.permute.xlu1 %8090  ;;  %7089 = vmatprep.mubr.msk.f32.mxu1 %vm1334_vm0, %v3122_v53  ;;  %7563 = vmatprep.subr.bf16.mxu0 %v7562_v37  ;;  %v8098_v26 = vunpack.i.h.bf16 %v8096_v18  ;;  %v8097_v29 = vunpack.i.l.bf16 %v8096_v18 }
 0xaac   : > { %v8093_v38 = vunpack.i.h.bf16 %v8091_v36  ;;  %v8092_v11 = vunpack.i.l.bf16 %v8091_v36  ;;  %7565 = vmatpush3.bf16.msra.mxu0 %v7562_v37  ;;  %v12784_v37 = vld [vmem:[#allocation27_spill] sm:$0xff] }
 0xaad   : > { %v7570_v48 = vpack.c.bf16 %v8098_v26, %v8097_v29 }
 0xaae   : > { %v7566_v56 = vpack.c.bf16 %v8093_v38, %v8092_v11  ;;  %7090 = vmatmul.mubr.msk.f32.gmra.mrb[74].mxu1 %vm1334_vm0, %v3124_v10  ;;  %v12785_v11 = vld [vmem:[#allocation28_spill] sm:$0xff] }
 0xaaf   : > { %v8101_v31 = vpop.permute.xlu1 %8100  ;;  %7092 = vmatprep.mubr.msk.f32.mxu1 %vm1334_vm0, %v3126_v2  ;;  %v12781_v2 = vld [vmem:[#allocation66_spill] sm:$0xff] }
 0xab0   : > { %v8103_v50 = vunpack.i.h.bf16 %v8101_v31  ;;  %v8102_v7 = vunpack.i.l.bf16 %v8101_v31  ;;  %7567 = vmatprep.subr.bf16.mxu0 %v7566_v56  ;;  %v12787_v31 = vld [vmem:[#allocation72_spill] sm:$0xff] }
 0xab1   : > { %7569 = vmatpush3.bf16.msra.mxu0 %v7566_v56  ;;  %v12786_v56 = vld [vmem:[#allocation26_spill] sm:$0xff] }
 0xab2   : > { %7093 = vmatmul.mubr.msk.f32.gmra.mrb[76].mxu1 %vm1334_vm0, %v3128_v52  ;;  %7571 = vmatprep.subr.bf16.mxu0 %v7570_v48  ;;  %v7574_v9 = vpack.c.bf16 %v8103_v50, %v8102_v7  ;;  %v12788_v50 = vld [vmem:[#allocation73_spill] sm:$0xff] }
 0xab3   : > { %7095 = vmatprep.mubr.msk.f32.mxu1 %vm1334_vm0, %v3130_v44  ;;  %v12782_v44 = vld [vmem:[#allocation30_spill] sm:$0xff] }
 0xab5   : > { %7573 = vmatpush3.bf16.msra.mxu0 %v7570_v48 }
 0xab6   : > { %7096 = vmatmul.mubr.msk.f32.gmra.mrb[78].mxu1 %vm1334_vm0, %v3132_v32  ;;  %7575 = vmatprep.subr.bf16.mxu0 %v7574_v9 }
 0xab7   : > { %4621 = vmatprep.mubr.f32.mxu1 %v12778_v20 }
 0xab9   : > { %7577 = vmatpush3.bf16.msra.mxu0 %v7574_v9  ;;  %v12789_v9 = vld [vmem:[#allocation68_spill] sm:$0xff] }
 0xb18   : > { %v11013_v17 = vpop.f32.mrb[48].mxu1 }
 0xb19   : > { %v11015_v23 = vpop.f32.mrb[49].mxu1 }
 0xb1a   : > { %v8129_v4 = vpack.i.bf16 %v11013_v17, %v11015_v23 }
 0xb4c   : > { %v11019_v35 = vpop.f32.mrb[50].mxu1 }
 0xb4d   : > { %v11021_v33 = vpop.f32.mrb[51].mxu1 }
 0xb4e   : > { %v8144_v62 = vpack.i.bf16 %v11019_v35, %v11021_v33 }
 0xb54   : > { %v11025_v19 = vpop.f32.mrb[52].mxu1 }
 0xb55   : > { %v11027_v1 = vpop.f32.mrb[53].mxu1 }
 0xb56   : > { %v8159_v25 = vpack.i.bf16 %v11025_v19, %v11027_v1 }
 0xb58   : > { %v11031_v46 = vpop.f32.mrb[54].mxu1 }
 0xb59   : > { %v11033_v45 = vpop.f32.mrb[55].mxu1 }
 0xb5a   : > { %v8174_v3 = vpack.i.bf16 %v11031_v46, %v11033_v45 }
 0xb5d   : > { %v11037_v12 = vpop.f32.mrb[56].mxu1 }
 0xb5e   : > { %v11039_v0 = vpop.f32.mrb[57].mxu1 }
 0xb5f   : > { %v8189_v5 = vpack.i.bf16 %v11037_v12, %v11039_v0  ;;  %v12813_v12 = vld [vmem:[#allocation48_spill] sm:$0xff]  ;;  %v12814_v0 = vld [vmem:[#allocation49_spill] sm:$0xff] }
 0xb61   : > { %v11043_v59 = vpop.f32.mrb[58].mxu1 }
 0xb62   : > { %v11045_v57 = vpop.f32.mrb[59].mxu1 }
 0xb63   : > { %v8204_v41 = vpack.i.bf16 %v11043_v59, %v11045_v57  ;;  %v12816_v59 = vld [vmem:[#allocation25_spill] sm:$0xff]  ;;  %v12817_v57 = vld [vmem:[#allocation34_spill] sm:$0xff] }
 0xb65   : > { %v11049_v39 = vpop.f32.mrb[60].mxu1 }
 0xb66   : > { %v11051_v49 = vpop.f32.mrb[61].mxu1 }
 0xb67   : > { %v8219_v28 = vpack.i.bf16 %v11049_v39, %v11051_v49 }
 0xb69   : > { %v11055_v13 = vpop.f32.mrb[62].mxu1 }
 0xb6a   : > { %v11057_v27 = vpop.f32.mrb[63].mxu1 }
 0xb6b   : > { %v8234_v14 = vpack.i.bf16 %v11055_v13, %v11057_v27 }
 0xb6d   : > { %v7076_v61 = vpop.f32.mrb[64].mxu1 }
 0xb6e   : > { %v3301_v6 = vadd.f32 %v10724_v15, %v7076_v61  ;;  %v3295_v43 = vpop.f32.mrb[65].mxu1  ;;  %v12780_v15 = vld [vmem:[#allocation71_spill] sm:$0xff] }
 0xb6f   : > { %v3296_v16 = vadd.f32 %v10730_v51, %v3295_v43  ;;  %v12790_v43 = vld [vmem:[#allocation74_spill] sm:$0xff] }
 0xb70   : > { %3376 = vmax.xlane.f32.xlu1 %v3301_v6 }
 0xb71   : > { %v7079_v34 = vpop.f32.mrb[66].mxu1  ;;  %3374 = vmax.xlane.f32.xlu0 %v3296_v16 }
 0xb72   : > { %v3311_v58 = vadd.f32 %v10738_v47, %v7079_v34  ;;  %v3305_v40 = vpop.f32.mrb[67].mxu1 }
 0xb73   : > { %v3306_v63 = vadd.f32 %v12779_v30, %v3305_v40  ;;  %v12791_v40 = vld [vmem:[#allocation69_spill] sm:$0xff] }
 0xb75   : > { %v7082_v55 = vpop.f32.mrb[68].mxu1  ;;  %3380 = vmax.xlane.f32.xlu0 %v3311_v58 }
 0xb76   : > { %v3321_v42 = vadd.f32 %v10796_v8, %v7082_v55  ;;  %v3315_v22 = vpop.f32.mrb[69].mxu1 }
 0xb77   : > { %v3316_v10 = vadd.f32 %v12781_v2, %v3315_v22  ;;  %v12792_v22 = vld [vmem:[#allocation70_spill] sm:$0xff] }
 0xb78   : > { %3384 = vmax.xlane.f32.xlu1 %v3321_v42 }
 0xb79   : > { %v7085_v53 = vpop.f32.mrb[70].mxu1  ;;  %3378 = vmax.xlane.f32.xlu0 %v3306_v63 }
 0xb7a   : > { %v11067_v54 = vadd.f32 %v12780_v15, %v7085_v53  ;;  %v3325_v51 = vpop.f32.mrb[71].mxu1 }
 0xb7b   : > { %v11075_v24 = vadd.f32 %v12783_v60, %v3325_v51 }
 0xb7c   : > { %3388 = vmax.xlane.f32.xlu1 %v11067_v54 }
 0xb7d   : > { %v7088_v47 = vpop.f32.mrb[72].mxu1  ;;  %3382 = vmax.xlane.f32.xlu0 %v3316_v10 }
 0xb7e   : > { %v11072_v52 = vadd.f32 %v12782_v44, %v7088_v47  ;;  %v3335_v8 = vpop.f32.mrb[73].mxu1 }
 0xb7f   : > { %v11080_v18 = vadd.f32 %v12784_v37, %v3335_v8 }
 0xb80   : > { %3392 = vmax.xlane.f32.xlu1 %v11072_v52 }
 0xb81   : > { %v7091_v21 = vpop.f32.mrb[74].mxu1  ;;  %3386 = vmax.xlane.f32.xlu0 %v11075_v24 }
 0xb82   : > { %v3345_v32 = vpop.f32.mrb[75].mxu1  ;;  %v11088_v48 = vadd.f32 %v12787_v31, %v7091_v21 }
 0xb83   : > { %v11095_v61 = vadd.f32 %v12789_v9, %v3345_v32 }
 0xb85   : > { %v7094_v36 = vpop.f32.mrb[76].mxu1  ;;  %3390 = vmax.xlane.f32.xlu0 %v11080_v18 }
 0xb86   : > { %v3355_v26 = vpop.f32.mrb[77].mxu1  ;;  %v11092_v7 = vadd.f32 %v12788_v50, %v7094_v36 }
 0xb87   : > { %v11103_v55 = vadd.f32 %v12791_v40, %v3355_v26 }
 0xb89   : > { %v7097_v29 = vpop.f32.mrb[78].mxu1 }
 0xb8a   : > { %v3365_v38 = vpop.f32.mrb[79].mxu1  ;;  %v11100_v34 = vadd.f32 %v12790_v43, %v7097_v29 }
 0xb8b   : > { %v11108_v30 = vadd.f32 %v12792_v22, %v3365_v38 }
 0xb91   : > { %8110 = vrot.lane.b32.xlu1 %v12785_v11, %s9088_s10 }
 0xb9b   : > { %8105 = vrot.lane.b32.xlu0 %v12786_v56, %s9088_s10 }
 0xbb5   : > { %3396 = vmax.xlane.f32.xlu1 %v11088_v48 }
 0xbb9   : > { %3400 = vmax.xlane.f32.xlu1 %v11092_v7 }
 0xbba   : > { %3394 = vmax.xlane.f32.xlu0 %v11095_v61 }
 0xbbd   : > { %3404 = vmax.xlane.f32.xlu1 %v11100_v34 }
 0xbbe   : > { %3398 = vmax.xlane.f32.xlu0 %v11103_v55 }
 0xbc2   : > { %3402 = vmax.xlane.f32.xlu0 %v11108_v30 }
 0xbfd   : > { %v3377_v53 = vpop.xlane.xlu1 %3376 }
 0xbfe   : > { %v3407_v15 = vsub.f32 %v3301_v6, %v3377_v53  ;;  %v3375_v51 = vpop.xlane.xlu0 %3374 }
 0xbff   : > { %v3406_v2 = vsub.f32 %v3296_v16, %v3375_v51 }
 0xc00   : > { %v3424_v47 = vmul.f32 1.442695, %v3407_v15 }
 0xc01   : > { %v3422_v44 = vmul.f32 1.442695, %v3406_v2 }
 0xc02   : > { %8500 = vpow2.f32 %v3424_v47  ;;  %v3381_v8 = vpop.xlane.xlu0 %3380 }
 0xc03   : > { %8502 = vpow2.f32 %v3422_v44  ;;  %v3409_v60 = vsub.f32 %v3311_v58, %v3381_v8 }
 0xc05   : > { %v3428_v21 = vmul.f32 1.442695, %v3409_v60  ;;  %v3385_v32 = vpop.xlane.xlu1 %3384  ;;  %v12793_v60 = vld [vmem:[#allocation31_spill] sm:$0xff] }
 0xc06   : > { %v3411_v37 = vsub.f32 %v3321_v42, %v3385_v32  ;;  %v3379_v36 = vpop.xlane.xlu0 %3378 }
 0xc07   : > { %8504 = vpow2.f32 %v3428_v21  ;;  %v3408_v26 = vsub.f32 %v3306_v63, %v3379_v36  ;;  %v12794_v21 = vld [vmem:[#allocation29_spill] sm:$0xff] }
 0xc08   : > { %v3432_v29 = vmul.f32 1.442695, %v3411_v37 }
 0xc09   : > { %v3426_v38 = vmul.f32 1.442695, %v3408_v26  ;;  %v3389_v11 = vpop.xlane.xlu1 %3388 }
 0xc0a   : > { %8506 = vpow2.f32 %v3432_v29  ;;  %v3383_v56 = vpop.xlane.xlu0 %3382  ;;  %v3413_v32 = vsub.f32 %v11067_v54, %v3389_v11 }
 0xc0b   : > { %8508 = vpow2.f32 %v3426_v38  ;;  %v3410_v6 = vsub.f32 %v3316_v10, %v3383_v56 }
 0xc0c   : > { %v11111_v16 = vpop.eup %8500  ;;  %v3436_v36 = vmul.f32 1.442695, %v3413_v32 }
 0xc0d   : > { %v11113_v31 = vpop.eup %8502  ;;  %v3430_v50 = vmul.f32 1.442695, %v3410_v6  ;;  %3456 = vadd.xlane.f32.xlu0 %v11111_v16  ;;  %v3393_v58 = vpop.xlane.xlu1 %3392 }
 0xc0e   : > { %3454 = vadd.xlane.f32.xlu1 %v11113_v31  ;;  %v3387_v42 = vpop.xlane.xlu0 %3386  ;;  %v3415_v38 = vsub.f32 %v11072_v52, %v3393_v58 }
 0xc0f   : > { %8510 = vpow2.f32 %v3430_v50  ;;  %v3412_v37 = vsub.f32 %v11075_v24, %v3387_v42 }
 0xc10   : > { %8512 = vpow2.f32 %v3436_v36 }
 0xc11   : > { %v11117_v63 = vpop.eup %8504  ;;  %v8111_v10 = vpop.permute.xlu1 %8110  ;;  %v3434_v29 = vmul.f32 1.442695, %v3412_v37 }
 0xc12   : > { %3460 = vadd.xlane.f32.xlu0 %v11117_v63  ;;  %v3391_v9 = vpop.xlane.xlu0 %3390  ;;  %v8113_v53 = vunpack.i.h.bf16 %v8111_v10  ;;  %v8112_v15 = vunpack.i.l.bf16 %v8111_v10  ;;  %v3440_v10 = vmul.f32 1.442695, %v3415_v38 }
 0xc13   : > { %v3414_v26 = vsub.f32 %v11080_v18, %v3391_v9  ;;  %8514 = vpow2.f32 %v3434_v29  ;;  %v12796_v29 = vld [vmem:[#allocation36_spill] sm:$0xff] }
 0xc14   : > { %v11120_v43 = vpop.eup %8506  ;;  %v7582_v8 = vpack.c.bf16 %v8113_v53, %v8112_v15 }
 0xc15   : > { %v11122_v40 = vpop.eup %8508  ;;  %v3438_v56 = vmul.f32 1.442695, %v3414_v26  ;;  %v12795_v26 = vld [vmem:[#allocation43_spill] sm:$0xff] }
 0xc16   : > { %3464 = vadd.xlane.f32.xlu0 %v11120_v43  ;;  %3458 = vadd.xlane.f32.xlu1 %v11122_v40  ;;  %v8106_v22 = vpop.permute.xlu0 %8105  ;;  %v12797_v38 = vpack.i.bf16 %v12795_v26, %v12796_v29 }
 0xc17   : > { %v8108_v51 = vunpack.i.h.bf16 %v8106_v22  ;;  %v8107_v2 = vunpack.i.l.bf16 %v8106_v22  ;;  %8516 = vpow2.f32 %v3438_v56  ;;  %v12798_v56 = vld [vmem:[#allocation39_spill] sm:$0xff] }
 0xc18   : > { %8518 = vpow2.f32 %v3440_v10 }
 0xc19   : > { %v11126_v47 = vpop.eup %8510  ;;  %v7578_v44 = vpack.c.bf16 %v8108_v51, %v8107_v2 }
 0xc1a   : > { %3462 = vadd.xlane.f32.xlu1 %v11126_v47  ;;  %v11140_v18 = vpop.eup %8512 }
 0xc1b   : > { %7579 = vmatprep.subr.bf16.mxu0 %v7578_v44 }
 0xc1c   : > { %7581 = vmatpush3.bf16.msra.mxu0 %v7578_v44 }
 0xc1d   : > { %7583 = vmatprep.subr.bf16.mxu0 %v7582_v8  ;;  %v11145_v51 = vpop.eup %8514 }
 0xc20   : > { %7585 = vmatpush3.bf16.msra.mxu0 %v7582_v8 }
 0xc2b   : > { %8120 = vrot.lane.b32.xlu1 %v12793_v60, %s9088_s10 }
 0xc2c   : > { %8115 = vrot.lane.b32.xlu0 %v12794_v21, %s9088_s10 }
 0xc42   : > { %v3397_v6 = vpop.xlane.xlu1 %3396 }
 0xc43   : > { %v3417_v50 = vsub.f32 %v11088_v48, %v3397_v6  ;;  %v12799_v6 = vld [vmem:[#allocation40_spill] sm:$0xff] }
 0xc45   : > { %v3444_v53 = vmul.f32 1.442695, %v3417_v50  ;;  %v12800_v50 = vpack.i.bf16 %v12798_v56, %v12799_v6 }
 0xc46   : > { %v3401_v22 = vpop.xlane.xlu1 %3400 }
 0xc47   : > { %v3419_v54 = vsub.f32 %v11092_v7, %v3401_v22  ;;  %v3395_v11 = vpop.xlane.xlu0 %3394  ;;  %8520 = vpow2.f32 %v3444_v53  ;;  %v11147_v7 = vpop.eup %8516 }
 0xc48   : > { %v3416_v24 = vsub.f32 %v11095_v61, %v3395_v11  ;;  %v11152_v8 = vpop.eup %8518 }
 0xc49   : > { %v3448_v52 = vmul.f32 1.442695, %v3419_v54 }
 0xc4a   : > { %v3442_v42 = vmul.f32 1.442695, %v3416_v24  ;;  %v3405_v9 = vpop.xlane.xlu1 %3404 }
 0xc4b   : > { %v3421_v58 = vsub.f32 %v11100_v34, %v3405_v9  ;;  %3468 = vadd.xlane.f32.xlu0 %v11140_v18  ;;  %v3399_v48 = vpop.xlane.xlu0 %3398 }
 0xc4c   : > { %8522 = vpow2.f32 %v3442_v42  ;;  %v3418_v15 = vsub.f32 %v11103_v55, %v3399_v48 }
 0xc4d   : > { %8524 = vpow2.f32 %v3448_v52  ;;  %v3452_v61 = vmul.f32 1.442695, %v3421_v58 }
 0xc4e   : > { %v3446_v2 = vmul.f32 1.442695, %v3418_v15 }
 0xc4f   : > { %3466 = vadd.xlane.f32.xlu1 %v11145_v51  ;;  %3470 = vadd.xlane.f32.xlu0 %v11147_v7  ;;  %v3403_v44 = vpop.xlane.xlu0 %3402 }
 0xc50   : > { %8526 = vpow2.f32 %v3446_v2  ;;  %v3420_v34 = vsub.f32 %v11108_v30, %v3403_v44 }
 0xc51   : > { %8528 = vpow2.f32 %v3452_v61  ;;  %v11155_v55 = vpop.eup %8520 }
 0xc52   : > { %v3450_v60 = vmul.f32 1.442695, %v3420_v34 }
 0xc53   : > { %3472 = vadd.xlane.f32.xlu1 %v11152_v8 }
 0xc54   : > { %8530 = vpow2.f32 %v3450_v60 }
 0xc56   : > { %v11157_v21 = vpop.eup %8522 }
 0xc57   : > { %3476 = vadd.xlane.f32.xlu1 %v11155_v55  ;;  %3474 = vadd.xlane.f32.xlu0 %v11157_v21  ;;  %v11161_v32 = vpop.eup %8524 }
 0xc5a   : > { %v11163_v37 = vpop.eup %8526 }
 0xc5b   : > { %3480 = vadd.xlane.f32.xlu1 %v11161_v32  ;;  %3478 = vadd.xlane.f32.xlu0 %v11163_v37  ;;  %v11167_v30 = vpop.eup %8528 }
 0xc5e   : > { %v11169_v36 = vpop.eup %8530 }
 0xc5f   : > { %3484 = vadd.xlane.f32.xlu1 %v11167_v30  ;;  %3482 = vadd.xlane.f32.xlu0 %v11169_v36 }
 0xc70   : > { %8130 = vrot.lane.b32.xlu1 %v8129_v4, %s9087_s9 }
 0xc75   : > { %8125 = vrot.lane.b32.xlu0 %v12797_v38, %s9088_s10 }
 0xc79   : > { %8145 = vrot.lane.b32.xlu0 %v8144_v62, %s9087_s9 }
 0xc7d   : > { %8155 = vrot.lane.b32.xlu0 %v12800_v50, %s9088_s10 }
 0xc9a   : > { %v3457_v10 = vpop.xlane.xlu0 %3456 }
 0xc9b   : > { %v3455_v22 = vpop.xlane.xlu1 %3454 }
 0xc9c   : > { %8532 = vrcp.f32 %v3455_v22 }
 0xc9d   : > { %8534 = vrcp.f32 %v3457_v10 }
 0xc9f   : > { %v3461_v17 = vpop.xlane.xlu0 %3460 }
 0xca3   : > { %v3459_v23 = vpop.xlane.xlu1 %3458  ;;  %v3465_v4 = vpop.xlane.xlu0 %3464 }
 0xca4   : > { %8536 = vrcp.f32 %v3459_v23 }
 0xca5   : > { %8538 = vrcp.f32 %v3461_v17 }
 0xca6   : > { %v8533_v53 = vpop.eup %8532 }
 0xca7   : > { %v3463_v54 = vpop.xlane.xlu1 %3462  ;;  %v8116_v11 = vpop.permute.xlu0 %8115  ;;  %v3502_v24 = vmul.f32 %v8533_v53, %v11113_v31 }
 0xca8   : > { %v8118_v35 = vunpack.i.h.bf16 %v8116_v11  ;;  %v8117_v33 = vunpack.i.l.bf16 %v8116_v11  ;;  %8540 = vrcp.f32 %v3463_v54  ;;  %v8535_v48 = vpop.eup %8534 }
 0xca9   : > { %7130 = vmatprep.mubr.f32.mxu0 %v3502_v24  ;;  %8542 = vrcp.f32 %v3465_v4  ;;  %v3503_v2 = vmul.f32 %v8535_v48, %v11111_v16 }
 0xcaa   : > { %v7586_v62 = vpack.c.bf16 %v8118_v35, %v8117_v33 }
 0xcab   : > { %v8121_v42 = vpop.permute.xlu1 %8120 }
 0xcac   : > { %v8123_v9 = vunpack.i.h.bf16 %v8121_v42  ;;  %v8122_v52 = vunpack.i.l.bf16 %v8121_v42  ;;  %7587 = vmatprep.subr.bf16.mxu0 %v7586_v62 }
 0xcad   : > { %7589 = vmatpush3.bf16.msra.mxu0 %v7586_v62 }
 0xcae   : > { %v7590_v58 = vpack.c.bf16 %v8123_v9, %v8122_v52  ;;  %v8537_v15 = vpop.eup %8536 }
 0xcaf   : > { %v8539_v31 = vpop.eup %8538  ;;  %v3504_v61 = vmul.f32 %v8537_v15, %v11122_v40  ;;  %v3955_v15 = vld [vmem:[#allocation10 + $0x10] sm:$0xff] }
 0xcb0   : > { %7591 = vmatprep.subr.bf16.mxu0 %v7590_v58  ;;  %v3505_v34 = vmul.f32 %v8539_v31, %v11117_v63  ;;  %v3956_v31 = vld [vmem:[#allocation10 + $0x18] sm:$0xff] }
 0xcb1   : > { %7593 = vmatpush3.bf16.msra.mxu0 %v7590_v58 }
 0xcb2   : > { %v8541_v44 = vpop.eup %8540 }
 0xcb3   : > { %v8543_v60 = vpop.eup %8542  ;;  %v3506_v26 = vmul.f32 %v8541_v44, %v11126_v47  ;;  %v3957_v44 = vld [vmem:[#allocation10 + $0x20] sm:$0xff] }
 0xcb4   : > { %7131 = vmatmul.mubr.f32.vlgmr.msra.gmra.mrb[80].mxu0 %v3503_v2  ;;  %v3507_v29 = vmul.f32 %v8543_v60, %v11120_v43  ;;  %v3960_v60 = vld [vmem:[#allocation10 + $0x38] sm:$0xff] }
 0xcb5   : > { %7133 = vmatprep.mubr.f32.mxu0 %v3504_v61  ;;  %v7598_v61 = vpack.c.bf16 %v3956_v31, %v3955_v15 }
 0xcb8   : > { %7134 = vmatmul.mubr.f32.gmra.mrb[82].mxu0 %v3505_v34  ;;  %v3959_v34 = vld [vmem:[#allocation10 + $0x30] sm:$0xff] }
 0xcb9   : > { %7136 = vmatprep.mubr.f32.mxu0 %v3506_v26  ;;  %v3962_v26 = vld [vmem:[#allocation10 + $0x48] sm:$0xff] }
 0xcbc   : > { %7137 = vmatmul.mubr.f32.gmra.mrb[84].mxu0 %v3507_v29 }
 0xcd8   : > { %v3469_v38 = vpop.xlane.xlu0 %3468 }
 0xcd9   : > { %8544 = vrcp.f32 %v3469_v38  ;;  %v3963_v38 = vld [vmem:[#allocation10 + $0x50] sm:$0xff] }
 0xcdc   : > { %v3467_v56 = vpop.xlane.xlu1 %3466  ;;  %v3471_v16 = vpop.xlane.xlu0 %3470 }
 0xcdd   : > { %8546 = vrcp.f32 %v3467_v56  ;;  %v3964_v56 = vld [vmem:[#allocation10 + $0x58] sm:$0xff] }
 0xcde   : > { %8548 = vrcp.f32 %v3471_v16  ;;  %v7614_v16 = vpack.c.bf16 %v3964_v56, %v3963_v38 }
 0xce0   : > { %v3473_v40 = vpop.xlane.xlu1 %3472 }
 0xce1   : > { %8550 = vrcp.f32 %v3473_v40  ;;  %v3965_v40 = vld [vmem:[#allocation10 + $0x60] sm:$0xff] }
 0xce3   : > { %v8545_v63 = vpop.eup %8544 }
 0xce4   : > { %v3477_v6 = vpop.xlane.xlu1 %3476  ;;  %v3475_v50 = vpop.xlane.xlu0 %3474  ;;  %v3509_v23 = vmul.f32 %v8545_v63, %v11140_v18  ;;  %v3967_v63 = vld [vmem:[#allocation10 + $0x70] sm:$0xff] }
 0xce5   : > { %8552 = vrcp.f32 %v3477_v6  ;;  %v3966_v6 = vld [vmem:[#allocation10 + $0x68] sm:$0xff] }
 0xce6   : > { %8554 = vrcp.f32 %v3475_v50  ;;  %v7618_v50 = vpack.c.bf16 %v3966_v6, %v3965_v40 }
 0xce7   : > { %v8547_v10 = vpop.eup %8546 }
 0xce8   : > { %v8549_v47 = vpop.eup %8548  ;;  %v3481_v22 = vpop.xlane.xlu1 %3480  ;;  %v3508_v43 = vmul.f32 %v8547_v10, %v11145_v51  ;;  %v3968_v10 = vld [vmem:[#allocation10 + $0x78] sm:$0xff] }
 0xce9   : > { %v3479_v17 = vpop.xlane.xlu0 %3478  ;;  %8556 = vrcp.f32 %v3481_v22  ;;  %v3510_v4 = vmul.f32 %v8549_v47, %v11147_v7  ;;  %v7622_v47 = vpack.c.bf16 %v3968_v10, %v3967_v63 }
 0xcea   : > { %8558 = vrcp.f32 %v3479_v17  ;;  %7139 = vmatprep.mubr.f32.mxu0 %v3508_v43 }
 0xceb   : > { %v8551_v53 = vpop.eup %8550  ;;  %7140 = vmatmul.mubr.f32.gmra.mrb[86].mxu0 %v3509_v23 }
 0xcec   : > { %v3485_v54 = vpop.xlane.xlu1 %3484  ;;  %7142 = vmatprep.mubr.f32.mxu0 %v3510_v4  ;;  %v3511_v24 = vmul.f32 %v8551_v53, %v11152_v8 }
 0xced   : > { %v3483_v11 = vpop.xlane.xlu0 %3482  ;;  %8560 = vrcp.f32 %v3485_v54  ;;  %v12801_v54 = vld [vmem:[#allocation37_spill] sm:$0xff] }
 0xcee   : > { %8562 = vrcp.f32 %v3483_v11  ;;  %v12802_v11 = vld [vmem:[#allocation38_spill] sm:$0xff] }
 0xcef   : > { %v8553_v35 = vpop.eup %8552  ;;  %7143 = vmatmul.mubr.f32.gmra.mrb[88].mxu0 %v3511_v24  ;;  %v12803_v24 = vpack.i.bf16 %v12801_v54, %v12802_v11 }
 0xcf0   : > { %v8555_v33 = vpop.eup %8554  ;;  %v3513_v51 = vmul.f32 %v8553_v35, %v11155_v55  ;;  %v3953_v55 = vld [vmem:[#allocation10] sm:$0xff] }
 0xcf1   : > { %v3512_v18 = vmul.f32 %v8555_v33, %v11157_v21  ;;  %v3954_v21 = vld [vmem:[#allocation10 + $0x8] sm:$0xff] }
 0xcf2   : > { %v7594_v2 = vpack.c.bf16 %v3954_v21, %v3953_v55  ;;  %v12810_v55 = vld [vmem:[#allocation46_spill] sm:$0xff]  ;;  %v12811_v21 = vld [vmem:[#allocation47_spill] sm:$0xff] }
 0xcf3   : > { %v8557_v62 = vpop.eup %8556  ;;  %7145 = vmatprep.mubr.f32.mxu0 %v3512_v18  ;;  %v12804_v18 = vld [vmem:[#allocation41_spill] sm:$0xff]  ;;  %v12812_v15 = vpack.i.bf16 %v12810_v55, %v12811_v21 }
 0xcf4   : > { %v8559_v42 = vpop.eup %8558  ;;  %7146 = vmatmul.mubr.f32.gmra.mrb[90].mxu0 %v3513_v51  ;;  %v3515_v9 = vmul.f32 %v8557_v62, %v11161_v32  ;;  %7595 = vmatprep.subr.bf16.mxu0 %v7594_v2  ;;  %v12805_v62 = vld [vmem:[#allocation42_spill] sm:$0xff] }
 0xcf5   : > { %v3514_v7 = vmul.f32 %v8559_v42, %v11163_v37  ;;  %v3958_v37 = vld [vmem:[#allocation10 + $0x28] sm:$0xff]  ;;  %7597 = vmatpush3.bf16.msra.mxu0 %v7594_v2  ;;  %v12806_v42 = vpack.i.bf16 %v12804_v18, %v12805_v62 }
 0xcf6   : > { %7599 = vmatprep.subr.bf16.mxu0 %v7598_v61  ;;  %v7602_v32 = vpack.c.bf16 %v3958_v37, %v3957_v44 }
 0xcf7   : > { %v8561_v52 = vpop.eup %8560  ;;  %7148 = vmatprep.mubr.f32.mxu0 %v3514_v7  ;;  %v12807_v7 = vld [vmem:[#allocation44_spill] sm:$0xff] }
 0xcf8   : > { %v8563_v8 = vpop.eup %8562  ;;  %7149 = vmatmul.mubr.f32.gmra.mrb[92].mxu0 %v3515_v9  ;;  %v3517_v48 = vmul.f32 %v8561_v52, %v11167_v30  ;;  %v3961_v30 = vld [vmem:[#allocation10 + $0x40] sm:$0xff]  ;;  %v12808_v9 = vld [vmem:[#allocation45_spill] sm:$0xff] }
 0xcf9   : > { %v3516_v58 = vmul.f32 %v8563_v8, %v11169_v36  ;;  %7601 = vmatpush3.bf16.msra.mxu0 %v7598_v61  ;;  %v7606_v36 = vpack.c.bf16 %v3960_v60, %v3959_v34  ;;  %v7610_v29 = vpack.c.bf16 %v3962_v26, %v3961_v30  ;;  %v12809_v52 = vpack.i.bf16 %v12807_v7, %v12808_v9  ;;  %v8126_v34 = vpop.permute.xlu0 %8125  ;;  %v8131_v60 = vpop.permute.xlu1 %8130 }
 0xcfa   : > { %7603 = vmatprep.subr.bf16.mxu0 %v7602_v32  ;;  %v8127_v30 = vunpack.i.l.bf16 %v8126_v34  ;;  %v8133_v39 = vunpack.i.h.bf16 %v8131_v60  ;;  %v8132_v49 = vunpack.i.l.bf16 %v8131_v60 }
 0xcfb   : > { %7151 = vmatprep.mubr.f32.mxu0 %v3516_v58 }
 0xcfc   : > { %7152 = vmatmul.mubr.f32.gmra.mrb[94].mxu0 %v3517_v48 }
 0xcfd   : > { %7605 = vmatpush3.bf16.msra.mxu0 %v7602_v32 }
 0xcfe   : > { %7607 = vmatprep.subr.bf16.mxu0 %v7606_v36 }
 0xd01   : > { %7609 = vmatpush3.bf16.msra.mxu0 %v7606_v36  ;;  %v8128_v36 = vunpack.i.h.bf16 %v8126_v34 }
 0xd02   : > { %7611 = vmatprep.subr.bf16.mxu0 %v7610_v29 }
 0xd05   : > { %7613 = vmatpush3.bf16.msra.mxu0 %v7610_v29  ;;  %v12820_v29 = vld [vmem:[#allocation51_spill] sm:$0xff] }
 0xd06   : > { %7615 = vmatprep.subr.bf16.mxu0 %v7614_v16  ;;  %v3903_v38 = vsel %vm1334_vm0, %v12820_v29, %v8127_v30 }
 0xd09   : > { %7617 = vmatpush3.bf16.msra.mxu0 %v7614_v16  ;;  %v8146_v16 = vpop.permute.xlu0 %8145 }
 0xd0a   : > { %7619 = vmatprep.subr.bf16.mxu0 %v7618_v50  ;;  %v8147_v54 = vunpack.i.l.bf16 %v8146_v16 }
 0xd0d   : > { %7621 = vmatpush3.bf16.msra.mxu0 %v7618_v50 }
 0xd0e   : > { %7623 = vmatprep.subr.bf16.mxu0 %v7622_v47 }
 0xd11   : > { %7625 = vmatpush3.bf16.msra.mxu0 %v7622_v47 }
 0xd87   : > { %v7132_v22 = vpop.f32.mrb[80].mxu0 }
 0xd88   : > { %v3632_v17 = vpop.f32.mrb[81].mxu0 }
 0xd89   : > { %v8134_v43 = vpack.i.bf16 %v7132_v22, %v3632_v17  ;;  %v8156_v22 = vpop.permute.xlu0 %8155  ;;  %v12821_v17 = vld [vmem:[#allocation53_spill] sm:$0xff] }
 0xd8b   : > { %8135 = vrot.lane.b32.xlu1 %v8134_v43, %s9086_s23  ;;  %v7135_v23 = vpop.f32.mrb[82].mxu0 }
 0xd8c   : > { %v3642_v4 = vpop.f32.mrb[83].mxu0 }
 0xd8d   : > { %v8149_v53 = vpack.i.bf16 %v7135_v23, %v3642_v4  ;;  %v12822_v23 = vld [vmem:[#allocation52_spill] sm:$0xff] }
 0xd8f   : > { %8140 = vrot.lane.b32.xlu1 %v12803_v24, %s9088_s10  ;;  %v7138_v35 = vpop.f32.mrb[84].mxu0 }
 0xd90   : > { %v3652_v33 = vpop.f32.mrb[85].mxu0 }
 0xd91   : > { %v8164_v51 = vpack.i.bf16 %v7138_v35, %v3652_v33  ;;  %v8158_v33 = vunpack.i.h.bf16 %v8156_v22 }
 0xd93   : > { %8150 = vrot.lane.b32.xlu1 %v8149_v53, %s9086_s23  ;;  %8165 = vrot.lane.b32.xlu0 %v8164_v51, %s9086_s23  ;;  %v8148_v53 = vunpack.i.h.bf16 %v8146_v16  ;;  %v8157_v51 = vunpack.i.l.bf16 %v8156_v22 }
 0xd97   : > { %8160 = vrot.lane.b32.xlu1 %v8159_v25, %s9087_s9  ;;  %8175 = vrot.lane.b32.xlu0 %v8174_v3, %s9087_s9 }
 0xd9b   : > { %8170 = vrot.lane.b32.xlu1 %v12806_v42, %s9088_s10  ;;  %8185 = vrot.lane.b32.xlu0 %v12809_v52, %s9088_s10 }
 0xdbe   : > { %v7141_v8 = vpop.f32.mrb[86].mxu0 }
 0xdbf   : > { %v3662_v58 = vpop.f32.mrb[87].mxu0 }
 0xdc0   : > { %v8179_v48 = vpack.i.bf16 %v7141_v8, %v3662_v58 }
 0xdc2   : > { %8180 = vrot.lane.b32.xlu1 %v8179_v48, %s9086_s23  ;;  %v7144_v19 = vpop.f32.mrb[88].mxu0 }
 0xdc3   : > { %v3672_v1 = vpop.f32.mrb[89].mxu0 }
 0xdc4   : > { %v8194_v25 = vpack.i.bf16 %v7144_v19, %v3672_v1  ;;  %v12823_v1 = vld [vmem:[#allocation55_spill] sm:$0xff] }
 0xdc6   : > { %8190 = vrot.lane.b32.xlu1 %v8189_v5, %s9087_s9  ;;  %8195 = vrot.lane.b32.xlu0 %v8194_v25, %s9086_s23  ;;  %v12815_v5 = vpack.i.bf16 %v12813_v12, %v12814_v0  ;;  %v3907_v25 = vsel %vm1334_vm0, %v12823_v1, %v8157_v51 }
 0xdc7   : > { %v7147_v46 = vpop.f32.mrb[90].mxu0 }
 0xdc8   : > { %v3682_v45 = vpop.f32.mrb[91].mxu0 }
 0xdc9   : > { %v8209_v3 = vpack.i.bf16 %v7147_v46, %v3682_v45  ;;  %v12824_v46 = vld [vmem:[#allocation54_spill] sm:$0xff] }
 0xdca   : > { %8200 = vrot.lane.b32.xlu1 %v12812_v15, %s9088_s10  ;;  %8205 = vrot.lane.b32.xlu0 %v8204_v41, %s9087_s9  ;;  %v12818_v41 = vpack.i.bf16 %v12816_v59, %v12817_v57  ;;  %v3908_v45 = vsel %vm1334_vm0, %v12824_v46, %v8158_v33 }
 0xdcb   : > { %v7150_v2 = vpop.f32.mrb[92].mxu0 }
 0xdcc   : > { %v3692_v31 = vpop.f32.mrb[93].mxu0 }
 0xdcd   : > { %v8224_v61 = vpack.i.bf16 %v7150_v2, %v3692_v31 }
 0xdce   : > { %8215 = vrot.lane.b32.xlu0 %v12815_v5, %s9088_s10  ;;  %8210 = vrot.lane.b32.xlu1 %v8209_v3, %s9086_s23  ;;  %v12825_v5 = vld [vmem:[#allocation57_spill] sm:$0xff] }
 0xdcf   : > { %v7153_v44 = vpop.f32.mrb[94].mxu0 }
 0xdd0   : > { %v3702_v37 = vpop.f32.mrb[95].mxu0 }
 0xdd1   : > { %v8239_v32 = vpack.i.bf16 %v7153_v44, %v3702_v37  ;;  %v12826_v37 = vld [vmem:[#allocation56_spill] sm:$0xff] }
 0xdd2   : > { %8220 = vrot.lane.b32.xlu1 %v8219_v28, %s9087_s9  ;;  %8225 = vrot.lane.b32.xlu0 %v8224_v61, %s9086_s23  ;;  %v12819_v28 = vld [vmem:[#allocation50_spill] sm:$0xff] }
 0xdd3   : > { %v3904_v26 = vsel %vm1334_vm0, %v12819_v28, %v8128_v36 }
 0xdd4   : > { %v3921_v40 = vsel %vm3919_vm2, %v3904_v26, %v8133_v39 }
 0xdd6   : > { %8230 = vrot.lane.b32.xlu1 %v12818_v41, %s9088_s10  ;;  %8235 = vrot.lane.b32.xlu0 %v8234_v14, %s9087_s9  ;;  %v3920_v14 = vsel %vm3919_vm2, %v3903_v38, %v8132_v49  ;;  %s12941_s10 = sld [smem:[#allocation84_spill]] }
 0xdda   : > { %8240 = vrot.lane.b32.xlu1 %v8239_v32, %s9086_s23 }
 0xddc   : > { %s12438_s2 = scalar_lea.hbm %s12941_s10, %s6169_s4 }
 0xdfd   : > { %v8136_v56 = vpop.permute.xlu1 %8135 }
 0xdfe   : > { %v8138_v13 = vunpack.i.h.bf16 %v8136_v56  ;;  %v8137_v27 = vunpack.i.l.bf16 %v8136_v56 }
 0xe00   : > { %v3937_v6 = vsel %vm3936_vm3, %v3920_v14, %v8137_v27  ;;  %v3938_v50 = vsel %vm3936_vm3, %v3921_v40, %v8138_v13  ;;  %v12827_v14 = vld [vmem:[#allocation59_spill] sm:$0xff] }
 0xe01   : > { %v8141_v63 = vpop.permute.xlu1 %8140  ;;  %7186 = vmatprep.mubr.f32.mxu0 %v3937_v6  ;;  %v12828_v6 = vld [vmem:[#allocation58_spill] sm:$0xff] }
 0xe02   : > { %v8143_v10 = vunpack.i.h.bf16 %v8141_v63  ;;  %v8142_v47 = vunpack.i.l.bf16 %v8141_v63  ;;  %7187 = vmatmul.mubr.f32.vlgmr.msra.gmra.mrb[96].mxu0 %v3938_v50 }
 0xe04   : > { %v3905_v43 = vsel %vm1334_vm0, %v12821_v17, %v8142_v47  ;;  %v3906_v4 = vsel %vm1334_vm0, %v12822_v23, %v8143_v10 }
 0xe05   : > { %v8151_v11 = vpop.permute.xlu1 %8150  ;;  %v3922_v18 = vsel %vm3919_vm2, %v3905_v43, %v8147_v54  ;;  %v3923_v62 = vsel %vm3919_vm2, %v3906_v4, %v8148_v53  ;;  %v8166_v42 = vpop.permute.xlu0 %8165 }
 0xe06   : > { %v8153_v24 = vunpack.i.h.bf16 %v8151_v11  ;;  %v8152_v35 = vunpack.i.l.bf16 %v8151_v11  ;;  %v8168_v48 = vunpack.i.h.bf16 %v8166_v42  ;;  %v8167_v19 = vunpack.i.l.bf16 %v8166_v42  ;;  %v12829_v11 = vld [vmem:[#allocation61_spill] sm:$0xff] }
 0xe08   : > { %v3939_v7 = vsel %vm3936_vm3, %v3922_v18, %v8152_v35  ;;  %v3940_v9 = vsel %vm3936_vm3, %v3923_v62, %v8153_v24  ;;  %v12830_v35 = vld [vmem:[#allocation60_spill] sm:$0xff] }
 0xe09   : > { %v8161_v52 = vpop.permute.xlu1 %8160  ;;  %7189 = vmatprep.mubr.f32.mxu0 %v3939_v7  ;;  %v8176_v31 = vpop.permute.xlu0 %8175 }
 0xe0a   : > { %v8163_v8 = vunpack.i.h.bf16 %v8161_v52  ;;  %v8162_v58 = vunpack.i.l.bf16 %v8161_v52  ;;  %7190 = vmatmul.mubr.f32.gmra.mrb[98].mxu0 %v3940_v9  ;;  %v8178_v59 = vunpack.i.h.bf16 %v8176_v31  ;;  %v8177_v57 = vunpack.i.l.bf16 %v8176_v31 }
 0xe0c   : > { %v3924_v3 = vsel %vm3919_vm2, %v3907_v25, %v8162_v58  ;;  %v3925_v55 = vsel %vm3919_vm2, %v3908_v45, %v8163_v8 }
 0xe0d   : > { %v3941_v21 = vsel %vm3936_vm3, %v3924_v3, %v8167_v19  ;;  %v3942_v15 = vsel %vm3936_vm3, %v3925_v55, %v8168_v48  ;;  %v8171_v2 = vpop.permute.xlu1 %8170  ;;  %v8186_v0 = vpop.permute.xlu0 %8185  ;;  %v12831_v55 = vld [vmem:[#allocation63_spill] sm:$0xff] }
 0xe0e   : > { %7192 = vmatprep.mubr.f32.mxu0 %v3941_v21  ;;  %v8173_v61 = vunpack.i.h.bf16 %v8171_v2  ;;  %v8172_v12 = vunpack.i.l.bf16 %v8171_v2  ;;  %v8188_v36 = vunpack.i.h.bf16 %v8186_v0  ;;  %v8187_v30 = vunpack.i.l.bf16 %v8186_v0 }
 0xe0f   : > { %7193 = vmatmul.mubr.f32.gmra.mrb[100].mxu0 %v3942_v15  ;;  %v12832_v15 = vld [vmem:[#allocation62_spill] sm:$0xff] }
 0xe10   : > { %v3909_v44 = vsel %vm1334_vm0, %v12825_v5, %v8172_v12  ;;  %v3910_v32 = vsel %vm1334_vm0, %v12826_v37, %v8173_v61  ;;  %v3911_v40 = vsel %vm1334_vm0, %v12827_v14, %v8187_v30  ;;  %v3912_v50 = vsel %vm1334_vm0, %v12828_v6, %v8188_v36 }
 0xe11   : > { %v3926_v39 = vsel %vm3919_vm2, %v3909_v44, %v8177_v57  ;;  %v3927_v49 = vsel %vm3919_vm2, %v3910_v32, %v8178_v59 }
 0xe34   : > { %v8181_v41 = vpop.permute.xlu1 %8180 }
 0xe35   : > { %v8183_v34 = vunpack.i.h.bf16 %v8181_v41  ;;  %v8182_v60 = vunpack.i.l.bf16 %v8181_v41  ;;  %v12833_v41 = vld [vmem:[#allocation65_spill] sm:$0xff] }
 0xe37   : > { %v3943_v28 = vsel %vm3936_vm3, %v3926_v39, %v8182_v60  ;;  %v3944_v26 = vsel %vm3936_vm3, %v3927_v49, %v8183_v34  ;;  %v12834_v60 = vld [vmem:[#allocation64_spill] sm:$0xff] }
 0xe38   : > { %v8191_v29 = vpop.permute.xlu1 %8190  ;;  %7195 = vmatprep.mubr.f32.mxu0 %v3943_v28  ;;  %v8196_v38 = vpop.permute.xlu0 %8195 }
 0xe39   : > { %v8193_v56 = vunpack.i.h.bf16 %v8191_v29  ;;  %v8192_v16 = vunpack.i.l.bf16 %v8191_v29  ;;  %v8198_v13 = vunpack.i.h.bf16 %v8196_v38  ;;  %v8197_v27 = vunpack.i.l.bf16 %v8196_v38  ;;  %7196 = vmatmul.mubr.f32.gmra.mrb[102].mxu0 %v3944_v26 }
 0xe3b   : > { %v3928_v63 = vsel %vm3919_vm2, %v3911_v40, %v8192_v16  ;;  %v3929_v10 = vsel %vm3919_vm2, %v3912_v50, %v8193_v56  ;;  %v11329_v56 = vld [vmem:[%s12493_s7] ss:$0 sm:$0xff]  ;;  %v8772_v40 = vld [vmem:[%s9456_s24 + $0x8] sm:$0xff] }
 0xe3c   : > { %v8201_v47 = vpop.permute.xlu1 %8200  ;;  %v8206_v22 = vpop.permute.xlu0 %8205  ;;  %v3945_v17 = vsel %vm3936_vm3, %v3928_v63, %v8197_v27  ;;  %v3946_v43 = vsel %vm3936_vm3, %v3929_v10, %v8198_v13  ;;  %v8773_v50 = vld [vmem:[%s9456_s24] sm:$0xff] }
 0xe3d   : > { %v8203_v23 = vunpack.i.h.bf16 %v8201_v47  ;;  %v8202_v4 = vunpack.i.l.bf16 %v8201_v47  ;;  %7198 = vmatprep.mubr.f32.mxu0 %v3945_v17  ;;  %v8208_v53 = vunpack.i.h.bf16 %v8206_v22  ;;  %v8207_v54 = vunpack.i.l.bf16 %v8206_v22 }
 0xe3e   : > { %7199 = vmatmul.mubr.f32.gmra.mrb[104].mxu0 %v3946_v43  ;;  %v8774_v43 = vld [vmem:[%s9456_s24 + $0x10] sm:$0xff] }
 0xe3f   : > { %v3913_v24 = vsel %vm1334_vm0, %v12829_v11, %v8202_v4  ;;  %v3914_v33 = vsel %vm1334_vm0, %v12830_v35, %v8203_v23  ;;  %v8775_v11 = vld [vmem:[%s9456_s24 + $0x18] sm:$0xff]  ;;  %v8776_v35 = vld [vmem:[%s9456_s24 + $0x28] sm:$0xff] }
 0xe40   : > { %v8216_v51 = vpop.permute.xlu0 %8215  ;;  %v8211_v18 = vpop.permute.xlu1 %8210  ;;  %v3930_v52 = vsel %vm3919_vm2, %v3913_v24, %v8207_v54  ;;  %v3931_v8 = vsel %vm3919_vm2, %v3914_v33, %v8208_v53 }
 0xe41   : > { %v8213_v62 = vunpack.i.h.bf16 %v8211_v18  ;;  %v8212_v42 = vunpack.i.l.bf16 %v8211_v18  ;;  %v8218_v7 = vunpack.i.h.bf16 %v8216_v51  ;;  %v8217_v9 = vunpack.i.l.bf16 %v8216_v51  ;;  %v8777_v18 = vld [vmem:[%s9456_s24 + $0x20] sm:$0xff] }
 0xe43   : > { %v3947_v58 = vsel %vm3936_vm3, %v3930_v52, %v8212_v42  ;;  %v3948_v48 = vsel %vm3936_vm3, %v3931_v8, %v8213_v62  ;;  %v3915_v21 = vsel %vm1334_vm0, %v12831_v55, %v8217_v9  ;;  %v3916_v2 = vsel %vm1334_vm0, %v12832_v15, %v8218_v7  ;;  %v8778_v8 = vld [vmem:[%s9456_s24 + $0x38] sm:$0xff] }
 0xe44   : > { %v8221_v19 = vpop.permute.xlu1 %8220  ;;  %7201 = vmatprep.mubr.f32.mxu0 %v3947_v58  ;;  %v8226_v1 = vpop.permute.xlu0 %8225 }
 0xe45   : > { %v8223_v25 = vunpack.i.h.bf16 %v8221_v19  ;;  %v8222_v46 = vunpack.i.l.bf16 %v8221_v19  ;;  %v8228_v45 = vunpack.i.h.bf16 %v8226_v1  ;;  %v8227_v3 = vunpack.i.l.bf16 %v8226_v1  ;;  %7202 = vmatmul.mubr.f32.gmra.mrb[106].mxu0 %v3948_v48  ;;  %v8779_v48 = vld [vmem:[%s9456_s24 + $0x30] sm:$0xff] }
 0xe47   : > { %v3932_v31 = vsel %vm3919_vm2, %v3915_v21, %v8222_v46  ;;  %v3933_v61 = vsel %vm3919_vm2, %v3916_v2, %v8223_v25  ;;  %v8781_v21 = vld [vmem:[%s9456_s24 + $0x40] sm:$0xff] }
 0xe48   : > { %v8231_v12 = vpop.permute.xlu1 %8230  ;;  %v8236_v0 = vpop.permute.xlu0 %8235  ;;  %v3949_v5 = vsel %vm3936_vm3, %v3932_v31, %v8227_v3  ;;  %v3950_v44 = vsel %vm3936_vm3, %v3933_v61, %v8228_v45  ;;  %v8780_v3 = vld [vmem:[%s9456_s24 + $0x48] sm:$0xff] }
 0xe49   : > { %v8233_v37 = vunpack.i.h.bf16 %v8231_v12  ;;  %v8232_v32 = vunpack.i.l.bf16 %v8231_v12  ;;  %7204 = vmatprep.mubr.f32.mxu0 %v3949_v5  ;;  %v8238_v59 = vunpack.i.h.bf16 %v8236_v0  ;;  %v8237_v57 = vunpack.i.l.bf16 %v8236_v0  ;;  %v8782_v0 = vld [vmem:[%s9456_s24 + $0x58] sm:$0xff] }
 0xe4a   : > { %7205 = vmatmul.mubr.f32.gmra.mrb[108].mxu0 %v3950_v44  ;;  %v8783_v44 = vld [vmem:[%s9456_s24 + $0x50] sm:$0xff] }
 0xe4b   : > { %v3917_v34 = vsel %vm1334_vm0, %v12833_v41, %v8232_v32  ;;  %v3918_v36 = vsel %vm1334_vm0, %v12834_v60, %v8233_v37 }
 0xe4c   : > { %v8241_v30 = vpop.permute.xlu1 %8240  ;;  %v3934_v28 = vsel %vm3919_vm2, %v3917_v34, %v8237_v57  ;;  %v3935_v26 = vsel %vm3919_vm2, %v3918_v36, %v8238_v59  ;;  %v8784_v34 = vld [vmem:[%s9456_s24 + $0x68] sm:$0xff]  ;;  %v8785_v36 = vld [vmem:[%s9456_s24 + $0x60] sm:$0xff] }
 0xe4d   : > { %v8243_v39 = vunpack.i.h.bf16 %v8241_v30  ;;  %v8242_v49 = vunpack.i.l.bf16 %v8241_v30 }
 0xe4f   : > { %v3951_v29 = vsel %vm3936_vm3, %v3934_v28, %v8242_v49  ;;  %v3952_v38 = vsel %vm3936_vm3, %v3935_v26, %v8243_v39 }
 0xe50   : > { %7207 = vmatprep.mubr.f32.mxu0 %v3951_v29  ;;  %v8786_v29 = vld [vmem:[%s9456_s24 + $0x78] sm:$0xff] }
 0xe51   : > { %7208 = vmatmul.mubr.f32.gmra.mrb[110].mxu0 %v3952_v38 }
 0xe52   : > { %4782 = vmatprep.mubr.f32.mxu0 %v12778_v20 }
 0xed5   : > { %v7188_v16 = vpop.f32.mrb[96].mxu0 }
 0xed6   : > { %v4048_v13 = vadd.f32 %v7188_v16, %v11329_v56  ;;  %v4042_v27 = vpop.f32.mrb[97].mxu0  ;;  %v8787_v16 = vld [vmem:[%s9456_s24 + $0x70] sm:$0xff] }
 0xed7   : > { %v4043_v14 = vadd.f32 %v11329_v56, %v4042_v27 }
 0xed8   : > { %v11334_v6 = vadd.f32 %v8772_v40, %v4048_v13 }
 0xed9   : > { %v11337_v63 = vadd.f32 %v8773_v50, %v4043_v14 }
 0xeda   : > { %12835 = vst [vmem:[#allocation32_spill] sm:$0xff] %v11334_v6  ;;  %4141 = vadd.xlane.f32.xlu1 %v11334_v6 }
 0xedb   : > { %12836 = vst [vmem:[#allocation33_spill] sm:$0xff] %v11337_v63  ;;  %4139 = vadd.xlane.f32.xlu0 %v11337_v63 }
 0xedd   : > { %v7191_v10 = vpop.f32.mrb[98].mxu0 }
 0xede   : > { %v4052_v47 = vpop.f32.mrb[99].mxu0  ;;  %v4058_v17 = vadd.f32 %v7191_v10, %v11329_v56 }
 0xedf   : > { %v4053_v22 = vadd.f32 %v11329_v56, %v4052_v47 }
 0xee0   : > { %v11349_v24 = vadd.f32 %v8775_v11, %v4058_v17 }
 0xee1   : > { %v11344_v23 = vadd.f32 %v8774_v43, %v4053_v22 }
 0xee2   : > { %v7194_v4 = vpop.f32.mrb[100].mxu0  ;;  %12838 = vst [vmem:[#allocation71_spill] sm:$0xff] %v11349_v24 }
 0xee3   : > { %12837 = vst [vmem:[#allocation35_spill] sm:$0xff] %v11344_v23  ;;  %v4068_v53 = vadd.f32 %v7194_v4, %v11329_v56  ;;  %v4062_v54 = vpop.f32.mrb[101].mxu0  ;;  %4143 = vadd.xlane.f32.xlu0 %v11344_v23 }
 0xee4   : > { %v4063_v51 = vadd.f32 %v11329_v56, %v4062_v54 }
 0xee5   : > { %v11352_v33 = vadd.f32 %v8776_v35, %v4068_v53 }
 0xee6   : > { %v11358_v62 = vadd.f32 %v8777_v18, %v4063_v51 }
 0xee7   : > { %12839 = vst [vmem:[#allocation66_spill] sm:$0xff] %v11352_v33  ;;  %4149 = vadd.xlane.f32.xlu1 %v11352_v33  ;;  %4145 = vadd.xlane.f32.xlu0 %v11349_v24 }
 0xee8   : > { %12840 = vst [vmem:[#allocation30_spill] sm:$0xff] %v11358_v62 }
 0xeeb   : > { %4147 = vadd.xlane.f32.xlu0 %v11358_v62 }
 0xf0c   : > { %v7197_v42 = vpop.f32.mrb[102].mxu0 }
 0xf0d   : > { %v4078_v7 = vadd.f32 %v7197_v42, %v11329_v56  ;;  %v4072_v9 = vpop.f32.mrb[103].mxu0 }
 0xf0e   : > { %v4073_v52 = vadd.f32 %v11329_v56, %v4072_v9 }
 0xf0f   : > { %v11364_v58 = vadd.f32 %v8778_v8, %v4078_v7 }
 0xf10   : > { %v11367_v19 = vadd.f32 %v8779_v48, %v4073_v52 }
 0xf11   : > { %12841 = vst [vmem:[#allocation67_spill] sm:$0xff] %v11364_v58  ;;  %4153 = vadd.xlane.f32.xlu1 %v11364_v58  ;;  %v7200_v1 = vpop.f32.mrb[104].mxu0 }
 0xf12   : > { %12842 = vst [vmem:[#allocation27_spill] sm:$0xff] %v11367_v19  ;;  %v4088_v25 = vadd.f32 %v7200_v1, %v11329_v56  ;;  %v4082_v46 = vpop.f32.mrb[105].mxu0  ;;  %4151 = vadd.xlane.f32.xlu0 %v11367_v19 }
 0xf13   : > { %v4083_v45 = vadd.f32 %v11329_v56, %v4082_v46  ;;  %v4476_v46 = vld [vmem:[#allocation11 + $0x28] sm:$0xff] }
 0xf14   : > { %v11374_v55 = vadd.f32 %v8780_v3, %v4088_v25  ;;  %v4472_v25 = vld [vmem:[#allocation11 + $0x8] sm:$0xff] }
 0xf15   : > { %v11377_v15 = vadd.f32 %v8781_v21, %v4083_v45  ;;  %v4474_v45 = vld [vmem:[#allocation11 + $0x18] sm:$0xff]  ;;  %v7626_v3 = vpack.c.bf16 %v4476_v46, %v4472_v25  ;;  %v4495_v25 = vld [vmem:[#allocation11 + $0xc0] sm:$0xff] }
 0xf16   : > { %12843 = vst [vmem:[#allocation28_spill] sm:$0xff] %v11374_v55  ;;  %4157 = vadd.xlane.f32.xlu1 %v11374_v55  ;;  %v4478_v21 = vld [vmem:[#allocation11 + $0x38] sm:$0xff]  ;;  %v4499_v46 = vld [vmem:[#allocation11 + $0xe0] sm:$0xff] }
 0xf17   : > { %12844 = vst [vmem:[#allocation26_spill] sm:$0xff] %v11377_v15  ;;  %4155 = vadd.xlane.f32.xlu0 %v11377_v15  ;;  %7627 = vmatprep.subr.bf16.mxu1 %v7626_v3  ;;  %v7640_v3 = vpack.c.bf16 %v4499_v46, %v4495_v25  ;;  %v4525_v25 = vld [vmem:[#allocation11 + $0x1b0] sm:$0xff] }
 0xf18   : > { %v7203_v2 = vpop.f32.mrb[106].mxu0 }
 0xf19   : > { %v4098_v31 = vadd.f32 %v7203_v2, %v11329_v56  ;;  %v4092_v61 = vpop.f32.mrb[107].mxu0  ;;  %v4471_v2 = vld [vmem:[#allocation11] sm:$0xff] }
 0xf1a   : > { %v4093_v12 = vadd.f32 %v11329_v56, %v4092_v61  ;;  %v7658_v61 = vpack.c.bf16 %v4478_v21, %v4474_v45  ;;  %v4497_v21 = vld [vmem:[#allocation11 + $0xd0] sm:$0xff] }
 0xf1b   : > { %v11384_v5 = vadd.f32 %v8782_v0, %v4098_v31  ;;  %v4475_v31 = vld [vmem:[#allocation11 + $0x20] sm:$0xff]  ;;  %v4473_v0 = vld [vmem:[#allocation11 + $0x10] sm:$0xff] }
 0xf1c   : > { %v11387_v37 = vadd.f32 %v8783_v44, %v4093_v12  ;;  %v7628_v12 = vpack.c.bf16 %v4475_v31, %v4471_v2  ;;  %v4477_v44 = vld [vmem:[#allocation11 + $0x30] sm:$0xff]  ;;  %7659 = vmatprep.subr.bf16.mxu0 %v7658_v61  ;;  %v4504_v61 = vld [vmem:[#allocation11 + $0x108] sm:$0xff] }
 0xf1d   : > { %12845 = vst [vmem:[#allocation72_spill] sm:$0xff] %v11384_v5  ;;  %4161 = vadd.xlane.f32.xlu1 %v11384_v5  ;;  %v7206_v32 = vpop.f32.mrb[108].mxu0  ;;  %v4501_v2 = vld [vmem:[#allocation11 + $0xf0] sm:$0xff] }
 0xf1e   : > { %12846 = vst [vmem:[#allocation73_spill] sm:$0xff] %v11387_v37  ;;  %v4108_v59 = vadd.f32 %v7206_v32, %v11329_v56  ;;  %v4102_v57 = vpop.f32.mrb[109].mxu0  ;;  %4159 = vadd.xlane.f32.xlu0 %v11387_v37  ;;  %v7660_v32 = vpack.c.bf16 %v4477_v44, %v4473_v0  ;;  %7629 = vmatpush1.bf16.msra.mxu1 %v7628_v12  ;;  %v4508_v12 = vld [vmem:[#allocation11 + $0x128] sm:$0xff]  ;;  %v4506_v0 = vld [vmem:[#allocation11 + $0x118] sm:$0xff] }
 0xf1f   : > { %v4103_v41 = vadd.f32 %v11329_v56, %v4102_v57  ;;  %v4484_v57 = vld [vmem:[#allocation11 + $0x68] sm:$0xff]  ;;  %v7672_v31 = vpack.c.bf16 %v4501_v2, %v4497_v21  ;;  %v7642_v44 = vpack.c.bf16 %v4508_v12, %v4504_v61  ;;  %v4530_v2 = vld [vmem:[#allocation11 + $0x1d8] sm:$0xff] }
 0xf20   : > { %v11394_v60 = vadd.f32 %v8784_v34, %v4108_v59  ;;  %v4480_v59 = vld [vmem:[#allocation11 + $0x48] sm:$0xff]  ;;  %7661 = vmatpush1.bf16.msra.mxu0 %v7660_v32  ;;  %v4510_v32 = vld [vmem:[#allocation11 + $0x138] sm:$0xff] }
 0xf21   : > { %v11397_v30 = vadd.f32 %v8785_v36, %v4103_v41  ;;  %v4482_v41 = vld [vmem:[#allocation11 + $0x58] sm:$0xff]  ;;  %v7630_v34 = vpack.c.bf16 %v4484_v57, %v4480_v59  ;;  %v4503_v59 = vld [vmem:[#allocation11 + $0x100] sm:$0xff]  ;;  %v4532_v21 = vld [vmem:[#allocation11 + $0x1e8] sm:$0xff] }
 0xf22   : > { %12847 = vst [vmem:[#allocation68_spill] sm:$0xff] %v11394_v60  ;;  %4165 = vadd.xlane.f32.xlu1 %v11394_v60  ;;  %v4486_v36 = vld [vmem:[#allocation11 + $0x78] sm:$0xff]  ;;  %v4507_v57 = vld [vmem:[#allocation11 + $0x120] sm:$0xff] }
 0xf23   : > { %12848 = vst [vmem:[#allocation74_spill] sm:$0xff] %v11397_v30  ;;  %4163 = vadd.xlane.f32.xlu0 %v11397_v30  ;;  %7631 = vmatprep.subr.bf16.mxu1 %v7630_v34  ;;  %v7644_v34 = vpack.c.bf16 %v4507_v57, %v4503_v59 }
 0xf24   : > { %v7209_v39 = vpop.f32.mrb[110].mxu0 }
 0xf25   : > { %v4118_v49 = vadd.f32 %v7209_v39, %v11329_v56  ;;  %v4112_v28 = vpop.f32.mrb[111].mxu0  ;;  %v4479_v39 = vld [vmem:[#allocation11 + $0x40] sm:$0xff] }
 0xf26   : > { %v4113_v26 = vadd.f32 %v11329_v56, %v4112_v28  ;;  %v7662_v28 = vpack.c.bf16 %v4486_v36, %v4482_v41  ;;  %v7674_v41 = vpack.c.bf16 %v4510_v32, %v4506_v0  ;;  %v4505_v36 = vld [vmem:[#allocation11 + $0x110] sm:$0xff]  ;;  %v4534_v0 = vld [vmem:[#allocation11 + $0x1f8] sm:$0xff]  ;;  %v4531_v32 = vld [vmem:[#allocation11 + $0x1e0] sm:$0xff] }
 0xf27   : > { %v11404_v38 = vadd.f32 %v8786_v29, %v4118_v49  ;;  %v4483_v49 = vld [vmem:[#allocation11 + $0x60] sm:$0xff]  ;;  %v4481_v29 = vld [vmem:[#allocation11 + $0x50] sm:$0xff]  ;;  %v7686_v57 = vpack.c.bf16 %v4534_v0, %v4530_v2 }
 0xf28   : > { %v11407_v13 = vadd.f32 %v8787_v16, %v4113_v26  ;;  %v7632_v26 = vpack.c.bf16 %v4483_v49, %v4479_v39  ;;  %v4485_v16 = vld [vmem:[#allocation11 + $0x70] sm:$0xff]  ;;  %7663 = vmatprep.subr.bf16.mxu0 %v7662_v28  ;;  %v4512_v28 = vld [vmem:[#allocation11 + $0x148] sm:$0xff] }
 0xf29   : > { %12849 = vst [vmem:[#allocation69_spill] sm:$0xff] %v11404_v38  ;;  %4169 = vadd.xlane.f32.xlu1 %v11404_v38  ;;  %v4509_v39 = vld [vmem:[#allocation11 + $0x130] sm:$0xff] }
 0xf2a   : > { %12850 = vst [vmem:[#allocation70_spill] sm:$0xff] %v11407_v13  ;;  %4167 = vadd.xlane.f32.xlu0 %v11407_v13  ;;  %7633 = vmatpush1.bf16.msra.mxu1 %v7632_v26  ;;  %v7676_v49 = vpack.c.bf16 %v4509_v39, %v4505_v36  ;;  %v4516_v26 = vld [vmem:[#allocation11 + $0x168] sm:$0xff]  ;;  %v4533_v36 = vld [vmem:[#allocation11 + $0x1f0] sm:$0xff] }
 0xf67   : > { %v4142_v27 = vpop.xlane.xlu1 %4141 }
 0xf68   : > { %v4172_v14 = vmul.f32 0.0078125, %v4142_v27  ;;  %v4140_v40 = vpop.xlane.xlu0 %4139  ;;  %v7664_v27 = vpack.c.bf16 %v4485_v16, %v4481_v29  ;;  %v4514_v29 = vld [vmem:[#allocation11 + $0x158] sm:$0xff]  ;;  %v7646_v16 = vpack.c.bf16 %v4516_v26, %v4512_v28 }
 0xf69   : > { %v4171_v50 = vmul.f32 0.0078125, %v4140_v40  ;;  %v4492_v40 = vld [vmem:[#allocation11 + $0xa8] sm:$0xff] }
 0xf6a   : > { %v11412_v10 = vsub.f32 %v11334_v6, %v4172_v14  ;;  %v4488_v14 = vld [vmem:[#allocation11 + $0x88] sm:$0xff]  ;;  %7665 = vmatpush1.bf16.msra.mxu0 %v7664_v27  ;;  %v4518_v27 = vld [vmem:[#allocation11 + $0x178] sm:$0xff] }
 0xf6b   : > { %v11415_v47 = vsub.f32 %v11337_v63, %v4171_v50  ;;  %v4490_v50 = vld [vmem:[#allocation11 + $0x98] sm:$0xff] }
 0xf6c   : > { %v4204_v56 = vmul.f32 %v11412_v10, %v11412_v10 }
 0xf6d   : > { %v4203_v22 = vmul.f32 %v11415_v47, %v11415_v47 }
 0xf6e   : > { %4221 = vadd.xlane.f32.xlu1 %v4204_v56  ;;  %v7634_v56 = vpack.c.bf16 %v4492_v40, %v4488_v14  ;;  %v4511_v14 = vld [vmem:[#allocation11 + $0x140] sm:$0xff] }
 0xf6f   : > { %4219 = vadd.xlane.f32.xlu0 %v4203_v22  ;;  %v4494_v22 = vld [vmem:[#allocation11 + $0xb8] sm:$0xff]  ;;  %v4515_v40 = vld [vmem:[#allocation11 + $0x160] sm:$0xff] }
 0xf70   : > { %v4144_v17 = vpop.xlane.xlu0 %4143  ;;  %7635 = vmatprep.subr.bf16.mxu1 %v7634_v56  ;;  %v7648_v56 = vpack.c.bf16 %v4515_v40, %v4511_v14 }
 0xf71   : > { %v4173_v43 = vmul.f32 0.0078125, %v4144_v17  ;;  %v4487_v17 = vld [vmem:[#allocation11 + $0x80] sm:$0xff] }
 0xf73   : > { %v11422_v4 = vsub.f32 %v11344_v23, %v4173_v43  ;;  %v4491_v43 = vld [vmem:[#allocation11 + $0xa0] sm:$0xff] }
 0xf74   : > { %v4150_v53 = vpop.xlane.xlu1 %4149  ;;  %v4146_v54 = vpop.xlane.xlu0 %4145 }
 0xf75   : > { %v4176_v11 = vmul.f32 0.0078125, %v4150_v53  ;;  %v4174_v35 = vmul.f32 0.0078125, %v4146_v54  ;;  %v4205_v51 = vmul.f32 %v11422_v4, %v11422_v4  ;;  %v7666_v53 = vpack.c.bf16 %v4494_v22, %v4490_v50  ;;  %v4513_v22 = vld [vmem:[#allocation11 + $0x150] sm:$0xff] }
 0xf76   : > { %v7636_v54 = vpack.c.bf16 %v4491_v43, %v4487_v17  ;;  %v7678_v50 = vpack.c.bf16 %v4518_v27, %v4514_v29  ;;  %v4517_v17 = vld [vmem:[#allocation11 + $0x170] sm:$0xff] }
 0xf77   : > { %v11427_v18 = vsub.f32 %v11349_v24, %v4174_v35  ;;  %4223 = vadd.xlane.f32.xlu0 %v4205_v51  ;;  %v11430_v7 = vsub.f32 %v11352_v33, %v4176_v11  ;;  %v4489_v11 = vld [vmem:[#allocation11 + $0x90] sm:$0xff]  ;;  %7667 = vmatprep.subr.bf16.mxu0 %v7666_v53  ;;  %v7680_v43 = vpack.c.bf16 %v4517_v17, %v4513_v22  ;;  %v4520_v53 = vld [vmem:[#allocation11 + $0x188] sm:$0xff] }
 0xf78   : > { %v4148_v42 = vpop.xlane.xlu0 %4147  ;;  %v4493_v35 = vld [vmem:[#allocation11 + $0xb0] sm:$0xff]  ;;  %7637 = vmatpush1.bf16.msra.mxu1 %v7636_v54  ;;  %v4524_v54 = vld [vmem:[#allocation11 + $0x1a8] sm:$0xff] }
 0xf79   : > { %v4175_v9 = vmul.f32 0.0078125, %v4148_v42  ;;  %v4206_v52 = vmul.f32 %v11427_v18, %v11427_v18  ;;  %v4208_v48 = vmul.f32 %v11430_v7, %v11430_v7  ;;  %v7668_v51 = vpack.c.bf16 %v4493_v35, %v4489_v11  ;;  %v4496_v42 = vld [vmem:[#allocation11 + $0xc8] sm:$0xff]  ;;  %v4522_v11 = vld [vmem:[#allocation11 + $0x198] sm:$0xff] }
 0xf7a   : > { %v7650_v35 = vpack.c.bf16 %v4524_v54, %v4520_v53 }
 0xf7b   : > { %v11435_v8 = vsub.f32 %v11358_v62, %v4175_v9  ;;  %4225 = vadd.xlane.f32.xlu1 %v4206_v52  ;;  %v4500_v9 = vld [vmem:[#allocation11 + $0xe8] sm:$0xff]  ;;  %v4498_v52 = vld [vmem:[#allocation11 + $0xd8] sm:$0xff]  ;;  %7669 = vmatpush1.bf16.msra.mxu0 %v7668_v51 }
 0xf7c   : > { %v4526_v51 = vld [vmem:[#allocation11 + $0x1b8] sm:$0xff] }
 0xf7d   : > { %v4207_v1 = vmul.f32 %v11435_v8, %v11435_v8 }
 0xf7f   : > { %4229 = vadd.xlane.f32.xlu1 %v4208_v48  ;;  %4227 = vadd.xlane.f32.xlu0 %v4207_v1  ;;  %v7638_v48 = vpack.c.bf16 %v4500_v9, %v4496_v42  ;;  %v4502_v1 = vld [vmem:[#allocation11 + $0xf8] sm:$0xff]  ;;  %v4519_v42 = vld [vmem:[#allocation11 + $0x180] sm:$0xff] }
 0xf80   : > { %v7670_v45 = vpack.c.bf16 %v4502_v1, %v4498_v52  ;;  %v4523_v9 = vld [vmem:[#allocation11 + $0x1a0] sm:$0xff]  ;;  %v7682_v52 = vpack.c.bf16 %v4526_v51, %v4522_v11  ;;  %v4521_v1 = vld [vmem:[#allocation11 + $0x190] sm:$0xff] }
 0xf81   : > { %7639 = vmatprep.subr.bf16.mxu1 %v7638_v48  ;;  %v7652_v48 = vpack.c.bf16 %v4523_v9, %v4519_v42  ;;  %v7684_v46 = vpack.c.bf16 %v4525_v25, %v4521_v1 }
 0xf82   : > { %7671 = vmatprep.subr.bf16.mxu0 %v7670_v45  ;;  %7641 = vmatpush1.bf16.msra.mxu1 %v7640_v3  ;;  %v4528_v3 = vld [vmem:[#allocation11 + $0x1c8] sm:$0xff] }
 0xf83   : > { %7673 = vmatpush1.bf16.msra.mxu0 %v7672_v31  ;;  %7643 = vmatprep.subr.bf16.mxu1 %v7642_v44  ;;  %v7654_v12 = vpack.c.bf16 %v4532_v21, %v4528_v3  ;;  %v4527_v44 = vld [vmem:[#allocation11 + $0x1c0] sm:$0xff] }
 0xf84   : > { %7675 = vmatprep.subr.bf16.mxu0 %v7674_v41  ;;  %v7656_v41 = vpack.c.bf16 %v4531_v32, %v4527_v44 }
 0xf86   : > { %7645 = vmatpush1.bf16.msra.mxu1 %v7644_v34  ;;  %v4529_v34 = vld [vmem:[#allocation11 + $0x1d0] sm:$0xff] }
 0xf87   : > { %7677 = vmatpush1.bf16.msra.mxu0 %v7676_v49  ;;  %7647 = vmatprep.subr.bf16.mxu1 %v7646_v16  ;;  %v7688_v49 = vpack.c.bf16 %v4533_v36, %v4529_v34  ;;  %v5472_v34 = vld [vmem:[#allocation13 + $0x88] sm:$0xff] }
 0xf88   : > { %7679 = vmatprep.subr.bf16.mxu0 %v7678_v50 }
 0xf8a   : > { %7649 = vmatpush1.bf16.msra.mxu1 %v7648_v56 }
 0xf8b   : > { %7681 = vmatpush1.bf16.msra.mxu0 %v7680_v43  ;;  %7651 = vmatprep.subr.bf16.mxu1 %v7650_v35 }
 0xf8c   : > { %7683 = vmatprep.subr.bf16.mxu0 %v7682_v52 }
 0xf8e   : > { %7653 = vmatpush1.bf16.msra.mxu1 %v7652_v48 }
 0xf8f   : > { %7685 = vmatpush1.bf16.msra.mxu0 %v7684_v46  ;;  %7655 = vmatprep.subr.bf16.mxu1 %v7654_v12 }
 0xf90   : > { %7687 = vmatprep.subr.bf16.mxu0 %v7686_v57 }
 0xf92   : > { %7657 = vmatpush1.bf16.msra.mxu1 %v7656_v41  ;;  %v5471_v41 = vld [vmem:[#allocation13 + $0x80] sm:$0xff] }
 0xf93   : > { %7689 = vmatpush1.bf16.msra.mxu0 %v7688_v49 }
 0xf9e   : > { %v4154_v45 = vpop.xlane.xlu1 %4153 }
 0xf9f   : > { %v4178_v31 = vmul.f32 0.0078125, %v4154_v45  ;;  %v4152_v61 = vpop.xlane.xlu0 %4151 }
 0xfa0   : > { %v4177_v59 = vmul.f32 0.0078125, %v4152_v61 }
 0xfa1   : > { %v11442_v39 = vsub.f32 %v11364_v58, %v4178_v31 }
 0xfa2   : > { %v11445_v28 = vsub.f32 %v11367_v19, %v4177_v59 }
 0xfa3   : > { %v4158_v26 = vpop.xlane.xlu1 %4157  ;;  %v4210_v29 = vmul.f32 %v11442_v39, %v11442_v39 }
 0xfa4   : > { %v4180_v16 = vmul.f32 0.0078125, %v4158_v26  ;;  %v4156_v27 = vpop.xlane.xlu0 %4155  ;;  %v4209_v14 = vmul.f32 %v11445_v28, %v11445_v28  ;;  %v7690_v26 = vpack.c.bf16 %v5472_v34, %v5471_v41 }
 0xfa5   : > { %v4179_v40 = vmul.f32 0.0078125, %v4156_v27  ;;  %4233 = vadd.xlane.f32.xlu1 %v4210_v29  ;;  %v5503_v29 = vld [vmem:[#allocation13 + $0x180] sm:$0xff] }
 0xfa6   : > { %v11452_v50 = vsub.f32 %v11374_v55, %v4180_v16  ;;  %4231 = vadd.xlane.f32.xlu0 %v4209_v14  ;;  %v5504_v16 = vld [vmem:[#allocation13 + $0x188] sm:$0xff]  ;;  %7691 = vmatprep.subr.bf16.mxu1 %v7690_v26  ;;  %v11497_v26 = vld [vmem:[%s12494_s8] ss:$0 sm:$0xff] }
 0xfa7   : > { %v11455_v56 = vsub.f32 %v11377_v15, %v4179_v40  ;;  %v11491_v14 = vpack.c.bf16 %v5504_v16, %v5503_v29 }
 0xfa8   : > { %v4212_v22 = vmul.f32 %v11452_v50, %v11452_v50 }
 0xfa9   : > { %v4211_v17 = vmul.f32 %v11455_v56, %v11455_v56  ;;  %7723 = vmatprep.subr.bf16.mxu0 %v11491_v14 }
 0xfaa   : > { %v4162_v43 = vpop.xlane.xlu1 %4161  ;;  %4237 = vadd.xlane.f32.xlu1 %v4212_v22 }
 0xfab   : > { %v4182_v53 = vmul.f32 0.0078125, %v4162_v43  ;;  %4235 = vadd.xlane.f32.xlu0 %v4211_v17  ;;  %v4160_v54 = vpop.xlane.xlu0 %4159 }
 0xfac   : > { %v4181_v11 = vmul.f32 0.0078125, %v4160_v54 }
 0xfad   : > { %v11462_v35 = vsub.f32 %v11384_v5, %v4182_v53 }
 0xfae   : > { %v11465_v51 = vsub.f32 %v11387_v37, %v4181_v11 }
 0xfaf   : > { %v4166_v42 = vpop.xlane.xlu1 %4165  ;;  %v4214_v9 = vmul.f32 %v11462_v35, %v11462_v35 }
 0xfb0   : > { %v4184_v52 = vmul.f32 0.0078125, %v4166_v42  ;;  %v4164_v48 = vpop.xlane.xlu0 %4163  ;;  %v4213_v1 = vmul.f32 %v11465_v51, %v11465_v51 }
 0xfb1   : > { %v4183_v25 = vmul.f32 0.0078125, %v4164_v48  ;;  %4241 = vadd.xlane.f32.xlu1 %v4214_v9 }
 0xfb2   : > { %v11472_v46 = vsub.f32 %v11394_v60, %v4184_v52  ;;  %4239 = vadd.xlane.f32.xlu0 %v4213_v1 }
 0xfb3   : > { %v11475_v45 = vsub.f32 %v11397_v30, %v4183_v25 }
 0xfb4   : > { %v4216_v3 = vmul.f32 %v11472_v46, %v11472_v46 }
 0xfb5   : > { %v4215_v21 = vmul.f32 %v11475_v45, %v11475_v45 }
 0xfb6   : > { %v4170_v2 = vpop.xlane.xlu1 %4169  ;;  %4245 = vadd.xlane.f32.xlu1 %v4216_v3 }
 0xfb7   : > { %v4186_v31 = vmul.f32 0.0078125, %v4170_v2  ;;  %4243 = vadd.xlane.f32.xlu0 %v4215_v21  ;;  %v4168_v61 = vpop.xlane.xlu0 %4167 }
 0xfb8   : > { %v4185_v12 = vmul.f32 0.0078125, %v4168_v61 }
 0xfb9   : > { %v11482_v0 = vsub.f32 %v11404_v38, %v4186_v31 }
 0xfba   : > { %v11485_v44 = vsub.f32 %v11407_v13, %v4185_v12 }
 0xfbb   : > { %v4218_v32 = vmul.f32 %v11482_v0, %v11482_v0 }
 0xfbc   : > { %v4217_v59 = vmul.f32 %v11485_v44, %v11485_v44 }
 0xfbd   : > { %4249 = vadd.xlane.f32.xlu1 %v4218_v32 }
 0xfbe   : > { %4247 = vadd.xlane.f32.xlu0 %v4217_v59 }
 0xffb   : > { %v4222_v57 = vpop.xlane.xlu1 %4221 }
 0xffc   : > { %v4252_v36 = vmul.f32 0.007874016, %v4222_v57  ;;  %v4220_v49 = vpop.xlane.xlu0 %4219 }
 0xffd   : > { %v4251_v27 = vmul.f32 0.007874016, %v4220_v49 }
 0xffe   : > { %8564 = vrsqrt.f32 %v4252_v36  ;;  %vm4276_vm4 = vcmp.eq.f32.partialorder %v4252_v36, inf  ;;  %vm4278_vm5 = vcmp.eq.f32.partialorder %v4252_v36, 0.0  ;;  %v4279_v42 = vand.u32 2147483648, %v4252_v36 }
 0xfff   : > { %8566 = vrsqrt.f32 %v4251_v27  ;;  %vm4269_vm6 = vcmp.eq.f32.partialorder %v4251_v27, inf  ;;  %v4272_v48 = vand.u32 2147483648, %v4251_v27  ;;  %vm4271_vm7 = vcmp.eq.f32.partialorder %v4251_v27, 0.0 }
0x1004   : > { %v4224_v40 = vpop.xlane.xlu0 %4223 }
0x1005   : > { %v4253_v22 = vmul.f32 0.007874016, %v4224_v40 }
0x1007   : > { %8568 = vrsqrt.f32 %v4253_v22  ;;  %vm4283_vm8 = vcmp.eq.f32.partialorder %v4253_v22, inf  ;;  %v4286_v41 = vand.u32 2147483648, %v4253_v22  ;;  %vm4285_vm9 = vcmp.eq.f32.partialorder %v4253_v22, 0.0 }
0x1008   : > { %v8565_v17 = vpop.eup %8564  ;;  %v4226_v43 = vpop.xlane.xlu1 %4225 }
0x1009   : > { %v8567_v53 = vpop.eup %8566  ;;  %v4275_v54 = vmul.f32 %v8565_v17, %v4252_v36  ;;  %v4254_v11 = vmul.f32 0.007874016, %v4226_v43  ;;  %v5456_v17 = vld [vmem:[#allocation13 + $0x8] sm:$0xff]  ;;  %v5487_v43 = vld [vmem:[#allocation13 + $0x100] sm:$0xff] }
0x100a   : > { %v4268_v9 = vmul.f32 %v8567_v53, %v4251_v27  ;;  %v5488_v53 = vld [vmem:[#allocation13 + $0x108] sm:$0xff] }
0x100b   : > { %v4277_v52 = vsel %vm4276_vm4, %v4252_v36, %v4275_v54  ;;  %8570 = vrsqrt.f32 %v4254_v11  ;;  %vm4290_vm10 = vcmp.eq.f32.partialorder %v4254_v11, inf  ;;  %v4293_v40 = vand.u32 2147483648, %v4254_v11 }
0x100c   : > { %v4270_v1 = vsel %vm4269_vm6, %v4251_v27, %v4268_v9  ;;  %v4230_v25 = vpop.xlane.xlu1 %4229  ;;  %v4228_v3 = vpop.xlane.xlu0 %4227  ;;  %v4280_v21 = vsel %vm4278_vm5, %v4279_v42, %v4277_v52  ;;  %v5455_v27 = vld [vmem:[#allocation13] sm:$0xff]  ;;  %vm4292_vm11 = vcmp.eq.f32.partialorder %v4254_v11, 0.0  ;;  %v4385_v9 = vmul.f32 %v11497_v26, %v11415_v47 }
0x100d   : > { %v4273_v2 = vsel %vm4271_vm7, %v4272_v48, %v4270_v1  ;;  %v4256_v31 = vmul.f32 0.007874016, %v4230_v25  ;;  %v4255_v61 = vmul.f32 0.007874016, %v4228_v3  ;;  %v4402_v32 = vadd.f32 1e-06, %v4280_v21 }
0x100e   : > { %v4401_v12 = vadd.f32 1e-06, %v4273_v2  ;;  %v11506_v25 = vld [vmem:[%s12851_s17] ss:$0 sm:$0xff]  ;;  %v7692_v21 = vpack.c.bf16 %v5456_v17, %v5455_v27  ;;  %v11508_v2 = vpack.c.bf16 %v5488_v53, %v5487_v43  ;;  %v4388_v43 = vmul.f32 %v11497_v26, %v11427_v18 }
0x100f   : > { %8572 = vrsqrt.f32 %v4256_v31  ;;  %vm4304_vm12 = vcmp.eq.f32.partialorder %v4256_v31, inf  ;;  %vm4306_vm13 = vcmp.eq.f32.partialorder %v4256_v31, 0.0  ;;  %vm4297_vm14 = vcmp.eq.f32.partialorder %v4255_v61, inf }
0x1010   : > { %8574 = vrcp.f32 %v4401_v12  ;;  %v4307_v12 = vand.u32 2147483648, %v4256_v31  ;;  %vm4299_vm15 = vcmp.eq.f32.partialorder %v4255_v61, 0.0  ;;  %v4390_v18 = vmul.f32 %v11497_v26, %v11430_v7 }
0x1011   : > { %v8569_v59 = vpop.eup %8568  ;;  %8576 = vrsqrt.f32 %v4255_v61 }
0x1012   : > { %v4282_v57 = vmul.f32 %v8569_v59, %v4253_v22  ;;  %8578 = vrcp.f32 %v4402_v32 }
0x1014   : > { %v4284_v34 = vsel %vm4283_vm8, %v4253_v22, %v4282_v57  ;;  %v4386_v22 = vmul.f32 %v11497_v26, %v11412_v10  ;;  %v4300_v57 = vand.u32 2147483648, %v4255_v61 }
0x1015   : > { %v8571_v36 = vpop.eup %8570  ;;  %v4287_v49 = vsel %vm4285_vm9, %v4286_v41, %v4284_v34 }
0x1016   : > { %v4289_v29 = vmul.f32 %v8571_v36, %v4254_v11  ;;  %v4403_v16 = vadd.f32 1e-06, %v4287_v49 }
0x1018   : > { %v4291_v54 = vsel %vm4290_vm10, %v4254_v11, %v4289_v29  ;;  %8580 = vrcp.f32 %v4403_v16 }
0x1019   : > { %v8573_v42 = vpop.eup %8572  ;;  %v4294_v52 = vsel %vm4292_vm11, %v4293_v40, %v4291_v54 }
0x101a   : > { %v8575_v48 = vpop.eup %8574  ;;  %v4303_v1 = vmul.f32 %v8573_v42, %v4256_v31  ;;  %v4404_v3 = vadd.f32 1e-06, %v4294_v52 }
0x101b   : > { %v8577_v11 = vpop.eup %8576  ;;  %v4433_v10 = vmul.f32 %v8575_v48, %v4385_v9  ;;  %v4389_v9 = vmul.f32 %v11497_v26, %v11435_v8 }
0x101c   : > { %v8579_v32 = vpop.eup %8578  ;;  %v4305_v59 = vsel %vm4304_vm12, %v4256_v31, %v4303_v1  ;;  %v4296_v47 = vmul.f32 %v8577_v11, %v4255_v61  ;;  %8582 = vrcp.f32 %v4404_v3  ;;  %v4387_v31 = vmul.f32 %v11497_v26, %v11422_v4 }
0x101d   : > { %v4455_v41 = vadd.f32 %v11506_v25, %v4433_v10  ;;  %v4434_v34 = vmul.f32 %v8579_v32, %v4386_v22  ;;  %v4308_v36 = vsel %vm4306_vm13, %v4307_v12, %v4305_v59 }
0x101e   : > { %v4298_v49 = vsel %vm4297_vm14, %v4255_v61, %v4296_v47  ;;  %v4406_v29 = vadd.f32 1e-06, %v4308_v36 }
0x101f   : > { %4622 = vmatmul.mubr.f32.vlgmr.msra.gmra.mrb[80].mxu1 %v4455_v41  ;;  %4783 = vmatmul.mubr.f32.vlgmr.msra.gmra.mrb[112].mxu0 %v4455_v41  ;;  %v4301_v16 = vsel %vm4299_vm15, %v4300_v57, %v4298_v49  ;;  %v4456_v40 = vadd.f32 %v11506_v25, %v4434_v34 }
0x1020   : > { %4627 = vmatprep.mubr.f32.mxu1 %v12778_v20  ;;  %4788 = vmatprep.mubr.f32.mxu0 %v12778_v20  ;;  %v4405_v27 = vadd.f32 1e-06, %v4301_v16  ;;  %8584 = vrcp.f32 %v4406_v29 }
0x1021   : > { %7693 = vmatpush3.bf16.msra.mxu1 %v7692_v21  ;;  %7725 = vmatpush3.bf16.msra.mxu0 %v11508_v2 }
0x1022   : > { %v8581_v17 = vpop.eup %8580  ;;  %8586 = vrcp.f32 %v4405_v27 }
0x1023   : > { %4628 = vmatmul.mubr.f32.gmra.mrb[82].mxu1 %v4456_v40  ;;  %4789 = vmatmul.mubr.f32.gmra.mrb[114].mxu0 %v4456_v40  ;;  %v4435_v61 = vmul.f32 %v8581_v17, %v4387_v31 }
0x1024   : > { %4633 = vmatprep.mubr.f32.mxu1 %v12778_v20  ;;  %4794 = vmatprep.mubr.f32.mxu0 %v12778_v20 }
0x1025   : > { %v4457_v4 = vadd.f32 %v11506_v25, %v4435_v61 }
0x1026   : > { %v8583_v53 = vpop.eup %8582 }
0x1027   : > { %4634 = vmatmul.mubr.f32.gmra.mrb[84].mxu1 %v4457_v4  ;;  %4795 = vmatmul.mubr.f32.gmra.mrb[116].mxu0 %v4457_v4  ;;  %v4436_v54 = vmul.f32 %v8583_v53, %v4388_v43 }
0x1028   : > { %4639 = vmatprep.mubr.f32.mxu1 %v12778_v20  ;;  %4800 = vmatprep.mubr.f32.mxu0 %v12778_v20 }
0x1029   : > { %v4458_v42 = vadd.f32 %v11506_v25, %v4436_v54 }
0x102a   : > { %v8585_v22 = vpop.eup %8584 }
0x102b   : > { %4640 = vmatmul.mubr.f32.gmra.mrb[86].mxu1 %v4458_v42  ;;  %4801 = vmatmul.mubr.f32.gmra.mrb[118].mxu0 %v4458_v42  ;;  %v4438_v3 = vmul.f32 %v8585_v22, %v4390_v18 }
0x102c   : > { %v8587_v52 = vpop.eup %8586  ;;  %4645 = vmatprep.mubr.f32.mxu1 %v12778_v20  ;;  %4806 = vmatprep.mubr.f32.mxu0 %v12778_v20 }
0x102d   : > { %v4437_v48 = vmul.f32 %v8587_v52, %v4389_v9  ;;  %v4460_v11 = vadd.f32 %v11506_v25, %v4438_v3 }
0x102f   : > { %v4459_v1 = vadd.f32 %v11506_v25, %v4437_v48 }
0x1031   : > { %4646 = vmatmul.mubr.f32.gmra.mrb[88].mxu1 %v4459_v1  ;;  %4807 = vmatmul.mubr.f32.gmra.mrb[120].mxu0 %v4459_v1 }
0x1032   : > { %v4234_v21 = vpop.xlane.xlu1 %4233  ;;  %4651 = vmatprep.mubr.f32.mxu1 %v12778_v20  ;;  %4812 = vmatprep.mubr.f32.mxu0 %v12778_v20 }
0x1033   : > { %v4258_v8 = vmul.f32 0.007874016, %v4234_v21  ;;  %v4232_v12 = vpop.xlane.xlu0 %4231 }
0x1034   : > { %v4257_v10 = vmul.f32 0.007874016, %v4232_v12 }
0x1035   : > { %8588 = vrsqrt.f32 %v4258_v8  ;;  %4652 = vmatmul.mubr.f32.gmra.mrb[90].mxu1 %v4460_v11  ;;  %4813 = vmatmul.mubr.f32.gmra.mrb[122].mxu0 %v4460_v11  ;;  %vm4318_vm0 = vcmp.eq.f32.partialorder %v4258_v8, inf  ;;  %vm4320_vm1 = vcmp.eq.f32.partialorder %v4258_v8, 0.0  ;;  %v4321_v27 = vand.u32 2147483648, %v4258_v8 }
0x1036   : > { %8590 = vrsqrt.f32 %v4257_v10  ;;  %4657 = vmatprep.mubr.f32.mxu1 %v12778_v20  ;;  %4818 = vmatprep.mubr.f32.mxu0 %v12778_v20  ;;  %vm4311_vm2 = vcmp.eq.f32.partialorder %v4257_v10, inf  ;;  %v4314_v17 = vand.u32 2147483648, %v4257_v10  ;;  %vm4313_vm3 = vcmp.eq.f32.partialorder %v4257_v10, 0.0 }
0x1037   : > { %v4238_v7 = vpop.xlane.xlu1 %4237 }
0x1038   : > { %v4260_v32 = vmul.f32 0.007874016, %v4238_v7  ;;  %v4236_v59 = vpop.xlane.xlu0 %4235 }
0x1039   : > { %v4259_v47 = vmul.f32 0.007874016, %v4236_v59 }
0x103a   : > { %8592 = vrsqrt.f32 %v4260_v32  ;;  %vm4332_vm4 = vcmp.eq.f32.partialorder %v4260_v32, inf  ;;  %v4335_v3 = vand.u32 2147483648, %v4260_v32  ;;  %vm4334_vm6 = vcmp.eq.f32.partialorder %v4260_v32, 0.0 }
0x103b   : > { %8594 = vrsqrt.f32 %v4259_v47  ;;  %vm4325_vm5 = vcmp.eq.f32.partialorder %v4259_v47, inf  ;;  %v4328_v11 = vand.u32 2147483648, %v4259_v47  ;;  %vm4327_vm7 = vcmp.eq.f32.partialorder %v4259_v47, 0.0 }
0x103e   : > { %v4242_v57 = vpop.xlane.xlu1 %4241 }
0x103f   : > { %v8589_v41 = vpop.eup %8588  ;;  %v11537_v34 = vmul.f32 0.007874016, %v4242_v57  ;;  %v4240_v36 = vpop.xlane.xlu0 %4239 }
0x1040   : > { %v8591_v49 = vpop.eup %8590  ;;  %v4317_v29 = vmul.f32 %v8589_v41, %v4258_v8  ;;  %v4261_v16 = vmul.f32 0.007874016, %v4240_v36 }
0x1041   : > { %v4310_v31 = vmul.f32 %v8591_v49, %v4257_v10  ;;  %8596 = vrsqrt.f32 %v11537_v34  ;;  %vm4346_vm8 = vcmp.eq.f32.partialorder %v11537_v34, inf  ;;  %vm4348_vm11 = vcmp.eq.f32.partialorder %v11537_v34, 0.0 }
0x1042   : > { %v4319_v40 = vsel %vm4318_vm0, %v4258_v8, %v4317_v29  ;;  %8598 = vrsqrt.f32 %v4261_v16  ;;  %vm4339_vm9 = vcmp.eq.f32.partialorder %v4261_v16, inf  ;;  %vm4341_vm10 = vcmp.eq.f32.partialorder %v4261_v16, 0.0 }
0x1043   : > { %v4312_v61 = vsel %vm4311_vm2, %v4257_v10, %v4310_v31  ;;  %v4246_v43 = vpop.xlane.xlu1 %4245  ;;  %v4322_v4 = vsel %vm4320_vm1, %v4321_v27, %v4319_v40 }
0x1044   : > { %v8593_v53 = vpop.eup %8592  ;;  %v11540_v54 = vmul.f32 0.007874016, %v4246_v43  ;;  %v4244_v42 = vpop.xlane.xlu0 %4243  ;;  %v4315_v22 = vsel %vm4313_vm3, %v4314_v17, %v4312_v61  ;;  %v4408_v1 = vadd.f32 1e-06, %v4322_v4  ;;  %v4342_v17 = vand.u32 2147483648, %v4261_v16 }
0x1045   : > { %v8595_v9 = vpop.eup %8594  ;;  %v4331_v52 = vmul.f32 %v8593_v53, %v4260_v32  ;;  %v11542_v18 = vmul.f32 0.007874016, %v4244_v42  ;;  %v4407_v48 = vadd.f32 1e-06, %v4315_v22  ;;  %v4349_v61 = vand.u32 2147483648, %v11537_v34 }
0x1046   : > { %v4324_v21 = vmul.f32 %v8595_v9, %v4259_v47  ;;  %8600 = vrsqrt.f32 %v11540_v54  ;;  %v4391_v22 = vmul.f32 %v11497_v26, %v11445_v28  ;;  %vm4360_vm14 = vcmp.eq.f32.partialorder %v11540_v54, inf }
0x1047   : > { %v4333_v8 = vsel %vm4332_vm4, %v4260_v32, %v4331_v52  ;;  %8602 = vrsqrt.f32 %v11542_v18  ;;  %vm4353_vm12 = vcmp.eq.f32.partialorder %v11542_v18, inf  ;;  %vm4355_vm13 = vcmp.eq.f32.partialorder %v11542_v18, 0.0 }
0x1048   : > { %v4326_v12 = vsel %vm4325_vm5, %v4259_v47, %v4324_v21  ;;  %8604 = vrcp.f32 %v4407_v48  ;;  %v4336_v7 = vsel %vm4334_vm6, %v4335_v3, %v4333_v8  ;;  %vm4362_vm15 = vcmp.eq.f32.partialorder %v11540_v54, 0.0 }
0x1049   : > { %8606 = vrcp.f32 %v4408_v1  ;;  %v4329_v10 = vsel %vm4327_vm7, %v4328_v11, %v4326_v12  ;;  %v4410_v40 = vadd.f32 1e-06, %v4336_v7 }
0x104a   : > { %v4250_v59 = vpop.xlane.xlu1 %4249  ;;  %v4409_v57 = vadd.f32 1e-06, %v4329_v10 }
0x104b   : > { %v8597_v41 = vpop.eup %8596  ;;  %v11546_v36 = vmul.f32 0.007874016, %v4250_v59  ;;  %v4248_v49 = vpop.xlane.xlu0 %4247 }
0x104c   : > { %v8599_v29 = vpop.eup %8598  ;;  %v4345_v27 = vmul.f32 %v8597_v41, %v11537_v34  ;;  %v11549_v31 = vmul.f32 0.007874016, %v4248_v49  ;;  %8608 = vrcp.f32 %v4409_v57  ;;  %v4393_v41 = vmul.f32 %v11497_v26, %v11455_v56 }
0x104d   : > { %v4338_v32 = vmul.f32 %v8599_v29, %v4261_v16  ;;  %8610 = vrsqrt.f32 %v11546_v36  ;;  %v4363_v49 = vand.u32 2147483648, %v11540_v54  ;;  %vm4374_vm2 = vcmp.eq.f32.partialorder %v11546_v36, inf }
0x104e   : > { %v4347_v47 = vsel %vm4346_vm8, %v11537_v34, %v4345_v27  ;;  %8612 = vrsqrt.f32 %v11549_v31  ;;  %v4356_v34 = vand.u32 2147483648, %v11542_v18  ;;  %vm4367_vm0 = vcmp.eq.f32.partialorder %v11549_v31, inf }
0x104f   : > { %v4340_v43 = vsel %vm4339_vm9, %v4261_v16, %v4338_v32  ;;  %8614 = vrcp.f32 %v4410_v40  ;;  %v4350_v52 = vsel %vm4348_vm11, %v4349_v61, %v4347_v47  ;;  %v4392_v16 = vmul.f32 %v11497_v26, %v11442_v39 }
0x1050   : > { %v8601_v4 = vpop.eup %8600  ;;  %v4343_v53 = vsel %vm4341_vm10, %v4342_v17, %v4340_v43  ;;  %v4412_v28 = vadd.f32 1e-06, %v4350_v52  ;;  %v4370_v43 = vand.u32 2147483648, %v11549_v31  ;;  %vm4369_vm1 = vcmp.eq.f32.partialorder %v11549_v31, 0.0 }
0x1051   : > { %v8603_v42 = vpop.eup %8602  ;;  %v4411_v9 = vadd.f32 1e-06, %v4343_v53  ;;  %v4359_v1 = vmul.f32 %v8601_v4, %v11540_v54  ;;  %v4395_v52 = vmul.f32 %v11497_v26, %v11465_v51  ;;  %vm4376_vm3 = vcmp.eq.f32.partialorder %v11546_v36, 0.0 }
0x1052   : > { %v8605_v48 = vpop.eup %8604  ;;  %v4352_v3 = vmul.f32 %v8603_v42, %v11542_v18  ;;  %v4396_v51 = vmul.f32 %v11497_v26, %v11462_v35 }
0x1053   : > { %v8607_v21 = vpop.eup %8606  ;;  %v4439_v8 = vmul.f32 %v8605_v48, %v4391_v22  ;;  %8616 = vrcp.f32 %v4411_v9  ;;  %v4361_v39 = vsel %vm4360_vm14, %v11540_v54, %v4359_v1  ;;  %v4394_v54 = vmul.f32 %v11497_v26, %v11452_v50 }
0x1054   : > { %v4354_v11 = vsel %vm4353_vm12, %v11542_v18, %v4352_v3  ;;  %v4440_v10 = vmul.f32 %v8607_v21, %v4392_v16  ;;  %8618 = vrcp.f32 %v4412_v28  ;;  %v4364_v47 = vsel %vm4362_vm15, %v4363_v49, %v4361_v39 }
0x1055   : > { %v4461_v12 = vadd.f32 %v11506_v25, %v4439_v8  ;;  %v4357_v7 = vsel %vm4355_vm13, %v4356_v34, %v4354_v11  ;;  %v4414_v4 = vadd.f32 1e-06, %v4364_v47  ;;  %v4397_v28 = vmul.f32 %v11497_v26, %v11475_v45 }
0x1056   : > { %v8609_v59 = vpop.eup %8608  ;;  %v4413_v29 = vadd.f32 1e-06, %v4357_v7  ;;  %v4462_v40 = vadd.f32 %v11506_v25, %v4440_v10  ;;  %v4398_v7 = vmul.f32 %v11497_v26, %v11472_v46 }
0x1057   : > { %v8611_v57 = vpop.eup %8610  ;;  %4658 = vmatmul.mubr.f32.gmra.mrb[92].mxu1 %v4461_v12  ;;  %4819 = vmatmul.mubr.f32.gmra.mrb[124].mxu0 %v4461_v12  ;;  %v4441_v32 = vmul.f32 %v8609_v59, %v4393_v41 }
0x1058   : > { %v8613_v18 = vpop.eup %8612  ;;  %4663 = vmatprep.mubr.f32.mxu1 %v12778_v20  ;;  %4824 = vmatprep.mubr.f32.mxu0 %v12778_v20  ;;  %v4373_v17 = vmul.f32 %v8611_v57, %v11546_v36  ;;  %8620 = vrcp.f32 %v4413_v29  ;;  %v4399_v57 = vmul.f32 %v11497_v26, %v11485_v44 }
0x1059   : > { %v4366_v27 = vmul.f32 %v8613_v18, %v11549_v31  ;;  %v8615_v56 = vpop.eup %8614  ;;  %v4463_v53 = vadd.f32 %v11506_v25, %v4441_v32  ;;  %8622 = vrcp.f32 %v4414_v4  ;;  %v4400_v18 = vmul.f32 %v11497_v26, %v11482_v0  ;;  %v5505_v32 = vld [vmem:[#allocation13 + $0x190] sm:$0xff]  ;;  %v5506_v0 = vld [vmem:[#allocation13 + $0x198] sm:$0xff] }
0x105a   : > { %v4442_v42 = vmul.f32 %v8615_v56, %v4394_v54  ;;  %v4375_v9 = vsel %vm4374_vm2, %v11546_v36, %v4373_v17  ;;  %v5457_v26 = vld [vmem:[#allocation13 + $0x10] sm:$0xff]  ;;  %v5458_v56 = vld [vmem:[#allocation13 + $0x18] sm:$0xff]  ;;  %v11625_v54 = vpack.c.bf16 %v5506_v0, %v5505_v32 }
0x105b   : > { %v4368_v61 = vsel %vm4367_vm0, %v11549_v31, %v4366_v27  ;;  %4664 = vmatmul.mubr.f32.gmra.mrb[94].mxu1 %v4462_v40  ;;  %4825 = vmatmul.mubr.f32.gmra.mrb[126].mxu0 %v4462_v40  ;;  %v4377_v31 = vand.u32 2147483648, %v11546_v36  ;;  %v5473_v27 = vld [vmem:[#allocation13 + $0x90] sm:$0xff]  ;;  %v5474_v40 = vld [vmem:[#allocation13 + $0x98] sm:$0xff] }
0x105c   : > { %4669 = vmatprep.mubr.f32.mxu1 %v12778_v20  ;;  %4830 = vmatprep.mubr.f32.mxu0 %v12778_v20  ;;  %v4371_v50 = vsel %vm4369_vm1, %v4370_v43, %v4368_v61  ;;  %v4464_v1 = vadd.f32 %v11506_v25, %v4442_v42  ;;  %v7694_v47 = vpack.c.bf16 %v5474_v40, %v5473_v27  ;;  %v5489_v43 = vld [vmem:[#allocation13 + $0x110] sm:$0xff]  ;;  %v5490_v4 = vld [vmem:[#allocation13 + $0x118] sm:$0xff]  ;;  %v5475_v42 = vld [vmem:[#allocation13 + $0xa0] sm:$0xff] }
0x105d   : > { %v8617_v22 = vpop.eup %8616  ;;  %v4415_v48 = vadd.f32 1e-06, %v4371_v50  ;;  %v4378_v21 = vsel %vm4376_vm3, %v4377_v31, %v4375_v9  ;;  %v7696_v61 = vpack.c.bf16 %v5458_v56, %v5457_v26  ;;  %v5476_v50 = vld [vmem:[#allocation13 + $0xa8] sm:$0xff]  ;;  %7727 = vmatprep.subr.bf16.mxu0 %v11625_v54  ;;  %v5495_v27 = vld [vmem:[#allocation13 + $0x140] sm:$0xff]  ;;  %v5482_v0 = vld [vmem:[#allocation13 + $0xd8] sm:$0xff] }
0x105e   : > { %v4443_v3 = vmul.f32 %v8617_v22, %v4395_v52  ;;  %v8619_v16 = vpop.eup %8618  ;;  %v4416_v36 = vadd.f32 1e-06, %v4378_v21  ;;  %7695 = vmatprep.subr.bf16.mxu1 %v7694_v47  ;;  %v5507_v22 = vld [vmem:[#allocation13 + $0x1a0] sm:$0xff]  ;;  %v5508_v9 = vld [vmem:[#allocation13 + $0x1a8] sm:$0xff]  ;;  %v5481_v47 = vld [vmem:[#allocation13 + $0xd0] sm:$0xff] }
0x105f   : > { %4670 = vmatmul.mubr.f32.gmra.mrb[96].mxu1 %v4463_v53  ;;  %4831 = vmatmul.mubr.f32.gmra.mrb[128].mxu0 %v4463_v53  ;;  %8624 = vrcp.f32 %v4415_v48  ;;  %v4444_v8 = vmul.f32 %v8619_v16, %v4396_v51  ;;  %v11627_v53 = vpack.c.bf16 %v5490_v4, %v5489_v43  ;;  %v5459_v52 = vld [vmem:[#allocation13 + $0x20] sm:$0xff]  ;;  %v11631_v31 = vpack.c.bf16 %v5508_v9, %v5507_v22  ;;  %v5477_v16 = vld [vmem:[#allocation13 + $0xb0] sm:$0xff]  ;;  %v5478_v51 = vld [vmem:[#allocation13 + $0xb8] sm:$0xff] }
0x1060   : > { %4675 = vmatprep.mubr.f32.mxu1 %v12778_v20  ;;  %4836 = vmatprep.mubr.f32.mxu0 %v12778_v20  ;;  %v4465_v34 = vadd.f32 %v11506_v25, %v4443_v3  ;;  %8626 = vrcp.f32 %v4416_v36  ;;  %v5492_v3 = vld [vmem:[#allocation13 + $0x128] sm:$0xff]  ;;  %v5509_v36 = vld [vmem:[#allocation13 + $0x1b0] sm:$0xff]  ;;  %v7710_v56 = vpack.c.bf16 %v5482_v0, %v5481_v47  ;;  %v5466_v43 = vld [vmem:[#allocation13 + $0x58] sm:$0xff] }
0x1061   : > { %v4466_v35 = vadd.f32 %v11506_v25, %v4444_v8  ;;  %7697 = vmatpush3.bf16.msra.mxu1 %v7696_v61  ;;  %7729 = vmatpush3.bf16.msra.mxu0 %v11627_v53  ;;  %v5510_v8 = vld [vmem:[#allocation13 + $0x1b8] sm:$0xff]  ;;  %v5496_v40 = vld [vmem:[#allocation13 + $0x148] sm:$0xff]  ;;  %v5513_v26 = vld [vmem:[#allocation13 + $0x1d0] sm:$0xff] }
0x1062   : > { %v8621_v11 = vpop.eup %8620  ;;  %7731 = vmatprep.subr.bf16.mxu0 %v11631_v31  ;;  %v11645_v32 = vpack.c.bf16 %v5496_v40, %v5495_v27  ;;  %v5465_v61 = vld [vmem:[#allocation13 + $0x50] sm:$0xff]  ;;  %v5498_v22 = vld [vmem:[#allocation13 + $0x158] sm:$0xff]  ;;  %v5483_v9 = vld [vmem:[#allocation13 + $0xe0] sm:$0xff] }
0x1063   : > { %4676 = vmatmul.mubr.f32.gmra.mrb[98].mxu1 %v4464_v1  ;;  %4837 = vmatmul.mubr.f32.gmra.mrb[130].mxu0 %v4464_v1  ;;  %v4445_v12 = vmul.f32 %v8621_v11, %v4397_v28  ;;  %v8623_v10 = vpop.eup %8622  ;;  %v5491_v1 = vld [vmem:[#allocation13 + $0x120] sm:$0xff]  ;;  %v5461_v11 = vld [vmem:[#allocation13 + $0x30] sm:$0xff]  ;;  %v5462_v28 = vld [vmem:[#allocation13 + $0x38] sm:$0xff] }
0x1064   : > { %4681 = vmatprep.mubr.f32.mxu1 %v12778_v20  ;;  %4842 = vmatprep.mubr.f32.mxu0 %v12778_v20  ;;  %v4446_v59 = vmul.f32 %v8623_v10, %v4398_v7  ;;  %v11633_v21 = vpack.c.bf16 %v5492_v3, %v5491_v1  ;;  %v5493_v10 = vld [vmem:[#allocation13 + $0x130] sm:$0xff]  ;;  %v5494_v7 = vld [vmem:[#allocation13 + $0x138] sm:$0xff]  ;;  %12853 = vst [vmem:[#allocation29_spill] sm:$0xff] %v11645_v32  ;;  %v5516_v1 = vld [vmem:[#allocation13 + $0x1e8] sm:$0xff] }
0x1065   : > { %v4467_v45 = vadd.f32 %v11506_v25, %v4445_v12  ;;  %v7704_v12 = vpack.c.bf16 %v5462_v28, %v5461_v11  ;;  %v5467_v3 = vld [vmem:[#allocation13 + $0x60] sm:$0xff]  ;;  %v5485_v28 = vld [vmem:[#allocation13 + $0xf0] sm:$0xff] }
0x1066   : > { %v4468_v46 = vadd.f32 %v11506_v25, %v4446_v59  ;;  %7733 = vmatpush3.bf16.msra.mxu0 %v11633_v21  ;;  %v5479_v59 = vld [vmem:[#allocation13 + $0xc0] sm:$0xff] }
0x1067   : > { %4682 = vmatmul.mubr.f32.gmra.mrb[100].mxu1 %v4465_v34  ;;  %4843 = vmatmul.mubr.f32.gmra.mrb[132].mxu0 %v4465_v34  ;;  %v7702_v34 = vpack.c.bf16 %v5478_v51, %v5477_v16  ;;  %v5468_v16 = vld [vmem:[#allocation13 + $0x68] sm:$0xff]  ;;  %v4535_v27 = vld [vmem:[%s12860_s28] sm:$0xf] }
0x1068   : > { %4687 = vmatprep.mubr.f32.mxu1 %v12778_v20  ;;  %4848 = vmatprep.mubr.f32.mxu0 %v12778_v20  ;;  %v12861_v40 = vld [vmem:[#allocation24_spill] sm:$0xff] }
0x1069   : > { %v8625_v39 = vpop.eup %8624  ;;  %v4551_v47 = vsub.s32 3, %v12861_v40  ;;  %v12862_v0 = vsub.s32 0, %v12861_v40 }
0x106a   : > { %v4447_v41 = vmul.f32 %v8625_v39, %v4399_v57  ;;  %v8627_v49 = vpop.eup %8626  ;;  %v5480_v39 = vld [vmem:[#allocation13 + $0xc8] sm:$0xff]  ;;  %v5511_v57 = vld [vmem:[#allocation13 + $0x1c0] sm:$0xff] }
0x106b   : > { %4688 = vmatmul.mubr.f32.gmra.mrb[102].mxu1 %v4466_v35  ;;  %4849 = vmatmul.mubr.f32.gmra.mrb[134].mxu0 %v4466_v35  ;;  %v4448_v29 = vmul.f32 %v8627_v49, %v4400_v18  ;;  %v11637_v35 = vpack.c.bf16 %v5510_v8, %v5509_v36  ;;  %v5463_v49 = vld [vmem:[#allocation13 + $0x40] sm:$0xff]  ;;  %v5464_v18 = vld [vmem:[#allocation13 + $0x48] sm:$0xff]  ;;  %v7716_v36 = vpack.c.bf16 %v5468_v16, %v5467_v3 }
0x106c   : > { %4693 = vmatprep.mubr.f32.mxu1 %v12778_v20  ;;  %4854 = vmatprep.mubr.f32.mxu0 %v12778_v20  ;;  %v4469_v44 = vadd.f32 %v11506_v25, %v4447_v41  ;;  %v5512_v41 = vld [vmem:[#allocation13 + $0x1c8] sm:$0xff] }
0x106d   : > { %v4470_v17 = vadd.f32 %v11506_v25, %v4448_v29  ;;  %v5460_v25 = vld [vmem:[#allocation13 + $0x28] sm:$0xff]  ;;  %7735 = vmatprep.subr.bf16.mxu0 %v11637_v35  ;;  %v7708_v29 = vpack.c.bf16 %v5464_v18, %v5463_v49  ;;  %v5501_v49 = vld [vmem:[#allocation13 + $0x170] sm:$0xff]  ;;  %v5502_v18 = vld [vmem:[#allocation13 + $0x178] sm:$0xff] }
0x106e   : > { %v7700_v48 = vpack.c.bf16 %v5460_v25, %v5459_v52  ;;  %v5484_v52 = vld [vmem:[#allocation13 + $0xe8] sm:$0xff]  ;;  %v5515_v25 = vld [vmem:[#allocation13 + $0x1e0] sm:$0xff] }
0x106f   : > { %4694 = vmatmul.mubr.f32.gmra.mrb[104].mxu1 %v4467_v45  ;;  %4855 = vmatmul.mubr.f32.gmra.mrb[136].mxu0 %v4467_v45  ;;  %v11639_v45 = vpack.c.bf16 %v5494_v7, %v5493_v10  ;;  %v11655_v51 = vpack.c.bf16 %v5516_v1, %v5515_v25  ;;  %v5500_v8 = vld [vmem:[#allocation13 + $0x168] sm:$0xff]  ;;  %v5517_v10 = vld [vmem:[#allocation13 + $0x1f0] sm:$0xff] }
0x1070   : > { %4699 = vmatprep.mubr.f32.mxu1 %v12778_v20  ;;  %4860 = vmatprep.mubr.f32.mxu0 %v12778_v20 }
0x1071   : > { %7737 = vmatpush3.bf16.msra.mxu0 %v11639_v45  ;;  %12856 = vst [vmem:[#allocation39_spill] sm:$0xff] %v11655_v51 }
0x1073   : > { %4700 = vmatmul.mubr.f32.gmra.mrb[106].mxu1 %v4468_v46  ;;  %4861 = vmatmul.mubr.f32.gmra.mrb[138].mxu0 %v4468_v46  ;;  %v7706_v46 = vpack.c.bf16 %v5480_v39, %v5479_v59  ;;  %v5518_v59 = vld [vmem:[#allocation13 + $0x1f8] sm:$0xff]  ;;  %v5469_v39 = vld [vmem:[#allocation13 + $0x70] sm:$0xff] }
0x1074   : > { %4705 = vmatprep.mubr.f32.mxu1 %v12778_v20  ;;  %4866 = vmatprep.mubr.f32.mxu0 %v12778_v20 }
0x1077   : > { %4706 = vmatmul.mubr.f32.gmra.mrb[108].mxu1 %v4469_v44  ;;  %4867 = vmatmul.mubr.f32.gmra.mrb[140].mxu0 %v4469_v44  ;;  %v11643_v44 = vpack.c.bf16 %v5512_v41, %v5511_v57  ;;  %v5470_v57 = vld [vmem:[#allocation13 + $0x78] sm:$0xff] }
0x1078   : > { %4711 = vmatprep.mubr.f32.mxu1 %v12778_v20  ;;  %4872 = vmatprep.mubr.f32.mxu0 %v12778_v20  ;;  %v7698_v20 = vpack.c.bf16 %v5476_v50, %v5475_v42  ;;  %v7712_v42 = vpack.c.bf16 %v5466_v43, %v5465_v61  ;;  %v5497_v50 = vld [vmem:[#allocation13 + $0x150] sm:$0xff]  ;;  %v7720_v41 = vpack.c.bf16 %v5470_v57, %v5469_v39  ;;  %v12866_v61 = vsub.s32 1, %v12861_v40 }
0x1079   : > { %12852 = vst [vmem:[#allocation31_spill] sm:$0xff] %v11643_v44  ;;  %7739 = vmatprep.subr.bf16.mxu0 %v11643_v44 }
0x107a   : > { %7699 = vmatprep.subr.bf16.mxu1 %v7698_v20  ;;  %7741 = vmatpush3.bf16.msra.mxu0 %v11645_v32  ;;  %v11651_v20 = vpack.c.bf16 %v5498_v22, %v5497_v50  ;;  %v11682_v43 = vrot.slane %v4535_v27, %v12866_v61 }
0x107b   : > { %4712 = vmatmul.mubr.f32.gmra.mrb[110].mxu1 %v4470_v17  ;;  %4873 = vmatmul.mubr.f32.gmra.mrb[142].mxu0 %v4470_v17  ;;  %v5514_v17 = vld [vmem:[#allocation13 + $0x1d8] sm:$0xff] }
0x107c   : > { %7701 = vmatpush3.bf16.msra.mxu1 %v7700_v48  ;;  %v11649_v4 = vpack.c.bf16 %v5514_v17, %v5513_v26  ;;  %12855 = vst [vmem:[#allocation36_spill] sm:$0xff] %v11651_v20  ;;  %v7714_v48 = vpack.c.bf16 %v5484_v52, %v5483_v9  ;;  %v11674_v26 = vrot.slane %v4535_v27, %v12862_v0  ;;  %12867 = vst [vmem:[#allocation44_spill] sm:$0xff] %v11682_v43 }
0x107d   : > { %7703 = vmatprep.subr.bf16.mxu1 %v7702_v34  ;;  %v5499_v34 = vld [vmem:[#allocation13 + $0x160] sm:$0xff] }
0x107e   : > { %12854 = vst [vmem:[#allocation43_spill] sm:$0xff] %v11649_v4  ;;  %7743 = vmatprep.subr.bf16.mxu0 %v11649_v4  ;;  %v11657_v11 = vpack.c.bf16 %v5500_v8, %v5499_v34  ;;  %12863 = vst [vmem:[#allocation41_spill] sm:$0xff] %v11674_v26 }
0x107f   : > { %7745 = vmatpush3.bf16.msra.mxu0 %v11651_v20 }
0x1080   : > { %7705 = vmatpush3.bf16.msra.mxu1 %v7704_v12  ;;  %12857 = vst [vmem:[#allocation40_spill] sm:$0xff] %v11657_v11  ;;  %v5486_v12 = vld [vmem:[#allocation13 + $0xf8] sm:$0xff]  ;;  %7747 = vmatprep.subr.bf16.mxu0 %v11655_v51 }
0x1081   : > { %7707 = vmatprep.subr.bf16.mxu1 %v7706_v46  ;;  %v7718_v7 = vpack.c.bf16 %v5486_v12, %v5485_v28  ;;  %v11660_v46 = vpack.c.bf16 %v5518_v59, %v5517_v10 }
0x1083   : > { %12858 = vst [vmem:[#allocation37_spill] sm:$0xff] %v11660_v46  ;;  %7749 = vmatpush3.bf16.msra.mxu0 %v11657_v11 }
0x1084   : > { %7709 = vmatpush3.bf16.msra.mxu1 %v7708_v29  ;;  %v11663_v29 = vpack.c.bf16 %v5502_v18, %v5501_v49  ;;  %7751 = vmatprep.subr.bf16.mxu0 %v11660_v46 }
0x1085   : > { %7711 = vmatprep.subr.bf16.mxu1 %v7710_v56  ;;  %v12864_v56 = vsub.s32 2, %v12861_v40 }
0x1086   : > { %12859 = vst [vmem:[#allocation38_spill] sm:$0xff] %v11663_v29 }
0x1087   : > { %7753 = vmatpush3.bf16.msra.mxu0 %v11663_v29  ;;  %v11678_v17 = vrot.slane %v4535_v27, %v12864_v56 }
0x1088   : > { %7713 = vmatpush3.bf16.msra.mxu1 %v7712_v42  ;;  %v11684_v42 = vrot.slane %v4535_v27, %v4551_v47 }
0x1089   : > { %7715 = vmatprep.subr.bf16.mxu1 %v7714_v48  ;;  %12865 = vst [vmem:[#allocation42_spill] sm:$0xff] %v11678_v17 }
0x108a   : > { %12868 = vst [vmem:[#allocation45_spill] sm:$0xff] %v11684_v42 }
0x108c   : > { %7717 = vmatpush3.bf16.msra.mxu1 %v7716_v36 }
0x108d   : > { %7719 = vmatprep.subr.bf16.mxu1 %v7718_v7 }
0x1090   : > { %7721 = vmatpush3.bf16.msra.mxu1 %v7720_v41 }
0x1091   : > { %7754 = vmatprep.subr.bf16.mxu1 %v11491_v14 }
0x10f2   : > { %v4623_v14 = vpop.f32.mrb[80].mxu1  ;;  %v4784_v50 = vpop.f32.mrb[112].mxu0 }
0x10f3   : > { %v4624_v22 = vadd.f32 %v4623_v14, %v11674_v26  ;;  %v4785_v9 = vadd.f32 %v4784_v50, %v11678_v17  ;;  %v4625_v52 = vpop.f32.mrb[81].mxu1  ;;  %v4786_v25 = vpop.f32.mrb[113].mxu0 }
0x10f4   : > { %v11689_v48 = vadd.f32 %v4625_v52, %v11682_v43  ;;  %v11692_v1 = vadd.f32 %v4786_v25, %v11684_v42 }
0x10f5   : > { %v4943_v3 = vmul.f32 0.044715, %v4624_v22  ;;  %v4945_v16 = vmul.f32 0.044715, %v4785_v9 }
0x10f6   : > { %v4944_v36 = vmul.f32 0.044715, %v11689_v48  ;;  %v4946_v34 = vmul.f32 0.044715, %v11692_v1  ;;  %v4629_v8 = vpop.f32.mrb[82].mxu1  ;;  %v4790_v28 = vpop.f32.mrb[114].mxu0 }
0x10f7   : > { %v5007_v12 = vmul.f32 %v4943_v3, %v4624_v22  ;;  %v5009_v10 = vmul.f32 %v4945_v16, %v4785_v9  ;;  %v4631_v7 = vpop.f32.mrb[83].mxu1  ;;  %v4792_v59 = vpop.f32.mrb[115].mxu0  ;;  %v11699_v41 = vadd.f32 %v4629_v8, %v11674_v26  ;;  %v11702_v27 = vadd.f32 %v4790_v28, %v11678_v17 }
0x10f8   : > { %v5008_v39 = vmul.f32 %v4944_v36, %v11689_v48  ;;  %v5010_v57 = vmul.f32 %v4946_v34, %v11692_v1  ;;  %v11705_v40 = vadd.f32 %v4631_v7, %v11682_v43  ;;  %v11708_v47 = vadd.f32 %v4792_v59, %v11684_v42 }
0x10f9   : > { %v5071_v49 = vmul.f32 %v5007_v12, %v4624_v22  ;;  %v5073_v18 = vmul.f32 %v5009_v10, %v4785_v9  ;;  %v11712_v16 = vmul.f32 0.5, %v4624_v22  ;;  %v4947_v36 = vmul.f32 0.044715, %v11699_v41 }
0x10fa   : > { %v4635_v0 = vpop.f32.mrb[84].mxu1  ;;  %v4796_v56 = vpop.f32.mrb[116].mxu0  ;;  %v5072_v61 = vmul.f32 %v5008_v39, %v11689_v48  ;;  %v5074_v3 = vmul.f32 %v5010_v57, %v11692_v1  ;;  %v4949_v12 = vmul.f32 0.044715, %v11702_v27  ;;  %v4948_v10 = vmul.f32 0.044715, %v11705_v40 }
0x10fb   : > { %v5135_v14 = vadd.f32 %v5071_v49, %v4624_v22  ;;  %v5137_v50 = vadd.f32 %v5073_v18, %v4785_v9  ;;  %v4637_v52 = vpop.f32.mrb[85].mxu1  ;;  %v4798_v25 = vpop.f32.mrb[117].mxu0  ;;  %v11716_v34 = vadd.f32 %v4635_v0, %v11674_v26  ;;  %v11719_v8 = vadd.f32 %v4796_v56, %v11678_v17 }
0x10fc   : > { %v11724_v7 = vadd.f32 %v4637_v52, %v11682_v43  ;;  %v4950_v22 = vmul.f32 0.044715, %v11708_v47  ;;  %v5136_v49 = vadd.f32 %v5072_v61, %v11689_v48  ;;  %v11728_v18 = vmul.f32 0.5, %v4785_v9 }
0x10fd   : > { %v5199_v28 = vmul.f32 0.7978846, %v5135_v14  ;;  %v5201_v59 = vmul.f32 0.7978846, %v5137_v50  ;;  %v4951_v0 = vmul.f32 0.044715, %v11716_v34  ;;  %v11732_v56 = vadd.f32 %v4798_v25, %v11684_v42 }
0x10fe   : > { %v4641_v39 = vpop.f32.mrb[86].mxu1  ;;  %v4802_v57 = vpop.f32.mrb[118].mxu0  ;;  %v5138_v13 = vadd.f32 %v5074_v3, %v11692_v1  ;;  %v5011_v52 = vmul.f32 %v4947_v36, %v11699_v41  ;;  %v4953_v50 = vmul.f32 0.044715, %v11719_v8  ;;  %v4952_v60 = vmul.f32 0.044715, %v11724_v7 }
0x10ff   : > { %v4643_v14 = vpop.f32.mrb[87].mxu1  ;;  %v4804_v38 = vpop.f32.mrb[119].mxu0  ;;  %v11739_v30 = vadd.f32 %v4641_v39, %v11674_v26  ;;  %8628 = vtanh.f32 %v5199_v28  ;;  %v11742_v9 = vmul.f32 %v4949_v12, %v11702_v27  ;;  %v5012_v61 = vmul.f32 %v4948_v10, %v11705_v40 }
0x1100   : > { %v11746_v25 = vadd.f32 %v4802_v57, %v11678_v17  ;;  %8630 = vtanh.f32 %v5201_v59  ;;  %v5014_v3 = vmul.f32 %v4950_v22, %v11708_v47  ;;  %v11750_v36 = vadd.f32 %v4643_v14, %v11682_v43 }
0x1101   : > { %v5200_v5 = vmul.f32 0.7978846, %v5136_v49  ;;  %v11753_v37 = vmul.f32 %v4951_v0, %v11716_v34  ;;  %v4954_v28 = vmul.f32 0.044715, %v11732_v56  ;;  %v11757_v12 = vadd.f32 %v4804_v38, %v11684_v42 }
0x1102   : > { %v5202_v39 = vmul.f32 0.7978846, %v5138_v13  ;;  %v11760_v10 = vmul.f32 %v4953_v50, %v11719_v8  ;;  %v11763_v59 = vmul.f32 %v4952_v60, %v11724_v7  ;;  %v4955_v22 = vmul.f32 0.044715, %v11739_v30 }
0x1103   : > { %8632 = vtanh.f32 %v5200_v5  ;;  %v4957_v49 = vmul.f32 0.044715, %v11746_v25  ;;  %v4956_v50 = vmul.f32 0.044715, %v11750_v36  ;;  %v5076_v5 = vmul.f32 %v5012_v61, %v11705_v40 }
0x1104   : > { %v4647_v57 = vpop.f32.mrb[88].mxu1  ;;  %v4808_v14 = vpop.f32.mrb[120].mxu0  ;;  %8634 = vtanh.f32 %v5202_v39  ;;  %v5018_v58 = vmul.f32 %v4954_v28, %v11732_v56  ;;  %v4882_v19 = vmul.f32 0.5, %v11692_v1  ;;  %v11790_v61 = vmul.f32 %v4955_v22, %v11739_v30 }
0x1105   : > { %v11768_v0 = vadd.f32 %v4647_v57, %v11674_v26  ;;  %v11771_v38 = vadd.f32 %v4808_v14, %v11678_v17  ;;  %v4649_v13 = vpop.f32.mrb[89].mxu1  ;;  %v4810_v55 = vpop.f32.mrb[121].mxu0  ;;  %v4958_v57 = vmul.f32 0.044715, %v11757_v12  ;;  %v4880_v14 = vmul.f32 0.5, %v11689_v48 }
0x1106   : > { %v11775_v60 = vadd.f32 %v4649_v13, %v11682_v43  ;;  %v11778_v15 = vadd.f32 %v4810_v55, %v11684_v42  ;;  %v5140_v24 = vadd.f32 %v5076_v5, %v11705_v40  ;;  %v5078_v55 = vmul.f32 %v5014_v3, %v11708_v47 }
0x1107   : > { %v4959_v39 = vmul.f32 0.044715, %v11768_v0  ;;  %v4961_v33 = vmul.f32 0.044715, %v11771_v38  ;;  %v11798_v63 = vmul.f32 %v4957_v49, %v11746_v25  ;;  %v5020_v29 = vmul.f32 %v4956_v50, %v11750_v36 }
0x1108   : > { %v4653_v62 = vpop.f32.mrb[90].mxu1  ;;  %v4814_v13 = vpop.f32.mrb[122].mxu0  ;;  %v4960_v28 = vmul.f32 0.044715, %v11775_v60  ;;  %v4962_v23 = vmul.f32 0.044715, %v11778_v15  ;;  %v5022_v46 = vmul.f32 %v4958_v57, %v11757_v12  ;;  %v5075_v49 = vmul.f32 %v5011_v52, %v11699_v41 }
0x1109   : > { %v11795_v48 = vadd.f32 %v4653_v62, %v11674_v26  ;;  %v4655_v1 = vpop.f32.mrb[91].mxu1  ;;  %v4816_v6 = vpop.f32.mrb[123].mxu0  ;;  %v11802_v5 = vadd.f32 %v4814_v13, %v11678_v17  ;;  %v11805_v3 = vmul.f32 0.5, %v11705_v40  ;;  %v11812_v62 = vmul.f32 0.5, %v11708_v47 }
0x110a   : > { %v8629_v22 = vpop.eup %8628  ;;  %v11809_v11 = vadd.f32 %v4655_v1, %v11682_v43  ;;  %v11816_v50 = vmul.f32 %v4959_v39, %v11768_v0  ;;  %v11819_v13 = vadd.f32 %v4816_v6, %v11684_v42  ;;  %v5204_v40 = vmul.f32 0.7978846, %v5140_v24 }
0x110b   : > { %v8631_v26 = vpop.eup %8630  ;;  %v5142_v17 = vadd.f32 %v5078_v55, %v11708_v47  ;;  %v11823_v57 = vmul.f32 %v4961_v33, %v11771_v38  ;;  %v11826_v1 = vmul.f32 %v4960_v28, %v11775_v60  ;;  %v11829_v43 = vmul.f32 %v4962_v23, %v11778_v15 }
0x110c   : > { %v4963_v52 = vmul.f32 0.044715, %v11795_v48  ;;  %v4965_v39 = vmul.f32 0.044715, %v11802_v5  ;;  %v5327_v20 = vadd.f32 1.0, %v8629_v22  ;;  %8636 = vtanh.f32 %v5204_v40 }
0x110d   : > { %v8633_v51 = vpop.eup %8632  ;;  %v5206_v6 = vmul.f32 0.7978846, %v5142_v17  ;;  %v4964_v47 = vmul.f32 0.044715, %v11809_v11  ;;  %v5329_v33 = vadd.f32 1.0, %v8631_v26  ;;  %v5139_v42 = vadd.f32 %v5075_v49, %v11699_v41 }
0x110e   : > { %v8635_v24 = vpop.eup %8634  ;;  %v5328_v55 = vadd.f32 1.0, %v8633_v51  ;;  %v4966_v28 = vmul.f32 0.044715, %v11819_v13  ;;  %v5077_v23 = vmul.f32 %v11742_v9, %v11702_v27  ;;  %v11839_v32 = vmul.f32 %v4963_v52, %v11795_v48 }
0x110f   : > { %v5330_v4 = vadd.f32 1.0, %v8635_v24  ;;  %8638 = vtanh.f32 %v5206_v6  ;;  %v5203_v40 = vmul.f32 0.7978846, %v5139_v42  ;;  %v5080_v17 = vmul.f32 %v11763_v59, %v11724_v7 }
0x1110   : > { %v5392_v22 = vmul.f32 %v5328_v55, %v4880_v14  ;;  %v5391_v51 = vmul.f32 %v5327_v20, %v11712_v16  ;;  %v5141_v26 = vadd.f32 %v5077_v23, %v11702_v27  ;;  %v5082_v49 = vmul.f32 %v5018_v58, %v11732_v56 }
0x1111   : > { %v5394_v44 = vmul.f32 %v5330_v4, %v4882_v19  ;;  %v5393_v6 = vmul.f32 %v5329_v33, %v11728_v18  ;;  %8640 = vtanh.f32 %v5203_v40  ;;  %v5144_v9 = vadd.f32 %v5080_v17, %v11724_v7 }
0x1112   : > { %5590 = vmatprep.mubr.f32.mxu1 %v5392_v22  ;;  %v5079_v14 = vmul.f32 %v11753_v37, %v11716_v34  ;;  %v11851_v42 = vmul.f32 %v4965_v39, %v11802_v5  ;;  %v5205_v19 = vmul.f32 0.7978846, %v5141_v26  ;;  %v5146_v4 = vadd.f32 %v5082_v49, %v11732_v56 }
0x1113   : > { %5735 = vmatprep.mubr.f32.mxu0 %v5394_v44  ;;  %5591 = vmatmul.mubr.f32.vlgmr.msra.gmra.mrb[112].mxu1 %v5391_v51  ;;  %v5081_v58 = vmul.f32 %v11760_v10, %v11719_v8  ;;  %v11857_v20 = vmul.f32 %v4964_v47, %v11809_v11  ;;  %v5208_v16 = vmul.f32 0.7978846, %v5144_v9  ;;  %v5084_v37 = vmul.f32 %v5020_v29, %v11750_v36 }
0x1114   : > { %5736 = vmatmul.mubr.f32.vlgmr.msra.gmra.mrb[144].mxu0 %v5393_v6  ;;  %v5143_v18 = vadd.f32 %v5079_v14, %v11716_v34  ;;  %7762 = vmatpush3.bf16.msra.mxu1 %v11508_v2  ;;  %8642 = vtanh.f32 %v5205_v19  ;;  %v5210_v44 = vmul.f32 0.7978846, %v5146_v4  ;;  %v5086_v52 = vmul.f32 %v5022_v46, %v11757_v12 }
0x1115   : > { %v5145_v59 = vadd.f32 %v5081_v58, %v11719_v8  ;;  %7755 = vmatprep.subr.bf16.mxu1 %v11625_v54  ;;  %v11866_v10 = vmul.f32 %v4966_v28, %v11819_v13  ;;  %8644 = vtanh.f32 %v5208_v16  ;;  %v5148_v24 = vadd.f32 %v5084_v37, %v11750_v36 }
0x1116   : > { %v5207_v39 = vmul.f32 0.7978846, %v5143_v18  ;;  %v8637_v47 = vpop.eup %8636  ;;  %8646 = vtanh.f32 %v5210_v44  ;;  %v5150_v2 = vadd.f32 %v5086_v52, %v11757_v12  ;;  %v5083_v55 = vmul.f32 %v11790_v61, %v11739_v30  ;;  %v12869_v44 = vld [vmem:[#allocation31_spill] sm:$0xff] }
0x1117   : > { %v5209_v29 = vmul.f32 0.7978846, %v5145_v59  ;;  %v5332_v33 = vadd.f32 1.0, %v8637_v47  ;;  %v4883_v46 = vmul.f32 0.5, %v11699_v41  ;;  %v5212_v54 = vmul.f32 0.7978846, %v5148_v24 }
0x1118   : > { %8648 = vtanh.f32 %v5207_v39  ;;  %7763 = vmatpush3.bf16.msra.mxu1 %v11627_v53  ;;  %v5214_v23 = vmul.f32 0.7978846, %v5150_v2  ;;  %v5147_v22 = vadd.f32 %v5083_v55, %v11739_v30  ;;  %v5085_v40 = vmul.f32 %v11798_v63, %v11746_v25 }
0x1119   : > { %v8639_v28 = vpop.eup %8638  ;;  %8650 = vtanh.f32 %v5209_v29  ;;  %7756 = vmatprep.subr.bf16.mxu1 %v11631_v31  ;;  %v5396_v17 = vmul.f32 %v5332_v33, %v11805_v3  ;;  %v4885_v51 = vmul.f32 0.5, %v11702_v27  ;;  %v5088_v26 = vmul.f32 %v11826_v1, %v11775_v60 }
0x111a   : > { %v5334_v61 = vadd.f32 1.0, %v8639_v28  ;;  %8652 = vtanh.f32 %v5212_v54  ;;  %v5211_v41 = vmul.f32 0.7978846, %v5147_v22  ;;  %v5149_v53 = vadd.f32 %v5085_v40, %v11746_v25  ;;  %v12870_v54 = vld [vmem:[#allocation29_spill] sm:$0xff] }
0x111b   : > { %8654 = vtanh.f32 %v5214_v23  ;;  %v8641_v49 = vpop.eup %8640  ;;  %5595 = vmatprep.mubr.f32.mxu1 %v5396_v17  ;;  %v4888_v63 = vmul.f32 0.5, %v11724_v7  ;;  %v4890_v31 = vmul.f32 0.5, %v11732_v56  ;;  %v5090_v3 = vmul.f32 %v11829_v43, %v11778_v15  ;;  %v12871_v17 = vld [vmem:[#allocation43_spill] sm:$0xff] }
0x111c   : > { %v5398_v6 = vmul.f32 %v5334_v61, %v11812_v62  ;;  %7764 = vmatpush3.bf16.msra.mxu1 %v11633_v21  ;;  %v5331_v27 = vadd.f32 1.0, %v8641_v49  ;;  %8656 = vtanh.f32 %v5211_v41  ;;  %v5213_v9 = vmul.f32 0.7978846, %v5149_v53 }
0x111d   : > { %v5152_v14 = vadd.f32 %v5088_v26, %v11775_v60  ;;  %7757 = vmatprep.subr.bf16.mxu1 %v11637_v35  ;;  %v4887_v1 = vmul.f32 0.5, %v11716_v34  ;;  %v5154_v62 = vadd.f32 %v5090_v3, %v11778_v15  ;;  %v5087_v7 = vmul.f32 %v11816_v50, %v11768_v0 }
0x111e   : > { %5740 = vmatprep.mubr.f32.mxu0 %v5398_v6  ;;  %v5089_v43 = vmul.f32 %v11823_v57, %v11771_v38  ;;  %v8643_v56 = vpop.eup %8642  ;;  %v5395_v21 = vmul.f32 %v5331_v27, %v4883_v46  ;;  %v4889_v19 = vmul.f32 0.5, %v11719_v8  ;;  %8658 = vtanh.f32 %v5213_v9 }
0x111f   : > { %v5216_v4 = vmul.f32 0.7978846, %v5152_v14  ;;  %v8645_v58 = vpop.eup %8644  ;;  %v5333_v16 = vadd.f32 1.0, %v8643_v56  ;;  %v5218_v35 = vmul.f32 0.7978846, %v5154_v62  ;;  %v5151_v18 = vadd.f32 %v5087_v7, %v11768_v0  ;;  %v12873_v7 = vld [vmem:[#allocation39_spill] sm:$0xff] }
0x1120   : > { %v5153_v34 = vadd.f32 %v5089_v43, %v11771_v38  ;;  %7765 = vmatpush3.bf16.msra.mxu1 %v11639_v45  ;;  %v8647_v37 = vpop.eup %8646  ;;  %v5336_v50 = vadd.f32 1.0, %v8645_v58  ;;  %v4892_v57 = vmul.f32 0.5, %v11750_v36  ;;  %v5092_v8 = vmul.f32 %v11857_v20, %v11809_v11 }
0x1121   : > { %5596 = vmatmul.mubr.f32.gmra.mrb[114].mxu1 %v5395_v21  ;;  %8660 = vtanh.f32 %v5216_v4  ;;  %7758 = vmatprep.subr.bf16.mxu1 %v12869_v44  ;;  %v5397_v52 = vmul.f32 %v5333_v16, %v4885_v51  ;;  %v5338_v39 = vadd.f32 1.0, %v8647_v37  ;;  %v5215_v24 = vmul.f32 0.7978846, %v5151_v18 }
0x1122   : > { %v8649_v59 = vpop.eup %8648  ;;  %8662 = vtanh.f32 %v5218_v35  ;;  %v5400_v29 = vmul.f32 %v5336_v50, %v4888_v63  ;;  %v5217_v45 = vmul.f32 0.7978846, %v5153_v34  ;;  %v5156_v55 = vadd.f32 %v5092_v8, %v11809_v11  ;;  %v12874_v34 = vld [vmem:[#allocation41_spill] sm:$0xff]  ;;  %v12875_v8 = vld [vmem:[#allocation42_spill] sm:$0xff] }
0x1123   : > { %v8651_v47 = vpop.eup %8650  ;;  %v5335_v2 = vadd.f32 1.0, %v8649_v59  ;;  %5741 = vmatmul.mubr.f32.gmra.mrb[146].mxu0 %v5397_v52  ;;  %v5402_v36 = vmul.f32 %v5338_v39, %v4890_v31  ;;  %8664 = vtanh.f32 %v5215_v24  ;;  %v5094_v20 = vmul.f32 %v11866_v10, %v11819_v13  ;;  %v12876_v52 = vld [vmem:[#allocation40_spill] sm:$0xff] }
0x1124   : > { %v8653_v33 = vpop.eup %8652  ;;  %v5337_v46 = vadd.f32 1.0, %v8651_v47  ;;  %7766 = vmatpush3.bf16.msra.mxu1 %v12870_v54  ;;  %5600 = vmatprep.mubr.f32.mxu1 %v5400_v29  ;;  %8666 = vtanh.f32 %v5217_v45  ;;  %v5220_v40 = vmul.f32 0.7978846, %v5156_v55  ;;  %v4894_v51 = vmul.f32 0.5, %v11757_v12  ;;  %v12872_v12 = vld [vmem:[#allocation36_spill] sm:$0xff]  ;;  %v12878_v45 = vld [vmem:[#allocation37_spill] sm:$0xff] }
0x1125   : > { %v8655_v28 = vpop.eup %8654  ;;  %v5399_v23 = vmul.f32 %v5335_v2, %v4887_v1  ;;  %v5340_v22 = vadd.f32 1.0, %v8653_v33  ;;  %7759 = vmatprep.subr.bf16.mxu1 %v12871_v17  ;;  %5745 = vmatprep.mubr.f32.mxu0 %v5402_v36  ;;  %v5158_v53 = vadd.f32 %v5094_v20, %v11819_v13  ;;  %v4891_v49 = vmul.f32 0.5, %v11739_v30  ;;  %v12877_v24 = vld [vmem:[#allocation44_spill] sm:$0xff] }
0x1126   : > { %v5401_v61 = vmul.f32 %v5337_v46, %v4889_v19  ;;  %v5342_v41 = vadd.f32 1.0, %v8655_v28  ;;  %v8657_v26 = vpop.eup %8656  ;;  %8668 = vtanh.f32 %v5220_v40  ;;  %v5091_v6 = vmul.f32 %v11839_v32, %v11795_v48  ;;  %v12879_v46 = vld [vmem:[#allocation45_spill] sm:$0xff] }
0x1127   : > { %5601 = vmatmul.mubr.f32.gmra.mrb[116].mxu1 %v5399_v23  ;;  %v5404_v10 = vmul.f32 %v5340_v22, %v4892_v57  ;;  %v5339_v31 = vadd.f32 1.0, %v8657_v26  ;;  %v5222_v3 = vmul.f32 0.7978846, %v5158_v53  ;;  %v5093_v27 = vmul.f32 %v11851_v42, %v11802_v5 }
0x1128   : > { %5746 = vmatmul.mubr.f32.gmra.mrb[148].mxu0 %v5401_v61  ;;  %v5406_v63 = vmul.f32 %v5342_v41, %v4894_v51  ;;  %7767 = vmatpush3.bf16.msra.mxu1 %v12872_v12  ;;  %v8659_v9 = vpop.eup %8658  ;;  %v4893_v14 = vmul.f32 0.5, %v11746_v25  ;;  %v5155_v1 = vadd.f32 %v5091_v6, %v11795_v48  ;;  %v4896_v4 = vmul.f32 0.5, %v11775_v60 }
0x1129   : > { %5605 = vmatprep.mubr.f32.mxu1 %v5404_v10  ;;  %7760 = vmatprep.subr.bf16.mxu1 %v12873_v7  ;;  %v5403_v32 = vmul.f32 %v5339_v31, %v4891_v49  ;;  %v5341_v43 = vadd.f32 1.0, %v8659_v9  ;;  %8670 = vtanh.f32 %v5222_v3  ;;  %v5157_v56 = vadd.f32 %v5093_v27, %v11802_v5 }
0x112a   : > { %v4659_v30 = vpop.f32.mrb[92].mxu1  ;;  %v4820_v62 = vpop.f32.mrb[124].mxu0  ;;  %5750 = vmatprep.mubr.f32.mxu0 %v5406_v63  ;;  %v5219_v58 = vmul.f32 0.7978846, %v5155_v1  ;;  %v4898_v50 = vmul.f32 0.5, %v11778_v15  ;;  %v4895_v33 = vmul.f32 0.5, %v11768_v0 }
0x112b   : > { %v4661_v21 = vpop.f32.mrb[93].mxu1  ;;  %v4822_v42 = vpop.f32.mrb[125].mxu0  ;;  %5606 = vmatmul.mubr.f32.gmra.mrb[118].mxu1 %v5403_v32  ;;  %v5405_v25 = vmul.f32 %v5341_v43, %v4893_v14  ;;  %v5221_v18 = vmul.f32 0.7978846, %v5157_v56  ;;  %v11924_v37 = vadd.f32 %v4659_v30, %v12874_v34  ;;  %v11928_v44 = vadd.f32 %v4820_v62, %v12875_v8  ;;  %v12880_v63 = vld [vmem:[#allocation38_spill] sm:$0xff] }
0x112c   : > { %v8661_v19 = vpop.eup %8660  ;;  %8672 = vtanh.f32 %v5219_v58  ;;  %7768 = vmatpush3.bf16.msra.mxu1 %v12876_v52  ;;  %v11932_v47 = vadd.f32 %v4661_v21, %v12877_v24  ;;  %v11937_v20 = vadd.f32 %v4822_v42, %v12879_v46  ;;  %v4897_v28 = vmul.f32 0.5, %v11771_v38 }
0x112d   : > { %v8663_v16 = vpop.eup %8662  ;;  %v5344_v35 = vadd.f32 1.0, %v8661_v19  ;;  %5751 = vmatmul.mubr.f32.gmra.mrb[150].mxu0 %v5405_v25  ;;  %8674 = vtanh.f32 %v5221_v18  ;;  %7761 = vmatprep.subr.bf16.mxu1 %v12878_v45  ;;  %v4967_v22 = vmul.f32 0.044715, %v11924_v37  ;;  %v4900_v61 = vmul.f32 0.5, %v11809_v11 }
0x112e   : > { %v5346_v57 = vadd.f32 1.0, %v8663_v16  ;;  %v4665_v59 = vpop.f32.mrb[94].mxu1  ;;  %v8665_v60 = vpop.eup %8664  ;;  %v4969_v51 = vmul.f32 0.044715, %v11928_v44  ;;  %v4968_v10 = vmul.f32 0.044715, %v11932_v47 }
0x112f   : > { %v5408_v39 = vmul.f32 %v5344_v35, %v4896_v4  ;;  %v4826_v29 = vpop.f32.mrb[126].mxu0  ;;  %v4667_v2 = vpop.f32.mrb[95].mxu1  ;;  %v5343_v36 = vadd.f32 1.0, %v8665_v60  ;;  %v11945_v49 = vadd.f32 %v4665_v59, %v12874_v34  ;;  %v4902_v31 = vmul.f32 0.5, %v11819_v13 }
0x1130   : > { %v8667_v15 = vpop.eup %8666  ;;  %v5410_v55 = vmul.f32 %v5346_v57, %v4898_v50  ;;  %v4828_v54 = vpop.f32.mrb[127].mxu0  ;;  %7769 = vmatpush3.bf16.msra.mxu1 %v12880_v63  ;;  %v4899_v11 = vmul.f32 0.5, %v11795_v48  ;;  %v4970_v3 = vmul.f32 0.044715, %v11937_v20  ;;  %v11952_v27 = vadd.f32 %v4826_v29, %v12875_v8 }
0x1131   : > { %5610 = vmatprep.mubr.f32.mxu1 %v5408_v39  ;;  %v5345_v23 = vadd.f32 1.0, %v8667_v15  ;;  %v8669_v40 = vpop.eup %8668  ;;  %v5407_v17 = vmul.f32 %v5343_v36, %v4895_v33  ;;  %v4901_v14 = vmul.f32 0.5, %v11802_v5  ;;  %v11956_v1 = vmul.f32 %v4967_v22, %v11924_v37 }
0x1132   : > { %5755 = vmatprep.mubr.f32.mxu0 %v5410_v55  ;;  %v4671_v41 = vpop.f32.mrb[96].mxu1  ;;  %v4832_v0 = vpop.f32.mrb[128].mxu0  ;;  %v5348_v26 = vadd.f32 1.0, %v8669_v40  ;;  %v11959_v30 = vadd.f32 %v4667_v2, %v12877_v24  ;;  %v11962_v13 = vmul.f32 %v4969_v51, %v11928_v44  ;;  %v11965_v48 = vadd.f32 %v4828_v54, %v12879_v46 }
0x1133   : > { %v5409_v53 = vmul.f32 %v5345_v23, %v4897_v28  ;;  %v4673_v38 = vpop.f32.mrb[97].mxu1  ;;  %v4834_v6 = vpop.f32.mrb[129].mxu0  ;;  %5611 = vmatmul.mubr.f32.gmra.mrb[120].mxu1 %v5407_v17  ;;  %v11968_v7 = vadd.f32 %v4671_v41, %v12874_v34  ;;  %v5032_v5 = vmul.f32 %v4968_v10, %v11932_v47  ;;  %v4971_v56 = vmul.f32 0.044715, %v11945_v49 }
0x1134   : > { %v8671_v12 = vpop.eup %8670  ;;  %v5412_v9 = vmul.f32 %v5348_v26, %v4900_v61  ;;  %v11973_v21 = vadd.f32 %v4832_v0, %v12875_v8  ;;  %v11976_v42 = vadd.f32 %v4673_v38, %v12877_v24  ;;  %v5034_v25 = vmul.f32 %v4970_v3, %v11937_v20 }
0x1135   : > { %5756 = vmatmul.mubr.f32.gmra.mrb[152].mxu0 %v5409_v53  ;;  %v5350_v62 = vadd.f32 1.0, %v8671_v12  ;;  %v4973_v35 = vmul.f32 0.044715, %v11952_v27  ;;  %v11981_v18 = vadd.f32 %v4834_v6, %v12879_v46  ;;  %v4972_v59 = vmul.f32 0.044715, %v11959_v30 }
0x1136   : > { %v4677_v32 = vpop.f32.mrb[98].mxu1  ;;  %v4838_v43 = vpop.f32.mrb[130].mxu0  ;;  %5615 = vmatprep.mubr.f32.mxu1 %v5412_v9  ;;  %v4974_v29 = vmul.f32 0.044715, %v11965_v48  ;;  %v4975_v2 = vmul.f32 0.044715, %v11968_v7  ;;  %v11996_v33 = vmul.f32 %v4971_v56, %v11945_v49 }
0x1137   : > { %v4679_v19 = vpop.f32.mrb[99].mxu1  ;;  %v4840_v4 = vpop.f32.mrb[131].mxu0  ;;  %v5414_v16 = vmul.f32 %v5350_v62, %v4902_v31  ;;  %v11985_v52 = vadd.f32 %v4677_v32, %v12874_v34  ;;  %v11988_v60 = vadd.f32 %v4838_v43, %v12875_v8  ;;  %v4977_v36 = vmul.f32 0.044715, %v11973_v21 }
0x1138   : > { %v8673_v58 = vpop.eup %8672  ;;  %v11993_v45 = vadd.f32 %v4679_v19, %v12877_v24  ;;  %v4976_v54 = vmul.f32 0.044715, %v11976_v42  ;;  %v12001_v40 = vmul.f32 %v4973_v35, %v11952_v27  ;;  %v4978_v17 = vmul.f32 0.044715, %v11981_v18 }
0x1139   : > { %v8675_v50 = vpop.eup %8674  ;;  %v5347_v57 = vadd.f32 1.0, %v8673_v58  ;;  %5760 = vmatprep.mubr.f32.mxu0 %v5414_v16  ;;  %v12005_v61 = vadd.f32 %v4840_v4, %v12879_v46  ;;  %v12008_v41 = vmul.f32 %v4972_v59, %v11959_v30  ;;  %v4979_v0 = vmul.f32 0.044715, %v11985_v52 }
0x113a   : > { %v5349_v39 = vadd.f32 1.0, %v8675_v50  ;;  %v4683_v15 = vpop.f32.mrb[100].mxu1  ;;  %v4844_v28 = vpop.f32.mrb[132].mxu0  ;;  %v4981_v53 = vmul.f32 0.044715, %v11988_v60  ;;  %v12016_v10 = vmul.f32 %v4974_v29, %v11965_v48  ;;  %v12024_v3 = vmul.f32 %v4975_v2, %v11968_v7 }
0x113b   : > { %v5411_v55 = vmul.f32 %v5347_v57, %v4899_v11  ;;  %v4685_v23 = vpop.f32.mrb[101].mxu1  ;;  %v4846_v51 = vpop.f32.mrb[133].mxu0  ;;  %v12013_v26 = vadd.f32 %v4683_v15, %v12874_v34  ;;  %v4980_v38 = vmul.f32 0.044715, %v11993_v45  ;;  %v12020_v6 = vadd.f32 %v4844_v28, %v12875_v8 }
0x113c   : > { %v5413_v22 = vmul.f32 %v5349_v39, %v4901_v14  ;;  %v5096_v11 = vmul.f32 %v5032_v5, %v11932_v47  ;;  %v12027_v12 = vmul.f32 %v4977_v36, %v11973_v21  ;;  %v12030_v9 = vmul.f32 %v4976_v54, %v11976_v42 }
0x113d   : > { %5616 = vmatmul.mubr.f32.gmra.mrb[122].mxu1 %v5411_v55  ;;  %12881 = vst [vmem:[#allocation46_spill] sm:$0xff] %v12013_v26  ;;  %12882 = vst [vmem:[#allocation47_spill] sm:$0xff] %v12020_v6  ;;  %v12033_v14 = vadd.f32 %v4685_v23, %v12877_v24  ;;  %v12036_v43 = vmul.f32 %v4978_v17, %v11981_v18  ;;  %v4982_v56 = vmul.f32 0.044715, %v12005_v61  ;;  %v4983_v16 = vmul.f32 0.044715, %v12013_v26 }
0x113e   : > { %5761 = vmatmul.mubr.f32.gmra.mrb[154].mxu0 %v5413_v22  ;;  %v4689_v63 = vpop.f32.mrb[102].mxu1  ;;  %v4850_v31 = vpop.f32.mrb[134].mxu0  ;;  %v12040_v5 = vadd.f32 %v4846_v51, %v12879_v46  ;;  %v12046_v4 = vmul.f32 %v4979_v0, %v11985_v52  ;;  %v12049_v58 = vmul.f32 %v4981_v53, %v11988_v60  ;;  %v5160_v35 = vadd.f32 %v5096_v11, %v11932_v47 }
0x113f   : > { %v4691_v62 = vpop.f32.mrb[103].mxu1  ;;  %v4852_v32 = vpop.f32.mrb[135].mxu0  ;;  %v12043_v19 = vadd.f32 %v4689_v63, %v12874_v34  ;;  %v12054_v50 = vmul.f32 %v4980_v38, %v11993_v45  ;;  %v4985_v57 = vmul.f32 0.044715, %v12020_v6  ;;  %v12058_v59 = vadd.f32 %v4850_v31, %v12875_v8 }
0x1140   : > { %12883 = vst [vmem:[#allocation48_spill] sm:$0xff] %v12040_v5  ;;  %v12061_v39 = vmul.f32 0.5, %v11932_v47  ;;  %v4984_v29 = vmul.f32 0.044715, %v12033_v14  ;;  %v12065_v2 = vadd.f32 %v4691_v62, %v12877_v24  ;;  %v5224_v36 = vmul.f32 0.7978846, %v5160_v35 }
0x1141   : > { %12884 = vst [vmem:[#allocation49_spill] sm:$0xff] %v12043_v19  ;;  %12885 = vst [vmem:[#allocation25_spill] sm:$0xff] %v12058_v59  ;;  %v5098_v54 = vmul.f32 %v5034_v25, %v11937_v20  ;;  %v12069_v28 = vmul.f32 %v4982_v56, %v12005_v61  ;;  %v4986_v23 = vmul.f32 0.044715, %v12040_v5  ;;  %v4987_v22 = vmul.f32 0.044715, %v12043_v19 }
0x1142   : > { %v4695_v15 = vpop.f32.mrb[104].mxu1  ;;  %v4856_v55 = vpop.f32.mrb[136].mxu0  ;;  %v12074_v47 = vadd.f32 %v4852_v32, %v12879_v46  ;;  %v12077_v0 = vmul.f32 %v4983_v16, %v12013_v26  ;;  %8676 = vtanh.f32 %v5224_v36  ;;  %v12086_v38 = vmul.f32 %v4985_v57, %v12020_v6 }
0x1143   : > { %v4697_v17 = vpop.f32.mrb[105].mxu1  ;;  %v4858_v51 = vpop.f32.mrb[137].mxu0  ;;  %v12080_v53 = vadd.f32 %v4695_v15, %v12874_v34  ;;  %v12083_v25 = vadd.f32 %v4856_v55, %v12875_v8  ;;  %v4989_v63 = vmul.f32 0.044715, %v12058_v59  ;;  %v5162_v32 = vadd.f32 %v5098_v54, %v11937_v20 }
0x1144   : > { %12886 = vst [vmem:[#allocation34_spill] sm:$0xff] %v12074_v47  ;;  %12887 = vst [vmem:[#allocation50_spill] sm:$0xff] %v12077_v0  ;;  %v12090_v31 = vadd.f32 %v4697_v17, %v12877_v24  ;;  %v12094_v56 = vmul.f32 %v4984_v29, %v12033_v14  ;;  %v4988_v16 = vmul.f32 0.044715, %v12065_v2  ;;  %v5095_v57 = vmul.f32 %v11956_v1, %v11924_v37 }
0x1145   : > { %12888 = vst [vmem:[#allocation51_spill] sm:$0xff] %v12080_v53  ;;  %12889 = vst [vmem:[#allocation53_spill] sm:$0xff] %v12083_v25  ;;  %v4993_v35 = vmul.f32 0.044715, %v12083_v25  ;;  %v12101_v55 = vmul.f32 %v4986_v23, %v12040_v5  ;;  %v12104_v36 = vmul.f32 %v4987_v22, %v12043_v19  ;;  %v4990_v17 = vmul.f32 0.044715, %v12074_v47 }
0x1146   : > { %12890 = vst [vmem:[#allocation52_spill] sm:$0xff] %v12086_v38  ;;  %12891 = vst [vmem:[#allocation55_spill] sm:$0xff] %v12090_v31  ;;  %v4701_v11 = vpop.f32.mrb[106].mxu1  ;;  %v4862_v62 = vpop.f32.mrb[138].mxu0  ;;  %v12108_v54 = vadd.f32 %v4858_v51, %v12879_v46  ;;  %v4991_v38 = vmul.f32 0.044715, %v12080_v53  ;;  %v12126_v19 = vmul.f32 %v4989_v63, %v12058_v59 }
0x1147   : > { %v4703_v15 = vpop.f32.mrb[107].mxu1  ;;  %12892 = vst [vmem:[#allocation54_spill] sm:$0xff] %v12101_v55  ;;  %12893 = vst [vmem:[#allocation57_spill] sm:$0xff] %v12104_v36  ;;  %v4864_v29 = vpop.f32.mrb[139].mxu0  ;;  %v5057_v6 = vmul.f32 %v4993_v35, %v12083_v25  ;;  %v12113_v0 = vadd.f32 %v4701_v11, %v12874_v34  ;;  %v12116_v1 = vmul.f32 0.5, %v11937_v20  ;;  %v12120_v22 = vadd.f32 %v4862_v62, %v12875_v8 }
0x1148   : > { %v4992_v23 = vmul.f32 0.044715, %v12090_v31  ;;  %v12123_v36 = vadd.f32 %v4703_v15, %v12877_v24  ;;  %v5226_v51 = vmul.f32 0.7978846, %v5162_v32  ;;  %12895 = vst [vmem:[#allocation59_spill] sm:$0xff] %v12126_v19  ;;  %v12129_v35 = vmul.f32 %v4988_v16, %v12065_v2 }
0x1149   : > { %12894 = vst [vmem:[#allocation56_spill] sm:$0xff] %v12120_v22  ;;  %v5121_v11 = vmul.f32 %v5057_v6, %v12083_v25  ;;  %v5159_v20 = vadd.f32 %v5095_v57, %v11924_v37  ;;  %v12134_v5 = vmul.f32 %v4990_v17, %v12074_v47  ;;  %v4994_v62 = vmul.f32 0.044715, %v12108_v54 }
0x114a   : > { %12896 = vst [vmem:[#allocation58_spill] sm:$0xff] %v12129_v35  ;;  %v4707_v26 = vpop.f32.mrb[108].mxu1  ;;  %v4868_v55 = vpop.f32.mrb[140].mxu0  ;;  %8678 = vtanh.f32 %v5226_v51  ;;  %v12138_v32 = vmul.f32 0.5, %v11924_v37  ;;  %v4995_v16 = vmul.f32 0.044715, %v12113_v0  ;;  %v12142_v19 = vadd.f32 %v4864_v29, %v12879_v46 }
0x114b   : > { %12897 = vst [vmem:[#allocation61_spill] sm:$0xff] %v12134_v5  ;;  %v4709_v63 = vpop.f32.mrb[109].mxu1  ;;  %v4870_v15 = vpop.f32.mrb[141].mxu0  ;;  %v5223_v6 = vmul.f32 0.7978846, %v5159_v20  ;;  %v5097_v57 = vmul.f32 %v11962_v13, %v11928_v44  ;;  %v12147_v17 = vmul.f32 %v4991_v38, %v12080_v53  ;;  %v12150_v59 = vmul.f32 %v4992_v23, %v12090_v31 }
0x114c   : > { %v4997_v37 = vmul.f32 0.044715, %v12120_v22  ;;  %v4996_v51 = vmul.f32 0.044715, %v12123_v36  ;;  %v8677_v35 = vpop.eup %8676  ;;  %v5185_v29 = vadd.f32 %v5121_v11, %v12083_v25  ;;  %v12159_v13 = vadd.f32 %v4707_v26, %v12874_v34 }
0x114d   : > { %12898 = vst [vmem:[#allocation60_spill] sm:$0xff] %v12147_v17  ;;  %12899 = vst [vmem:[#allocation63_spill] sm:$0xff] %v12150_v59  ;;  %8680 = vtanh.f32 %v5223_v6  ;;  %v5161_v20 = vadd.f32 %v5097_v57, %v11928_v44  ;;  %v12164_v23 = vmul.f32 %v4994_v62, %v12108_v54  ;;  %v5352_v53 = vadd.f32 1.0, %v8677_v35 }
0x114e   : > { %v4713_v5 = vpop.f32.mrb[110].mxu1  ;;  %v12154_v47 = vpop.f32.mrb[142].mxu0  ;;  %v12167_v59 = vadd.f32 %v4868_v55, %v12875_v8  ;;  %v5100_v31 = vmul.f32 %v12008_v41, %v11959_v30  ;;  %v12172_v11 = vmul.f32 %v4995_v16, %v12113_v0  ;;  %v4998_v6 = vmul.f32 0.044715, %v12142_v19 }
0x114f   : > { %v4715_v38 = vpop.f32.mrb[111].mxu1  ;;  %v12161_v17 = vpop.f32.mrb[143].mxu0  ;;  %12900 = vst [vmem:[#allocation62_spill] sm:$0xff] %v12164_v23  ;;  %v5225_v26 = vmul.f32 0.7978846, %v5161_v20  ;;  %v12176_v57 = vadd.f32 %v4709_v63, %v12877_v24  ;;  %v12179_v25 = vmul.f32 %v4997_v37, %v12120_v22  ;;  %v5416_v35 = vmul.f32 %v5352_v53, %v12061_v39 }
0x1150   : > { %v12183_v55 = vadd.f32 %v4870_v15, %v12879_v46  ;;  %v5164_v62 = vadd.f32 %v5100_v31, %v11959_v30  ;;  %v5249_v41 = vmul.f32 0.7978846, %v5185_v29  ;;  %v12187_v16 = vmul.f32 %v4996_v51, %v12123_v36 }
0x1151   : > { %12901 = vst [vmem:[#allocation65_spill] sm:$0xff] %v12179_v25  ;;  %8682 = vtanh.f32 %v5225_v26  ;;  %v4999_v20 = vmul.f32 0.044715, %v12159_v13  ;;  %5620 = vmatprep.mubr.f32.mxu1 %v5416_v35  ;;  %v5001_v63 = vmul.f32 0.044715, %v12167_v59  ;;  %v5102_v37 = vmul.f32 %v12016_v10, %v11965_v48 }
0x1152   : > { %v5228_v23 = vmul.f32 0.7978846, %v5164_v62  ;;  %v5099_v39 = vmul.f32 %v11996_v33, %v11945_v49  ;;  %v12196_v53 = vmul.f32 %v4998_v6, %v12142_v19  ;;  %v4905_v31 = vmul.f32 0.5, %v11928_v44 }
0x1153   : > { %v5000_v15 = vmul.f32 0.044715, %v12176_v57  ;;  %v5101_v51 = vmul.f32 %v12001_v40, %v11952_v27  ;;  %v5002_v26 = vmul.f32 0.044715, %v12183_v55  ;;  %v5166_v35 = vadd.f32 %v5102_v37, %v11965_v48 }
0x1154   : > { %12902 = vst [vmem:[#allocation64_spill] sm:$0xff] %v12196_v53  ;;  %v8679_v29 = vpop.eup %8678  ;;  %8684 = vtanh.f32 %v5228_v23  ;;  %v5163_v10 = vadd.f32 %v5099_v39, %v11945_v49  ;;  %v4908_v6 = vmul.f32 0.5, %v11959_v30  ;;  %v12208_v44 = vmul.f32 %v4999_v20, %v12159_v13 }
0x1155   : > { %8686 = vtanh.f32 %v5249_v41  ;;  %v5354_v33 = vadd.f32 1.0, %v8679_v29  ;;  %v5165_v62 = vadd.f32 %v5101_v51, %v11952_v27  ;;  %v12211_v25 = vmul.f32 %v5001_v63, %v12167_v59 }
0x1156   : > { %v5230_v40 = vmul.f32 0.7978846, %v5166_v35  ;;  %v5227_v22 = vmul.f32 0.7978846, %v5163_v10  ;;  %v12215_v37 = vmul.f32 %v5000_v15, %v12176_v57  ;;  %v12218_v39 = vadd.f32 %v4713_v5, %v12874_v34 }
0x1157   : > { %v8681_v53 = vpop.eup %8680  ;;  %v5418_v23 = vmul.f32 %v5354_v33, %v12116_v1  ;;  %v5229_v41 = vmul.f32 0.7978846, %v5165_v62  ;;  %v12221_v51 = vmul.f32 %v5002_v26, %v12183_v55  ;;  %v12224_v20 = vadd.f32 %v4715_v38, %v12877_v24 }
0x1158   : > { %v5351_v30 = vadd.f32 1.0, %v8681_v53  ;;  %8688 = vtanh.f32 %v5230_v40  ;;  %v4910_v63 = vmul.f32 0.5, %v11965_v48  ;;  %v4907_v1 = vmul.f32 0.5, %v11945_v49 }
0x1159   : > { %5765 = vmatprep.mubr.f32.mxu0 %v5418_v23  ;;  %8690 = vtanh.f32 %v5227_v22  ;;  %v5104_v15 = vmul.f32 %v12030_v9, %v11976_v42  ;;  %v4909_v5 = vmul.f32 0.5, %v11952_v27  ;;  %v5106_v53 = vmul.f32 %v12036_v43, %v11981_v18 }
0x115a   : > { %v5415_v34 = vmul.f32 %v5351_v30, %v12138_v32  ;;  %8692 = vtanh.f32 %v5229_v41  ;;  %v5003_v24 = vmul.f32 0.044715, %v12218_v39  ;;  %v12237_v48 = vadd.f32 %v12154_v47, %v12875_v8 }
0x115b   : > { %v8683_v29 = vpop.eup %8682  ;;  %v5168_v49 = vadd.f32 %v5104_v15, %v11976_v42  ;;  %v5103_v9 = vmul.f32 %v12024_v3, %v11968_v7  ;;  %v5004_v27 = vmul.f32 0.044715, %v12224_v20  ;;  %v5170_v32 = vadd.f32 %v5106_v53, %v11981_v18 }
0x115c   : > { %5621 = vmatmul.mubr.f32.gmra.mrb[124].mxu1 %v5415_v34  ;;  %v5353_v22 = vadd.f32 1.0, %v8683_v29  ;;  %v5105_v43 = vmul.f32 %v12027_v12, %v11973_v21  ;;  %v12248_v38 = vadd.f32 %v12161_v17, %v12879_v46  ;;  %v5108_v26 = vmul.f32 %v12054_v50, %v11993_v45 }
0x115d   : > { %v5232_v8 = vmul.f32 0.7978846, %v5168_v49  ;;  %v5167_v47 = vadd.f32 %v5103_v9, %v11968_v7  ;;  %v5234_v10 = vmul.f32 0.7978846, %v5170_v32  ;;  %v5110_v62 = vmul.f32 %v12069_v28, %v12005_v61 }
0x115e   : > { %v8685_v3 = vpop.eup %8684  ;;  %v5417_v35 = vmul.f32 %v5353_v22, %v4905_v31  ;;  %v5169_v33 = vadd.f32 %v5105_v43, %v11973_v21  ;;  %v5172_v17 = vadd.f32 %v5108_v26, %v11993_v45  ;;  %v12260_v23 = vmul.f32 %v5003_v24, %v12218_v39 }
0x115f   : > { %v12256_v40 = vpop.eup %8686  ;;  %v5356_v12 = vadd.f32 1.0, %v8685_v3  ;;  %8694 = vtanh.f32 %v5232_v8  ;;  %v5231_v46 = vmul.f32 0.7978846, %v5167_v47  ;;  %v5174_v31 = vadd.f32 %v5110_v62, %v12005_v61 }
0x1160   : > { %5766 = vmatmul.mubr.f32.gmra.mrb[156].mxu0 %v5417_v35  ;;  %8696 = vtanh.f32 %v5234_v10  ;;  %v5233_v50 = vmul.f32 0.7978846, %v5169_v33  ;;  %v5236_v30 = vmul.f32 0.7978846, %v5172_v17  ;;  %v5107_v28 = vmul.f32 %v12046_v4, %v11985_v52  ;;  %v12903_v10 = vld [vmem:[#allocation48_spill] sm:$0xff]  ;;  %v12904_v33 = vld [vmem:[#allocation54_spill] sm:$0xff] }
0x1161   : > { %v5420_v41 = vmul.f32 %v5356_v12, %v4908_v6  ;;  %8698 = vtanh.f32 %v5231_v46  ;;  %v12266_v34 = vmul.f32 %v5004_v27, %v12224_v20  ;;  %v5238_v53 = vmul.f32 0.7978846, %v5174_v31  ;;  %v12905_v17 = vld [vmem:[#allocation46_spill] sm:$0xff] }
0x1162   : > { %v8689_v15 = vpop.eup %8688  ;;  %8700 = vtanh.f32 %v5233_v50  ;;  %v5109_v29 = vmul.f32 %v12049_v58, %v11988_v60  ;;  %v12271_v9 = vmul.f32 0.044715, %v12248_v38  ;;  %v5171_v6 = vadd.f32 %v5107_v28, %v11985_v52  ;;  %v12906_v50 = vld [vmem:[#allocation50_spill] sm:$0xff]  ;;  %v12908_v28 = vld [vmem:[#allocation52_spill] sm:$0xff] }
0x1163   : > { %v8691_v24 = vpop.eup %8690  ;;  %5625 = vmatprep.mubr.f32.mxu1 %v5420_v41  ;;  %v5358_v49 = vadd.f32 1.0, %v8689_v15  ;;  %8702 = vtanh.f32 %v5236_v30  ;;  %v5112_v32 = vmul.f32 %v12094_v56, %v12033_v14  ;;  %v4912_v58 = vmul.f32 0.5, %v11976_v42  ;;  %v12909_v15 = vld [vmem:[#allocation58_spill] sm:$0xff] }
0x1164   : > { %v8693_v22 = vpop.eup %8692  ;;  %v5355_v4 = vadd.f32 1.0, %v8691_v24  ;;  %8704 = vtanh.f32 %v5238_v53  ;;  %v5173_v27 = vadd.f32 %v5109_v29, %v11988_v60  ;;  %v5235_v47 = vmul.f32 0.7978846, %v5171_v6 }
0x1165   : > { %v5422_v43 = vmul.f32 %v5358_v49, %v4910_v63  ;;  %v5357_v8 = vadd.f32 1.0, %v8693_v22  ;;  %v5176_v35 = vadd.f32 %v5112_v32, %v12033_v14  ;;  %v5114_v62 = vmul.f32 %v12904_v33, %v12903_v10 }
0x1166   : > { %v5419_v26 = vmul.f32 %v5355_v4, %v4907_v1  ;;  %v5237_v3 = vmul.f32 0.7978846, %v5173_v27  ;;  %v4914_v46 = vmul.f32 0.5, %v11981_v18  ;;  %8706 = vtanh.f32 %v5235_v47  ;;  %v12910_v47 = vld [vmem:[#allocation34_spill] sm:$0xff] }
0x1167   : > { %5770 = vmatprep.mubr.f32.mxu0 %v5422_v43  ;;  %v5421_v12 = vmul.f32 %v5357_v8, %v4909_v5  ;;  %v5111_v56 = vmul.f32 %v12906_v50, %v12905_v17  ;;  %v4911_v63 = vmul.f32 0.5, %v11968_v7  ;;  %v5240_v42 = vmul.f32 0.7978846, %v5176_v35  ;;  %v12907_v5 = vld [vmem:[#allocation47_spill] sm:$0xff] }
0x1168   : > { %5626 = vmatmul.mubr.f32.gmra.mrb[126].mxu1 %v5419_v26  ;;  %8708 = vtanh.f32 %v5237_v3  ;;  %v5178_v1 = vadd.f32 %v5114_v62, %v12903_v10  ;;  %v4913_v41 = vmul.f32 0.5, %v11973_v21  ;;  %v5113_v18 = vmul.f32 %v12908_v28, %v12907_v5  ;;  %v12911_v26 = vld [vmem:[#allocation61_spill] sm:$0xff] }
0x1169   : > { %v8695_v31 = vpop.eup %8694  ;;  %5771 = vmatmul.mubr.f32.gmra.mrb[158].mxu0 %v5421_v12  ;;  %v5175_v30 = vadd.f32 %v5111_v56, %v12905_v17  ;;  %v5116_v53 = vmul.f32 %v12909_v15, %v12065_v2  ;;  %v4916_v7 = vmul.f32 0.5, %v11993_v45  ;;  %8710 = vtanh.f32 %v5240_v42  ;;  %v12913_v15 = vld [vmem:[#allocation57_spill] sm:$0xff] }
0x116a   : > { %v8697_v29 = vpop.eup %8696  ;;  %v5360_v24 = vadd.f32 1.0, %v8695_v31  ;;  %v5242_v49 = vmul.f32 0.7978846, %v5178_v1  ;;  %v5177_v27 = vadd.f32 %v5113_v18, %v12907_v5  ;;  %v5118_v3 = vmul.f32 %v12911_v26, %v12910_v47  ;;  %v12912_v18 = vld [vmem:[#allocation49_spill] sm:$0xff]  ;;  %v12918_v26 = vld [vmem:[#allocation51_spill] sm:$0xff] }
0x116b   : > { %v8699_v6 = vpop.eup %8698  ;;  %v5362_v22 = vadd.f32 1.0, %v8697_v29  ;;  %v5239_v4 = vmul.f32 0.7978846, %v5175_v30  ;;  %v5180_v21 = vadd.f32 %v5116_v53, %v12065_v2  ;;  %v5115_v53 = vmul.f32 %v12913_v15, %v12912_v18 }
0x116c   : > { %v8701_v32 = vpop.eup %8700  ;;  %v5424_v43 = vmul.f32 %v5360_v24, %v4912_v58  ;;  %v5359_v8 = vadd.f32 1.0, %v8699_v6  ;;  %8712 = vtanh.f32 %v5242_v49  ;;  %v5241_v45 = vmul.f32 0.7978846, %v5177_v27  ;;  %v12914_v6 = vld [vmem:[#allocation25_spill] sm:$0xff]  ;;  %v12916_v27 = vld [vmem:[#allocation55_spill] sm:$0xff] }
0x116d   : > { %v8703_v35 = vpop.eup %8702  ;;  %v5426_v33 = vmul.f32 %v5362_v22, %v4914_v46  ;;  %v5361_v62 = vadd.f32 1.0, %v8701_v32  ;;  %8714 = vtanh.f32 %v5239_v4  ;;  %v5244_v42 = vmul.f32 0.7978846, %v5180_v21  ;;  %v12917_v21 = vld [vmem:[#allocation63_spill] sm:$0xff] }
0x116e   : > { %v8705_v12 = vpop.eup %8704  ;;  %5630 = vmatprep.mubr.f32.mxu1 %v5424_v43  ;;  %v5423_v50 = vmul.f32 %v5359_v8, %v4911_v63  ;;  %v5364_v56 = vadd.f32 1.0, %v8703_v35  ;;  %v5182_v1 = vadd.f32 %v5118_v3, %v12910_v47  ;;  %v4918_v58 = vmul.f32 0.5, %v12005_v61 }
0x116f   : > { %5775 = vmatprep.mubr.f32.mxu0 %v5426_v33  ;;  %v5425_v31 = vmul.f32 %v5361_v62, %v4913_v41  ;;  %v5366_v30 = vadd.f32 1.0, %v8705_v12  ;;  %8716 = vtanh.f32 %v5241_v45  ;;  %v4915_v24 = vmul.f32 0.5, %v11985_v52  ;;  %v12915_v41 = vld [vmem:[#allocation59_spill] sm:$0xff] }
0x1170   : > { %5631 = vmatmul.mubr.f32.gmra.mrb[128].mxu1 %v5423_v50  ;;  %v5428_v28 = vmul.f32 %v5364_v56, %v4916_v7  ;;  %8718 = vtanh.f32 %v5244_v42  ;;  %v5246_v46 = vmul.f32 0.7978846, %v5182_v1  ;;  %v8707_v29 = vpop.eup %8706  ;;  %v4917_v49 = vmul.f32 0.5, %v11988_v60  ;;  %v12919_v60 = vld [vmem:[#allocation60_spill] sm:$0xff] }
0x1171   : > { %5776 = vmatmul.mubr.f32.gmra.mrb[160].mxu0 %v5425_v31  ;;  %v5430_v63 = vmul.f32 %v5366_v30, %v4918_v58  ;;  %v5117_v22 = vmul.f32 %v12915_v41, %v12914_v6  ;;  %v5363_v4 = vadd.f32 1.0, %v8707_v29  ;;  %v5179_v7 = vadd.f32 %v5115_v53, %v12912_v18 }
0x1172   : > { %v8709_v61 = vpop.eup %8708  ;;  %5635 = vmatprep.mubr.f32.mxu1 %v5428_v28  ;;  %8720 = vtanh.f32 %v5246_v46  ;;  %v5120_v32 = vmul.f32 %v12917_v21, %v12916_v27  ;;  %v4920_v8 = vmul.f32 0.5, %v12033_v14  ;;  %v5119_v3 = vmul.f32 %v12919_v60, %v12918_v26 }
0x1173   : > { %5780 = vmatprep.mubr.f32.mxu0 %v5430_v63  ;;  %v5365_v43 = vadd.f32 1.0, %v8709_v61  ;;  %v5181_v52 = vadd.f32 %v5117_v22, %v12914_v6  ;;  %v8711_v35 = vpop.eup %8710  ;;  %v5427_v33 = vmul.f32 %v5363_v4, %v4915_v24  ;;  %v4922_v62 = vmul.f32 0.5, %v12903_v10 }
0x1174   : > { %v5243_v45 = vmul.f32 0.7978846, %v5179_v7  ;;  %v5184_v12 = vadd.f32 %v5120_v32, %v12916_v27  ;;  %v5368_v56 = vadd.f32 1.0, %v8711_v35  ;;  %v5183_v1 = vadd.f32 %v5119_v3, %v12918_v26 }
0x1175   : > { %v5429_v50 = vmul.f32 %v5365_v43, %v4917_v49  ;;  %v5245_v42 = vmul.f32 0.7978846, %v5181_v52  ;;  %5636 = vmatmul.mubr.f32.gmra.mrb[130].mxu1 %v5427_v33  ;;  %v4919_v14 = vmul.f32 0.5, %v12905_v17  ;;  %v5124_v30 = vmul.f32 %v12187_v16, %v12123_v36 }
0x1176   : > { %v8713_v31 = vpop.eup %8712  ;;  %8722 = vtanh.f32 %v5243_v45  ;;  %v5248_v58 = vmul.f32 0.7978846, %v5184_v12  ;;  %v5432_v10 = vmul.f32 %v5368_v56, %v4920_v8  ;;  %v5247_v15 = vmul.f32 0.7978846, %v5183_v1 }
0x1177   : > { %v8715_v28 = vpop.eup %8714  ;;  %5781 = vmatmul.mubr.f32.gmra.mrb[162].mxu0 %v5429_v50  ;;  %v5370_v46 = vadd.f32 1.0, %v8713_v31  ;;  %8724 = vtanh.f32 %v5245_v42  ;;  %v5188_v29 = vadd.f32 %v5124_v30, %v12123_v36  ;;  %v5123_v63 = vmul.f32 %v12172_v11, %v12113_v0  ;;  %v12920_v31 = vld [vmem:[#allocation62_spill] sm:$0xff] }
0x1178   : > { %v5367_v53 = vadd.f32 1.0, %v8715_v28  ;;  %8726 = vtanh.f32 %v5248_v58  ;;  %5640 = vmatprep.mubr.f32.mxu1 %v5432_v10  ;;  %v4921_v49 = vmul.f32 0.5, %v12907_v5  ;;  %v5128_v16 = vmul.f32 %v12215_v37, %v12176_v57 }
0x1179   : > { %v8717_v24 = vpop.eup %8716  ;;  %v5434_v17 = vmul.f32 %v5370_v46, %v4922_v62  ;;  %8728 = vtanh.f32 %v5247_v15  ;;  %v5252_v4 = vmul.f32 0.7978846, %v5188_v29  ;;  %v5187_v7 = vadd.f32 %v5123_v63, %v12113_v0 }
0x117a   : > { %v8719_v41 = vpop.eup %8718  ;;  %v5431_v22 = vmul.f32 %v5367_v53, %v4919_v14  ;;  %v5369_v61 = vadd.f32 1.0, %v8717_v24  ;;  %v4924_v21 = vmul.f32 0.5, %v12065_v2  ;;  %v5192_v11 = vadd.f32 %v5128_v16, %v12176_v57 }
0x117b   : > { %5785 = vmatprep.mubr.f32.mxu0 %v5434_v17  ;;  %v5372_v32 = vadd.f32 1.0, %v8719_v41  ;;  %v5127_v43 = vmul.f32 %v12208_v44, %v12159_v13  ;;  %v4926_v37 = vmul.f32 0.5, %v12910_v47  ;;  %8730 = vtanh.f32 %v5252_v4 }
0x117c   : > { %v8721_v5 = vpop.eup %8720  ;;  %5641 = vmatmul.mubr.f32.gmra.mrb[132].mxu1 %v5431_v22  ;;  %v5433_v8 = vmul.f32 %v5369_v61, %v4921_v49  ;;  %v5251_v52 = vmul.f32 0.7978846, %v5187_v7  ;;  %v5256_v35 = vmul.f32 0.7978846, %v5192_v11  ;;  %v5005_v2 = vmul.f32 0.044715, %v12237_v48 }
0x117d   : > { %v5436_v60 = vmul.f32 %v5372_v32, %v4924_v21  ;;  %v5374_v3 = vadd.f32 1.0, %v8721_v5  ;;  %v5191_v33 = vadd.f32 %v5127_v43, %v12159_v13  ;;  %v5132_v62 = vmul.f32 %v12266_v34, %v12224_v20  ;;  %v12923_v32 = vld [vmem:[#allocation65_spill] sm:$0xff] }
0x117e   : > { %5786 = vmatmul.mubr.f32.gmra.mrb[164].mxu0 %v5433_v8  ;;  %8732 = vtanh.f32 %v5251_v52  ;;  %v5131_v44 = vmul.f32 %v12260_v23, %v12218_v39  ;;  %v5070_v47 = vmul.f32 %v12271_v9, %v12248_v38  ;;  %v4923_v56 = vmul.f32 0.5, %v12912_v18  ;;  %v12921_v9 = vld [vmem:[#allocation64_spill] sm:$0xff] }
0x117f   : > { %5645 = vmatprep.mubr.f32.mxu1 %v5436_v60  ;;  %v5438_v45 = vmul.f32 %v5374_v3, %v4926_v37  ;;  %8734 = vtanh.f32 %v5256_v35  ;;  %v5255_v12 = vmul.f32 0.7978846, %v5191_v33  ;;  %v5196_v42 = vadd.f32 %v5132_v62, %v12224_v20 }
0x1180   : > { %v8723_v50 = vpop.eup %8722  ;;  %v5195_v1 = vadd.f32 %v5131_v44, %v12218_v39  ;;  %v5122_v34 = vmul.f32 %v12920_v31, %v12108_v54  ;;  %v4925_v58 = vmul.f32 0.5, %v12914_v6  ;;  %v5126_v30 = vmul.f32 %v12921_v9, %v12142_v19 }
0x1181   : > { %v8725_v14 = vpop.eup %8724  ;;  %5790 = vmatprep.mubr.f32.mxu0 %v5438_v45  ;;  %v5371_v23 = vadd.f32 1.0, %v8723_v50  ;;  %8736 = vtanh.f32 %v5255_v12  ;;  %v5260_v46 = vmul.f32 0.7978846, %v5196_v42  ;;  %v4928_v63 = vmul.f32 0.5, %v12916_v27  ;;  %v12922_v27 = vld [vmem:[#allocation56_spill] sm:$0xff] }
0x1182   : > { %v8727_v28 = vpop.eup %8726  ;;  %v5373_v10 = vadd.f32 1.0, %v8725_v14  ;;  %v5259_v18 = vmul.f32 0.7978846, %v5195_v1  ;;  %v5186_v15 = vadd.f32 %v5122_v34, %v12108_v54  ;;  %v5190_v17 = vadd.f32 %v5126_v30, %v12142_v19 }
0x1183   : > { %v8729_v53 = vpop.eup %8728  ;;  %v5435_v29 = vmul.f32 %v5371_v23, %v4923_v56  ;;  %v5376_v24 = vadd.f32 1.0, %v8727_v28  ;;  %8738 = vtanh.f32 %v5260_v46  ;;  %v4927_v22 = vmul.f32 0.5, %v12918_v26 }
0x1184   : > { %v5437_v49 = vmul.f32 %v5373_v10, %v4925_v58  ;;  %v5375_v16 = vadd.f32 1.0, %v8729_v53  ;;  %v5250_v6 = vmul.f32 0.7978846, %v5186_v15  ;;  %8740 = vtanh.f32 %v5259_v18 }
0x1185   : > { %5646 = vmatmul.mubr.f32.gmra.mrb[134].mxu1 %v5435_v29  ;;  %v5440_v41 = vmul.f32 %v5376_v24, %v4928_v63  ;;  %v5254_v61 = vmul.f32 0.7978846, %v5190_v17  ;;  %v8731_v4 = vpop.eup %8730  ;;  %v5069_v7 = vmul.f32 %v5005_v2, %v12237_v48  ;;  %v4932_v21 = vmul.f32 0.5, %v12123_v36 }
0x1186   : > { %5791 = vmatmul.mubr.f32.gmra.mrb[166].mxu0 %v5437_v49  ;;  %8742 = vtanh.f32 %v5250_v6  ;;  %v5125_v11 = vmul.f32 %v12923_v32, %v12922_v27  ;;  %v5439_v43 = vmul.f32 %v5375_v16, %v4927_v22  ;;  %v5380_v5 = vadd.f32 1.0, %v8731_v4  ;;  %v12924_v49 = vld [vmem:[#allocation53_spill] sm:$0xff] }
0x1187   : > { %5650 = vmatprep.mubr.f32.mxu1 %v5440_v41  ;;  %8744 = vtanh.f32 %v5254_v61  ;;  %v5130_v8 = vmul.f32 %v12221_v51, %v12183_v55  ;;  %v4931_v37 = vmul.f32 0.5, %v12113_v0  ;;  %v5129_v60 = vmul.f32 %v12211_v25, %v12167_v59 }
0x1188   : > { %v8733_v26 = vpop.eup %8732  ;;  %v5189_v52 = vadd.f32 %v5125_v11, %v12922_v27  ;;  %v5134_v36 = vmul.f32 %v5070_v47, %v12248_v38  ;;  %v5444_v35 = vmul.f32 %v5380_v5, %v4932_v21  ;;  %v4936_v2 = vmul.f32 0.5, %v12176_v57 }
0x1189   : > { %v8735_v3 = vpop.eup %8734  ;;  %5651 = vmatmul.mubr.f32.gmra.mrb[136].mxu1 %v5439_v43  ;;  %v5379_v33 = vadd.f32 1.0, %v8733_v26  ;;  %v5194_v62 = vadd.f32 %v5130_v8, %v12183_v55  ;;  %v5193_v45 = vadd.f32 %v5129_v60, %v12167_v59  ;;  %v5133_v47 = vmul.f32 %v5069_v7, %v12237_v48 }
0x118a   : > { %v5384_v44 = vadd.f32 1.0, %v8735_v3  ;;  %v5253_v51 = vmul.f32 0.7978846, %v5189_v52  ;;  %v5198_v0 = vadd.f32 %v5134_v36, %v12248_v38  ;;  %5655 = vmatprep.mubr.f32.mxu1 %v5444_v35  ;;  %v4935_v57 = vmul.f32 0.5, %v12159_v13 }
0x118b   : > { %v8737_v12 = vpop.eup %8736  ;;  %v5443_v50 = vmul.f32 %v5379_v33, %v4931_v37  ;;  %v5258_v25 = vmul.f32 0.7978846, %v5194_v62  ;;  %v5257_v1 = vmul.f32 0.7978846, %v5193_v45  ;;  %v5197_v34 = vadd.f32 %v5133_v47, %v12237_v48  ;;  %v12382_v33 = vld [vmem:[%s12925_s12] ss:$0 sm:$0xff] }
0x118c   : > { %v5448_v56 = vmul.f32 %v5384_v44, %v4936_v2  ;;  %v5383_v42 = vadd.f32 1.0, %v8737_v12  ;;  %8746 = vtanh.f32 %v5253_v51  ;;  %v5262_v31 = vmul.f32 0.7978846, %v5198_v0  ;;  %v12926_v45 = vld [vmem:[#allocation33_spill] sm:$0xff] }
0x118d   : > { %5656 = vmatmul.mubr.f32.gmra.mrb[138].mxu1 %v5443_v50  ;;  %8748 = vtanh.f32 %v5258_v25  ;;  %v8739_v14 = vpop.eup %8738  ;;  %v4940_v23 = vmul.f32 0.5, %v12224_v20  ;;  %v5261_v28 = vmul.f32 0.7978846, %v5197_v34  ;;  %v4939_v13 = vmul.f32 0.5, %v12218_v39 }
0x118e   : > { %5660 = vmatprep.mubr.f32.mxu1 %v5448_v56  ;;  %8750 = vtanh.f32 %v5257_v1  ;;  %v8741_v58 = vpop.eup %8740  ;;  %v5447_v9 = vmul.f32 %v5383_v42, %v4935_v57  ;;  %v5388_v30 = vadd.f32 1.0, %v8739_v14  ;;  %v4930_v29 = vmul.f32 0.5, %v12108_v54 }
0x118f   : > { %8752 = vtanh.f32 %v5262_v31  ;;  %v5387_v46 = vadd.f32 1.0, %v8741_v58  ;;  %v5377_v20 = vadd.f32 1.0, %v12256_v40  ;;  %v4929_v16 = vmul.f32 0.5, %v12924_v49  ;;  %v12927_v58 = vld [vmem:[#allocation32_spill] sm:$0xff] }
0x1190   : > { %v8743_v10 = vpop.eup %8742  ;;  %v5452_v15 = vmul.f32 %v5388_v30, %v4940_v23  ;;  %8754 = vtanh.f32 %v5261_v28  ;;  %v4934_v41 = vmul.f32 0.5, %v12142_v19  ;;  %v4933_v32 = vmul.f32 0.5, %v12922_v27 }
0x1191   : > { %v8745_v18 = vpop.eup %8744  ;;  %5661 = vmatmul.mubr.f32.gmra.mrb[140].mxu1 %v5447_v9  ;;  %v5378_v53 = vadd.f32 1.0, %v8743_v10  ;;  %v5451_v63 = vmul.f32 %v5387_v46, %v4939_v13  ;;  %v5441_v61 = vmul.f32 %v5377_v20, %v4929_v16  ;;  %v4938_v40 = vmul.f32 0.5, %v12183_v55  ;;  %v12929_v16 = vld [vmem:[#allocation71_spill] sm:$0xff] }
0x1192   : > { %5665 = vmatprep.mubr.f32.mxu1 %v5452_v15  ;;  %v5382_v17 = vadd.f32 1.0, %v8745_v18  ;;  %v4937_v19 = vmul.f32 0.5, %v12167_v59  ;;  %v4942_v37 = vmul.f32 0.5, %v12248_v38  ;;  %v4941_v27 = vmul.f32 0.5, %v12237_v48 }
0x1193   : > { %v5442_v24 = vmul.f32 %v5378_v53, %v4930_v29  ;;  %v12928_v53 = vld [vmem:[#allocation35_spill] sm:$0xff] }
0x1194   : > { %v5446_v7 = vmul.f32 %v5382_v17, %v4934_v41 }
0x1195   : > { %5666 = vmatmul.mubr.f32.gmra.mrb[142].mxu1 %v5451_v63 }
0x1196   : > { %v8747_v6 = vpop.eup %8746  ;;  %5795 = vmatprep.mubr.f32.mxu1 %v5442_v24 }
0x1197   : > { %v8749_v22 = vpop.eup %8748  ;;  %v5381_v39 = vadd.f32 1.0, %v8747_v6 }
0x1198   : > { %v8751_v4 = vpop.eup %8750  ;;  %v5386_v54 = vadd.f32 1.0, %v8749_v22 }
0x1199   : > { %v8753_v21 = vpop.eup %8752  ;;  %5796 = vmatmul.mubr.f32.vlgmr.msra.gmra.mrb[144].mxu1 %v5441_v61  ;;  %v5445_v11 = vmul.f32 %v5381_v39, %v4933_v32  ;;  %v5385_v43 = vadd.f32 1.0, %v8751_v4 }
0x119a   : > { %5800 = vmatprep.mubr.f32.mxu1 %v5446_v7  ;;  %v8755_v5 = vpop.eup %8754  ;;  %v5450_v8 = vmul.f32 %v5386_v54, %v4938_v40  ;;  %v5390_v26 = vadd.f32 1.0, %v8753_v21  ;;  %v12930_v21 = vld [vmem:[#allocation30_spill] sm:$0xff] }
0x119b   : > { %v5449_v52 = vmul.f32 %v5385_v43, %v4937_v19  ;;  %v5389_v60 = vadd.f32 1.0, %v8755_v5 }
0x119c   : > { %v5454_v36 = vmul.f32 %v5390_v26, %v4942_v37 }
0x119d   : > { %5801 = vmatmul.mubr.f32.gmra.mrb[146].mxu1 %v5445_v11  ;;  %v5453_v55 = vmul.f32 %v5389_v60, %v4941_v27 }
0x119e   : > { %5805 = vmatprep.mubr.f32.mxu1 %v5450_v8 }
0x11a1   : > { %5806 = vmatmul.mubr.f32.gmra.mrb[148].mxu1 %v5449_v52  ;;  %v12931_v52 = vld [vmem:[#allocation66_spill] sm:$0xff] }
0x11a2   : > { %5810 = vmatprep.mubr.f32.mxu1 %v5454_v36 }
0x11a5   : > { %5811 = vmatmul.mubr.f32.gmra.mrb[150].mxu1 %v5453_v55 }
0x11e6   : > { %v6522_v3 = vpop.f32.mrb[112].mxu1 }
0x11e7   : > { %v6602_v35 = vpop.f32.mrb[144].mxu0  ;;  %v6523_v59 = vpop.f32.mrb[113].mxu1 }
0x11e8   : > { %v6524_v2 = vadd.f32 %v6523_v59, %v6522_v3  ;;  %v6603_v38 = vpop.f32.mrb[145].mxu0 }
0x11e9   : > { %v6604_v62 = vadd.f32 %v6603_v38, %v6602_v35 }
0x11ea   : > { %v5593_v44 = vadd.f32 %v6524_v2, %v12382_v33 }
0x11ec   : > { %v5738_v51 = vadd.f32 %v6604_v62, %v5593_v44  ;;  %v12932_v62 = vld [vmem:[#allocation27_spill] sm:$0xff] }
0x11ee   : > { %v5816_v0 = vadd.f32 %v5738_v51, %v12926_v45 }
0x11f0   : > { %5832 = vst [vmem:[%s12387_s26] sm:$0xff] %v5816_v0 }
0x11f4   : > { %v6525_v48 = vpop.f32.mrb[114].mxu1 }
0x11f5   : > { %v6526_v12 = vpop.f32.mrb[115].mxu1 }
0x11f6   : > { %v6527_v50 = vadd.f32 %v6526_v12, %v6525_v48  ;;  %v6605_v25 = vpop.f32.mrb[146].mxu0 }
0x11f7   : > { %v6606_v56 = vpop.f32.mrb[147].mxu0 }
0x11f8   : > { %v5598_v47 = vadd.f32 %v6527_v50, %v12382_v33  ;;  %v6607_v42 = vadd.f32 %v6606_v56, %v6605_v25  ;;  %v12933_v56 = vld [vmem:[#allocation67_spill] sm:$0xff] }
0x11fa   : > { %v6528_v1 = vpop.f32.mrb[116].mxu1  ;;  %v5743_v57 = vadd.f32 %v6607_v42, %v5598_v47 }
0x11fb   : > { %v6608_v31 = vpop.f32.mrb[148].mxu0  ;;  %v6529_v34 = vpop.f32.mrb[117].mxu1 }
0x11fc   : > { %v6530_v14 = vadd.f32 %v6529_v34, %v6528_v1  ;;  %v6609_v23 = vpop.f32.mrb[149].mxu0  ;;  %v5817_v9 = vadd.f32 %v5743_v57, %v12927_v58 }
0x11fd   : > { %v6610_v30 = vadd.f32 %v6609_v23, %v6608_v31 }
0x11fe   : > { %v5603_v28 = vadd.f32 %v6530_v14, %v12382_v33  ;;  %5833 = vst [vmem:[%s12387_s26 + $0x8] sm:$0xff] %v5817_v9  ;;  %v6531_v10 = vpop.f32.mrb[118].mxu1 }
0x11ff   : > { %v6532_v18 = vpop.f32.mrb[119].mxu1 }
0x1200   : > { %v5748_v46 = vadd.f32 %v6610_v30, %v5603_v28  ;;  %v6611_v15 = vpop.f32.mrb[150].mxu0  ;;  %v6533_v13 = vadd.f32 %v6532_v18, %v6531_v10 }
0x1201   : > { %v6612_v63 = vpop.f32.mrb[151].mxu0 }
0x1202   : > { %v5818_v29 = vadd.f32 %v5748_v46, %v12928_v53  ;;  %v5608_v20 = vadd.f32 %v6533_v13, %v12382_v33  ;;  %v6613_v24 = vadd.f32 %v6612_v63, %v6611_v15  ;;  %v12934_v46 = vld [vmem:[#allocation26_spill] sm:$0xff] }
0x1204   : > { %5834 = vst [vmem:[%s12387_s26 + $0x10] sm:$0xff] %v5818_v29  ;;  %v5753_v17 = vadd.f32 %v6613_v24, %v5608_v20 }
0x1206   : > { %v6534_v49 = vpop.f32.mrb[120].mxu1  ;;  %v5819_v6 = vadd.f32 %v5753_v17, %v12929_v16  ;;  %v12935_v17 = vld [vmem:[#allocation28_spill] sm:$0xff] }
0x1207   : > { %v6535_v22 = vpop.f32.mrb[121].mxu1 }
0x1208   : > { %v6614_v41 = vpop.f32.mrb[152].mxu0  ;;  %v6536_v61 = vadd.f32 %v6535_v22, %v6534_v49  ;;  %5835 = vst [vmem:[%s12387_s26 + $0x18] sm:$0xff] %v5819_v6 }
0x1209   : > { %v6615_v39 = vpop.f32.mrb[153].mxu0 }
0x120a   : > { %v6616_v4 = vadd.f32 %v6615_v39, %v6614_v41  ;;  %v5613_v7 = vadd.f32 %v6536_v61, %v12382_v33 }
0x120c   : > { %v5758_v54 = vadd.f32 %v6616_v4, %v5613_v7  ;;  %v12936_v4 = vld [vmem:[#allocation73_spill] sm:$0xff] }
0x120e   : > { %v5820_v32 = vadd.f32 %v5758_v54, %v12930_v21 }
0x1210   : > { %v6537_v40 = vpop.f32.mrb[122].mxu1  ;;  %5836 = vst [vmem:[%s12387_s26 + $0x20] sm:$0xff] %v5820_v32 }
0x1211   : > { %v6617_v11 = vpop.f32.mrb[154].mxu0  ;;  %v6538_v43 = vpop.f32.mrb[123].mxu1 }
0x1212   : > { %v6539_v5 = vadd.f32 %v6538_v43, %v6537_v40  ;;  %v6618_v8 = vpop.f32.mrb[155].mxu0 }
0x1213   : > { %v6619_v26 = vadd.f32 %v6618_v8, %v6617_v11 }
0x1214   : > { %v5618_v19 = vadd.f32 %v6539_v5, %v12382_v33 }
0x1216   : > { %v5763_v37 = vadd.f32 %v6619_v26, %v5618_v19 }
0x1218   : > { %v5821_v60 = vadd.f32 %v5763_v37, %v12931_v52  ;;  %v12937_v52 = vld [vmem:[#allocation72_spill] sm:$0xff] }
0x121a   : > { %5837 = vst [vmem:[%s12387_s26 + $0x28] sm:$0xff] %v5821_v60 }
0x122f   : > { %v6540_v36 = vpop.f32.mrb[124].mxu1 }
0x1230   : > { %v6541_v27 = vpop.f32.mrb[125].mxu1 }
0x1231   : > { %v6542_v55 = vadd.f32 %v6541_v27, %v6540_v36 }
0x1233   : > { %v6620_v3 = vpop.f32.mrb[156].mxu0  ;;  %v5623_v35 = vadd.f32 %v6542_v55, %v12382_v33 }
0x1234   : > { %v6621_v59 = vpop.f32.mrb[157].mxu0 }
0x1235   : > { %v6622_v2 = vadd.f32 %v6621_v59, %v6620_v3 }
0x1237   : > { %v5768_v38 = vadd.f32 %v6622_v2, %v5623_v35 }
0x1239   : > { %v5822_v44 = vadd.f32 %v5768_v38, %v12932_v62 }
0x123b   : > { %5838 = vst [vmem:[%s12387_s26 + $0x30] sm:$0xff] %v5822_v44  ;;  %v6543_v51 = vpop.f32.mrb[126].mxu1 }
0x123c   : > { %v6623_v45 = vpop.f32.mrb[158].mxu0  ;;  %v6544_v0 = vpop.f32.mrb[127].mxu1 }
0x123d   : > { %v6545_v48 = vadd.f32 %v6544_v0, %v6543_v51  ;;  %v6624_v12 = vpop.f32.mrb[159].mxu0 }
0x123e   : > { %v6625_v50 = vadd.f32 %v6624_v12, %v6623_v45 }
0x123f   : > { %v5628_v25 = vadd.f32 %v6545_v48, %v12382_v33 }
0x1241   : > { %v5773_v47 = vadd.f32 %v6625_v50, %v5628_v25 }
0x1243   : > { %v5823_v42 = vadd.f32 %v5773_v47, %v12933_v56  ;;  %v6546_v1 = vpop.f32.mrb[128].mxu1  ;;  %v12938_v47 = vld [vmem:[#allocation74_spill] sm:$0xff] }
0x1244   : > { %v6626_v57 = vpop.f32.mrb[160].mxu0  ;;  %v6547_v31 = vpop.f32.mrb[129].mxu1 }
0x1245   : > { %5839 = vst [vmem:[%s12387_s26 + $0x38] sm:$0xff] %v5823_v42  ;;  %v6548_v34 = vadd.f32 %v6547_v31, %v6546_v1  ;;  %v6627_v14 = vpop.f32.mrb[161].mxu0 }
0x1246   : > { %v6628_v23 = vadd.f32 %v6627_v14, %v6626_v57  ;;  %v12939_v14 = vld [vmem:[#allocation68_spill] sm:$0xff] }
0x1247   : > { %v5633_v58 = vadd.f32 %v6548_v34, %v12382_v33 }
0x1248   : > { %v6549_v30 = vpop.f32.mrb[130].mxu1 }
0x1249   : > { %v5778_v9 = vadd.f32 %v6628_v23, %v5633_v58  ;;  %v6550_v10 = vpop.f32.mrb[131].mxu1 }
0x124a   : > { %v6629_v28 = vpop.f32.mrb[162].mxu0  ;;  %v6551_v15 = vadd.f32 %v6550_v10, %v6549_v30 }
0x124b   : > { %v5824_v18 = vadd.f32 %v5778_v9, %v12934_v46  ;;  %v6630_v13 = vpop.f32.mrb[163].mxu0  ;;  %v12940_v46 = vld [vmem:[#allocation70_spill] sm:$0xff] }
0x124c   : > { %v6631_v53 = vadd.f32 %v6630_v13, %v6629_v28  ;;  %v5638_v29 = vadd.f32 %v6551_v15, %v12382_v33 }
0x124d   : > { %5840 = vst [vmem:[%s12387_s26 + $0x40] sm:$0xff] %v5824_v18 }
0x124e   : > { %v5783_v63 = vadd.f32 %v6631_v53, %v5638_v29  ;;  %v12942_v53 = vld [vmem:[#allocation69_spill] sm:$0xff] }
0x124f   : > { %v6552_v20 = vpop.f32.mrb[132].mxu1 }
0x1250   : > { %v6553_v24 = vpop.f32.mrb[133].mxu1  ;;  %v5825_v49 = vadd.f32 %v5783_v63, %v12935_v17 }
0x1251   : > { %v6632_v16 = vpop.f32.mrb[164].mxu0  ;;  %v6554_v6 = vadd.f32 %v6553_v24, %v6552_v20 }
0x1252   : > { %v6633_v41 = vpop.f32.mrb[165].mxu0  ;;  %5841 = vst [vmem:[%s12387_s26 + $0x48] sm:$0xff] %v5825_v49 }
0x1253   : > { %v5643_v22 = vadd.f32 %v6554_v6, %v12382_v33  ;;  %v6634_v61 = vadd.f32 %v6633_v41, %v6632_v16 }
0x1255   : > { %v5788_v39 = vadd.f32 %v6634_v61, %v5643_v22 }
0x1257   : > { %v5826_v7 = vadd.f32 %v5788_v39, %v12936_v4 }
0x1258   : > { %v6555_v54 = vpop.f32.mrb[134].mxu1 }
0x1259   : > { %5842 = vst [vmem:[%s12387_s26 + $0x50] sm:$0xff] %v5826_v7  ;;  %v6635_v21 = vpop.f32.mrb[166].mxu0  ;;  %v6556_v32 = vpop.f32.mrb[135].mxu1 }
0x125a   : > { %v6557_v40 = vadd.f32 %v6556_v32, %v6555_v54  ;;  %v6636_v11 = vpop.f32.mrb[167].mxu0 }
0x125b   : > { %v6637_v43 = vadd.f32 %v6636_v11, %v6635_v21 }
0x125c   : > { %v5648_v5 = vadd.f32 %v6557_v40, %v12382_v33  ;;  %v6558_v8 = vpop.f32.mrb[136].mxu1 }
0x125d   : > { %v6559_v26 = vpop.f32.mrb[137].mxu1 }
0x125e   : > { %v5793_v19 = vadd.f32 %v6637_v43, %v5648_v5  ;;  %v6560_v37 = vadd.f32 %v6559_v26, %v6558_v8 }
0x1260   : > { %v5827_v60 = vadd.f32 %v5793_v19, %v12937_v52  ;;  %v6561_v36 = vpop.f32.mrb[138].mxu1  ;;  %v5653_v45 = vadd.f32 %v6560_v37, %v12382_v33 }
0x1261   : > { %v6562_v27 = vpop.f32.mrb[139].mxu1 }
0x1262   : > { %5843 = vst [vmem:[%s12387_s26 + $0x58] sm:$0xff] %v5827_v60  ;;  %v6563_v55 = vadd.f32 %v6562_v27, %v6561_v36 }
0x1264   : > { %v6564_v3 = vpop.f32.mrb[140].mxu1  ;;  %v5658_v25 = vadd.f32 %v6563_v55, %v12382_v33 }
0x1265   : > { %v6565_v35 = vpop.f32.mrb[141].mxu1 }
0x1266   : > { %v6566_v59 = vadd.f32 %v6565_v35, %v6564_v3 }
0x1268   : > { %v6567_v2 = vpop.f32.mrb[142].mxu1  ;;  %v5663_v34 = vadd.f32 %v6566_v59, %v12382_v33 }
0x1269   : > { %v6568_v38 = vpop.f32.mrb[143].mxu1 }
0x126a   : > { %v6569_v62 = vadd.f32 %v6568_v38, %v6567_v2 }
0x126c   : > { %v6638_v44 = vpop.f32.mrb[144].mxu1  ;;  %v5668_v10 = vadd.f32 %v6569_v62, %v12382_v33 }
0x126d   : > { %v6639_v51 = vpop.f32.mrb[145].mxu1 }
0x126e   : > { %v6640_v0 = vadd.f32 %v6639_v51, %v6638_v44 }
0x1270   : > { %v5798_v48 = vadd.f32 %v6640_v0, %v5653_v45  ;;  %v6641_v12 = vpop.f32.mrb[146].mxu1 }
0x1271   : > { %v6642_v50 = vpop.f32.mrb[147].mxu1 }
0x1272   : > { %v5828_v56 = vadd.f32 %v5798_v48, %v12938_v47  ;;  %v6643_v42 = vadd.f32 %v6642_v50, %v6641_v12 }
0x1274   : > { %5844 = vst [vmem:[%s12387_s26 + $0x60] sm:$0xff] %v5828_v56  ;;  %v5803_v1 = vadd.f32 %v6643_v42, %v5658_v25  ;;  %v6644_v57 = vpop.f32.mrb[148].mxu1 }
0x1275   : > { %v6645_v31 = vpop.f32.mrb[149].mxu1 }
0x1276   : > { %v5829_v23 = vadd.f32 %v5803_v1, %v12939_v14  ;;  %v6646_v58 = vadd.f32 %v6645_v31, %v6644_v57 }
0x1278   : > { %5845 = vst [vmem:[%s12387_s26 + $0x68] sm:$0xff] %v5829_v23  ;;  %v5808_v9 = vadd.f32 %v6646_v58, %v5663_v34  ;;  %v6647_v30 = vpop.f32.mrb[150].mxu1 }
0x1279   : > { %v6648_v28 = vpop.f32.mrb[151].mxu1 }
0x127a   : > { %v5830_v18 = vadd.f32 %v5808_v9, %v12940_v46  ;;  %v6649_v15 = vadd.f32 %v6648_v28, %v6647_v30 }
0x127c   : > { %5846 = vst [vmem:[%s12387_s26 + $0x70] sm:$0xff] %v5830_v18  ;;  %v5813_v13 = vadd.f32 %v6649_v15, %v5668_v10 }
0x127e   : > { %v5831_v29 = vadd.f32 %v5813_v13, %v12942_v53 }
0x1280   : > { %5847 = vst [vmem:[%s12387_s26 + $0x78] sm:$0xff] %v5831_v29 }
0x1281   : > { %9001 = shalt.err (!%p8998_p8)
}
0x1282   : > { %s9002_s0 = scalar_lea.hbm %s12438_s2, 2048  ;;  %s9006_s20 = scalar_lea.hbm %s12941_s10, 4096 }
0x1283   : > { %p9003_p12 = scmp.ne.s32.totalorder %s12438_s2, %s9002_s0  ;;  %p9007_p1 = scmp.lt.u32.totalorder %s12438_s2, %s12941_s10 }
0x1284   : > { %p9008_p13 = scmp.lt.u32.totalorder %s9006_s20, %s9002_s0  ;;  %p9010_p7 = scmp.lt.u32.totalorder %s9002_s0, %s12438_s2 }
0x1285   : > { %p9004_p3 = pnand %p9003_p12, %p12943_p2 }
0x1286   : > { %p9009_p0 = por %p9008_p13, %p9007_p1 }
0x1287   : > { %p9005_p4 = pneg %p9004_p3 }
0x1288   : > { %p9011_p6 = por %p9010_p7, %p9009_p0 }
0x128a   : > { %p9012_p11 = pnand %p9011_p6, %p9005_p4 }
0x128c   : > { %9015 = shalt.err (!%p9012_p11)
}
0x128d   : > { %s9090_s14 = smov 128   ;;  %s9091_s12 = smov 8  }
0x128e   : > { %7794 = dma.vmem_to_hbm [thread:$0]  (%p12943_p2), %s12440_s25, 2048, %s12438_s2, %s5849_s15, %s9090_s14, %s9090_s14, %s9091_s12  }
0x128f PF: > { %s5877_s26 = sand.u32 1, %s9058_s29   ;;  %p12944_p5 = scmp.ne.s32.totalorder %s12657_s18, 0 }
0x1290   : > { %p12945_p9 = scmp.ge.s32.totalorder %s9070_s16, 2  ;;  %s5878_s4 = scalar_lea.sflag [#allocation4], %s5877_s26 }
0x1292   : > { %p7820_p10 = pnand %p12945_p9, %p12944_p5 }
0x1294   : > { %9053 = dma.done.wait (!%p7820_p10), %s5878_s4, 2048  }
0x1295   : > { %9055 = vsyncadd (!%p7820_p10), %s5878_s4, 4294965248  ;;  %s12946_s16 = sld [smem:[#allocation22_spill]]  ;;  %s12947_s23 = sld [smem:[#allocation21_spill]] }
0x1296   : > { %s12948_s15 = sld [smem:[#allocation23_spill]]  ;;  %s12949_s29 = smov %s9062_s30 }
0x129b   : > { %p32_p8 = scmp.ge.s32.totalorder %s12946_s16, 4   ;;  %s12950_s30 = smov %s12947_s23 }
0x129d   :  { %34 = sbr.rel (!%p32_p8) target bundleno = 20 (0x14), region = 154 }
0x12a4   :  { %5883 = vsyncpa [#allocation3], 1 }
0x12a5   :  { %5885 = vsyncpa [#allocation3 + $0x1], 1 }
0x12a6   :  { %5886 = vsyncpa [#allocation6], 1 }
0x12a7   :  { %5888 = vsyncpa [#allocation6 + $0x1], 1 }
0x12a8   :  { %5889 = vsyncpa [#allocation9], 1 }
0x12a9   :  { %5890 = vsyncpa [#allocation12], 1 }
0x12aa   :  { %5891 = vsyncpa [#allocation4], 1 }
0x12ab   :  { %5893 = vsyncpa [#allocation4 + $0x1], 1 }

</bundles_post_ra>
